<compile_context>
chip_gen: v5e
topology: v5e:2x2
jax: 0.10.0
libtpu: 0.0.40
codegen_flags: <defaults>
</compile_context>

<pallas_src>
import functools

import jax
import jax.numpy as jnp
from jax.experimental import pallas as pl
from jax.experimental.pallas import tpu as pltpu

LANE = 128


def _round_up(x, n):
    return ((x + n - 1) // n) * n


def _cdiv(a, b):
    return -(-a // b)


def _vmem_budget():
    """(data budget, compiler vmem limit) in bytes, generation aware."""
    try:
        cap = int(pltpu.get_tpu_info().vmem_capacity_bytes)
    except Exception:
        cap = 64 * 1024 * 1024                      # conservative (v7x-sized)
    limit = min((cap * 3) // 4, 100 * 1024 * 1024)  # ~48MiB v7x / ~96MiB v5e,v6e
    return limit // 2, limit


def _bn_fold(bn, eps=1e-5):
    scale = bn["gamma"] / jnp.sqrt(bn["var"] + eps)
    bias = bn["beta"] - bn["mean"] * scale
    return scale, bias


# ---------------------------------------------------------------------------
# Fused BasicBlock kernel (stride == 1): conv1+bn1+relu -> conv2+bn2 ->
# shortcut add -> relu, all per (batch, row-band) grid step.
# ---------------------------------------------------------------------------
def _fused_block_kernel(x_ref, w1_ref, b1_ref, w2_ref, b2_ref, *rest,
                        th, ho, wo, cin, p_pad, proj):
    if proj:
        wsc_ref, bsc_ref, o_ref, o1_scr = rest
    else:
        o_ref, o1_scr = rest

    band = pl.program_id(1)

    # ---- conv1 (3x3, stride 1, pad 1) + bn1 + relu over th+2 out1 rows ----
    m1 = (th + 2) * wo
    acc1 = jnp.zeros((m1, p_pad), jnp.float32)
    for kh in range(3):
        for kw in range(3):
            tap = x_ref[kh:kh + th + 2, kw:kw + wo, :].reshape(m1, cin)
            acc1 = acc1 + jnp.dot(tap, w1_ref[3 * kh + kw],
                                  preferred_element_type=jnp.float32)
    z1 = jnp.maximum(acc1 + b1_ref[...], 0.0).reshape(th + 2, wo, p_pad)

    # out1 halo rows outside the image act as conv2's zero padding.
    row = (jax.lax.broadcasted_iota(jnp.int32, (th + 2, 1, 1), 0)
           + band * th - 1)
    z1 = jnp.where((row >= 0) & (row < ho), z1, 0.0)

    o1_scr[...] = jnp.zeros_like(o1_scr)             # zero W-pad columns
    o1_scr[:, 1:wo + 1, :] = z1.astype(o1_scr.dtype)

    # ---- conv2 (3x3, stride 1, pad 1) + bn2 ----
    m2 = th * wo
    acc2 = jnp.zeros((m2, p_pad), jnp.float32)
    for kh in range(3):
        for kw in range(3):
            tap = o1_scr[kh:kh + th, kw:kw + wo, :].reshape(m2, p_pad)
            acc2 = acc2 + jnp.dot(tap, w2_ref[3 * kh + kw],
                                  preferred_element_type=jnp.float32)
    z2 = acc2 + b2_ref[...]

    # ---- shortcut + add + relu ----
    xc = x_ref[2:2 + th, 1:1 + wo, :].reshape(m2, cin)
    if proj:
        res = (jnp.dot(xc, wsc_ref[...], preferred_element_type=jnp.float32)
               + bsc_ref[...])
    else:
        res = xc.astype(jnp.float32)
        if p_pad > cin:
            res = jnp.concatenate(
                [res, jnp.zeros((m2, p_pad - cin), jnp.float32)], axis=-1)

    out = jnp.maximum(z2 + res, 0.0)
    o_ref[...] = out.reshape(th, wo, p_pad).astype(o_ref.dtype)


def _choose_band_rows(ho, wo, cin, p_pad, n_batch, budget, cap=None):
    """Largest output row-band that fits the VMEM budget (>=2 grid steps)."""
    wts = (9 * cin * p_pad + 9 * p_pad * p_pad + cin * p_pad) * 2

    def footprint(th):
        xband = 2 * (th + 4) * (wo + 2) * cin * 2    # double-buffered bf16 band
        o1 = (th + 2) * (wo + 2) * p_pad * 2         # conv1-out scratch (bf16)
        out = 2 * th * wo * p_pad * 4                # double-buffered f32 out
        tmp = 2 * (th + 2) * wo * p_pad * 4          # f32 accumulators / temps
        return wts + xband + o1 + out + tmp

    th = ho if cap is None else max(1, min(int(cap), ho))
    while th > 8 and footprint(th) > budget:
        th = _cdiv(th, 2)
    # Megacore: keep at least two grid steps so both v7x TensorCores get work.
    if n_batch * _cdiv(ho, th) < 2 and th > 1:
        th = _cdiv(th, 2)
    return max(th, 1)


def _basic_block_fused_s1(x_nhwc, params, band_rows=None):
    n, h, w, cin = map(int, x_nhwc.shape)
    planes = int(params["w1"].shape[-1])
    p_pad = _round_up(planes, LANE)
    ho, wo = h, w
    budget, vmem_limit = _vmem_budget()
    th = _choose_band_rows(ho, wo, cin, p_pad, n, budget, band_rows)
    nb = _cdiv(ho, th)

    # Overlapping input row bands (2-row halo top/bottom, 1-col W pad), bf16.
    x_bf = x_nhwc.astype(jnp.bfloat16)
    xpad = jnp.pad(x_bf, ((0, 0), (2, nb * th - ho + 2), (1, 1), (0, 0)))
    xbands = jnp.stack([xpad[:, b * th:b * th + th + 4] for b in range(nb)],
                       axis=1)                       # (n, nb, th+4, w+2, cin)

    # Fold BN scale into conv weights in f32, then cast to bf16 and pad Cout.
    s1, b1 = _bn_fold(params["bn1"])
    s2, b2 = _bn_fold(params["bn2"])
    w1f = jnp.pad((params["w1"] * s1).reshape(9, cin, planes).astype(jnp.bfloat16),
                  ((0, 0), (0, 0), (0, p_pad - planes)))
    w2f = jnp.pad((params["w2"] * s2).reshape(9, planes, planes).astype(jnp.bfloat16),
                  ((0, 0), (0, p_pad - planes), (0, p_pad - planes)))
    b1f = jnp.pad(b1.reshape(1, planes), ((0, 0), (0, p_pad - planes)))
    b2f = jnp.pad(b2.reshape(1, planes), ((0, 0), (0, p_pad - planes)))

    proj = "wsc" in params
    in_specs = [
        pl.BlockSpec((None, None, th + 4, w + 2, cin),
                     lambda nn, bb: (nn, bb, 0, 0, 0)),
        pl.BlockSpec((9, cin, p_pad), lambda nn, bb: (0, 0, 0)),
        pl.BlockSpec((1, p_pad), lambda nn, bb: (0, 0)),
        pl.BlockSpec((9, p_pad, p_pad), lambda nn, bb: (0, 0, 0)),
        pl.BlockSpec((1, p_pad), lambda nn, bb: (0, 0)),
    ]
    args = [xbands, w1f, b1f, w2f, b2f]
    if proj:
        ssc, bsc = _bn_fold(params["bnsc"])
        wscf = jnp.pad(
            (params["wsc"].reshape(cin, planes) * ssc).astype(jnp.bfloat16),
            ((0, 0), (0, p_pad - planes)))
        bscf = jnp.pad(bsc.reshape(1, planes), ((0, 0), (0, p_pad - planes)))
        in_specs += [pl.BlockSpec((cin, p_pad), lambda nn, bb: (0, 0)),
                     pl.BlockSpec((1, p_pad), lambda nn, bb: (0, 0))]
        args += [wscf, bscf]

    kernel = functools.partial(_fused_block_kernel, th=th, ho=ho, wo=wo,
                               cin=cin, p_pad=p_pad, proj=proj)
    out = pl.pallas_call(
        kernel,
        out_shape=jax.ShapeDtypeStruct((n, nb * th, wo, p_pad), jnp.float32),
        grid_spec=pltpu.PrefetchScalarGridSpec(
            num_scalar_prefetch=0,
            grid=(n, nb),
            in_specs=in_specs,
            out_specs=pl.BlockSpec((None, th, wo, p_pad),
                                   lambda nn, bb: (nn, bb, 0, 0)),
            scratch_shapes=[pltpu.VMEM((th + 2, wo + 2, p_pad), jnp.bfloat16)]),
        compiler_params=pltpu.CompilerParams(
            dimension_semantics=("parallel", "parallel"),
            vmem_limit_bytes=vmem_limit),
    )(*args)
    return out[:, :ho, :, :planes]


# ---------------------------------------------------------------------------
# Fallback (stride != 1): im2col matmul kernels with folded BN + bf16 I/O.
# ---------------------------------------------------------------------------
def _matmul_epilogue_kernel(p_ref, w_ref, b_ref, o_ref, *, relu):
    y = jnp.dot(p_ref[...], w_ref[...],
                preferred_element_type=jnp.float32) + b_ref[...]
    if relu:
        y = jnp.maximum(y, 0.0)
    o_ref[...] = y.astype(o_ref.dtype)


def _matmul_epilogue_res_kernel(p_ref, w_ref, b_ref, r_ref, o_ref):
    y = (jnp.dot(p_ref[...], w_ref[...], preferred_element_type=jnp.float32)
         + b_ref[...] + r_ref[...].astype(jnp.float32))
    o_ref[...] = jnp.maximum(y, 0.0).astype(o_ref.dtype)


def _choose_tm(m, kc, cout_pad, has_res, out_bytes, budget):
    def footprint(tm):
        v = 2 * tm * kc * 2 + kc * cout_pad * 2
        v += 2 * tm * cout_pad * out_bytes + tm * cout_pad * 4
        if has_res:
            v += 2 * tm * cout_pad * 2
        return v

    tm = 1024
    while tm > 128 and footprint(tm) > budget:
        tm //= 2
    if m <= tm:
        tm = max(8, _round_up(m, 8))
        if m > 8:                       # keep >=2 grid steps for megacore
            tm = _round_up(_cdiv(m, 2), 8)
    return tm


def _conv_matmul(patches, w_folded, bias, residual=None, relu=True,
                 out_dtype=jnp.bfloat16):
    """patches (M,K) bf16 @ w (K,C) + bias [+residual] [+ReLU]."""
    m, kc = map(int, patches.shape)
    cout = int(w_folded.shape[-1])
    cout_pad = _round_up(cout, LANE)
    kc_pad = _round_up(kc, LANE)
    if kc_pad > kc + kc // 8:           # skip K padding if waste > ~12%
        kc_pad = kc
    budget, vmem_limit = _vmem_budget()
    out_bytes = jnp.dtype(out_dtype).itemsize
    tm = _choose_tm(m, kc_pad, cout_pad, residual is not None, out_bytes,
                    budget)
    m_pad = _round_up(m, tm)

    p = jnp.pad(patches.astype(jnp.bfloat16),
                ((0, m_pad - m), (0, kc_pad - kc)))
    wp = jnp.pad(w_folded.astype(jnp.bfloat16),
                 ((0, kc_pad - kc), (0, cout_pad - cout)))
    bp = jnp.pad(bias.reshape(1, cout).astype(jnp.float32),
                 ((0, 0), (0, cout_pad - cout)))

    in_specs = [pl.BlockSpec((tm, kc_pad), lambda i: (i, 0)),
                pl.BlockSpec((kc_pad, cout_pad), lambda i: (0, 0)),
                pl.BlockSpec((1, cout_pad), lambda i: (0, 0))]
    args = [p, wp, bp]
    if residual is not None:
        rp = jnp.pad(residual.astype(jnp.bfloat16),
                     ((0, m_pad - m), (0, cout_pad - cout)))
        in_specs.append(pl.BlockSpec((tm, cout_pad), lambda i: (i, 0)))
        args.append(rp)
        kernel = _matmul_epilogue_res_kernel
    else:
        kernel = functools.partial(_matmul_epilogue_kernel, relu=relu)

    out = pl.pallas_call(
        kernel,
        out_shape=jax.ShapeDtypeStruct((m_pad, cout_pad), out_dtype),
        grid_spec=pltpu.PrefetchScalarGridSpec(
            num_scalar_prefetch=0,
            grid=(m_pad // tm,),
            in_specs=in_specs,
            out_specs=pl.BlockSpec((tm, cout_pad), lambda i: (i, 0))),
        compiler_params=pltpu.CompilerParams(
            dimension_semantics=("parallel",),
            vmem_limit_bytes=vmem_limit),
    )(*args)
    return out[:m, :cout]


def _extract_patches(x_nhwc, ksize, stride, padding):
    """(N*Ho*Wo, k*k*C) im2col patches; tap order (kh, kw, c) matches HWIO."""
    n, h, w, c = map(int, x_nhwc.shape)
    xp = jnp.pad(x_nhwc,
                 ((0, 0), (padding, padding), (padding, padding), (0, 0)))
    ho = (h + 2 * padding - ksize) // stride + 1
    wo = (w + 2 * padding - ksize) // stride + 1
    taps = []
    for kh in range(ksize):
        for kw in range(ksize):
            sl = xp[:, kh:kh + stride * ho:stride,
                    kw:kw + stride * wo:stride, :]
            taps.append(sl.reshape(n * ho * wo, c))
    return jnp.concatenate(taps, axis=-1), ho, wo


def _basic_block_fallback(x_nhwc, params, stride):
    x_bf = x_nhwc.astype(jnp.bfloat16)
    n, h, w, cin = map(int, x_bf.shape)
    planes = int(params["w1"].shape[-1])

    s1, b1 = _bn_fold(params["bn1"])
    s2, b2 = _bn_fold(params["bn2"])

    # conv1 + bn1 + relu (bf16 intermediate)
    p1, ho, wo = _extract_patches(x_bf, 3, stride, 1)
    w1f = (params["w1"] * s1).reshape(9 * cin, planes)
    out1 = _conv_matmul(p1, w1f, b1, relu=True, out_dtype=jnp.bfloat16)
    out1_img = out1.reshape(n, ho, wo, planes)

    # projection shortcut (always present when stride != 1)
    psc, _, _ = _extract_patches(x_bf, 1, stride, 0)
    ssc, bsc = _bn_fold(params["bnsc"])
    wscf = params["wsc"].reshape(cin, planes) * ssc
    residual = _conv_matmul(psc, wscf, bsc, relu=False, out_dtype=jnp.bfloat16)

    # conv2 + bn2 + residual add + relu
    p2, _, _ = _extract_patches(out1_img, 3, 1, 1)
    w2f = (params["w2"] * s2).reshape(9 * planes, planes)
    out = _conv_matmul(p2, w2f, b2, residual=residual, out_dtype=jnp.float32)
    return out.reshape(n, ho, wo, planes)


# ---------------------------------------------------------------------------
# Public forward + params + pure-JAX reference
# ---------------------------------------------------------------------------
@functools.partial(jax.jit, static_argnames=("stride", "band_rows"))
def basic_block_forward(x_nchw, params, stride=1, band_rows=None):
    x = jnp.transpose(x_nchw, (0, 2, 3, 1)).astype(jnp.float32)   # NHWC
    if stride == 1:
        out = _basic_block_fused_s1(x, params, band_rows)
    else:
        out = _basic_block_fallback(x, params, stride)
    return jnp.transpose(out, (0, 3, 1, 2))                        # NCHW


def init_params(key, in_planes, planes, stride):
    ks = jax.random.split(key, 6)

    def conv_w(k, kh, kw, cin, cout):  # HWIO
        bound = 1.0 / float(cin * kh * kw) ** 0.5
        return jax.random.uniform(k, (kh, kw, cin, cout), jnp.float32,
                                  -bound, bound)

    def bn_params(k):
        kg, kb, km, kv = jax.random.split(k, 4)
        return dict(
            gamma=jax.random.uniform(kg, (planes,), jnp.float32, 0.5, 1.5),
            beta=0.1 * jax.random.normal(kb, (planes,), jnp.float32),
            mean=0.1 * jax.random.normal(km, (planes,), jnp.float32),
            var=jax.random.uniform(kv, (planes,), jnp.float32, 0.5, 1.5),
        )

    params = {
        "w1": conv_w(ks[0], 3, 3, in_planes, planes),
        "bn1": bn_params(ks[1]),
        "w2": conv_w(ks[2], 3, 3, planes, planes),
        "bn2": bn_params(ks[3]),
    }
    if stride != 1 or in_planes != planes:
        params["wsc"] = conv_w(ks[4], 1, 1, in_planes, planes)
        params["bnsc"] = bn_params(ks[5])
    return params


def reference_forward(x_nchw, params, stride=1, eps=1e-5):
    x = jnp.transpose(x_nchw, (0, 2, 3, 1)).astype(jnp.float32)

    def conv2d(inp, wt, s, pad):
        return jax.lax.conv_general_dilated(
            inp.astype(jnp.bfloat16), wt.astype(jnp.bfloat16),
            window_strides=(s, s), padding=((pad, pad), (pad, pad)),
            dimension_numbers=("NHWC", "HWIO", "NHWC"),
            preferred_element_type=jnp.float32)

    def bn(inp, p):
        return ((inp - p["mean"]) / jnp.sqrt(p["var"] + eps) * p["gamma"]
                + p["beta"])

    out = jax.nn.relu(bn(conv2d(x, params["w1"], stride, 1), params["bn1"]))
    out = bn(conv2d(out, params["w2"], 1, 1), params["bn2"])
    if "wsc" in params:
        sc = bn(conv2d(x, params["wsc"], stride, 0), params["bnsc"])
    else:
        sc = x
    out = jax.nn.relu(out + sc)
    return jnp.transpose(out, (0, 3, 1, 2))


if __name__ == "__main__":
    key = jax.random.PRNGKey(0)
    kx, kp = jax.random.split(key)
    tol = 5e-2

    # Case 1: stride 1, projection shortcut (in_planes != planes) — fused path.
    x = jax.random.normal(kx, (2, 4, 16, 16), jnp.float32)
    params = init_params(kp, 4, 8, 1)
    out = jax.block_until_ready(basic_block_forward(x, params, stride=1))
    ref = reference_forward(x, params, 1)
    assert out.shape == (2, 8, 16, 16), out.shape
    err1 = float(jnp.max(jnp.abs(out - ref)))
    assert err1 < tol, err1

    # Case 2: stride 1, identity shortcut, multiple row-bands — fused path.
    x2 = jax.random.normal(kx, (2, 8, 16, 16), jnp.float32)
    params2 = init_params(kp, 8, 8, 1)
    out2 = jax.block_until_ready(
        basic_block_forward(x2, params2, stride=1, band_rows=6))
    ref2 = reference_forward(x2, params2, 1)
    err2 = float(jnp.max(jnp.abs(out2 - ref2)))
    assert err2 < tol, err2

    # Case 3: stride 2 downsampling block — im2col fallback path.
    params3 = init_params(kp, 4, 8, 2)
    out3 = jax.block_until_ready(basic_block_forward(x, params3, stride=2))
    ref3 = reference_forward(x, params3, 2)
    assert out3.shape == (2, 8, 8, 8), out3.shape
    err3 = float(jnp.max(jnp.abs(out3 - ref3)))
    assert err3 < tol, err3

    print("KERNEL_OK")
</pallas_src>

<mosaic_0001>
module attributes {stable_mosaic.version = 11 : i64} {
  func.func @_fused_block_kernel(%arg0: i32, %arg1: i32, %arg2: memref<1x1x20x18x4xbf16, #tpu.memory_space<vmem>>, %arg3: memref<9x4x128xbf16, #tpu.memory_space<vmem>>, %arg4: memref<1x128xf32, #tpu.memory_space<vmem>>, %arg5: memref<9x128x128xbf16, #tpu.memory_space<vmem>>, %arg6: memref<1x128xf32, #tpu.memory_space<vmem>>, %arg7: memref<4x128xbf16, #tpu.memory_space<vmem>>, %arg8: memref<1x128xf32, #tpu.memory_space<vmem>>, %arg9: memref<1x16x16x128xf32, #tpu.memory_space<vmem>>, %arg10: memref<18x18x128xbf16, #tpu.memory_space<vmem>>) attributes {dimension_semantics = [#tpu.dimension_semantics<parallel>, #tpu.dimension_semantics<parallel>], iteration_bounds = array<i64: 2, 1>, scalar_prefetch = 0 : i64, scratch_operands = 1 : i64, tpu.core_type = #tpu.core_type<tc>, window_params = [{transform_indices = @transform_0, window_bounds = array<i64: 1, 1, 20, 18, 4>}, {pipeline_mode = #tpu.pipeline_mode<synchronous>, transform_indices = @transform_1, window_bounds = array<i64: 9, 4, 128>}, {pipeline_mode = #tpu.pipeline_mode<synchronous>, transform_indices = @transform_2, window_bounds = array<i64: 1, 128>}, {pipeline_mode = #tpu.pipeline_mode<synchronous>, transform_indices = @transform_3, window_bounds = array<i64: 9, 128, 128>}, {pipeline_mode = #tpu.pipeline_mode<synchronous>, transform_indices = @transform_4, window_bounds = array<i64: 1, 128>}, {pipeline_mode = #tpu.pipeline_mode<synchronous>, transform_indices = @transform_5, window_bounds = array<i64: 4, 128>}, {pipeline_mode = #tpu.pipeline_mode<synchronous>, transform_indices = @transform_6, window_bounds = array<i64: 1, 128>}, {transform_indices = @transform_7, window_bounds = array<i64: 1, 16, 16, 128>}]} {
    %cst = arith.constant 0.000000e+00 : f32
    %0 = vector.broadcast %cst : f32 to vector<288x128xf32>
    %c0 = arith.constant 0 : index
    %c0_0 = arith.constant 0 : index
    %c0_1 = arith.constant 0 : index
    %c0_2 = arith.constant 0 : index
    %c0_3 = arith.constant 0 : index
    %1 = vector.load %arg2[%c0, %c0_0, %c0_1, %c0_2, %c0_3] : memref<1x1x20x18x4xbf16, #tpu.memory_space<vmem>>, vector<1x1x18x16x4xbf16>
    %2 = vector.shape_cast %1 : vector<1x1x18x16x4xbf16> to vector<18x16x4xbf16>
    %3 = vector.shape_cast %2 : vector<18x16x4xbf16> to vector<288x4xbf16>
    %c0_4 = arith.constant 0 : index
    %c0_5 = arith.constant 0 : index
    %c0_6 = arith.constant 0 : index
    %4 = vector.load %arg3[%c0_4, %c0_5, %c0_6] : memref<9x4x128xbf16, #tpu.memory_space<vmem>>, vector<1x4x128xbf16>
    %5 = vector.shape_cast %4 : vector<1x4x128xbf16> to vector<4x128xbf16>
    %cst_7 = arith.constant dense<0.000000e+00> : vector<288x128xf32>
    %6 = tpu.matmul %3, %5, %cst_7 {dimension_numbers = #tpu.dot_dimension_numbers<[1], [0], [0], [1], [0, 0, 1, 1], [], []>} : vector<288x4xbf16>, vector<4x128xbf16>, vector<288x128xf32> -> vector<288x128xf32>
    %7 = arith.addf %0, %6 : vector<288x128xf32>
    %c0_8 = arith.constant 0 : index
    %c0_9 = arith.constant 0 : index
    %c0_10 = arith.constant 0 : index
    %c1 = arith.constant 1 : index
    %c0_11 = arith.constant 0 : index
    %8 = vector.load %arg2[%c0_8, %c0_9, %c0_10, %c1, %c0_11] : memref<1x1x20x18x4xbf16, #tpu.memory_space<vmem>>, vector<1x1x18x16x4xbf16>
    %9 = vector.shape_cast %8 : vector<1x1x18x16x4xbf16> to vector<18x16x4xbf16>
    %10 = vector.shape_cast %9 : vector<18x16x4xbf16> to vector<288x4xbf16>
    %c1_12 = arith.constant 1 : index
    %c0_13 = arith.constant 0 : index
    %c0_14 = arith.constant 0 : index
    %11 = vector.load %arg3[%c1_12, %c0_13, %c0_14] : memref<9x4x128xbf16, #tpu.memory_space<vmem>>, vector<1x4x128xbf16>
    %12 = vector.shape_cast %11 : vector<1x4x128xbf16> to vector<4x128xbf16>
    %cst_15 = arith.constant dense<0.000000e+00> : vector<288x128xf32>
    %13 = tpu.matmul %10, %12, %cst_15 {dimension_numbers = #tpu.dot_dimension_numbers<[1], [0], [0], [1], [0, 0, 1, 1], [], []>} : vector<288x4xbf16>, vector<4x128xbf16>, vector<288x128xf32> -> vector<288x128xf32>
    %14 = arith.addf %7, %13 : vector<288x128xf32>
    %c0_16 = arith.constant 0 : index
    %c0_17 = arith.constant 0 : index
    %c0_18 = arith.constant 0 : index
    %c2 = arith.constant 2 : index
    %c0_19 = arith.constant 0 : index
    %15 = vector.load %arg2[%c0_16, %c0_17, %c0_18, %c2, %c0_19] : memref<1x1x20x18x4xbf16, #tpu.memory_space<vmem>>, vector<1x1x18x16x4xbf16>
    %16 = vector.shape_cast %15 : vector<1x1x18x16x4xbf16> to vector<18x16x4xbf16>
    %17 = vector.shape_cast %16 : vector<18x16x4xbf16> to vector<288x4xbf16>
    %c2_20 = arith.constant 2 : index
    %c0_21 = arith.constant 0 : index
    %c0_22 = arith.constant 0 : index
    %18 = vector.load %arg3[%c2_20, %c0_21, %c0_22] : memref<9x4x128xbf16, #tpu.memory_space<vmem>>, vector<1x4x128xbf16>
    %19 = vector.shape_cast %18 : vector<1x4x128xbf16> to vector<4x128xbf16>
    %cst_23 = arith.constant dense<0.000000e+00> : vector<288x128xf32>
    %20 = tpu.matmul %17, %19, %cst_23 {dimension_numbers = #tpu.dot_dimension_numbers<[1], [0], [0], [1], [0, 0, 1, 1], [], []>} : vector<288x4xbf16>, vector<4x128xbf16>, vector<288x128xf32> -> vector<288x128xf32>
    %21 = arith.addf %14, %20 : vector<288x128xf32>
    %c0_24 = arith.constant 0 : index
    %c0_25 = arith.constant 0 : index
    %c1_26 = arith.constant 1 : index
    %c0_27 = arith.constant 0 : index
    %c0_28 = arith.constant 0 : index
    %22 = vector.load %arg2[%c0_24, %c0_25, %c1_26, %c0_27, %c0_28] : memref<1x1x20x18x4xbf16, #tpu.memory_space<vmem>>, vector<1x1x18x16x4xbf16>
    %23 = vector.shape_cast %22 : vector<1x1x18x16x4xbf16> to vector<18x16x4xbf16>
    %24 = vector.shape_cast %23 : vector<18x16x4xbf16> to vector<288x4xbf16>
    %c3 = arith.constant 3 : index
    %c0_29 = arith.constant 0 : index
    %c0_30 = arith.constant 0 : index
    %25 = vector.load %arg3[%c3, %c0_29, %c0_30] : memref<9x4x128xbf16, #tpu.memory_space<vmem>>, vector<1x4x128xbf16>
    %26 = vector.shape_cast %25 : vector<1x4x128xbf16> to vector<4x128xbf16>
    %cst_31 = arith.constant dense<0.000000e+00> : vector<288x128xf32>
    %27 = tpu.matmul %24, %26, %cst_31 {dimension_numbers = #tpu.dot_dimension_numbers<[1], [0], [0], [1], [0, 0, 1, 1], [], []>} : vector<288x4xbf16>, vector<4x128xbf16>, vector<288x128xf32> -> vector<288x128xf32>
    %28 = arith.addf %21, %27 : vector<288x128xf32>
    %c0_32 = arith.constant 0 : index
    %c0_33 = arith.constant 0 : index
    %c1_34 = arith.constant 1 : index
    %c1_35 = arith.constant 1 : index
    %c0_36 = arith.constant 0 : index
    %29 = vector.load %arg2[%c0_32, %c0_33, %c1_34, %c1_35, %c0_36] : memref<1x1x20x18x4xbf16, #tpu.memory_space<vmem>>, vector<1x1x18x16x4xbf16>
    %30 = vector.shape_cast %29 : vector<1x1x18x16x4xbf16> to vector<18x16x4xbf16>
    %31 = vector.shape_cast %30 : vector<18x16x4xbf16> to vector<288x4xbf16>
    %c4 = arith.constant 4 : index
    %c0_37 = arith.constant 0 : index
    %c0_38 = arith.constant 0 : index
    %32 = vector.load %arg3[%c4, %c0_37, %c0_38] : memref<9x4x128xbf16, #tpu.memory_space<vmem>>, vector<1x4x128xbf16>
    %33 = vector.shape_cast %32 : vector<1x4x128xbf16> to vector<4x128xbf16>
    %cst_39 = arith.constant dense<0.000000e+00> : vector<288x128xf32>
    %34 = tpu.matmul %31, %33, %cst_39 {dimension_numbers = #tpu.dot_dimension_numbers<[1], [0], [0], [1], [0, 0, 1, 1], [], []>} : vector<288x4xbf16>, vector<4x128xbf16>, vector<288x128xf32> -> vector<288x128xf32>
    %35 = arith.addf %28, %34 : vector<288x128xf32>
    %c0_40 = arith.constant 0 : index
    %c0_41 = arith.constant 0 : index
    %c1_42 = arith.constant 1 : index
    %c2_43 = arith.constant 2 : index
    %c0_44 = arith.constant 0 : index
    %36 = vector.load %arg2[%c0_40, %c0_41, %c1_42, %c2_43, %c0_44] : memref<1x1x20x18x4xbf16, #tpu.memory_space<vmem>>, vector<1x1x18x16x4xbf16>
    %37 = vector.shape_cast %36 : vector<1x1x18x16x4xbf16> to vector<18x16x4xbf16>
    %38 = vector.shape_cast %37 : vector<18x16x4xbf16> to vector<288x4xbf16>
    %c5 = arith.constant 5 : index
    %c0_45 = arith.constant 0 : index
    %c0_46 = arith.constant 0 : index
    %39 = vector.load %arg3[%c5, %c0_45, %c0_46] : memref<9x4x128xbf16, #tpu.memory_space<vmem>>, vector<1x4x128xbf16>
    %40 = vector.shape_cast %39 : vector<1x4x128xbf16> to vector<4x128xbf16>
    %cst_47 = arith.constant dense<0.000000e+00> : vector<288x128xf32>
    %41 = tpu.matmul %38, %40, %cst_47 {dimension_numbers = #tpu.dot_dimension_numbers<[1], [0], [0], [1], [0, 0, 1, 1], [], []>} : vector<288x4xbf16>, vector<4x128xbf16>, vector<288x128xf32> -> vector<288x128xf32>
    %42 = arith.addf %35, %41 : vector<288x128xf32>
    %c0_48 = arith.constant 0 : index
    %c0_49 = arith.constant 0 : index
    %c2_50 = arith.constant 2 : index
    %c0_51 = arith.constant 0 : index
    %c0_52 = arith.constant 0 : index
    %43 = vector.load %arg2[%c0_48, %c0_49, %c2_50, %c0_51, %c0_52] : memref<1x1x20x18x4xbf16, #tpu.memory_space<vmem>>, vector<1x1x18x16x4xbf16>
    %44 = vector.shape_cast %43 : vector<1x1x18x16x4xbf16> to vector<18x16x4xbf16>
    %45 = vector.shape_cast %44 : vector<18x16x4xbf16> to vector<288x4xbf16>
    %c6 = arith.constant 6 : index
    %c0_53 = arith.constant 0 : index
    %c0_54 = arith.constant 0 : index
    %46 = vector.load %arg3[%c6, %c0_53, %c0_54] : memref<9x4x128xbf16, #tpu.memory_space<vmem>>, vector<1x4x128xbf16>
    %47 = vector.shape_cast %46 : vector<1x4x128xbf16> to vector<4x128xbf16>
    %cst_55 = arith.constant dense<0.000000e+00> : vector<288x128xf32>
    %48 = tpu.matmul %45, %47, %cst_55 {dimension_numbers = #tpu.dot_dimension_numbers<[1], [0], [0], [1], [0, 0, 1, 1], [], []>} : vector<288x4xbf16>, vector<4x128xbf16>, vector<288x128xf32> -> vector<288x128xf32>
    %49 = arith.addf %42, %48 : vector<288x128xf32>
    %c0_56 = arith.constant 0 : index
    %c0_57 = arith.constant 0 : index
    %c2_58 = arith.constant 2 : index
    %c1_59 = arith.constant 1 : index
    %c0_60 = arith.constant 0 : index
    %50 = vector.load %arg2[%c0_56, %c0_57, %c2_58, %c1_59, %c0_60] : memref<1x1x20x18x4xbf16, #tpu.memory_space<vmem>>, vector<1x1x18x16x4xbf16>
    %51 = vector.shape_cast %50 : vector<1x1x18x16x4xbf16> to vector<18x16x4xbf16>
    %52 = vector.shape_cast %51 : vector<18x16x4xbf16> to vector<288x4xbf16>
    %c7 = arith.constant 7 : index
    %c0_61 = arith.constant 0 : index
    %c0_62 = arith.constant 0 : index
    %53 = vector.load %arg3[%c7, %c0_61, %c0_62] : memref<9x4x128xbf16, #tpu.memory_space<vmem>>, vector<1x4x128xbf16>
    %54 = vector.shape_cast %53 : vector<1x4x128xbf16> to vector<4x128xbf16>
    %cst_63 = arith.constant dense<0.000000e+00> : vector<288x128xf32>
    %55 = tpu.matmul %52, %54, %cst_63 {dimension_numbers = #tpu.dot_dimension_numbers<[1], [0], [0], [1], [0, 0, 1, 1], [], []>} : vector<288x4xbf16>, vector<4x128xbf16>, vector<288x128xf32> -> vector<288x128xf32>
    %56 = arith.addf %49, %55 : vector<288x128xf32>
    %c0_64 = arith.constant 0 : index
    %c0_65 = arith.constant 0 : index
    %c2_66 = arith.constant 2 : index
    %c2_67 = arith.constant 2 : index
    %c0_68 = arith.constant 0 : index
    %57 = vector.load %arg2[%c0_64, %c0_65, %c2_66, %c2_67, %c0_68] : memref<1x1x20x18x4xbf16, #tpu.memory_space<vmem>>, vector<1x1x18x16x4xbf16>
    %58 = vector.shape_cast %57 : vector<1x1x18x16x4xbf16> to vector<18x16x4xbf16>
    %59 = vector.shape_cast %58 : vector<18x16x4xbf16> to vector<288x4xbf16>
    %c8 = arith.constant 8 : index
    %c0_69 = arith.constant 0 : index
    %c0_70 = arith.constant 0 : index
    %60 = vector.load %arg3[%c8, %c0_69, %c0_70] : memref<9x4x128xbf16, #tpu.memory_space<vmem>>, vector<1x4x128xbf16>
    %61 = vector.shape_cast %60 : vector<1x4x128xbf16> to vector<4x128xbf16>
    %cst_71 = arith.constant dense<0.000000e+00> : vector<288x128xf32>
    %62 = tpu.matmul %59, %61, %cst_71 {dimension_numbers = #tpu.dot_dimension_numbers<[1], [0], [0], [1], [0, 0, 1, 1], [], []>} : vector<288x4xbf16>, vector<4x128xbf16>, vector<288x128xf32> -> vector<288x128xf32>
    %63 = arith.addf %56, %62 : vector<288x128xf32>
    %c0_72 = arith.constant 0 : index
    %c0_73 = arith.constant 0 : index
    %64 = vector.load %arg4[%c0_72, %c0_73] : memref<1x128xf32, #tpu.memory_space<vmem>>, vector<1x128xf32>
    %65 = vector.broadcast %64 : vector<1x128xf32> to vector<288x128xf32>
    %66 = arith.addf %63, %65 : vector<288x128xf32>
    %cst_74 = arith.constant 0.000000e+00 : f32
    %67 = vector.broadcast %cst_74 : f32 to vector<288x128xf32>
    %68 = arith.maximumf %66, %67 : vector<288x128xf32>
    %69 = vector.shape_cast %68 : vector<288x128xf32> to vector<18x16x128xf32>
    %70 = tpu.iota {dimensions = array<i32: 0>} : vector<18x1x1xi32>
    %c16_i32 = arith.constant 16 : i32
    %71 = arith.muli %arg1, %c16_i32 : i32
    %72 = vector.broadcast %71 : i32 to vector<18x1x1xi32>
    %73 = arith.addi %70, %72 : vector<18x1x1xi32>
    %c1_i32 = arith.constant 1 : i32
    %74 = vector.broadcast %c1_i32 : i32 to vector<18x1x1xi32>
    %75 = arith.subi %73, %74 : vector<18x1x1xi32>
    %c0_i32 = arith.constant 0 : i32
    %76 = vector.broadcast %c0_i32 : i32 to vector<18x1x1xi32>
    %77 = arith.cmpi sge, %75, %76 : vector<18x1x1xi32>
    %c16_i32_75 = arith.constant 16 : i32
    %78 = vector.broadcast %c16_i32_75 : i32 to vector<18x1x1xi32>
    %79 = arith.cmpi slt, %75, %78 : vector<18x1x1xi32>
    %80 = arith.andi %77, %79 : vector<18x1x1xi1>
    %cst_76 = arith.constant 0.000000e+00 : f32
    %81 = vector.shape_cast %80 : vector<18x1x1xi1> to vector<18x1x1xi1>
    %82 = vector.broadcast %81 : vector<18x1x1xi1> to vector<18x16x128xi1>
    %83 = vector.broadcast %cst_76 : f32 to vector<18x16x128xf32>
    %84 = arith.select %82, %69, %83 : vector<18x16x128xi1>, vector<18x16x128xf32>
    %cst_77 = arith.constant 0.000000e+00 : bf16
    %85 = vector.broadcast %cst_77 : bf16 to vector<18x18x128xbf16>
    %c0_78 = arith.constant 0 : index
    %c0_79 = arith.constant 0 : index
    %c0_80 = arith.constant 0 : index
    %86 = vector.load %arg10[%c0_78, %c0_79, %c0_80] : memref<18x18x128xbf16, #tpu.memory_space<vmem>>, vector<18x18x128xbf16>
    tpu.vector_store %arg10[%c0_78, %c0_79, %c0_80], %85 {strides = array<i32>} : memref<18x18x128xbf16, #tpu.memory_space<vmem>>, vector<18x18x128xbf16>,
    %87 = arith.truncf %84 : vector<18x16x128xf32> to vector<18x16x128xbf16>
    %c0_81 = arith.constant 0 : index
    %c1_82 = arith.constant 1 : index
    %c0_83 = arith.constant 0 : index
    %88 = vector.load %arg10[%c0_81, %c1_82, %c0_83] : memref<18x18x128xbf16, #tpu.memory_space<vmem>>, vector<18x16x128xbf16>
    tpu.vector_store %arg10[%c0_81, %c1_82, %c0_83], %87 {strides = array<i32>} : memref<18x18x128xbf16, #tpu.memory_space<vmem>>, vector<18x16x128xbf16>,
    %cst_84 = arith.constant 0.000000e+00 : f32
    %89 = vector.broadcast %cst_84 : f32 to vector<256x128xf32>
    %c0_85 = arith.constant 0 : index
    %c0_86 = arith.constant 0 : index
    %c0_87 = arith.constant 0 : index
    %90 = vector.load %arg10[%c0_85, %c0_86, %c0_87] : memref<18x18x128xbf16, #tpu.memory_space<vmem>>, vector<16x16x128xbf16>
    %91 = vector.shape_cast %90 : vector<16x16x128xbf16> to vector<256x128xbf16>
    %c0_88 = arith.constant 0 : index
    %c0_89 = arith.constant 0 : index
    %c0_90 = arith.constant 0 : index
    %92 = vector.load %arg5[%c0_88, %c0_89, %c0_90] : memref<9x128x128xbf16, #tpu.memory_space<vmem>>, vector<1x128x128xbf16>
    %93 = vector.shape_cast %92 : vector<1x128x128xbf16> to vector<128x128xbf16>
    %cst_91 = arith.constant dense<0.000000e+00> : vector<256x128xf32>
    %94 = tpu.matmul %91, %93, %cst_91 {dimension_numbers = #tpu.dot_dimension_numbers<[1], [0], [0], [1], [0, 0, 1, 1], [], []>} : vector<256x128xbf16>, vector<128x128xbf16>, vector<256x128xf32> -> vector<256x128xf32>
    %95 = arith.addf %89, %94 : vector<256x128xf32>
    %c0_92 = arith.constant 0 : index
    %c1_93 = arith.constant 1 : index
    %c0_94 = arith.constant 0 : index
    %96 = vector.load %arg10[%c0_92, %c1_93, %c0_94] : memref<18x18x128xbf16, #tpu.memory_space<vmem>>, vector<16x16x128xbf16>
    %97 = vector.shape_cast %96 : vector<16x16x128xbf16> to vector<256x128xbf16>
    %c1_95 = arith.constant 1 : index
    %c0_96 = arith.constant 0 : index
    %c0_97 = arith.constant 0 : index
    %98 = vector.load %arg5[%c1_95, %c0_96, %c0_97] : memref<9x128x128xbf16, #tpu.memory_space<vmem>>, vector<1x128x128xbf16>
    %99 = vector.shape_cast %98 : vector<1x128x128xbf16> to vector<128x128xbf16>
    %cst_98 = arith.constant dense<0.000000e+00> : vector<256x128xf32>
    %100 = tpu.matmul %97, %99, %cst_98 {dimension_numbers = #tpu.dot_dimension_numbers<[1], [0], [0], [1], [0, 0, 1, 1], [], []>} : vector<256x128xbf16>, vector<128x128xbf16>, vector<256x128xf32> -> vector<256x128xf32>
    %101 = arith.addf %95, %100 : vector<256x128xf32>
    %c0_99 = arith.constant 0 : index
    %c2_100 = arith.constant 2 : index
    %c0_101 = arith.constant 0 : index
    %102 = vector.load %arg10[%c0_99, %c2_100, %c0_101] : memref<18x18x128xbf16, #tpu.memory_space<vmem>>, vector<16x16x128xbf16>
    %103 = vector.shape_cast %102 : vector<16x16x128xbf16> to vector<256x128xbf16>
    %c2_102 = arith.constant 2 : index
    %c0_103 = arith.constant 0 : index
    %c0_104 = arith.constant 0 : index
    %104 = vector.load %arg5[%c2_102, %c0_103, %c0_104] : memref<9x128x128xbf16, #tpu.memory_space<vmem>>, vector<1x128x128xbf16>
    %105 = vector.shape_cast %104 : vector<1x128x128xbf16> to vector<128x128xbf16>
    %cst_105 = arith.constant dense<0.000000e+00> : vector<256x128xf32>
    %106 = tpu.matmul %103, %105, %cst_105 {dimension_numbers = #tpu.dot_dimension_numbers<[1], [0], [0], [1], [0, 0, 1, 1], [], []>} : vector<256x128xbf16>, vector<128x128xbf16>, vector<256x128xf32> -> vector<256x128xf32>
    %107 = arith.addf %101, %106 : vector<256x128xf32>
    %c1_106 = arith.constant 1 : index
    %c0_107 = arith.constant 0 : index
    %c0_108 = arith.constant 0 : index
    %108 = vector.load %arg10[%c1_106, %c0_107, %c0_108] : memref<18x18x128xbf16, #tpu.memory_space<vmem>>, vector<16x16x128xbf16>
    %109 = vector.shape_cast %108 : vector<16x16x128xbf16> to vector<256x128xbf16>
    %c3_109 = arith.constant 3 : index
    %c0_110 = arith.constant 0 : index
    %c0_111 = arith.constant 0 : index
    %110 = vector.load %arg5[%c3_109, %c0_110, %c0_111] : memref<9x128x128xbf16, #tpu.memory_space<vmem>>, vector<1x128x128xbf16>
    %111 = vector.shape_cast %110 : vector<1x128x128xbf16> to vector<128x128xbf16>
    %cst_112 = arith.constant dense<0.000000e+00> : vector<256x128xf32>
    %112 = tpu.matmul %109, %111, %cst_112 {dimension_numbers = #tpu.dot_dimension_numbers<[1], [0], [0], [1], [0, 0, 1, 1], [], []>} : vector<256x128xbf16>, vector<128x128xbf16>, vector<256x128xf32> -> vector<256x128xf32>
    %113 = arith.addf %107, %112 : vector<256x128xf32>
    %c1_113 = arith.constant 1 : index
    %c1_114 = arith.constant 1 : index
    %c0_115 = arith.constant 0 : index
    %114 = vector.load %arg10[%c1_113, %c1_114, %c0_115] : memref<18x18x128xbf16, #tpu.memory_space<vmem>>, vector<16x16x128xbf16>
    %115 = vector.shape_cast %114 : vector<16x16x128xbf16> to vector<256x128xbf16>
    %c4_116 = arith.constant 4 : index
    %c0_117 = arith.constant 0 : index
    %c0_118 = arith.constant 0 : index
    %116 = vector.load %arg5[%c4_116, %c0_117, %c0_118] : memref<9x128x128xbf16, #tpu.memory_space<vmem>>, vector<1x128x128xbf16>
    %117 = vector.shape_cast %116 : vector<1x128x128xbf16> to vector<128x128xbf16>
    %cst_119 = arith.constant dense<0.000000e+00> : vector<256x128xf32>
    %118 = tpu.matmul %115, %117, %cst_119 {dimension_numbers = #tpu.dot_dimension_numbers<[1], [0], [0], [1], [0, 0, 1, 1], [], []>} : vector<256x128xbf16>, vector<128x128xbf16>, vector<256x128xf32> -> vector<256x128xf32>
    %119 = arith.addf %113, %118 : vector<256x128xf32>
    %c1_120 = arith.constant 1 : index
    %c2_121 = arith.constant 2 : index
    %c0_122 = arith.constant 0 : index
    %120 = vector.load %arg10[%c1_120, %c2_121, %c0_122] : memref<18x18x128xbf16, #tpu.memory_space<vmem>>, vector<16x16x128xbf16>
    %121 = vector.shape_cast %120 : vector<16x16x128xbf16> to vector<256x128xbf16>
    %c5_123 = arith.constant 5 : index
    %c0_124 = arith.constant 0 : index
    %c0_125 = arith.constant 0 : index
    %122 = vector.load %arg5[%c5_123, %c0_124, %c0_125] : memref<9x128x128xbf16, #tpu.memory_space<vmem>>, vector<1x128x128xbf16>
    %123 = vector.shape_cast %122 : vector<1x128x128xbf16> to vector<128x128xbf16>
    %cst_126 = arith.constant dense<0.000000e+00> : vector<256x128xf32>
    %124 = tpu.matmul %121, %123, %cst_126 {dimension_numbers = #tpu.dot_dimension_numbers<[1], [0], [0], [1], [0, 0, 1, 1], [], []>} : vector<256x128xbf16>, vector<128x128xbf16>, vector<256x128xf32> -> vector<256x128xf32>
    %125 = arith.addf %119, %124 : vector<256x128xf32>
    %c2_127 = arith.constant 2 : index
    %c0_128 = arith.constant 0 : index
    %c0_129 = arith.constant 0 : index
    %126 = vector.load %arg10[%c2_127, %c0_128, %c0_129] : memref<18x18x128xbf16, #tpu.memory_space<vmem>>, vector<16x16x128xbf16>
    %127 = vector.shape_cast %126 : vector<16x16x128xbf16> to vector<256x128xbf16>
    %c6_130 = arith.constant 6 : index
    %c0_131 = arith.constant 0 : index
    %c0_132 = arith.constant 0 : index
    %128 = vector.load %arg5[%c6_130, %c0_131, %c0_132] : memref<9x128x128xbf16, #tpu.memory_space<vmem>>, vector<1x128x128xbf16>
    %129 = vector.shape_cast %128 : vector<1x128x128xbf16> to vector<128x128xbf16>
    %cst_133 = arith.constant dense<0.000000e+00> : vector<256x128xf32>
    %130 = tpu.matmul %127, %129, %cst_133 {dimension_numbers = #tpu.dot_dimension_numbers<[1], [0], [0], [1], [0, 0, 1, 1], [], []>} : vector<256x128xbf16>, vector<128x128xbf16>, vector<256x128xf32> -> vector<256x128xf32>
    %131 = arith.addf %125, %130 : vector<256x128xf32>
    %c2_134 = arith.constant 2 : index
    %c1_135 = arith.constant 1 : index
    %c0_136 = arith.constant 0 : index
    %132 = vector.load %arg10[%c2_134, %c1_135, %c0_136] : memref<18x18x128xbf16, #tpu.memory_space<vmem>>, vector<16x16x128xbf16>
    %133 = vector.shape_cast %132 : vector<16x16x128xbf16> to vector<256x128xbf16>
    %c7_137 = arith.constant 7 : index
    %c0_138 = arith.constant 0 : index
    %c0_139 = arith.constant 0 : index
    %134 = vector.load %arg5[%c7_137, %c0_138, %c0_139] : memref<9x128x128xbf16, #tpu.memory_space<vmem>>, vector<1x128x128xbf16>
    %135 = vector.shape_cast %134 : vector<1x128x128xbf16> to vector<128x128xbf16>
    %cst_140 = arith.constant dense<0.000000e+00> : vector<256x128xf32>
    %136 = tpu.matmul %133, %135, %cst_140 {dimension_numbers = #tpu.dot_dimension_numbers<[1], [0], [0], [1], [0, 0, 1, 1], [], []>} : vector<256x128xbf16>, vector<128x128xbf16>, vector<256x128xf32> -> vector<256x128xf32>
    %137 = arith.addf %131, %136 : vector<256x128xf32>
    %c2_141 = arith.constant 2 : index
    %c2_142 = arith.constant 2 : index
    %c0_143 = arith.constant 0 : index
    %138 = vector.load %arg10[%c2_141, %c2_142, %c0_143] : memref<18x18x128xbf16, #tpu.memory_space<vmem>>, vector<16x16x128xbf16>
    %139 = vector.shape_cast %138 : vector<16x16x128xbf16> to vector<256x128xbf16>
    %c8_144 = arith.constant 8 : index
    %c0_145 = arith.constant 0 : index
    %c0_146 = arith.constant 0 : index
    %140 = vector.load %arg5[%c8_144, %c0_145, %c0_146] : memref<9x128x128xbf16, #tpu.memory_space<vmem>>, vector<1x128x128xbf16>
    %141 = vector.shape_cast %140 : vector<1x128x128xbf16> to vector<128x128xbf16>
    %cst_147 = arith.constant dense<0.000000e+00> : vector<256x128xf32>
    %142 = tpu.matmul %139, %141, %cst_147 {dimension_numbers = #tpu.dot_dimension_numbers<[1], [0], [0], [1], [0, 0, 1, 1], [], []>} : vector<256x128xbf16>, vector<128x128xbf16>, vector<256x128xf32> -> vector<256x128xf32>
    %143 = arith.addf %137, %142 : vector<256x128xf32>
    %c0_148 = arith.constant 0 : index
    %c0_149 = arith.constant 0 : index
    %144 = vector.load %arg6[%c0_148, %c0_149] : memref<1x128xf32, #tpu.memory_space<vmem>>, vector<1x128xf32>
    %145 = vector.broadcast %144 : vector<1x128xf32> to vector<256x128xf32>
    %146 = arith.addf %143, %145 : vector<256x128xf32>
    %c0_150 = arith.constant 0 : index
    %c0_151 = arith.constant 0 : index
    %c2_152 = arith.constant 2 : index
    %c1_153 = arith.constant 1 : index
    %c0_154 = arith.constant 0 : index
    %147 = vector.load %arg2[%c0_150, %c0_151, %c2_152, %c1_153, %c0_154] : memref<1x1x20x18x4xbf16, #tpu.memory_space<vmem>>, vector<1x1x16x16x4xbf16>
    %148 = vector.shape_cast %147 : vector<1x1x16x16x4xbf16> to vector<16x16x4xbf16>
    %149 = vector.shape_cast %148 : vector<16x16x4xbf16> to vector<256x4xbf16>
    %c0_155 = arith.constant 0 : index
    %c0_156 = arith.constant 0 : index
    %150 = vector.load %arg7[%c0_155, %c0_156] : memref<4x128xbf16, #tpu.memory_space<vmem>>, vector<4x128xbf16>
    %cst_157 = arith.constant dense<0.000000e+00> : vector<256x128xf32>
    %151 = tpu.matmul %149, %150, %cst_157 {dimension_numbers = #tpu.dot_dimension_numbers<[1], [0], [0], [1], [0, 0, 1, 1], [], []>} : vector<256x4xbf16>, vector<4x128xbf16>, vector<256x128xf32> -> vector<256x128xf32>
    %c0_158 = arith.constant 0 : index
    %c0_159 = arith.constant 0 : index
    %152 = vector.load %arg8[%c0_158, %c0_159] : memref<1x128xf32, #tpu.memory_space<vmem>>, vector<1x128xf32>
    %153 = vector.broadcast %152 : vector<1x128xf32> to vector<256x128xf32>
    %154 = arith.addf %151, %153 : vector<256x128xf32>
    %155 = arith.addf %146, %154 : vector<256x128xf32>
    %cst_160 = arith.constant 0.000000e+00 : f32
    %156 = vector.broadcast %cst_160 : f32 to vector<256x128xf32>
    %157 = arith.maximumf %155, %156 : vector<256x128xf32>
    %158 = vector.shape_cast %157 : vector<256x128xf32> to vector<16x16x128xf32>
    %c0_161 = arith.constant 0 : index
    %c0_162 = arith.constant 0 : index
    %c0_163 = arith.constant 0 : index
    %c0_164 = arith.constant 0 : index
    %159 = vector.load %arg9[%c0_161, %c0_162, %c0_163, %c0_164] : memref<1x16x16x128xf32, #tpu.memory_space<vmem>>, vector<1x16x16x128xf32>
    %160 = vector.shape_cast %159 : vector<1x16x16x128xf32> to vector<16x16x128xf32>
    %161 = vector.shape_cast %158 : vector<16x16x128xf32> to vector<1x16x16x128xf32>
    tpu.vector_store %arg9[%c0_161, %c0_162, %c0_163, %c0_164], %161 {strides = array<i32>} : memref<1x16x16x128xf32, #tpu.memory_space<vmem>>, vector<1x16x16x128xf32>,
    return
  }
  func.func @transform_0(%arg0: i32, %arg1: i32) -> (i32, i32, i32, i32, i32) {
    %c0_i32 = arith.constant 0 : i32
    %c0_i32_0 = arith.constant 0 : i32
    %c0_i32_1 = arith.constant 0 : i32
    %c0_i32_2 = arith.constant 0 : i32
    return %arg0, %arg1, %c0_i32, %c0_i32_0, %c0_i32_1 : i32, i32, i32, i32, i32
  }
  func.func @transform_1(%arg0: i32, %arg1: i32) -> (i32, i32, i32) {
    %c0_i32 = arith.constant 0 : i32
    %c0_i32_0 = arith.constant 0 : i32
    %c0_i32_1 = arith.constant 0 : i32
    %c0_i32_2 = arith.constant 0 : i32
    return %c0_i32, %c0_i32_0, %c0_i32_1 : i32, i32, i32
  }
  func.func @transform_2(%arg0: i32, %arg1: i32) -> (i32, i32) {
    %c0_i32 = arith.constant 0 : i32
    %c0_i32_0 = arith.constant 0 : i32
    %c0_i32_1 = arith.constant 0 : i32
    return %c0_i32, %c0_i32_0 : i32, i32
  }
  func.func @transform_3(%arg0: i32, %arg1: i32) -> (i32, i32, i32) {
    %c0_i32 = arith.constant 0 : i32
    %c0_i32_0 = arith.constant 0 : i32
    %c0_i32_1 = arith.constant 0 : i32
    %c0_i32_2 = arith.constant 0 : i32
    return %c0_i32, %c0_i32_0, %c0_i32_1 : i32, i32, i32
  }
  func.func @transform_4(%arg0: i32, %arg1: i32) -> (i32, i32) {
    %c0_i32 = arith.constant 0 : i32
    %c0_i32_0 = arith.constant 0 : i32
    %c0_i32_1 = arith.constant 0 : i32
    return %c0_i32, %c0_i32_0 : i32, i32
  }
  func.func @transform_5(%arg0: i32, %arg1: i32) -> (i32, i32) {
    %c0_i32 = arith.constant 0 : i32
    %c0_i32_0 = arith.constant 0 : i32
    %c0_i32_1 = arith.constant 0 : i32
    return %c0_i32, %c0_i32_0 : i32, i32
  }
  func.func @transform_6(%arg0: i32, %arg1: i32) -> (i32, i32) {
    %c0_i32 = arith.constant 0 : i32
    %c0_i32_0 = arith.constant 0 : i32
    %c0_i32_1 = arith.constant 0 : i32
    return %c0_i32, %c0_i32_0 : i32, i32
  }
  func.func @transform_7(%arg0: i32, %arg1: i32) -> (i32, i32, i32, i32) {
    %c0_i32 = arith.constant 0 : i32
    %c0_i32_0 = arith.constant 0 : i32
    %c0_i32_1 = arith.constant 0 : i32
    return %arg0, %arg1, %c0_i32, %c0_i32_0 : i32, i32, i32, i32
  }
}

</mosaic_0001>

<bundles_post_ra>
// kernel: basic_block_forward.1
= control target key start
LH: loop header
LB: loop body
LE: loop exit
PB: predicated region body
PF: predicated region fallthrough
CT: control target
= control target key end

     0   :  { %s12233_s24 = smov 0   ;;  %s12235_s25 = smov 0   ;;  %s15836_s0 = inlined_call_operand.vmem [shape: bf16[2,1,20,18,4], index: 0, kind: input, shape index: {}]   ;;  %s15837_s1 = inlined_call_operand.vmem [shape: bf16[9,4,128], index: 1, kind: input, shape index: {}]   ;;  %s15838_s2 = inlined_call_operand.vmem [shape: f32[1,128], index: 2, kind: input, shape index: {}]   ;;  %s15839_s3 = inlined_call_operand.vmem [shape: bf16[9,128,128], index: 3, kind: input, shape index: {}]   ;;  %s15840_s4 = inlined_call_operand.vmem [shape: f32[1,128], index: 4, kind: input, shape index: {}]   ;;  %s15841_s5 = inlined_call_operand.vmem [shape: bf16[4,128], index: 5, kind: input, shape index: {}]   ;;  %s15842_s6 = inlined_call_operand.vmem [shape: f32[1,128], index: 6, kind: input, shape index: {}]   ;;  %s15843_s7 = inlined_call_operand.vmem [shape: f32[2,16,16,128], index: 7, kind: output, shape index: {}]  }
   0x1   :  { %s12237_s26 = smov 0  }
   0x2 LB: > { %s29_s27 = sadd.s32 1, %s12186_s25  ;;  %p10535_p0 = scmp.ge.s32.totalorder %s12190_s26, 1  ;;  %s12190_s26 = sphi %s12237_s26, %s17_s26   ;;  %s12186_s25 = sphi %s12235_s25, %s16056_s25   ;;  %s12182_s24 = sphi %s12233_s24, %s16055_s24  }
   0x3   : > { %p31_p1 = scmp.ge.s32.totalorder %s29_s27, 2  ;;  %p257_p2 = scmp.lt.s32.totalorder %s12190_s26, 3 }
   0x5   : > { %s16058_s27 = smov (%p31_p1, %s29_s27), 0  ;;  %p258_p3 = pnand %p10535_p0, %p257_p2 }
   0x7   : > { %261 = sbr.rel (%p258_p3) target bundleno = 1825 (0x721), region = 48 }
   0xc   : > { %v10539_v0 = vld [vmem:[%s15837_s1 + $0x2] sm:$0x3]  ;;  %vm920_vm0 = vcmask 1041408   ;;  %p298_p4 = scmp.lt.s32.totalorder %s12182_s24, 1  ;;  %v355_v2 = vld [vmem:[%s15837_s1] sm:$0x3] }
   0xd   : > { %v922_v1 = vsel %vm920_vm0, %v10539_v0, 0  ;;  %v1168_v3 = vsel %vm920_vm0, %v355_v2, 0  ;;  %vm374_vm1 = vsmask.f32 3328  ;;  %vm375_vm2 = vsmask.f32 7440 }
   0xe   : > { %931 = vmatpush.bf16.msra.mxu0 %v922_v1  ;;  %s16060_s24 = smov (!%p298_p4, %s12182_s24), 1  ;;  %12092 = vmatpush.bf16.msra.mxu1 %v1168_v3  ;;  %vm1323_vm3 = vcmask 1042432   ;;  %vm1324_vm4 = vcmask 1046532   ;;  %vm12287_vm6 = vmor %vm374_vm1, %vm375_vm2  ;;  %vm865_vm7 = vcmask 31744   ;;  %v10666_v50 = vld [vmem:[%s15837_s1 + $0x4] sm:$0x3] }
   0xf   : > { %s12095_s9 = smul.u32 240, %s16060_s24  ;;  %vm12281_vm5 = vmor %vm1323_vm3, %vm1324_vm4  ;;  %v10721_v51 = vld [vmem:[%s15837_s1 + $0x6] sm:$0x3]  ;;  %v1563_v53 = vsel %vm920_vm0, %v10666_v50, 0  ;;  %vm5392_vm8 = vcmask 1043456   ;;  %vm5399_vm14 = vcmask 1040384  }
  0x10   : > { %12093 = vmatpush.bf16.msra.mxu2 %v1563_v53  ;;  %v12317_v56 = vsel %vm920_vm0, %v10721_v51, 0  ;;  %vm5393_vm9 = vsmask.f32 7938  ;;  %vm5029_vm10 = vsmask.f32 256  ;;  %s11917_s21 = sshll.u32 %s16060_s24, 8 }
  0x11   : > { %s12265_s12 = scalar_lea.vmem %s15836_s0, %s12095_s9  ;;  %12094 = vmatpush.bf16.msra.mxu3 %v12317_v56  ;;  %vm5030_vm11 = vsmask.f32 4368  ;;  %vm14109_vm12 = vmand %vm5392_vm8, %vm5393_vm9  ;;  %s15477_s23 = scalar_lea.vmem %s15843_s7, %s11917_s21  ;;  %v15747_v29 = vld [vmem:[%s15842_s6] ss:$0 sm:$0xff] }
  0x12   : > { %1177 = vmatpush.bf16.msrb.mxu0 %v1168_v3  ;;  %v319_v4 = vld [vmem:[%s12265_s12] sm:$0xf]  ;;  %v12269_v5 = vld [vmem:[%s12265_s12 + $0x4] sm:$0xf]  ;;  %v356_v6 = vld [vmem:[%s12265_s12 + $0x8] sm:$0x1] }
  0x13   : > { %v378_v7 = vshrl.u32 %v319_v4, 16  ;;  %v381_v8 = vshll.u32 %v319_v4, 16  ;;  %v387_v9 = vshll.u32 %v12269_v5, 16  ;;  %v391_v10 = vshrl.u32 %v12269_v5, 16  ;;  %v321_v11 = vld [vmem:[%s12265_s12 + $0xc] sm:$0xf]  ;;  %vm14119_vm13 = vmor %vm5029_vm10, %vm5030_vm11 }
  0x14   : > { %v397_v12 = vshll.u32 %v356_v6, 16  ;;  %v1328_v13 = vrot.slane %v12269_v5, 5  ;;  %v1331_v14 = vrot.slane %v356_v6, 5  ;;  %v322_v15 = vld [vmem:[%s12265_s12 + $0x10] sm:$0xf]  ;;  %v402_v16 = vshrl.u32 %v321_v11, 16  ;;  %vm14132_vm15 = vmand %vm5399_vm14, %vm5029_vm10 }
  0x15   : > { %v380_v17 = vrot.slane %v378_v7, 4  ;;  %v383_v18 = vrot.slane %v381_v8, 5  ;;  %v389_v19 = vrot.slane %v387_v9, 5  ;;  %v393_v20 = vrot.slane %v391_v10, 4  ;;  %v357_v35 = vld [vmem:[%s12265_s12 + $0x14] sm:$0x1] }
  0x16   : > { %v399_v21 = vrot.slane %v397_v12, 5  ;;  %v1330_v22 = vrot.slane %v1328_v13, 4  ;;  %v405_v23 = vshll.u32 %v321_v11, 16  ;;  %v411_v27 = vshll.u32 %v322_v15, 16  ;;  %v323_v46 = vld [vmem:[%s12265_s12 + $0x18] sm:$0xf] }
  0x17   : > { %v384_v24 = vor.u32 %v383_v18, %v380_v17  ;;  %v394_v25 = vor.u32 %v393_v20, %v389_v19  ;;  %v415_v28 = vshrl.u32 %v322_v15, 16  ;;  %v404_v31 = vrot.slane %v402_v16, 4  ;;  %v324_v47 = vld [vmem:[%s12265_s12 + $0x1c] sm:$0xf]  ;;  %v12311_v54 = vld [vmem:[%s12265_s12 + $0x28] sm:$0xf] }
  0x18   : > { %v12293_v30 = vsel %vm12281_vm5, %v1330_v22, %v1331_v14  ;;  %v407_v32 = vrot.slane %v405_v23, 5  ;;  %v413_v36 = vrot.slane %v411_v27, 5  ;;  %v421_v43 = vshll.u32 %v357_v35, 16  ;;  %v12314_v55 = vld [vmem:[%s12265_s12 + $0x2c] sm:$0x1]  ;;  %v11939_v60 = vld [vmem:[%s12265_s12 + $0x30] sm:$0xff] }
  0x19   : > { %v385_v33 = vrot.slane %v384_v24, 4  ;;  %v395_v34 = vrot.slane %v394_v25, 4  ;;  %v417_v37 = vrot.slane %v415_v28, 4  ;;  %v1272_v57 = vld [vmem:[%s12265_s12 + $0x24] sm:$0xe]  ;;  %v1349_v58 = vrot.slane %v12311_v54, 5  ;;  %10797 = vmatmul.msk.bf16.vlgmr.msra.gmra.mxu3 %vm865_vm7, %v11939_v60 }
  0x1a   : > { %v408_v42 = vor.u32 %v407_v32, %v404_v31  ;;  %v423_v49 = vrot.slane %v421_v43, 5  ;;  %v1352_v59 = vrot.slane %v12314_v55, 5  ;;  %v426_v61 = vshrl.u32 %v323_v46, 16  ;;  %v358_v15 = vld [vmem:[%s12265_s12 + $0x20] sm:$0x1]  ;;  %v11921_v23 = vld [vmem:[%s12265_s12 + $0x24] sm:$0xff] }
  0x1b   : > { %v390_v38 = vsel %vm12287_vm6, %v385_v33, %v389_v19  ;;  %v400_v39 = vsel %vm12287_vm6, %v395_v34, %v399_v21  ;;  %v418_v44 = vor.u32 %v417_v37, %v413_v36  ;;  %v429_v62 = vshll.u32 %v323_v46, 16  ;;  %v325_v27 = vld [vmem:[%s12265_s12 + $0x24] sm:$0xf]  ;;  %10633 = vmatmul.msk.bf16.vlgmr.msra.gmra.mxu1 %vm865_vm7, %v11921_v23  ;;  %v12340_v28 = vld [vmem:[%s12265_s12 + $0x34] sm:$0xf]  ;;  %v11940_v37 = vld [vmem:[%s12265_s12 + $0x3c] sm:$0xff] }
  0x1c   : > { %v811_v40 = vunpack.c.l.b16 %v390_v38  ;;  %v812_v41 = vunpack.c.l.b16 %v400_v39  ;;  %v409_v48 = vrot.slane %v408_v42, 4  ;;  %v10651_v63 = vrot.slane %v1272_v57, 9  ;;  %v12343_v31 = vld [vmem:[%s12265_s12 + $0x38] sm:$0x1]  ;;  %v1273_v32 = vld [vmem:[%s12265_s12 + $0x30] sm:$0xe] }
  0x1d   : > { %v419_v52 = vrot.slane %v418_v44, 4  ;;  %v435_v0 = vshll.u32 %v324_v47, 16  ;;  %v1351_v1 = vrot.slane %v1349_v58, 4  ;;  %v439_v4 = vshrl.u32 %v324_v47, 16 }
  0x1e   : > { %v847_v45 = vpack.c.b16 %v812_v41, %v811_v40  ;;  %v414_v2 = vsel %vm12287_vm6, %v409_v48, %v413_v36  ;;  %v1350_v6 = vsel %vm12281_vm5, %v10651_v63, %v1349_v58  ;;  %v428_v9 = vrot.slane %v426_v61, 4 }
  0x1f   : > { %v424_v3 = vsel %vm12287_vm6, %v419_v52, %v423_v49  ;;  %v1353_v7 = vsel %vm12281_vm5, %v1351_v1, %v1352_v59  ;;  %v1460_v8 = vunpack.c.l.b16 %v1350_v6  ;;  %v431_v10 = vrot.slane %v429_v62, 5  ;;  %v11922_v62 = vld [vmem:[%s12265_s12 + $0x30] sm:$0xff] }
  0x20   : > { %10540 = vmatmul.msk.bf16.vlgmr.msra.gmra.mxu0 %vm865_vm7, %v847_v45  ;;  %v1461_v11 = vunpack.c.l.b16 %v1353_v7  ;;  %v813_v12 = vunpack.c.l.b16 %v414_v2  ;;  %v814_v14 = vunpack.c.l.b16 %v424_v3  ;;  %v437_v16 = vrot.slane %v435_v0, 5  ;;  %v327_v1 = vld [vmem:[%s12265_s12 + $0x30] sm:$0xf]  ;;  %v12367_v2 = vld [vmem:[%s12265_s12 + $0x40] sm:$0xf] }
  0x21   : > { %1572 = vmatpush.bf16.msra.mxu0 %v1563_v53  ;;  %v441_v17 = vrot.slane %v439_v4, 4  ;;  %v432_v19 = vor.u32 %v431_v10, %v428_v9  ;;  %v445_v20 = vshll.u32 %v358_v15, 16  ;;  %v10652_v34 = vrot.slane %v1273_v32, 9  ;;  %v12370_v3 = vld [vmem:[%s12265_s12 + $0x44] sm:$0x1]  ;;  %v11941_v9 = vld [vmem:[%s12265_s12 + $0x48] sm:$0xff] }
  0x22   : > { %v1493_v18 = vpack.c.b16 %v1461_v11, %v1460_v8  ;;  %v848_v21 = vpack.c.b16 %v814_v14, %v813_v12  ;;  %v1356_v35 = vrot.slane %v12340_v28, 5  ;;  %v1359_v36 = vrot.slane %v12343_v31, 5  ;;  %v1274_v4 = vld [vmem:[%s12265_s12 + $0x3c] sm:$0xe] }
  0x23   : > { %v442_v22 = vor.u32 %v441_v17, %v437_v16  ;;  %v433_v24 = vrot.slane %v432_v19, 4  ;;  %v447_v25 = vrot.slane %v445_v20, 5  ;;  %v450_v38 = vshrl.u32 %v325_v27, 16 }
  0x24   : > { %10670 = vmatmul.msk.bf16.vlgmr.msra.gmra.mxu2 %vm865_vm7, %v1493_v18  ;;  %v453_v39 = vshll.u32 %v325_v27, 16  ;;  %v1357_v40 = vsel %vm12281_vm5, %v10652_v34, %v1356_v35  ;;  %v1358_v41 = vrot.slane %v1356_v35, 4  ;;  %v459_v45 = vshll.u32 %v12311_v54, 16 }
  0x25   : > { %v443_v33 = vrot.slane %v442_v22, 4  ;;  %v438_v42 = vsel %vm12287_vm6, %v433_v24, %v437_v16  ;;  %v1462_v43 = vunpack.c.l.b16 %v1357_v40  ;;  %v463_v46 = vshrl.u32 %v12311_v54, 16  ;;  %v329_v40 = vld [vmem:[%s12265_s12 + $0x3c] sm:$0xf] }
  0x26   : > { %v1360_v47 = vsel %vm12281_vm5, %v1358_v41, %v1359_v36  ;;  %v452_v49 = vrot.slane %v450_v38, 4  ;;  %v455_v50 = vrot.slane %v453_v39, 5  ;;  %v815_v51 = vunpack.c.l.b16 %v438_v42  ;;  %v332_v41 = vld [vmem:[%s12265_s12 + $0x4c] sm:$0xf]  ;;  %v12395_v42 = vld [vmem:[%s12265_s12 + $0x50] sm:$0x1] }
  0x27   : > { %v448_v44 = vsel %vm12287_vm6, %v443_v33, %v447_v25  ;;  %v1463_v48 = vunpack.c.l.b16 %v1360_v47  ;;  %v461_v57 = vrot.slane %v459_v45, 5  ;;  %v465_v58 = vrot.slane %v463_v46, 4  ;;  %v11942_v47 = vld [vmem:[%s12265_s12 + $0x54] sm:$0xff] }
  0x28   : > { %v816_v52 = vunpack.c.l.b16 %v448_v44  ;;  %v456_v59 = vor.u32 %v455_v50, %v452_v49  ;;  %v469_v54 = vshll.u32 %v12314_v55, 16  ;;  %v10653_v55 = vrot.slane %v1274_v4, 9 }
  0x29   : > { %10798 = vmatmul.msk.bf16.gmra.mxu3 %vm865_vm7, %v11940_v37  ;;  %v1494_v53 = vpack.c.b16 %v1463_v48, %v1462_v43  ;;  %v466_v61 = vor.u32 %v465_v58, %v461_v57  ;;  %v1363_v7 = vrot.slane %v12367_v2, 5  ;;  %v1366_v8 = vrot.slane %v12370_v3, 5  ;;  %v11923_v37 = vld [vmem:[%s12265_s12 + $0x3c] sm:$0xff]  ;;  %v1275_v43 = vld [vmem:[%s12265_s12 + $0x48] sm:$0xe] }
  0x2a   : > { %v849_v60 = vpack.c.b16 %v816_v52, %v815_v51  ;;  %v457_v63 = vrot.slane %v456_v59, 4  ;;  %v471_v0 = vrot.slane %v469_v54, 5  ;;  %v474_v10 = vshrl.u32 %v327_v1, 16 }
  0x2b   : > { %10634 = vmatmul.msk.bf16.gmra.mxu1 %vm865_vm7, %v11922_v62  ;;  %v467_v6 = vrot.slane %v466_v61, 4  ;;  %v477_v11 = vshll.u32 %v327_v1, 16  ;;  %v1364_v12 = vsel %vm12281_vm5, %v10653_v55, %v1363_v7  ;;  %v1365_v14 = vrot.slane %v1363_v7, 4 }
  0x2c   : > { %v462_v15 = vsel %vm12287_vm6, %v457_v63, %v461_v57  ;;  %v1464_v16 = vunpack.c.l.b16 %v1364_v12  ;;  %v483_v18 = vshll.u32 %v12340_v28, 16  ;;  %v487_v19 = vshrl.u32 %v12340_v28, 16  ;;  %v331_v12 = vld [vmem:[%s12265_s12 + $0x48] sm:$0xf] }
  0x2d   : > { %v472_v17 = vsel %vm12287_vm6, %v467_v6, %v471_v0  ;;  %v1367_v20 = vsel %vm12281_vm5, %v1365_v14, %v1366_v8  ;;  %v476_v22 = vrot.slane %v474_v10, 4  ;;  %v479_v23 = vrot.slane %v477_v11, 5  ;;  %v334_v14 = vld [vmem:[%s12265_s12 + $0x58] sm:$0xf] }
  0x2e   : > { %v817_v24 = vunpack.c.l.b16 %v462_v15  ;;  %v818_v25 = vunpack.c.l.b16 %v472_v17  ;;  %v485_v32 = vrot.slane %v483_v18, 5  ;;  %v489_v33 = vrot.slane %v487_v19, 4  ;;  %v12419_v15 = vld [vmem:[%s12265_s12 + $0x5c] sm:$0x1] }
  0x2f   : > { %v480_v34 = vor.u32 %v479_v23, %v476_v22  ;;  %v493_v28 = vshll.u32 %v12343_v31, 16  ;;  %v10654_v45 = vrot.slane %v1275_v43, 9  ;;  %v1370_v31 = vrot.slane %v332_v41, 5  ;;  %v11943_v22 = vld [vmem:[%s12265_s12 + $0x60] sm:$0xff] }
  0x30   : > { %10541 = vmatmul.msk.bf16.gmra.mxu0 %vm865_vm7, %v848_v21  ;;  %v1465_v21 = vunpack.c.l.b16 %v1367_v20  ;;  %v850_v35 = vpack.c.b16 %v818_v25, %v817_v24  ;;  %v490_v36 = vor.u32 %v489_v33, %v485_v32  ;;  %v1373_v46 = vrot.slane %v12395_v42, 5 }
  0x31   : > { %v481_v38 = vrot.slane %v480_v34, 4  ;;  %v495_v39 = vrot.slane %v493_v28, 5  ;;  %v498_v48 = vshrl.u32 %v329_v40, 16  ;;  %v501_v49 = vshll.u32 %v329_v40, 16 }
  0x32   : > { %v1495_v27 = vpack.c.b16 %v1465_v21, %v1464_v16  ;;  %v491_v44 = vrot.slane %v490_v36, 4  ;;  %v1371_v50 = vsel %vm12281_vm5, %v10654_v45, %v1370_v31  ;;  %v1372_v51 = vrot.slane %v1370_v31, 4  ;;  %v1276_v16 = vld [vmem:[%s12265_s12 + $0x54] sm:$0xe] }
  0x33   : > { %v486_v52 = vsel %vm12287_vm6, %v481_v38, %v485_v32  ;;  %v507_v58 = vshll.u32 %v12367_v2, 16  ;;  %v511_v59 = vshrl.u32 %v12367_v2, 16  ;;  %v500_v61 = vrot.slane %v498_v48, 4  ;;  %v11925_v48 = vld [vmem:[%s12265_s12 + $0x54] sm:$0xff] }
  0x34   : > { %10671 = vmatmul.msk.bf16.gmra.mxu2 %vm865_vm7, %v1494_v53  ;;  %v1466_v53 = vunpack.c.l.b16 %v1371_v50  ;;  %v496_v57 = vsel %vm12287_vm6, %v491_v44, %v495_v39  ;;  %v1374_v54 = vsel %vm12281_vm5, %v1372_v51, %v1373_v46  ;;  %v503_v62 = vrot.slane %v501_v49, 5  ;;  %v333_v51 = vld [vmem:[%s12265_s12 + $0x54] sm:$0xf] }
  0x35   : > { %v819_v63 = vunpack.c.l.b16 %v486_v52  ;;  %v820_v0 = vunpack.c.l.b16 %v496_v57  ;;  %v509_v4 = vrot.slane %v507_v58, 5  ;;  %v513_v6 = vrot.slane %v511_v59, 4  ;;  %v336_v52 = vld [vmem:[%s12265_s12 + $0x64] sm:$0xf]  ;;  %v1277_v57 = vld [vmem:[%s12265_s12 + $0x60] sm:$0xe] }
  0x36   : > { %v504_v55 = vor.u32 %v503_v62, %v500_v61  ;;  %v517_v2 = vshll.u32 %v12370_v3, 16  ;;  %v10655_v18 = vrot.slane %v1276_v16, 9  ;;  %v1377_v3 = vrot.slane %v334_v14, 5 }
  0x37   : > { %v851_v7 = vpack.c.b16 %v820_v0, %v819_v63  ;;  %v514_v8 = vor.u32 %v513_v6, %v509_v4  ;;  %v1380_v19 = vrot.slane %v12419_v15, 5  ;;  %v522_v20 = vshrl.u32 %v331_v12, 16 }
  0x38   : > { %v505_v10 = vrot.slane %v504_v55, 4  ;;  %v519_v11 = vrot.slane %v517_v2, 5  ;;  %v525_v21 = vshll.u32 %v331_v12, 16  ;;  %v531_v23 = vshll.u32 %v332_v41, 16 }
  0x39   : > { %10799 = vmatmul.msk.bf16.gmra.mxu3 %vm865_vm7, %v11941_v9  ;;  %v11924_v9 = vld [vmem:[%s12265_s12 + $0x48] sm:$0xff]  ;;  %v515_v17 = vrot.slane %v514_v8, 4  ;;  %v535_v24 = vshrl.u32 %v332_v41, 16  ;;  %v1378_v25 = vsel %vm12281_vm5, %v10655_v18, %v1377_v3  ;;  %v541_v31 = vshll.u32 %v12395_v42, 16 }
  0x3a   : > { %v1468_v32 = vunpack.c.l.b16 %v1378_v25  ;;  %v510_v33 = vsel %vm12287_vm6, %v505_v10, %v509_v4  ;;  %v527_v36 = vrot.slane %v525_v21, 5  ;;  %v533_v38 = vrot.slane %v531_v23, 5  ;;  %v338_v25 = vld [vmem:[%s12265_s12 + $0x70] sm:$0xf] }
  0x3b   : > { %10635 = vmatmul.msk.bf16.gmra.mxu1 %vm865_vm7, %v11923_v37  ;;  %v520_v34 = vsel %vm12287_vm6, %v515_v17, %v519_v11  ;;  %v537_v39 = vrot.slane %v535_v24, 4  ;;  %v821_v40 = vunpack.c.l.b16 %v510_v33  ;;  %v543_v50 = vrot.slane %v541_v31, 5  ;;  %v335_v24 = vld [vmem:[%s12265_s12 + $0x60] sm:$0xf] }
  0x3c   : > { %v822_v41 = vunpack.c.l.b16 %v520_v34  ;;  %v10656_v58 = vrot.slane %v1277_v57, 9  ;;  %v1384_v59 = vrot.slane %v336_v52, 5  ;;  %v546_v61 = vshrl.u32 %v333_v51, 16 }
  0x3d   : > { %v538_v45 = vor.u32 %v537_v39, %v533_v38  ;;  %v549_v0 = vshll.u32 %v333_v51, 16  ;;  %v559_v4 = vshrl.u32 %v334_v14, 16  ;;  %v573_v34 = vshll.u32 %v335_v24, 16 }
  0x3e   : > { %v852_v46 = vpack.c.b16 %v822_v41, %v821_v40  ;;  %v1385_v62 = vsel %vm12281_vm5, %v10656_v58, %v1384_v59  ;;  %v1386_v63 = vrot.slane %v1384_v59, 4  ;;  %v11945_v58 = vld [vmem:[%s12265_s12 + $0x78] sm:$0xff] }
  0x3f   : > { %v539_v49 = vrot.slane %v538_v45, 4  ;;  %v1470_v6 = vunpack.c.l.b16 %v1385_v62  ;;  %v551_v10 = vrot.slane %v549_v0, 5  ;;  %v561_v12 = vrot.slane %v559_v4, 4  ;;  %v340_v4 = vld [vmem:[%s12265_s12 + $0x7c] sm:$0xf] }
  0x40   : > { %10542 = vmatmul.msk.bf16.gmra.mxu0 %vm865_vm7, %v849_v60  ;;  %v1467_v60 = vunpack.c.l.b16 %v1374_v54 }
  0x42   : > { %v1496_v1 = vpack.c.b16 %v1467_v60, %v1466_v53  ;;  %v12441_v53 = vld [vmem:[%s12265_s12 + $0x68] sm:$0x1]  ;;  %v544_v60 = vsel %vm12287_vm6, %v539_v49, %v543_v50 }
  0x43   : > { %v1387_v42 = vrot.slane %v12441_v53, 5  ;;  %v824_v8 = vunpack.c.l.b16 %v544_v60  ;;  %v337_v60 = vld [vmem:[%s12265_s12 + $0x6c] sm:$0xf] }
  0x44   : > { %10672 = vmatmul.msk.bf16.gmra.mxu2 %vm865_vm7, %v1495_v27  ;;  %v1379_v27 = vrot.slane %v1377_v3, 4  ;;  %v565_v3 = vshll.u32 %v12419_v15, 16  ;;  %v594_v0 = vshrl.u32 %v337_v60, 16 }
  0x45   : > { %v1388_v55 = vsel %vm12281_vm5, %v1386_v63, %v1387_v42  ;;  %v589_v42 = vshll.u32 %v12441_v53, 16 }
  0x46   : > { %v1381_v28 = vsel %vm12281_vm5, %v1379_v27, %v1380_v19  ;;  %v1471_v2 = vunpack.c.l.b16 %v1388_v55  ;;  %v11944_v19 = vld [vmem:[%s12265_s12 + $0x6c] sm:$0xff]  ;;  %v567_v23 = vrot.slane %v565_v3, 5  ;;  %v570_v27 = vshrl.u32 %v335_v24, 16 }
  0x47   : > { %v1469_v37 = vunpack.c.l.b16 %v1381_v28  ;;  %v579_v28 = vshll.u32 %v336_v52, 16  ;;  %v591_v63 = vrot.slane %v589_v42, 5  ;;  %v607_v55 = vshrl.u32 %v338_v25, 16 }
  0x48   : > { %v1498_v16 = vpack.c.b16 %v1471_v2, %v1470_v6  ;;  %v572_v31 = vrot.slane %v570_v27, 4  ;;  %v603_v6 = vshll.u32 %v338_v25, 16  ;;  %v1398_v2 = vrot.slane %v340_v4, 5 }
  0x49   : > { %10800 = vmatmul.msk.bf16.gmra.mxu3 %vm865_vm7, %v11942_v47  ;;  %v1497_v43 = vpack.c.b16 %v1469_v37, %v1468_v32  ;;  %v1391_v32 = vrot.slane %v338_v25, 5  ;;  %v583_v37 = vshrl.u32 %v336_v52, 16  ;;  %v581_v49 = vrot.slane %v579_v28, 5 }
  0x4b   : > { %10636 = vmatmul.msk.bf16.gmra.mxu1 %vm865_vm7, %v11924_v9  ;;  %v548_v9 = vrot.slane %v546_v61, 4  ;;  %v1393_v39 = vrot.slane %v1391_v32, 4  ;;  %v585_v50 = vrot.slane %v583_v37, 4 }
  0x4d   : > { %v586_v59 = vor.u32 %v585_v50, %v581_v49 }
  0x4f   : > { %v587_v62 = vrot.slane %v586_v59, 4 }
  0x50   : > { %10543 = vmatmul.msk.bf16.gmra.mxu0 %vm865_vm7, %v850_v35  ;;  %v524_v35 = vrot.slane %v522_v20, 4  ;;  %v11926_v20 = vld [vmem:[%s12265_s12 + $0x60] sm:$0xff] }
  0x52   : > { %v528_v44 = vor.u32 %v527_v36, %v524_v35  ;;  %v12467_v35 = vld [vmem:[%s12265_s12 + $0x74] sm:$0x1]  ;;  %v1278_v36 = vld [vmem:[%s12265_s12 + $0x6c] sm:$0xe] }
  0x53   : > { %v1394_v40 = vrot.slane %v12467_v35, 5 }
  0x54   : > { %10673 = vmatmul.msk.bf16.gmra.mxu2 %vm865_vm7, %v1496_v1  ;;  %v529_v47 = vrot.slane %v528_v44, 4  ;;  %v555_v1 = vshll.u32 %v334_v14, 16  ;;  %v552_v14 = vor.u32 %v551_v10, %v548_v9  ;;  %v592_v9 = vsel %vm12287_vm6, %v587_v62, %v591_v63 }
  0x55   : > { %v1395_v45 = vsel %vm12281_vm5, %v1393_v39, %v1394_v40  ;;  %v339_v39 = vld [vmem:[%s12265_s12 + $0x78] sm:$0xf]  ;;  %v12508_v40 = vld [vmem:[%s12265_s12 + $0x88] sm:$0xf] }
  0x56   : > { %v534_v54 = vsel %vm12287_vm6, %v529_v47, %v533_v38  ;;  %v557_v11 = vrot.slane %v555_v1, 5  ;;  %v553_v21 = vrot.slane %v552_v14, 4  ;;  %v10657_v38 = vrot.slane %v1278_v36, 9  ;;  %v11928_v36 = vld [vmem:[%s12265_s12 + $0x78] sm:$0xff] }
  0x57   : > { %v597_v1 = vshll.u32 %v337_v60, 16  ;;  %v605_v14 = vrot.slane %v603_v6, 5 }
  0x58   : > { %v562_v18 = vor.u32 %v561_v12, %v557_v11  ;;  %v558_v15 = vsel %vm12287_vm6, %v553_v21, %v557_v11  ;;  %v1392_v44 = vsel %vm12281_vm5, %v10657_v38, %v1391_v32  ;;  %v1400_v11 = vrot.slane %v1398_v2, 4 }
  0x59   : > { %10801 = vmatmul.msk.bf16.gmra.mxu3 %vm865_vm7, %v11943_v22  ;;  %v825_v41 = vunpack.c.l.b16 %v558_v15  ;;  %v1472_v47 = vunpack.c.l.b16 %v1392_v44  ;;  %v828_v21 = vunpack.c.l.b16 %v592_v9  ;;  %v613_v32 = vshll.u32 %v12467_v35, 16 }
  0x5a   : > { %v563_v22 = vrot.slane %v562_v18, 4  ;;  %v609_v18 = vrot.slane %v607_v55, 4  ;;  %v621_v44 = vshll.u32 %v339_v39, 16 }
  0x5b   : > { %10637 = vmatmul.msk.bf16.gmra.mxu1 %vm865_vm7, %v11925_v48  ;;  %v1473_v48 = vunpack.c.l.b16 %v1395_v45  ;;  %v615_v38 = vrot.slane %v613_v32, 5  ;;  %v1405_v45 = vrot.slane %v12508_v40, 5  ;;  %v655_v32 = vshrl.u32 %v12508_v40, 16 }
  0x5c   : > { %v568_v33 = vsel %vm12287_vm6, %v563_v22, %v567_v23  ;;  %v610_v27 = vor.u32 %v609_v18, %v605_v14  ;;  %v623_v42 = vrot.slane %v621_v44, 5  ;;  %v12539_v18 = vld [vmem:[%s12265_s12 + $0x94] sm:$0xf] }
  0x5d   : > { %v1499_v51 = vpack.c.b16 %v1473_v48, %v1472_v47  ;;  %v12514_v47 = vld [vmem:[%s12265_s12 + $0x8c] sm:$0x1]  ;;  %v1280_v48 = vld [vmem:[%s12265_s12 + $0x84] sm:$0xe] }
  0x5e   : > { %v611_v37 = vrot.slane %v610_v27, 4  ;;  %v10659_v50 = vrot.slane %v1280_v48, 9 }
  0x60   : > { %10544 = vmatmul.msk.bf16.gmra.mxu0 %vm865_vm7, %v851_v7  ;;  %v823_v7 = vunpack.c.l.b16 %v534_v54  ;;  %v11927_v54 = vld [vmem:[%s12265_s12 + $0x6c] sm:$0xff] }
  0x62   : > { %v853_v17 = vpack.c.b16 %v824_v8, %v823_v7  ;;  %v12487_v7 = vld [vmem:[%s12265_s12 + $0x80] sm:$0x1]  ;;  %v1279_v8 = vld [vmem:[%s12265_s12 + $0x78] sm:$0xe] }
  0x63   : > { %v10658_v10 = vrot.slane %v1279_v8, 9  ;;  %v1401_v12 = vrot.slane %v12487_v7, 5 }
  0x64   : > { %10674 = vmatmul.msk.bf16.gmra.mxu2 %vm865_vm7, %v1497_v43  ;;  %v826_v43 = vunpack.c.l.b16 %v568_v33  ;;  %v11946_v33 = vld [vmem:[%s12265_s12 + $0x84] sm:$0xff] }
  0x65   : > { %v1399_v3 = vsel %vm12281_vm5, %v10658_v10, %v1398_v2  ;;  %v637_v2 = vshll.u32 %v12487_v7, 16  ;;  %v341_v7 = vld [vmem:[%s12265_s12 + $0x84] sm:$0xf] }
  0x66   : > { %v854_v52 = vpack.c.b16 %v826_v43, %v825_v41  ;;  %v1474_v22 = vunpack.c.l.b16 %v1399_v3  ;;  %v616_v41 = vsel %vm12287_vm6, %v611_v37, %v615_v38  ;;  %v618_v43 = vshrl.u32 %v339_v39, 16 }
  0x67   : > { %v642_v3 = vshrl.u32 %v341_v7, 16 }
  0x68   : > { %v620_v59 = vrot.slane %v618_v43, 4 }
  0x69   : > { %10802 = vmatmul.msk.bf16.gmra.mxu3 %vm865_vm7, %v11944_v19  ;;  %v1402_v19 = vsel %vm12281_vm5, %v1400_v11, %v1401_v12  ;;  %v11929_v11 = vld [vmem:[%s12265_s12 + $0x84] sm:$0xff] }
  0x6a   : > { %v1475_v23 = vunpack.c.l.b16 %v1402_v19  ;;  %v624_v6 = vor.u32 %v623_v42, %v620_v59  ;;  %v1412_v19 = vrot.slane %v12539_v18, 5 }
  0x6b   : > { %10638 = vmatmul.msk.bf16.gmra.mxu1 %vm865_vm7, %v11926_v20 }
  0x6c   : > { %v1500_v25 = vpack.c.b16 %v1475_v23, %v1474_v22  ;;  %v625_v12 = vrot.slane %v624_v6, 4  ;;  %v645_v22 = vshll.u32 %v341_v7, 16  ;;  %v651_v23 = vshll.u32 %v12508_v40, 16 }
  0x6d   : > { %v679_v6 = vshrl.u32 %v12539_v18, 16 }
  0x6e   : > { %v647_v43 = vrot.slane %v645_v22, 5 }
  0x70   : > { %10545 = vmatmul.msk.bf16.gmra.mxu0 %vm865_vm7, %v852_v46  ;;  %v575_v46 = vrot.slane %v573_v34, 5 }
  0x72   : > { %v576_v57 = vor.u32 %v575_v46, %v572_v31  ;;  %v627_v31 = vshll.u32 %v340_v4, 16  ;;  %v631_v46 = vshrl.u32 %v340_v4, 16 }
  0x74   : > { %10675 = vmatmul.msk.bf16.gmra.mxu2 %vm865_vm7, %v1498_v16  ;;  %v577_v61 = vrot.slane %v576_v57, 4  ;;  %v596_v16 = vrot.slane %v594_v0, 4  ;;  %v633_v62 = vrot.slane %v631_v46, 4  ;;  %v657_v46 = vrot.slane %v655_v32, 4 }
  0x76   : > { %v582_v53 = vsel %vm12287_vm6, %v577_v61, %v581_v49  ;;  %v629_v61 = vrot.slane %v627_v31, 5  ;;  %v653_v31 = vrot.slane %v651_v23, 5  ;;  %v681_v23 = vrot.slane %v679_v6, 4 }
  0x77   : > { %v827_v20 = vunpack.c.l.b16 %v582_v53  ;;  %v11947_v53 = vld [vmem:[%s12265_s12 + $0x90] sm:$0xff] }
  0x78   : > { %v634_v55 = vor.u32 %v633_v62, %v629_v61 }
  0x79   : > { %10803 = vmatmul.msk.bf16.gmra.mxu3 %vm865_vm7, %v11945_v58  ;;  %v855_v15 = vpack.c.b16 %v828_v21, %v827_v20  ;;  %v830_v58 = vunpack.c.l.b16 %v616_v41  ;;  %v630_v20 = vsel %vm12287_vm6, %v625_v12, %v629_v61  ;;  %v644_v41 = vrot.slane %v642_v3, 4  ;;  %v1282_v12 = vld [vmem:[%s12265_s12 + $0x9c] sm:$0xe] }
  0x7a   : > { %v831_v37 = vunpack.c.l.b16 %v630_v20  ;;  %v10661_v3 = vrot.slane %v1282_v12, 9 }
  0x7b   : > { %10639 = vmatmul.msk.bf16.gmra.mxu1 %vm865_vm7, %v11927_v54  ;;  %v1406_v54 = vsel %vm12281_vm5, %v10659_v50, %v1405_v45  ;;  %v648_v50 = vor.u32 %v647_v43, %v644_v41 }
  0x7c   : > { %v1476_v63 = vunpack.c.l.b16 %v1406_v54  ;;  %v11930_v54 = vld [vmem:[%s12265_s12 + $0x90] sm:$0xff] }
  0x7d   : > { %v649_v61 = vrot.slane %v648_v50, 4 }
  0x80   : > { %10546 = vmatmul.msk.bf16.gmra.mxu0 %vm865_vm7, %v853_v17  ;;  %v599_v17 = vrot.slane %v597_v1, 5 }
  0x82   : > { %v600_v24 = vor.u32 %v599_v17, %v596_v16  ;;  %v635_v16 = vrot.slane %v634_v55, 4  ;;  %v639_v17 = vrot.slane %v637_v2, 5  ;;  %v675_v55 = vshll.u32 %v12539_v18, 16 }
  0x84   : > { %10676 = vmatmul.msk.bf16.gmra.mxu2 %vm865_vm7, %v1499_v51  ;;  %v601_v28 = vrot.slane %v600_v24, 4  ;;  %v1407_v51 = vrot.slane %v1405_v45, 4  ;;  %v640_v21 = vsel %vm12287_vm6, %v635_v16, %v639_v17  ;;  %v12548_v24 = vld [vmem:[%s12265_s12 + $0x98] sm:$0x1] }
  0x85   : > { %v832_v38 = vunpack.c.l.b16 %v640_v21  ;;  %v685_v43 = vshll.u32 %v12548_v24, 16 }
  0x86   : > { %v606_v35 = vsel %vm12287_vm6, %v601_v28, %v605_v14  ;;  %v1415_v28 = vrot.slane %v12548_v24, 5 }
  0x87   : > { %v829_v57 = vunpack.c.l.b16 %v606_v35 }
  0x89   : > { %10804 = vmatmul.msk.bf16.gmra.mxu3 %vm865_vm7, %v11946_v33  ;;  %v856_v4 = vpack.c.b16 %v830_v58, %v829_v57  ;;  %v658_v57 = vor.u32 %v657_v46, %v653_v31  ;;  %v661_v58 = vshll.u32 %v12514_v47, 16 }
  0x8b   : > { %10640 = vmatmul.msk.bf16.gmra.mxu1 %vm865_vm7, %v11928_v36 }
  0x90   : > { %10547 = vmatmul.msk.bf16.gmra.mxu0 %vm865_vm7, %v854_v52  ;;  %v1408_v52 = vrot.slane %v12514_v47, 5 }
  0x92   : > { %v1409_v60 = vsel %vm12281_vm5, %v1407_v51, %v1408_v52  ;;  %v11948_v51 = vld [vmem:[%s12265_s12 + $0x9c] sm:$0xff] }
  0x93   : > { %v1477_v0 = vunpack.c.l.b16 %v1409_v60  ;;  %v343_v60 = vld [vmem:[%s12265_s12 + $0x90] sm:$0xf] }
  0x94   : > { %10677 = vmatmul.msk.bf16.gmra.mxu2 %vm865_vm7, %v1500_v25  ;;  %v1281_v25 = vld [vmem:[%s12265_s12 + $0x90] sm:$0xe]  ;;  %v666_v47 = vshrl.u32 %v343_v60, 16 }
  0x95   : > { %v1501_v1 = vpack.c.b16 %v1477_v0, %v1476_v63  ;;  %v10660_v33 = vrot.slane %v1281_v25, 9  ;;  %v659_v63 = vrot.slane %v658_v57, 4  ;;  %v663_v0 = vrot.slane %v661_v58, 5  ;;  %v11931_v57 = vld [vmem:[%s12265_s12 + $0x9c] sm:$0xff] }
  0x96   : > { %v668_v18 = vrot.slane %v666_v47, 4  ;;  %v677_v25 = vrot.slane %v675_v55, 5  ;;  %v687_v58 = vrot.slane %v685_v43, 5  ;;  %v12631_v47 = vld [vmem:[%s12265_s12 + $0xac] sm:$0xf] }
  0x97   : > { %v1413_v39 = vsel %vm12281_vm5, %v10660_v33, %v1412_v19  ;;  %v664_v17 = vsel %vm12287_vm6, %v659_v63, %v663_v0  ;;  %v1426_v55 = vrot.slane %v12631_v47, 5 }
  0x98   : > { %v12527_v9 = vpop.f32.mrf.mxu1  ;;  %v1478_v44 = vunpack.c.l.b16 %v1413_v39 }
  0x99   : > { %10805 = vmatmul.msk.bf16.gmra.mxu3 %vm865_vm7, %v11947_v53  ;;  %v654_v53 = vsel %vm12287_vm6, %v649_v61, %v653_v31  ;;  %v11949_v31 = vld [vmem:[%s12265_s12 + $0xa8] sm:$0xff] }
  0x9b   : > { %10641 = vmatmul.msk.bf16.gmra.mxu1 %vm865_vm7, %v11929_v11  ;;  %v12590_v11 = vld [vmem:[%s12265_s12 + $0xa4] sm:$0x1] }
  0x9c   : > { %v12536_v14 = vpop.f32.mrf.mxu3  ;;  %v1422_v20 = vrot.slane %v12590_v11, 5 }
  0x9d   : > { %v933_v34 = vpop.f32.mrf.mxu0 }
  0x9e   : > { %v1414_v34 = vrot.slane %v1412_v19, 4 }
  0xa0   : > { %10548 = vmatmul.msk.bf16.gmra.mxu0 %vm865_vm7, %v855_v15  ;;  %v12554_v15 = vpop.f32.mrf.mxu1  ;;  %v1416_v35 = vsel %vm12281_vm5, %v1414_v34, %v1415_v28  ;;  %v833_v34 = vunpack.c.l.b16 %v654_v53  ;;  %v834_v28 = vunpack.c.l.b16 %v664_v17  ;;  %v12638_v53 = vld [vmem:[%s12265_s12 + $0xb0] sm:$0x1] }
  0xa1   : > { %v1479_v45 = vunpack.c.l.b16 %v1416_v35 }
  0xa3   : > { %v1502_v48 = vpack.c.b16 %v1479_v45, %v1478_v44  ;;  %v682_v44 = vor.u32 %v681_v23, %v677_v25  ;;  %v858_v45 = vpack.c.b16 %v834_v28, %v833_v34 }
  0xa4   : > { %10678 = vmatmul.msk.bf16.gmra.mxu2 %vm865_vm7, %v1501_v1  ;;  %v12563_v40 = vpop.f32.mrf.mxu3  ;;  %v669_v1 = vshll.u32 %v343_v60, 16  ;;  %v345_v60 = vld [vmem:[%s12265_s12 + $0x9c] sm:$0xf] }
  0xa5   : > { %v935_v49 = vpop.f32.mrf.mxu0  ;;  %v683_v24 = vrot.slane %v682_v44, 4  ;;  %v693_v6 = vshll.u32 %v345_v60, 16 }
  0xa6   : > { %v857_v49 = vpack.c.b16 %v832_v38, %v831_v37  ;;  %v671_v21 = vrot.slane %v669_v1, 5  ;;  %v690_v1 = vshrl.u32 %v345_v60, 16 }
  0xa7   : > { %v12530_v10 = vpop.f32.mrf.mxu2 }
  0xa8   : > { %v12570_v59 = vpop.f32.mrf.mxu1  ;;  %v672_v35 = vor.u32 %v671_v21, %v668_v18 }
  0xa9   : > { %10806 = vmatmul.msk.bf16.gmra.mxu3 %vm865_vm7, %v11948_v51 }
  0xaa   : > { %v673_v50 = vrot.slane %v672_v35, 4 }
  0xab   : > { %10642 = vmatmul.msk.bf16.gmra.mxu1 %vm865_vm7, %v11930_v54 }
  0xac   : > { %v12579_v62 = vpop.f32.mrf.mxu3  ;;  %v678_v63 = vsel %vm12287_vm6, %v673_v50, %v677_v25  ;;  %v11950_v50 = vld [vmem:[%s12265_s12 + $0xb4] sm:$0xff] }
  0xad   : > { %v12525_v8 = vpop.f32.mrf.mxu0  ;;  %v835_v21 = vunpack.c.l.b16 %v678_v63 }
  0xaf   : > { %v12557_v36 = vpop.f32.mrf.mxu2 }
  0xb0   : > { %10549 = vmatmul.msk.bf16.gmra.mxu0 %vm865_vm7, %v856_v4  ;;  %v12582_v4 = vld [vmem:[%s12265_s12 + $0xa0] sm:$0xf]  ;;  %v12597_v7 = vpop.f32.mrf.mxu1 }
  0xb1   : > { %v1419_v2 = vrot.slane %v12582_v4, 5  ;;  %v703_v0 = vshrl.u32 %v12582_v4, 16 }
  0xb3   : > { %v1421_v19 = vrot.slane %v1419_v2, 4  ;;  %v1420_v32 = vsel %vm12281_vm5, %v10661_v3, %v1419_v2  ;;  %v699_v2 = vshll.u32 %v12582_v4, 16  ;;  %v705_v25 = vrot.slane %v703_v0, 4  ;;  %v347_v0 = vld [vmem:[%s12265_s12 + $0xa8] sm:$0xf] }
  0xb4   : > { %10679 = vmatmul.msk.bf16.gmra.mxu2 %vm865_vm7, %v1502_v48  ;;  %v12606_v37 = vpop.f32.mrf.mxu3  ;;  %v1480_v38 = vunpack.c.l.b16 %v1420_v32  ;;  %v695_v4 = vrot.slane %v693_v6, 5 }
  0xb5   : > { %v12551_v27 = vpop.f32.mrf.mxu0  ;;  %v1423_v33 = vsel %vm12281_vm5, %v1421_v19, %v1422_v20  ;;  %v1428_v19 = vrot.slane %v1426_v55, 4  ;;  %v1429_v20 = vrot.slane %v12638_v53, 5 }
  0xb6   : > { %v1481_v39 = vunpack.c.l.b16 %v1423_v33  ;;  %v692_v33 = vrot.slane %v690_v1, 4  ;;  %v12677_v1 = vld [vmem:[%s12265_s12 + $0xb8] sm:$0xf] }
  0xb7   : > { %v12573_v42 = vpop.f32.mrf.mxu2  ;;  %v1430_v28 = vsel %vm12281_vm5, %v1428_v19, %v1429_v20  ;;  %v1284_v19 = vld [vmem:[%s12265_s12 + $0xb4] sm:$0xe] }
  0xb8   : > { %v1503_v41 = vpack.c.b16 %v1481_v39, %v1480_v38  ;;  %v12611_v48 = vpop.f32.mrf.mxu1  ;;  %v701_v39 = vrot.slane %v699_v2, 5 }
  0xb9   : > { %10807 = vmatmul.msk.bf16.gmra.mxu3 %vm865_vm7, %v11949_v31 }
  0xbb   : > { %10643 = vmatmul.msk.bf16.gmra.mxu1 %vm865_vm7, %v11931_v57 }
  0xbc   : > { %v12622_v61 = vpop.f32.mrf.mxu3 }
  0xbd   : > { %v12567_v52 = vpop.f32.mrf.mxu0 }
  0xbf   : > { %v12600_v22 = vpop.f32.mrf.mxu2 }
  0xc0   : > { %10550 = vmatmul.msk.bf16.gmra.mxu0 %vm865_vm7, %v857_v49  ;;  %v12641_v17 = vpop.f32.mrf.mxu1 }
  0xc4   : > { %10680 = vmatmul.msk.bf16.gmra.mxu2 %vm865_vm7, %v1503_v41  ;;  %v12652_v35 = vpop.f32.mrf.mxu3  ;;  %v1483_v41 = vunpack.c.l.b16 %v1430_v28 }
  0xc5   : > { %v12593_v16 = vpop.f32.mrf.mxu0 }
  0xc7   : > { %v12615_v51 = vpop.f32.mrf.mxu2 }
  0xc8   : > { %v12660_v57 = vpop.f32.mrf.mxu1 }
  0xc9   : > { %10808 = vmatmul.msk.bf16.gmra.mxu3 %vm865_vm7, %v11950_v50 }
  0xcd   : > { %v948_v46 = vpop.f32.mrf.mxu0 }
  0xce   : > { %v1195_v49 = vadd.f32 %v12527_v9, %v948_v46  ;;  %v709_v46 = vshll.u32 %v12590_v11, 16 }
  0xcf   : > { %v12645_v32 = vpop.f32.mrf.mxu2 }
  0xd0   : > { %v1670_v54 = vadd.f32 %v12530_v10, %v1195_v49  ;;  %10551 = vmatmul.msk.bf16.gmra.mxu0 %vm865_vm7, %v858_v45  ;;  %v688_v10 = vsel %vm12287_vm6, %v683_v24, %v687_v58  ;;  %v696_v45 = vor.u32 %v695_v4, %v692_v33  ;;  %v706_v49 = vor.u32 %v705_v25, %v701_v39  ;;  %v11932_v24 = vld [vmem:[%s12265_s12 + $0xa8] sm:$0xff] }
  0xd1   : > { %v836_v23 = vunpack.c.l.b16 %v688_v10  ;;  %v711_v11 = vrot.slane %v709_v46, 5  ;;  %10644 = vmatmul.msk.bf16.gmra.mxu1 %vm865_vm7, %v11932_v24  ;;  %v12671_v10 = vpop.f32.mrf.mxu3  ;;  %v11951_v24 = vld [vmem:[%s12265_s12 + $0xc0] sm:$0xff] }
  0xd2   : > { %v12625_v9 = vadd.f32 %v12536_v14, %v1670_v54  ;;  %v1283_v14 = vld [vmem:[%s12265_s12 + $0xa8] sm:$0xe]  ;;  %v697_v54 = vrot.slane %v696_v45, 4  ;;  %v707_v63 = vrot.slane %v706_v49, 4 }
  0xd3   : > { %v10662_v3 = vrot.slane %v1283_v14, 9  ;;  %v859_v31 = vpack.c.b16 %v836_v23, %v835_v21  ;;  %v727_v14 = vshrl.u32 %v12631_v47, 16  ;;  %v10663_v21 = vrot.slane %v1284_v19, 9 }
  0xd4   : > { %v702_v6 = vsel %vm12287_vm6, %v697_v54, %v701_v39  ;;  %v712_v2 = vsel %vm12287_vm6, %v707_v63, %v711_v11 }
  0xd5   : > { %v950_v12 = vpop.f32.mrf.mxu0  ;;  %v1427_v34 = vsel %vm12281_vm5, %v10662_v3, %v1426_v55  ;;  %v714_v55 = vshrl.u32 %v347_v0, 16  ;;  %v12686_v3 = vld [vmem:[%s12265_s12 + $0xbc] sm:$0x1]  ;;  %v837_v4 = vunpack.c.l.b16 %v702_v6  ;;  %v838_v28 = vunpack.c.l.b16 %v712_v2  ;;  %v349_v6 = vld [vmem:[%s12265_s12 + $0xb4] sm:$0xf] }
  0xd6   : > { %v1197_v18 = vadd.f32 %v12554_v15, %v950_v12  ;;  %v1482_v15 = vunpack.c.l.b16 %v1427_v34  ;;  %v717_v12 = vshll.u32 %v347_v0, 16  ;;  %v1436_v25 = vrot.slane %v12686_v3, 5 }
  0xd7   : > { %v741_v19 = vshll.u32 %v349_v6, 16 }
  0xd8   : > { %v1671_v38 = vadd.f32 %v12557_v36, %v1197_v18  ;;  %v1504_v44 = vpack.c.b16 %v1483_v41, %v1482_v15  ;;  %v12690_v18 = vpop.f32.mrf.mxu1  ;;  %v719_v41 = vrot.slane %v717_v12, 5  ;;  %v738_v12 = vshrl.u32 %v349_v6, 16 }
  0xd9   : > { %10809 = vmatmul.msk.bf16.gmra.mxu3 %vm865_vm7, %v11951_v24 }
  0xda   : > { %v12655_v43 = vadd.f32 %v12563_v40, %v1671_v38  ;;  %10681 = vmatmul.msk.bf16.gmra.mxu2 %vm865_vm7, %v1504_v44  ;;  %v12664_v40 = vpop.f32.mrf.mxu2  ;;  %v716_v38 = vrot.slane %v714_v55, 4  ;;  %v12701_v44 = vpop.f32.mrf.mxu3 }
  0xdd   : > { %v953_v36 = vpop.f32.mrf.mxu0 }
  0xde   : > { %v1200_v58 = vadd.f32 %v12570_v59, %v953_v36  ;;  %v860_v36 = vpack.c.b16 %v838_v28, %v837_v4 }
  0xe0   : > { %v1672_v60 = vadd.f32 %v12573_v42, %v1200_v58  ;;  %10552 = vmatmul.msk.bf16.gmra.mxu0 %vm865_vm7, %v859_v31  ;;  %v1433_v42 = vrot.slane %v12677_v1, 5  ;;  %v720_v58 = vor.u32 %v719_v41, %v716_v38  ;;  %v12709_v11 = vpop.f32.mrf.mxu1 }
  0xe2   : > { %v12674_v59 = vadd.f32 %v12579_v62, %v1672_v60  ;;  %v723_v62 = vshll.u32 %v12631_v47, 16  ;;  %v1435_v23 = vrot.slane %v1433_v42, 4  ;;  %v12694_v34 = vpop.f32.mrf.mxu2  ;;  %v1434_v39 = vsel %vm12281_vm5, %v10663_v21, %v1433_v42 }
  0xe3   : > { %v1484_v45 = vunpack.c.l.b16 %v1434_v39  ;;  %v721_v42 = vrot.slane %v720_v58, 4 }
  0xe4   : > { %v1437_v47 = vsel %vm12281_vm5, %v1435_v23, %v1436_v25  ;;  %v725_v46 = vrot.slane %v723_v62, 5  ;;  %v747_v62 = vshll.u32 %v12677_v1, 16  ;;  %v12731_v25 = vld [vmem:[%s12265_s12 + $0xc8] sm:$0x1] }
  0xe5   : > { %v955_v20 = vpop.f32.mrf.mxu0  ;;  %v1485_v31 = vunpack.c.l.b16 %v1437_v47  ;;  %v1443_v47 = vrot.slane %v12731_v25, 5 }
  0xe6   : > { %v1202_v33 = vadd.f32 %v12597_v7, %v955_v20  ;;  %v729_v7 = vrot.slane %v727_v14, 4  ;;  %v352_v20 = vld [vmem:[%s12265_s12 + $0xc4] sm:$0xf]  ;;  %v726_v23 = vsel %vm12287_vm6, %v721_v42, %v725_v46 }
  0xe7   : > { %v1505_v50 = vpack.c.b16 %v1485_v31, %v1484_v45  ;;  %v1440_v21 = vrot.slane %v352_v20, 5  ;;  %v749_v45 = vrot.slane %v747_v62, 5 }
  0xe8   : > { %v1673_v15 = vadd.f32 %v12600_v22, %v1202_v33  ;;  %v733_v22 = vshll.u32 %v12638_v53, 16  ;;  %v730_v60 = vor.u32 %v729_v7, %v725_v46  ;;  %v12720_v53 = vpop.f32.mrf.mxu3  ;;  %v1285_v33 = vld [vmem:[%s12265_s12 + $0xc0] sm:$0xe]  ;;  %v12738_v28 = vpop.f32.mrf.mxu1 }
  0xe9   : > { %v10664_v38 = vrot.slane %v1285_v33, 9  ;;  %v1442_v39 = vrot.slane %v1440_v21, 4 }
  0xea   : > { %v12704_v49 = vadd.f32 %v12606_v37, %v1673_v15  ;;  %10682 = vmatmul.msk.bf16.gmra.mxu2 %vm865_vm7, %v1505_v50  ;;  %v12713_v0 = vpop.f32.mrf.mxu2  ;;  %v11933_v37 = vld [vmem:[%s12265_s12 + $0xb4] sm:$0xff]  ;;  %v735_v2 = vrot.slane %v733_v22, 5  ;;  %v731_v14 = vrot.slane %v730_v60, 4  ;;  %v740_v15 = vrot.slane %v738_v12, 4 }
  0xeb   : > { %10645 = vmatmul.msk.bf16.gmra.mxu1 %vm865_vm7, %v11933_v37  ;;  %v1441_v7 = vsel %vm12281_vm5, %v10664_v38, %v1440_v21  ;;  %v1444_v46 = vsel %vm12281_vm5, %v1442_v39, %v1443_v47  ;;  %v839_v50 = vunpack.c.l.b16 %v726_v23  ;;  %v757_v37 = vshll.u32 %v12686_v3, 16  ;;  %v351_v23 = vld [vmem:[%s12265_s12 + $0xc0] sm:$0xf] }
  0xec   : > { %v1486_v24 = vunpack.c.l.b16 %v1441_v7  ;;  %v762_v39 = vshrl.u32 %v351_v23, 16  ;;  %v765_v47 = vshll.u32 %v351_v23, 16  ;;  %v12789_v23 = vld [vmem:[%s12265_s12 + $0xd0] sm:$0xf] }
  0xed   : > { %v958_v54 = vpop.f32.mrf.mxu0  ;;  %v759_v21 = vrot.slane %v757_v37, 5 }
  0xee   : > { %v1205_v63 = vadd.f32 %v12611_v48, %v958_v54  ;;  %v1487_v54 = vunpack.c.l.b16 %v1444_v46 }
  0xf0   : > { %v1674_v55 = vadd.f32 %v12615_v51, %v1205_v63  ;;  %10553 = vmatmul.msk.bf16.gmra.mxu0 %vm865_vm7, %v860_v36  ;;  %v751_v51 = vshrl.u32 %v12677_v1, 16  ;;  %v743_v1 = vrot.slane %v741_v19, 5  ;;  %v12747_v58 = vpop.f32.mrf.mxu3  ;;  %v1506_v22 = vpack.c.b16 %v1487_v54, %v1486_v24  ;;  %v11934_v19 = vld [vmem:[%s12265_s12 + $0xc0] sm:$0xff] }
  0xf1   : > { %15851 = vst [vmem:[#allocation3_spill] sm:$0xff] %v12747_v58 }
  0xf2   : > { %v12723_v48 = vadd.f32 %v12622_v61, %v1674_v55  ;;  %v736_v61 = vsel %vm12287_vm6, %v731_v14, %v735_v2  ;;  %v12741_v41 = vpop.f32.mrf.mxu2  ;;  %v753_v31 = vrot.slane %v751_v51, 4  ;;  %v744_v60 = vor.u32 %v743_v1, %v740_v15  ;;  %v11952_v55 = vld [vmem:[%s12265_s12 + $0xcc] sm:$0xff]  ;;  %v12752_v2 = vpop.f32.mrf.mxu1 }
  0xf3   : > { %v840_v36 = vunpack.c.l.b16 %v736_v61  ;;  %10810 = vmatmul.msk.bf16.gmra.mxu3 %vm865_vm7, %v11952_v55  ;;  %v771_v15 = vshll.u32 %v352_v20, 16 }
  0xf4   : > { %v754_v63 = vor.u32 %v753_v31, %v749_v45  ;;  %v745_v62 = vrot.slane %v744_v60, 4 }
  0xf5   : > { %v12734_v4 = vpop.f32.mrf.mxu0  ;;  %v861_v6 = vpack.c.b16 %v840_v36, %v839_v50  ;;  %v767_v36 = vrot.slane %v765_v47, 5  ;;  %v773_v24 = vrot.slane %v771_v15, 5  ;;  %v795_v47 = vshll.u32 %v12789_v23, 16 }
  0xf6   : > { %v755_v51 = vrot.slane %v754_v63, 4 }
  0xf8   : > { %v12763_v33 = vpop.f32.mrf.mxu3  ;;  %v760_v38 = vsel %vm12287_vm6, %v755_v51, %v759_v21 }
  0xf9   : > { %v842_v46 = vunpack.c.l.b16 %v760_v38 }
  0xfa   : > { %10683 = vmatmul.msk.bf16.gmra.mxu2 %vm865_vm7, %v1506_v22  ;;  %v12756_v12 = vpop.f32.mrf.mxu2  ;;  %v12774_v31 = vpop.f32.mrf.mxu1 }
  0xfb   : > { %10646 = vmatmul.msk.bf16.gmra.mxu1 %vm865_vm7, %v11934_v19  ;;  %15852 = vst [vmem:[#allocation4_spill] sm:$0xff] %v12774_v31  ;;  %v11965_v31 = vld [vmem:[%s12265_s12 + $0x9c] sm:$0xff] }
  0xfd   : > { %v963_v42 = vpop.f32.mrf.mxu0 }
  0xfe   : > { %v1210_v14 = vadd.f32 %v12660_v57, %v963_v42  ;;  %v750_v57 = vsel %vm12287_vm6, %v745_v62, %v749_v45 }
  0xff   : > { %v841_v7 = vunpack.c.l.b16 %v750_v57 }
 0x100   : > { %v1676_v3 = vadd.f32 %v12664_v40, %v1210_v14  ;;  %10554 = vmatmul.msk.bf16.gmra.mxu0 %vm865_vm7, %v861_v6  ;;  %v775_v40 = vshrl.u32 %v352_v20, 16  ;;  %v12778_v45 = vpop.f32.mrf.mxu3  ;;  %v781_v20 = vshll.u32 %v12731_v25, 16 }
 0x101   : > { %15854 = vst [vmem:[#allocation6_spill] sm:$0xff] %v12778_v45  ;;  %v862_v22 = vpack.c.b16 %v842_v46, %v841_v7 }
 0x102   : > { %v12766_v61 = vadd.f32 %v12671_v10, %v1676_v3  ;;  %v12776_v50 = vpop.f32.mrf.mxu2  ;;  %v764_v10 = vrot.slane %v762_v39, 4  ;;  %v777_v54 = vrot.slane %v775_v40, 4  ;;  %v1224_v55 = vpop.f32.mrf.mxu1  ;;  %v783_v62 = vrot.slane %v781_v20, 5  ;;  %v353_v3 = vld [vmem:[%s12265_s12 + $0xcc] sm:$0xf] }
 0x103   : > { %15853 = vst [vmem:[#allocation5_spill] sm:$0xff] %v12776_v50  ;;  %v786_v38 = vshrl.u32 %v353_v3, 16  ;;  %v789_v39 = vshll.u32 %v353_v3, 16 }
 0x104   : > { %v768_v60 = vor.u32 %v767_v36, %v764_v10  ;;  %v778_v63 = vor.u32 %v777_v54, %v773_v24  ;;  %v797_v10 = vrot.slane %v795_v47, 5 }
 0x105   : > { %v12772_v1 = vpop.f32.mrf.mxu0  ;;  %v788_v7 = vrot.slane %v786_v38, 4  ;;  %v791_v46 = vrot.slane %v789_v39, 5 }
 0x106   : > { %v769_v14 = vrot.slane %v768_v60, 4  ;;  %v779_v19 = vrot.slane %v778_v63, 4 }
 0x107   : > { %v792_v20 = vor.u32 %v791_v46, %v788_v7 }
 0x108   : > { %v1940_v25 = vpop.f32.mrf.mxu3 }
 0x10a   : > { %v1619_v51 = vpop.f32.mrf.mxu2  ;;  %v12799_v54 = vpop.f32.mrf.mxu1 }
 0x10b   : > { %15855 = vst [vmem:[#allocation7_spill] sm:$0xff] %v12799_v54 }
 0x10d   : > { %v968_v37 = vpop.f32.mrf.mxu0 }
 0x10e   : > { %v1215_v6 = vadd.f32 %v12709_v11, %v968_v37  ;;  %v774_v11 = vsel %vm12287_vm6, %v769_v14, %v773_v24  ;;  %v12802_v24 = vld [vmem:[%s12265_s12 + $0xd4] sm:$0x1] }
 0x10f   : > { %v843_v15 = vunpack.c.l.b16 %v774_v11 }
 0x110   : > { %v1678_v42 = vadd.f32 %v12713_v0, %v1215_v6  ;;  %10555 = vmatmul.msk.bf16.gmra.mxu0 %vm865_vm7, %v862_v22  ;;  %v784_v0 = vsel %vm12287_vm6, %v779_v19, %v783_v62  ;;  %v805_v6 = vshll.u32 %v12802_v24, 16  ;;  %v793_v62 = vrot.slane %v792_v20, 4 }
 0x111   : > { %v844_v40 = vunpack.c.l.b16 %v784_v0 }
 0x112   : > { %v12785_v21 = vadd.f32 %v12720_v53, %v1678_v42  ;;  %v799_v53 = vshrl.u32 %v12789_v23, 16  ;;  %v12804_v22 = vpop.f32.mrf.mxu2  ;;  %v12807_v42 = vpop.f32.mrf.mxu3  ;;  %v807_v11 = vrot.slane %v805_v6, 5  ;;  %v798_v47 = vsel %vm12287_vm6, %v793_v62, %v797_v10  ;;  %v11918_v62 = vld [vmem:[%s12265_s12] sm:$0xff] }
 0x113   : > { %15856 = vst [vmem:[#allocation8_spill] sm:$0xff] %v12804_v22  ;;  %v863_v60 = vpack.c.b16 %v844_v40, %v843_v15  ;;  %v1229_v38 = vpop.f32.mrf.mxu1 }
 0x114   : > { %v801_v36 = vrot.slane %v799_v53, 4  ;;  %15857 = vst [vmem:[#allocation9_spill] sm:$0xff] %v12807_v42 }
 0x115   : > { %v12795_v57 = vpop.f32.mrf.mxu0 }
 0x116   : > { %v802_v37 = vor.u32 %v801_v36, %v797_v10 }
 0x118   : > { %v803_v3 = vrot.slane %v802_v37, 4 }
 0x11a   : > { %v808_v53 = vsel %vm12287_vm6, %v803_v3, %v807_v11  ;;  %v1945_v15 = vpop.f32.mrf.mxu3 }
 0x11b   : > { %v846_v40 = vunpack.c.l.b16 %v808_v53  ;;  %v12821_v36 = vpop.f32.mrf.mxu1 }
 0x11c   : > { %15860 = vst [vmem:[#allocation12_spill] sm:$0xff] %v12821_v36 }
 0x11d   : > { %v973_v63 = vpop.f32.mrf.mxu0 }
 0x11e   : > { %v1220_v14 = vadd.f32 %v12752_v2, %v973_v63  ;;  %v1624_v2 = vpop.f32.mrf.mxu2 }
 0x120   : > { %v1680_v19 = vadd.f32 %v12756_v12, %v1220_v14  ;;  %10556 = vmatmul.msk.bf16.gmra.mxu0 %vm865_vm7, %v863_v60  ;;  %v845_v12 = vunpack.c.l.b16 %v798_v47 }
 0x122   : > { %v12813_v0 = vadd.f32 %v12763_v33, %v1680_v19  ;;  %v864_v7 = vpack.c.b16 %v846_v40, %v845_v12  ;;  %v12826_v20 = vpop.f32.mrf.mxu3  ;;  %v1269_v40 = vld [vmem:[%s12265_s12] sm:$0xe] }
 0x123   : > { %15862 = vst [vmem:[#allocation14_spill] sm:$0xff] %v12826_v20  ;;  %v1234_v6 = vpop.f32.mrf.mxu1 }
 0x124   : > { %15858 = vst [vmem:[#allocation10_spill] sm:$0xff] %v12813_v0 }
 0x125   : > { %v12815_v39 = vpop.f32.mrf.mxu0 }
 0x126   : > { %15859 = vst [vmem:[#allocation11_spill] sm:$0xff] %v12815_v39  ;;  %v12823_v60 = vpop.f32.mrf.mxu2 }
 0x127   : > { %15861 = vst [vmem:[#allocation13_spill] sm:$0xff] %v12823_v60 }
 0x12a   : > { %v1950_v19 = vpop.f32.mrf.mxu3 }
 0x12d   : > { %v978_v46 = vpop.f32.mrf.mxu0 }
 0x12e   : > { %v1225_v33 = vadd.f32 %v1224_v55, %v978_v46  ;;  %v1629_v14 = vpop.f32.mrf.mxu2  ;;  %v1455_v46 = vunpack.c.l.b16 %v12293_v30 }
 0x130   : > { %v1682_v63 = vadd.f32 %v1619_v51, %v1225_v33  ;;  %10557 = vmatmul.msk.bf16.gmra.mxu0 %vm865_vm7, %v864_v7  ;;  %v12834_v51 = vpop.f32.mrf.mxu1  ;;  %v10648_v7 = vrot.slane %v1269_v40, 9 }
 0x131   : > { %15865 = vst [vmem:[#allocation17_spill] sm:$0xff] %v12834_v51 }
 0x132   : > { %v12828_v10 = vadd.f32 %v1940_v25, %v1682_v63  ;;  %v12843_v12 = vpop.f32.mrf.mxu3 }
 0x133   : > { %15869 = vst [vmem:[#allocation21_spill] sm:$0xff] %v12843_v12 }
 0x134   : > { %15863 = vst [vmem:[#allocation15_spill] sm:$0xff] %v12828_v10 }
 0x135   : > { %v12830_v37 = vpop.f32.mrf.mxu0 }
 0x136   : > { %15864 = vst [vmem:[#allocation16_spill] sm:$0xff] %v12830_v37  ;;  %v12839_v25 = vpop.f32.mrf.mxu2  ;;  %v10845_v37 = vld [vmem:[%s12265_s12 + $0x90] sm:$0xf] }
 0x137   : > { %15867 = vst [vmem:[#allocation19_spill] sm:$0xff] %v12839_v25  ;;  %v2343_v39 = vshll.u32 %v10845_v37, 16 }
 0x13d   : > { %v983_v3 = vpop.f32.mrf.mxu0 }
 0x13e   : > { %v1230_v11 = vadd.f32 %v1229_v38, %v983_v3  ;;  %v1239_v38 = vpop.f32.mrf.mxu1  ;;  %v1634_v63 = vpop.f32.mrf.mxu2 }
 0x140   : > { %v1684_v55 = vadd.f32 %v1624_v2, %v1230_v11  ;;  %10630 = vmatmul.msk.bf16.vlgmr.msrb.gmra.mxu0 %vm865_vm7, %v11918_v62  ;;  %v1329_v2 = vsel %vm12281_vm5, %v10648_v7, %v1328_v13  ;;  %v1955_v11 = vpop.f32.mrf.mxu3  ;;  %v11920_v13 = vld [vmem:[%s12265_s12 + $0x18] sm:$0xff] }
 0x141   : > { %1893 = vmatpush.bf16.msrb.mxu0 %v12317_v56  ;;  %v11919_v56 = vld [vmem:[%s12265_s12 + $0xc] sm:$0xff] }
 0x142   : > { %v12837_v47 = vadd.f32 %v1945_v15, %v1684_v55  ;;  %v1454_v15 = vunpack.c.l.b16 %v1329_v2 }
 0x144   : > { %15866 = vst [vmem:[#allocation18_spill] sm:$0xff] %v12837_v47  ;;  %v1490_v3 = vpack.c.b16 %v1455_v46, %v1454_v15  ;;  %v10976_v15 = vld [vmem:[%s15837_s1 + $0xc] sm:$0x3]  ;;  %v11955_v47 = vld [vmem:[%s12265_s12 + $0x24] sm:$0xff] }
 0x145   : > { %v12841_v53 = vpop.f32.mrf.mxu0 }
 0x146   : > { %15868 = vst [vmem:[#allocation20_spill] sm:$0xff] %v12841_v53  ;;  %v12857_v12 = vpop.f32.mrf.mxu1  ;;  %v12859_v5 = vpop.f32.mrf.mxu2 }
 0x147   : > { %15872 = vst [vmem:[#allocation24_spill] sm:$0xff] %v12857_v12 }
 0x148   : > { %15873 = vst [vmem:[#allocation25_spill] sm:$0xff] %v12859_v5  ;;  %v12861_v25 = vpop.f32.mrf.mxu3 }
 0x149   : > { %15874 = vst [vmem:[#allocation26_spill] sm:$0xff] %v12861_v25  ;;  %v1270_v25 = vld [vmem:[%s12265_s12 + $0xc] sm:$0xe] }
 0x14a   : > { %v10649_v5 = vrot.slane %v1270_v25, 9 }
 0x14d   : > { %v988_v33 = vpop.f32.mrf.mxu0 }
 0x14e   : > { %v1235_v62 = vadd.f32 %v1234_v6, %v988_v33  ;;  %v1244_v51 = vpop.f32.mrf.mxu1  ;;  %v3385_v33 = vsel %vm920_vm0, %v10976_v15, 0 }
 0x14f   : > { %3394 = vmatpush.bf16.msrb.mxu2 %v3385_v33 }
 0x150   : > { %v1686_v55 = vadd.f32 %v1629_v14, %v1235_v62  ;;  %10631 = vmatmul.msk.bf16.gmra.mxu0 %vm865_vm7, %v11919_v56  ;;  %v1639_v14 = vpop.f32.mrf.mxu2 }
 0x152   : > { %v12853_v40 = vadd.f32 %v1950_v19, %v1686_v55  ;;  %v1960_v19 = vpop.f32.mrf.mxu3 }
 0x154   : > { %15870 = vst [vmem:[#allocation22_spill] sm:$0xff] %v12853_v40 }
 0x155   : > { %v12855_v30 = vpop.f32.mrf.mxu0 }
 0x156   : > { %15871 = vst [vmem:[#allocation23_spill] sm:$0xff] %v12855_v30 }
 0x158   : > { %v12882_v55 = vpop.f32.mrf.mxu2 }
 0x159   : > { %15878 = vst [vmem:[#allocation30_spill] sm:$0xff] %v12882_v55 }
 0x15d   : > { %v993_v7 = vpop.f32.mrf.mxu0 }
 0x15e   : > { %v1240_v2 = vadd.f32 %v1239_v38, %v993_v7  ;;  %v11121_v38 = vld [vmem:[%s15837_s1 + $0xe] sm:$0x3] }
 0x15f   : > { %v4119_v62 = vsel %vm920_vm0, %v11121_v38, 0  ;;  %v12125_v38 = vld [vmem:[%s12265_s12 + $0x14] sm:$0x1] }
 0x160   : > { %v1688_v6 = vadd.f32 %v1634_v63, %v1240_v2  ;;  %10632 = vmatmul.msk.bf16.gmra.mxu0 %vm865_vm7, %v11920_v13  ;;  %v12876_v63 = vpop.f32.mrf.mxu1  ;;  %4128 = vmatpush.bf16.msrb.mxu3 %v4119_v62  ;;  %v12885_v2 = vpop.f32.mrf.mxu3  ;;  %v1338_v62 = vrot.slane %v12125_v38, 5 }
 0x161   : > { %15877 = vst [vmem:[#allocation29_spill] sm:$0xff] %v12876_v63  ;;  %v1644_v12 = vpop.f32.mrf.mxu2 }
 0x162   : > { %v12865_v46 = vadd.f32 %v1955_v11, %v1688_v6  ;;  %v10921_v11 = vld [vmem:[%s15837_s1 + $0xa] sm:$0x3]  ;;  %15879 = vst [vmem:[#allocation31_spill] sm:$0xff] %v12885_v2  ;;  %v12124_v6 = vld [vmem:[%s12265_s12 + $0x10] sm:$0xf] }
 0x163   : > { %v3064_v13 = vsel %vm920_vm0, %v10921_v11, 0  ;;  %v1335_v15 = vrot.slane %v12124_v6, 5 }
 0x164   : > { %15875 = vst [vmem:[#allocation27_spill] sm:$0xff] %v12865_v46  ;;  %3073 = vmatpush.bf16.msrb.mxu1 %v3064_v13 }
 0x165   : > { %v12867_v56 = vpop.f32.mrf.mxu0  ;;  %v1337_v46 = vrot.slane %v1335_v15, 4  ;;  %v1336_v6 = vsel %vm12281_vm5, %v10649_v5, %v1335_v15  ;;  %v10866_v5 = vld [vmem:[%s15837_s1 + $0x8] sm:$0x3] }
 0x166   : > { %15876 = vst [vmem:[#allocation28_spill] sm:$0xff] %v12867_v56 }
 0x168   : > { %v1249_v11 = vpop.f32.mrf.mxu1 }
 0x16d   : > { %v998_v7 = vpop.f32.mrf.mxu0 }
 0x16e   : > { %v1245_v33 = vadd.f32 %v1244_v51, %v998_v7  ;;  %v1339_v51 = vsel %vm12281_vm5, %v1337_v46, %v1338_v62  ;;  %v12127_v46 = vld [vmem:[%s12265_s12 + $0x20] sm:$0x1] }
 0x16f   : > { %v1457_v7 = vunpack.c.l.b16 %v1339_v51  ;;  %v1345_v15 = vrot.slane %v12127_v46, 5 }
 0x170   : > { %v1690_v63 = vadd.f32 %v1639_v14, %v1245_v33  ;;  %10667 = vmatmul.msk.bf16.vlgmr.msra.gmra.mxu0 %vm865_vm7, %v1490_v3  ;;  %v1965_v3 = vpop.f32.mrf.mxu3  ;;  %v1456_v14 = vunpack.c.l.b16 %v1336_v6  ;;  %v12899_v38 = vpop.f32.mrf.mxu1 }
 0x171   : > { %15882 = vst [vmem:[#allocation34_spill] sm:$0xff] %v12899_v38  ;;  %v11954_v38 = vld [vmem:[%s12265_s12 + $0x18] sm:$0xff] }
 0x172   : > { %v12891_v55 = vadd.f32 %v1960_v19, %v1690_v63  ;;  %v1491_v33 = vpack.c.b16 %v1457_v7, %v1456_v14  ;;  %v12126_v19 = vld [vmem:[%s12265_s12 + $0x1c] sm:$0xf]  ;;  %v2618_v14 = vsel %vm920_vm0, %v10866_v5, 0 }
 0x173   : > { %v1342_v63 = vrot.slane %v12126_v19, 5  ;;  %2627 = vmatpush.bf16.msra.mxu0 %v2618_v14 }
 0x174   : > { %15880 = vst [vmem:[#allocation32_spill] sm:$0xff] %v12891_v55  ;;  %v1271_v55 = vld [vmem:[%s12265_s12 + $0x18] sm:$0xe] }
 0x175   : > { %v12893_v13 = vpop.f32.mrf.mxu0  ;;  %v10650_v6 = vrot.slane %v1271_v55, 9  ;;  %v1344_v51 = vrot.slane %v1342_v63, 4 }
 0x176   : > { %15881 = vst [vmem:[#allocation33_spill] sm:$0xff] %v12893_v13  ;;  %v12903_v13 = vpop.f32.mrf.mxu2 }
 0x177   : > { %15883 = vst [vmem:[#allocation35_spill] sm:$0xff] %v12903_v13 }
 0x178   : > { %v12910_v62 = vpop.f32.mrf.mxu3 }
 0x179   : > { %15884 = vst [vmem:[#allocation36_spill] sm:$0xff] %v12910_v62 }
 0x17d   : > { %v1003_v25 = vpop.f32.mrf.mxu0 }
 0x17e   : > { %v1250_v2 = vadd.f32 %v1249_v11, %v1003_v25  ;;  %v1649_v46 = vpop.f32.mrf.mxu2 }
 0x180   : > { %v1692_v56 = vadd.f32 %v1644_v12, %v1250_v2  ;;  %10668 = vmatmul.msk.bf16.gmra.mxu0 %vm865_vm7, %v1491_v33  ;;  %v1343_v12 = vsel %vm12281_vm5, %v10650_v6, %v1342_v63  ;;  %v1346_v2 = vsel %vm12281_vm5, %v1344_v51, %v1345_v15  ;;  %v1254_v33 = vpop.f32.mrf.mxu1  ;;  %v1970_v55 = vpop.f32.mrf.mxu3  ;;  %v1447_v51 = vrot.slane %v12789_v23, 5 }
 0x181   : > { %v1458_v25 = vunpack.c.l.b16 %v1343_v12  ;;  %v1459_v19 = vunpack.c.l.b16 %v1346_v2  ;;  %v1286_v12 = vld [vmem:[%s12265_s12 + $0xcc] sm:$0xe] }
 0x182   : > { %v12913_v7 = vadd.f32 %v1965_v3, %v1692_v56  ;;  %v10665_v2 = vrot.slane %v1286_v12, 9 }
 0x183   : > { %v1492_v62 = vpack.c.b16 %v1459_v19, %v1458_v25 }
 0x184   : > { %15885 = vst [vmem:[#allocation37_spill] sm:$0xff] %v12913_v7 }
 0x185   : > { %v12915_v11 = vpop.f32.mrf.mxu0 }
 0x186   : > { %15886 = vst [vmem:[#allocation38_spill] sm:$0xff] %v12915_v11  ;;  %v12926_v63 = vpop.f32.mrf.mxu2  ;;  %v12958_v11 = vld [vmem:[%s12265_s12 + $0x14] sm:$0x1] }
 0x187   : > { %15889 = vst [vmem:[#allocation41_spill] sm:$0xff] %v12926_v63 }
 0x188   : > { %v12922_v3 = vpop.f32.mrf.mxu1  ;;  %v12930_v6 = vpop.f32.mrf.mxu3 }
 0x189   : > { %15887 = vst [vmem:[#allocation39_spill] sm:$0xff] %v12922_v3 }
 0x18a   : > { %15891 = vst [vmem:[#allocation43_spill] sm:$0xff] %v12930_v6 }
 0x18d   : > { %v1008_v13 = vpop.f32.mrf.mxu0 }
 0x18e   : > { %v1255_v5 = vadd.f32 %v1254_v33, %v1008_v13  ;;  %v1449_v13 = vrot.slane %v1447_v51, 4  ;;  %v1450_v33 = vrot.slane %v12802_v24, 5  ;;  %v1654_v6 = vpop.f32.mrf.mxu2  ;;  %v11953_v24 = vld [vmem:[%s12265_s12 + $0xd8] sm:$0xff] }
 0x18f   : > { %10811 = vmatmul.msk.bf16.gmra.mxu3 %vm865_vm7, %v11953_v24 }
 0x190   : > { %v1694_v56 = vadd.f32 %v1649_v46, %v1255_v5  ;;  %10669 = vmatmul.msk.bf16.gmra.mxu0 %vm865_vm7, %v1492_v62  ;;  %v1448_v62 = vsel %vm12281_vm5, %v10665_v2, %v1447_v51  ;;  %v1451_v25 = vsel %vm12281_vm5, %v1449_v13, %v1450_v33  ;;  %v11936_v5 = vld [vmem:[%s12265_s12 + $0xc] sm:$0xff]  ;;  %v1975_v63 = vpop.f32.mrf.mxu3  ;;  %v11067_v33 = vld [vmem:[%s12265_s12 + $0x18] sm:$0xf] }
 0x191   : > { %v1488_v19 = vunpack.c.l.b16 %v1448_v62  ;;  %v1489_v46 = vunpack.c.l.b16 %v1451_v25  ;;  %v11935_v2 = vld [vmem:[%s12265_s12 + $0xcc] sm:$0xff]  ;;  %v11068_v62 = vld [vmem:[%s12265_s12 + $0x1c] sm:$0xf]  ;;  %v3577_v25 = vshrl.u32 %v11067_v33, 16 }
 0x192   : > { %v12924_v14 = vadd.f32 %v1970_v55, %v1694_v56  ;;  %v1259_v55 = vpop.f32.mrf.mxu1  ;;  %10647 = vmatmul.msk.bf16.gmra.mxu1 %vm865_vm7, %v11935_v2 }
 0x193   : > { %v1507_v23 = vpack.c.b16 %v1489_v46, %v1488_v19  ;;  %v3580_v19 = vshll.u32 %v11067_v33, 16  ;;  %v3586_v46 = vshll.u32 %v11068_v62, 16 }
 0x194   : > { %15888 = vst [vmem:[#allocation40_spill] sm:$0xff] %v12924_v14 }
 0x195   : > { %v12928_v15 = vpop.f32.mrf.mxu0  ;;  %10684 = vmatmul.msk.bf16.gmra.mxu2 %vm865_vm7, %v1507_v23 }
 0x196   : > { %15890 = vst [vmem:[#allocation42_spill] sm:$0xff] %v12928_v15  ;;  %v10885_v15 = vld [vmem:[%s12265_s12 + $0xc] sm:$0xe] }
 0x19d   : > { %v1013_v56 = vpop.f32.mrf.mxu0 }
 0x19e   : > { %v1260_v12 = vadd.f32 %v1259_v55, %v1013_v56  ;;  %v3590_v55 = vshrl.u32 %v11068_v62, 16  ;;  %v3582_v56 = vrot.slane %v3580_v19, 5  ;;  %v10903_v62 = vrot.slane %v10885_v15, 9 }
 0x1a0   : > { %v1696_v51 = vadd.f32 %v1654_v6, %v1260_v12  ;;  %10794 = vmatmul.msk.bf16.vlgmr.msrb.gmra.mxu0 %vm865_vm7, %v11936_v5  ;;  %v11069_v6 = vld [vmem:[%s12265_s12 + $0x20] sm:$0x1]  ;;  %v3579_v5 = vrot.slane %v3577_v25, 4  ;;  %v3588_v12 = vrot.slane %v3586_v46, 5 }
 0x1a1   : > { %v3596_v2 = vshll.u32 %v11069_v6, 16  ;;  %v2832_v6 = vrot.slane %v12958_v11, 5 }
 0x1a2   : > { %v12945_v13 = vadd.f32 %v1975_v63, %v1696_v51  ;;  %v10813_v63 = vld [vmem:[%s12265_s12 + $0x10] sm:$0xf]  ;;  %v3583_v24 = vor.u32 %v3582_v56, %v3579_v5  ;;  %v3592_v51 = vrot.slane %v3590_v55, 4  ;;  %v10812_v5 = vld [vmem:[%s12265_s12 + $0xc] sm:$0xf] }
 0x1a3   : > { %v3598_v3 = vrot.slane %v3596_v2, 5  ;;  %v2079_v2 = vshll.u32 %v10812_v5, 16 }
 0x1a4   : > { %15892 = vst [vmem:[#allocation44_spill] sm:$0xff] %v12945_v13  ;;  %v2829_v13 = vrot.slane %v10813_v63, 5  ;;  %v3584_v14 = vrot.slane %v3583_v24, 4  ;;  %v3593_v33 = vor.u32 %v3592_v51, %v3588_v12 }
 0x1a5   : > { %v12950_v23 = vpop.f32.mrf.mxu0  ;;  %11049 = vmatmul.msk.bf16.vlgmr.msrb.gmra.mxu2 %vm865_vm7, %v11954_v38  ;;  %v2085_v38 = vshll.u32 %v10813_v63, 16 }
 0x1a6   : > { %15893 = vst [vmem:[#allocation45_spill] sm:$0xff] %v12950_v23  ;;  %v2831_v7 = vrot.slane %v2829_v13, 4  ;;  %v11937_v23 = vld [vmem:[%s12265_s12 + $0x18] sm:$0xff]  ;;  %v3589_v25 = vsel %vm12287_vm6, %v3584_v14, %v3588_v12  ;;  %v3594_v19 = vrot.slane %v3593_v33, 4  ;;  %v2830_v55 = vsel %vm12281_vm5, %v10903_v62, %v2829_v13  ;;  %v11176_v13 = vld [vmem:[%s15837_s1 + $0x10] sm:$0x3] }
 0x1a7   : > { %v4010_v56 = vunpack.c.l.b16 %v3589_v25  ;;  %v2955_v24 = vunpack.c.l.b16 %v2830_v55  ;;  %v2076_v12 = vshrl.u32 %v10812_v5, 16  ;;  %v2089_v62 = vshrl.u32 %v10813_v63, 16 }
 0x1a8   : > { %v3599_v15 = vsel %vm12287_vm6, %v3594_v19, %v3598_v3  ;;  %v2833_v14 = vsel %vm12281_vm5, %v2831_v7, %v2832_v6  ;;  %v4565_v3 = vsel %vm920_vm0, %v11176_v13, 0  ;;  %v11071_v7 = vld [vmem:[%s12265_s12 + $0x28] sm:$0xf]  ;;  %v2081_v63 = vrot.slane %v2079_v2, 5  ;;  %v11072_v13 = vld [vmem:[%s12265_s12 + $0x2c] sm:$0x1] }
 0x1a9   : > { %v4011_v51 = vunpack.c.l.b16 %v3599_v15  ;;  %v2956_v33 = vunpack.c.l.b16 %v2833_v14  ;;  %4574 = vmatpush.bf16.msrb.mxu0 %v4565_v3  ;;  %v3610_v55 = vshll.u32 %v11071_v7, 16  ;;  %v3614_v6 = vshrl.u32 %v11071_v7, 16 }
 0x1aa   : > { %v2078_v14 = vrot.slane %v2076_v12, 4  ;;  %v3620_v30 = vshll.u32 %v11072_v13, 16  ;;  %v2095_v12 = vshll.u32 %v12958_v11, 16 }
 0x1ab   : > { %v4046_v25 = vpack.c.b16 %v4011_v51, %v4010_v56  ;;  %v2991_v19 = vpack.c.b16 %v2956_v33, %v2955_v24  ;;  %v2087_v56 = vrot.slane %v2085_v38, 5  ;;  %v2091_v51 = vrot.slane %v2089_v62, 4 }
 0x1ac   : > { %v3612_v33 = vrot.slane %v3610_v55, 5  ;;  %v3622_v62 = vrot.slane %v3620_v30, 5  ;;  %v12987_v55 = vld [vmem:[%s12265_s12 + $0x20] sm:$0x1] }
 0x1ad   : > { %v1018_v46 = vpop.f32.mrf.mxu0  ;;  %11122 = vmatmul.msk.bf16.vlgmr.msrb.gmra.mxu3 %vm865_vm7, %v4046_v25  ;;  %10922 = vmatmul.msk.bf16.vlgmr.msrb.gmra.mxu1 %vm865_vm7, %v2991_v19  ;;  %v10816_v25 = vld [vmem:[%s12265_s12 + $0x1c] sm:$0xf]  ;;  %v3616_v19 = vrot.slane %v3614_v6, 4  ;;  %v2092_v20 = vor.u32 %v2091_v51, %v2087_v56  ;;  %v2839_v30 = vrot.slane %v12987_v55, 5 }
 0x1ae   : > { %v11070_v46 = vld [vmem:[%s12265_s12 + $0x24] sm:$0xf]  ;;  %v2836_v7 = vrot.slane %v10816_v25, 5 }
 0x1af   : > { %v3604_v5 = vshll.u32 %v11070_v46, 16  ;;  %v3617_v38 = vor.u32 %v3616_v19, %v3612_v33  ;;  %v2093_v11 = vrot.slane %v2092_v20, 4 }
 0x1b0   : > { %10795 = vmatmul.msk.bf16.gmra.mxu0 %vm865_vm7, %v11937_v23  ;;  %v3601_v23 = vshrl.u32 %v11070_v46, 16  ;;  %v2082_v46 = vor.u32 %v2081_v63, %v2078_v14 }
 0x1b1   : > { %v3606_v24 = vrot.slane %v3604_v5, 5  ;;  %v11938_v5 = vld [vmem:[%s12265_s12 + $0x24] sm:$0xff]  ;;  %v3618_v13 = vrot.slane %v3617_v38, 4  ;;  %v11073_v38 = vld [vmem:[%s12265_s12 + $0x30] sm:$0xf] }
 0x1b2   : > { %v3603_v3 = vrot.slane %v3601_v23, 4  ;;  %v2838_v23 = vrot.slane %v2836_v7, 4  ;;  %v2083_v63 = vrot.slane %v2082_v46, 4 }
 0x1b4   : > { %v3607_v40 = vor.u32 %v3606_v24, %v3603_v3  ;;  %v2097_v3 = vrot.slane %v2095_v12, 5  ;;  %v3623_v24 = vsel %vm12287_vm6, %v3618_v13, %v3622_v62  ;;  %v2840_v46 = vsel %vm12281_vm5, %v2838_v23, %v2839_v30  ;;  %v11074_v23 = vld [vmem:[%s12265_s12 + $0x34] sm:$0xf] }
 0x1b5   : > { %v1020_v15 = vpop.f32.mrf.mxu0  ;;  %11050 = vmatmul.msk.bf16.gmra.mxu2 %vm865_vm7, %v11955_v47  ;;  %v2088_v20 = vsel %vm12287_vm6, %v2083_v63, %v2087_v56  ;;  %v2113_v13 = vshrl.u32 %v10816_v25, 16  ;;  %v3638_v56 = vshrl.u32 %v11074_v23, 16 }
 0x1b6   : > { %v3608_v2 = vrot.slane %v3607_v40, 4  ;;  %v10886_v15 = vld [vmem:[%s12265_s12 + $0x18] sm:$0xe]  ;;  %v2098_v47 = vsel %vm12287_vm6, %v2093_v11, %v2097_v3  ;;  %v11075_v11 = vld [vmem:[%s12265_s12 + $0x38] sm:$0x1] }
 0x1b7   : > { %v10904_v60 = vrot.slane %v10886_v15, 9  ;;  %v2510_v30 = vunpack.c.l.b16 %v2098_v47  ;;  %v10887_v47 = vld [vmem:[%s12265_s12 + $0x24] sm:$0xe] }
 0x1b8   : > { %v3613_v6 = vsel %vm12287_vm6, %v3608_v2, %v3612_v33  ;;  %v4013_v33 = vunpack.c.l.b16 %v3623_v24  ;;  %v10815_v2 = vld [vmem:[%s12265_s12 + $0x18] sm:$0xf]  ;;  %v10905_v42 = vrot.slane %v10887_v47, 9  ;;  %v11076_v47 = vld [vmem:[%s12265_s12 + $0x3c] sm:$0xf] }
 0x1b9   : > { %v4012_v51 = vunpack.c.l.b16 %v3613_v6  ;;  %v2837_v40 = vsel %vm12281_vm5, %v10904_v60, %v2836_v7  ;;  %v2958_v60 = vunpack.c.l.b16 %v2840_v46  ;;  %v2100_v62 = vshrl.u32 %v10815_v2, 16 }
 0x1ba   : > { %v2957_v19 = vunpack.c.l.b16 %v2837_v40  ;;  %v2103_v15 = vshll.u32 %v10815_v2, 16  ;;  %v2109_v6 = vshll.u32 %v10816_v25, 16  ;;  %v2509_v40 = vunpack.c.l.b16 %v2088_v20 }
 0x1bb   : > { %v4047_v7 = vpack.c.b16 %v4013_v33, %v4012_v51  ;;  %v3634_v51 = vshll.u32 %v11074_v23, 16  ;;  %v2115_v2 = vrot.slane %v2113_v13, 4 }
 0x1bc   : > { %v2992_v12 = vpack.c.b16 %v2958_v60, %v2957_v19  ;;  %v2102_v19 = vrot.slane %v2100_v62, 4  ;;  %v2105_v33 = vrot.slane %v2103_v15, 5  ;;  %v2111_v25 = vrot.slane %v2109_v6, 5  ;;  %v10819_v60 = vld [vmem:[%s12265_s12 + $0x28] sm:$0xf]  ;;  %v11956_v6 = vld [vmem:[%s12265_s12 + $0x30] sm:$0xff] }
 0x1bd   : > { %v1179_v14 = vpop.f32.mrf.mxu0  ;;  %11123 = vmatmul.msk.bf16.gmra.mxu3 %vm865_vm7, %v4047_v7  ;;  %v3636_v46 = vrot.slane %v3634_v51, 5  ;;  %v2843_v36 = vrot.slane %v10819_v60, 5  ;;  %v2545_v62 = vpack.c.b16 %v2510_v30, %v2509_v40 }
 0x1be   : > { %10923 = vmatmul.msk.bf16.gmra.mxu1 %vm865_vm7, %v2992_v12  ;;  %v3628_v14 = vshll.u32 %v11073_v38, 16  ;;  %v3640_v12 = vrot.slane %v3638_v56, 4  ;;  %v2106_v53 = vor.u32 %v2105_v33, %v2102_v19  ;;  %v2116_v15 = vor.u32 %v2115_v2, %v2111_v25 }
 0x1c0   : > { %10796 = vmatmul.msk.bf16.gmra.mxu0 %vm865_vm7, %v11938_v5  ;;  %v3625_v5 = vshrl.u32 %v11073_v38, 16  ;;  %v3630_v24 = vrot.slane %v3628_v14, 5  ;;  %v3644_v38 = vshll.u32 %v11075_v11, 16  ;;  %v13014_v14 = vld [vmem:[%s12265_s12 + $0x2c] sm:$0x1]  ;;  %v2119_v11 = vshll.u32 %v12987_v55, 16 }
 0x1c1   : > { %v2846_v19 = vrot.slane %v13014_v14, 5  ;;  %v2107_v33 = vrot.slane %v2106_v53, 4 }
 0x1c2   : > { %v3627_v3 = vrot.slane %v3625_v5, 4  ;;  %v3646_v20 = vrot.slane %v3644_v38, 5  ;;  %v2845_v5 = vrot.slane %v2843_v36, 4 }
 0x1c3   : > { %v2112_v53 = vsel %vm12287_vm6, %v2107_v33, %v2111_v25  ;;  %v11078_v25 = vld [vmem:[%s12265_s12 + $0x44] sm:$0x1] }
 0x1c4   : > { %v3631_v7 = vor.u32 %v3630_v24, %v3627_v3  ;;  %v2844_v24 = vsel %vm12281_vm5, %v10905_v42, %v2843_v36  ;;  %v2847_v55 = vsel %vm12281_vm5, %v2845_v5, %v2846_v19  ;;  %v2117_v42 = vrot.slane %v2116_v15, 4 }
 0x1c5   : > { %v1181_v63 = vpop.f32.mrf.mxu0  ;;  %11051 = vmatmul.msk.bf16.gmra.mxu2 %vm865_vm7, %v11956_v6  ;;  %v2959_v30 = vunpack.c.l.b16 %v2844_v24  ;;  %v2121_v36 = vrot.slane %v2119_v11, 5  ;;  %v2137_v6 = vshrl.u32 %v10819_v60, 16  ;;  %v3649_v5 = vshrl.u32 %v11076_v47, 16 }
 0x1c6   : > { %v3632_v23 = vrot.slane %v3631_v7, 4  ;;  %v3641_v63 = vor.u32 %v3640_v12, %v3636_v46  ;;  %v2960_v7 = vunpack.c.l.b16 %v2847_v55 }
 0x1c8   : > { %v3637_v13 = vsel %vm12287_vm6, %v3632_v23, %v3636_v46  ;;  %v3642_v51 = vrot.slane %v3641_v63, 4  ;;  %v10818_v46 = vld [vmem:[%s12265_s12 + $0x24] sm:$0xf]  ;;  %v2993_v63 = vpack.c.b16 %v2960_v7, %v2959_v30  ;;  %v2511_v30 = vunpack.c.l.b16 %v2112_v53  ;;  %v10822_v7 = vld [vmem:[%s12265_s12 + $0x34] sm:$0xf] }
 0x1c9   : > { %v4014_v3 = vunpack.c.l.b16 %v3637_v13  ;;  %v2124_v38 = vshrl.u32 %v10818_v46, 16  ;;  %v2127_v23 = vshll.u32 %v10818_v46, 16  ;;  %v11077_v13 = vld [vmem:[%s12265_s12 + $0x40] sm:$0xf]  ;;  %v2139_v46 = vrot.slane %v2137_v6, 4 }
 0x1ca   : > { %v3647_v40 = vsel %vm12287_vm6, %v3642_v51, %v3646_v20  ;;  %v2133_v20 = vshll.u32 %v10819_v60, 16  ;;  %v3658_v15 = vshll.u32 %v11077_v13, 16  ;;  %v3662_v51 = vshrl.u32 %v11077_v13, 16 }
 0x1cb   : > { %v4015_v2 = vunpack.c.l.b16 %v3647_v40  ;;  %v2126_v24 = vrot.slane %v2124_v38, 4  ;;  %v2129_v19 = vrot.slane %v2127_v23, 5  ;;  %v3651_v40 = vrot.slane %v3649_v5, 4  ;;  %v10888_v5 = vld [vmem:[%s12265_s12 + $0x30] sm:$0xe] }
 0x1cc   : > { %v2135_v33 = vrot.slane %v2133_v20, 5  ;;  %v2850_v13 = vrot.slane %v10822_v7, 5  ;;  %v2143_v53 = vshll.u32 %v13014_v14, 16  ;;  %v10906_v20 = vrot.slane %v10888_v5, 9 }
 0x1cd   : > { %v13018_v56 = vpop.f32.mrf.mxu0  ;;  %v4048_v12 = vpack.c.b16 %v4015_v2, %v4014_v3  ;;  %v2122_v3 = vsel %vm12287_vm6, %v2117_v42, %v2121_v36  ;;  %v3660_v2 = vrot.slane %v3658_v15, 5  ;;  %v2130_v42 = vor.u32 %v2129_v19, %v2126_v24  ;;  %v11957_v15 = vld [vmem:[%s12265_s12 + $0x3c] sm:$0xff]  ;;  %v10821_v24 = vld [vmem:[%s12265_s12 + $0x30] sm:$0xf] }
 0x1ce   : > { %10924 = vmatmul.msk.bf16.gmra.mxu1 %vm865_vm7, %v2993_v63  ;;  %v2512_v55 = vunpack.c.l.b16 %v2122_v3  ;;  %v3664_v63 = vrot.slane %v3662_v51, 4  ;;  %v2140_v22 = vor.u32 %v2139_v46, %v2135_v33  ;;  %v2852_v6 = vrot.slane %v2850_v13, 4  ;;  %v13047_v3 = vld [vmem:[%s12265_s12 + $0x38] sm:$0x1] }
 0x1cf   : > { %11124 = vmatmul.msk.bf16.gmra.mxu3 %vm865_vm7, %v4048_v12  ;;  %v2853_v46 = vrot.slane %v13047_v3, 5  ;;  %v2131_v14 = vrot.slane %v2130_v42, 4  ;;  %v2157_v42 = vshll.u32 %v10822_v7, 16  ;;  %v2161_v5 = vshrl.u32 %v10822_v7, 16 }
 0x1d0   : > { %10867 = vmatmul.msk.bf16.vlgmr.msra.gmra.mxu0 %vm865_vm7, %v2545_v62  ;;  %v3652_v62 = vshll.u32 %v11076_v47, 16  ;;  %v3668_v47 = vshll.u32 %v11078_v25, 16  ;;  %v3665_v38 = vor.u32 %v3664_v63, %v3660_v2 }
 0x1d2   : > { %v3654_v60 = vrot.slane %v3652_v62, 5  ;;  %v3670_v23 = vrot.slane %v3668_v47, 5  ;;  %v2546_v62 = vpack.c.b16 %v2512_v55, %v2511_v30  ;;  %v3666_v25 = vrot.slane %v3665_v38, 4 }
 0x1d3   : > { %v2854_v47 = vsel %vm12281_vm5, %v2852_v6, %v2853_v46  ;;  %v2151_v38 = vshll.u32 %v10821_v24, 16  ;;  %v2159_v46 = vrot.slane %v2157_v42, 5 }
 0x1d4   : > { %v3655_v12 = vor.u32 %v3654_v60, %v3651_v40  ;;  %v2851_v60 = vsel %vm12281_vm5, %v10906_v20, %v2850_v13  ;;  %v3671_v30 = vsel %vm12287_vm6, %v3666_v25, %v3670_v23  ;;  %v2148_v13 = vshrl.u32 %v10821_v24, 16 }
 0x1d5   : > { %v13037_v11 = vpop.f32.mrf.mxu0  ;;  %11052 = vmatmul.msk.bf16.gmra.mxu2 %vm865_vm7, %v11957_v15  ;;  %v2961_v55 = vunpack.c.l.b16 %v2851_v60  ;;  %v4017_v63 = vunpack.c.l.b16 %v3671_v30  ;;  %v2153_v60 = vrot.slane %v2151_v38, 5  ;;  %v2163_v30 = vrot.slane %v2161_v5, 4 }
 0x1d6   : > { %v3656_v36 = vrot.slane %v3655_v12, 4  ;;  %v2141_v12 = vrot.slane %v2140_v22, 4  ;;  %v2136_v22 = vsel %vm12287_vm6, %v2131_v14, %v2135_v33  ;;  %v11081_v33 = vld [vmem:[%s12265_s12 + $0x50] sm:$0x1] }
 0x1d8   : > { %v3661_v51 = vsel %vm12287_vm6, %v3656_v36, %v3660_v2  ;;  %v2145_v2 = vrot.slane %v2143_v53, 5  ;;  %v2962_v36 = vunpack.c.l.b16 %v2854_v47  ;;  %v11080_v53 = vld [vmem:[%s12265_s12 + $0x4c] sm:$0xf]  ;;  %v10825_v47 = vld [vmem:[%s12265_s12 + $0x40] sm:$0xf] }
 0x1d9   : > { %v4016_v19 = vunpack.c.l.b16 %v3661_v51  ;;  %v11079_v51 = vld [vmem:[%s12265_s12 + $0x48] sm:$0xf]  ;;  %v3682_v25 = vshll.u32 %v11080_v53, 16  ;;  %v3686_v7 = vshrl.u32 %v11080_v53, 16  ;;  %v2164_v53 = vor.u32 %v2163_v30, %v2159_v46 }
 0x1da   : > { %v2994_v15 = vpack.c.b16 %v2962_v36, %v2961_v55  ;;  %v2146_v23 = vsel %vm12287_vm6, %v2141_v12, %v2145_v2  ;;  %v3673_v6 = vshrl.u32 %v11079_v51, 16  ;;  %v2513_v12 = vunpack.c.l.b16 %v2136_v22 }
 0x1db   : > { %v4049_v20 = vpack.c.b16 %v4017_v63, %v4016_v19  ;;  %v2150_v19 = vrot.slane %v2148_v13, 4  ;;  %v3684_v2 = vrot.slane %v3682_v25, 5  ;;  %v2514_v63 = vunpack.c.l.b16 %v2146_v23  ;;  %v11958_v25 = vld [vmem:[%s12265_s12 + $0x48] sm:$0xff]  ;;  %v13079_v23 = vld [vmem:[%s12265_s12 + $0x44] sm:$0x1] }
 0x1dc   : > { %v3675_v14 = vrot.slane %v3673_v6, 4  ;;  %v2857_v10 = vrot.slane %v10825_v47, 5  ;;  %v2167_v13 = vshll.u32 %v13047_v3, 16  ;;  %v10889_v6 = vld [vmem:[%s12265_s12 + $0x3c] sm:$0xe] }
 0x1dd   : > { %v13051_v40 = vpop.f32.mrf.mxu0  ;;  %v10907_v54 = vrot.slane %v10889_v6, 9  ;;  %v2547_v22 = vpack.c.b16 %v2514_v63, %v2513_v12  ;;  %v2181_v6 = vshll.u32 %v10825_v47, 16 }
 0x1de   : > { %10925 = vmatmul.msk.bf16.gmra.mxu1 %vm865_vm7, %v2994_v15  ;;  %v3692_v15 = vshll.u32 %v11081_v33, 16 }
 0x1df   : > { %11125 = vmatmul.msk.bf16.gmra.mxu3 %vm865_vm7, %v4049_v20  ;;  %v3688_v20 = vrot.slane %v3686_v7, 4  ;;  %v2858_v3 = vsel %vm12281_vm5, %v10907_v54, %v2857_v10 }
 0x1e0   : > { %10868 = vmatmul.msk.bf16.gmra.mxu0 %vm865_vm7, %v2546_v62  ;;  %v3676_v62 = vshll.u32 %v11079_v51, 16  ;;  %v2154_v51 = vor.u32 %v2153_v60, %v2150_v19  ;;  %v3694_v5 = vrot.slane %v3692_v15, 5  ;;  %v2963_v63 = vunpack.c.l.b16 %v2858_v3  ;;  %v10824_v15 = vld [vmem:[%s12265_s12 + $0x3c] sm:$0xf] }
 0x1e1   : > { %v3689_v42 = vor.u32 %v3688_v20, %v3684_v2  ;;  %v11084_v3 = vld [vmem:[%s12265_s12 + $0x5c] sm:$0x1] }
 0x1e2   : > { %v3678_v55 = vrot.slane %v3676_v62, 5  ;;  %v2859_v62 = vrot.slane %v2857_v10, 4  ;;  %v2155_v60 = vrot.slane %v2154_v51, 4 }
 0x1e3   : > { %v3690_v33 = vrot.slane %v3689_v42, 4  ;;  %v2172_v42 = vshrl.u32 %v10824_v15, 16 }
 0x1e4   : > { %v3679_v36 = vor.u32 %v3678_v55, %v3675_v14  ;;  %v2860_v14 = vrot.slane %v13079_v23, 5  ;;  %v2165_v55 = vrot.slane %v2164_v53, 4  ;;  %v2160_v51 = vsel %vm12287_vm6, %v2155_v60, %v2159_v46 }
 0x1e5   : > { %v13071_v24 = vpop.f32.mrf.mxu0  ;;  %11053 = vmatmul.msk.bf16.gmra.mxu2 %vm865_vm7, %v11958_v25  ;;  %v3695_v12 = vsel %vm12287_vm6, %v3690_v33, %v3694_v5  ;;  %v2175_v5 = vshll.u32 %v10824_v15, 16  ;;  %v2185_v25 = vshrl.u32 %v10825_v47, 16  ;;  %v2515_v60 = vunpack.c.l.b16 %v2160_v51 }
 0x1e6   : > { %v3680_v38 = vrot.slane %v3679_v36, 4  ;;  %v2169_v36 = vrot.slane %v2167_v13, 5  ;;  %v2861_v20 = vsel %vm12281_vm5, %v2859_v62, %v2860_v14  ;;  %v11083_v62 = vld [vmem:[%s12265_s12 + $0x58] sm:$0xf]  ;;  %v13102_v47 = vrot.slane %v2181_v6, 5 }
 0x1e7   : > { %v2964_v54 = vunpack.c.l.b16 %v2861_v20  ;;  %v3706_v33 = vshll.u32 %v11083_v62, 16  ;;  %v3710_v46 = vshrl.u32 %v11083_v62, 16  ;;  %v10828_v20 = vld [vmem:[%s12265_s12 + $0x4c] sm:$0xf]  ;;  %v10890_v62 = vld [vmem:[%s12265_s12 + $0x48] sm:$0xe] }
 0x1e8   : > { %v3685_v7 = vsel %vm12287_vm6, %v3680_v38, %v3684_v2  ;;  %v4019_v2 = vunpack.c.l.b16 %v3695_v12  ;;  %v2170_v53 = vsel %vm12287_vm6, %v2165_v55, %v2169_v36  ;;  %v11082_v38 = vld [vmem:[%s12265_s12 + $0x54] sm:$0xf]  ;;  %v2174_v36 = vrot.slane %v2172_v42, 4 }
 0x1e9   : > { %v4018_v30 = vunpack.c.l.b16 %v3685_v7  ;;  %v2995_v13 = vpack.c.b16 %v2964_v54, %v2963_v63  ;;  %v3700_v7 = vshll.u32 %v11082_v38, 16  ;;  %v2177_v12 = vrot.slane %v2175_v5, 5 }
 0x1ea   : > { %v3708_v63 = vrot.slane %v3706_v33, 5  ;;  %v3712_v54 = vrot.slane %v3710_v46, 4  ;;  %v10908_v5 = vrot.slane %v10890_v62, 9  ;;  %v11959_v33 = vld [vmem:[%s12265_s12 + $0x54] sm:$0xff] }
 0x1eb   : > { %v4050_v10 = vpack.c.b16 %v4019_v2, %v4018_v30  ;;  %v2516_v30 = vunpack.c.l.b16 %v2170_v53  ;;  %v3702_v55 = vrot.slane %v3700_v7, 5  ;;  %v2187_v2 = vrot.slane %v2185_v25, 4 }
 0x1ec   : > { %v3713_v51 = vor.u32 %v3712_v54, %v3708_v63  ;;  %v2178_v42 = vor.u32 %v2177_v12, %v2174_v36 }
 0x1ed   : > { %v1574_v19 = vpop.f32.mrf.mxu0  ;;  %v2548_v7 = vpack.c.b16 %v2516_v30, %v2515_v60  ;;  %v2188_v25 = vor.u32 %v2187_v2, %v13102_v47  ;;  %v10827_v60 = vld [vmem:[%s12265_s12 + $0x48] sm:$0xf] }
 0x1ee   : > { %10926 = vmatmul.msk.bf16.gmra.mxu1 %vm865_vm7, %v2995_v13  ;;  %v2864_v13 = vrot.slane %v10828_v20, 5  ;;  %v2199_v62 = vshll.u32 %v10827_v60, 16 }
 0x1ef   : > { %11126 = vmatmul.msk.bf16.gmra.mxu3 %vm865_vm7, %v4050_v10  ;;  %v3716_v10 = vshll.u32 %v11084_v3, 16  ;;  %v3714_v3 = vrot.slane %v3713_v51, 4 }
 0x1f0   : > { %10869 = vmatmul.msk.bf16.gmra.mxu0 %vm865_vm7, %v2547_v22  ;;  %v3697_v22 = vshrl.u32 %v11082_v38, 16  ;;  %v2866_v6 = vrot.slane %v2864_v13, 4 }
 0x1f1   : > { %v3718_v53 = vrot.slane %v3716_v10, 5  ;;  %v2189_v10 = vrot.slane %v2188_v25, 4 }
 0x1f2   : > { %v3699_v14 = vrot.slane %v3697_v22, 4  ;;  %v1185_v22 = vadd.f32 %v13018_v56, %v12525_v8  ;;  %v2865_v8 = vsel %vm12281_vm5, %v10908_v5, %v2864_v13  ;;  %v11085_v5 = vld [vmem:[%s12265_s12 + $0x60] sm:$0xf] }
 0x1f3   : > { %v3719_v30 = vsel %vm12287_vm6, %v3714_v3, %v3718_v53  ;;  %v2965_v12 = vunpack.c.l.b16 %v2865_v8  ;;  %v1187_v53 = vadd.f32 %v13037_v11, %v12551_v27  ;;  %v3721_v25 = vshrl.u32 %v11085_v5, 16  ;;  %v11087_v8 = vld [vmem:[%s12265_s12 + $0x68] sm:$0x1] }
 0x1f4   : > { %v3703_v15 = vor.u32 %v3702_v55, %v3699_v14  ;;  %v2191_v55 = vshll.u32 %v13079_v23, 16  ;;  %v4021_v2 = vunpack.c.l.b16 %v3719_v30 }
 0x1f5   : > { %v1576_v19 = vpop.f32.mrf.mxu0  ;;  %11054 = vmatmul.msk.bf16.gmra.mxu2 %vm865_vm7, %v11959_v33  ;;  %v2205_v33 = vshll.u32 %v10828_v20, 16 }
 0x1f6   : > { %v3704_v38 = vrot.slane %v3703_v15, 4  ;;  %v13111_v19 = vld [vmem:[%s12265_s12 + $0x50] sm:$0x1]  ;;  %v2193_v13 = vrot.slane %v2191_v55, 5 }
 0x1f7   : > { %v2867_v56 = vrot.slane %v13111_v19, 5  ;;  %v13142_v30 = vrot.slane %v2205_v33, 5  ;;  %v2215_v33 = vshll.u32 %v13111_v19, 16 }
 0x1f8   : > { %v3709_v46 = vsel %vm12287_vm6, %v3704_v38, %v3708_v63  ;;  %v2179_v63 = vrot.slane %v2178_v42, 4  ;;  %v2196_v38 = vshrl.u32 %v10827_v60, 16  ;;  %v2194_v27 = vsel %vm12287_vm6, %v2189_v10, %v2193_v13 }
 0x1f9   : > { %v4020_v15 = vunpack.c.l.b16 %v3709_v46  ;;  %v2868_v23 = vsel %vm12281_vm5, %v2866_v6, %v2867_v56  ;;  %v2209_v6 = vshrl.u32 %v10828_v20, 16  ;;  %v3724_v46 = vshll.u32 %v11085_v5, 16 }
 0x1fa   : > { %v2966_v54 = vunpack.c.l.b16 %v2868_v23  ;;  %v2184_v42 = vsel %vm12287_vm6, %v2179_v63, %v13102_v47  ;;  %v2198_v11 = vrot.slane %v2196_v38, 4  ;;  %v2201_v47 = vrot.slane %v2199_v62, 5  ;;  %v10831_v23 = vld [vmem:[%s12265_s12 + $0x58] sm:$0xf] }
 0x1fb   : > { %v4051_v51 = vpack.c.b16 %v4021_v2, %v4020_v15  ;;  %v3723_v20 = vrot.slane %v3721_v25, 4  ;;  %v3726_v56 = vrot.slane %v3724_v46, 5  ;;  %v2517_v60 = vunpack.c.l.b16 %v2184_v42 }
 0x1fc   : > { %v2518_v2 = vunpack.c.l.b16 %v2194_v27  ;;  %v3740_v10 = vshll.u32 %v11087_v8, 16  ;;  %v2871_v13 = vrot.slane %v10831_v23, 5  ;;  %v2202_v38 = vor.u32 %v2201_v47, %v2198_v11  ;;  %v10830_v47 = vld [vmem:[%s12265_s12 + $0x54] sm:$0xf] }
 0x1fd   : > { %v1579_v14 = vpop.f32.mrf.mxu0  ;;  %v1190_v25 = vadd.f32 %v13051_v40, %v12567_v52 }
 0x1fe   : > { %v13119_v36 = vadd.f32 %v1579_v14, %v1185_v22  ;;  %v2996_v22 = vpack.c.b16 %v2966_v54, %v2965_v12  ;;  %v2211_v12 = vrot.slane %v2209_v6, 4  ;;  %v3727_v54 = vor.u32 %v3726_v56, %v3723_v20 }
 0x1ff   : > { %11127 = vmatmul.msk.bf16.gmra.mxu3 %vm865_vm7, %v4051_v51  ;;  %v3742_v5 = vrot.slane %v3740_v10, 5  ;;  %v2549_v46 = vpack.c.b16 %v2518_v2, %v2517_v60 }
 0x200   : > { %10870 = vmatmul.msk.bf16.gmra.mxu0 %vm865_vm7, %v2548_v7  ;;  %v11086_v7 = vld [vmem:[%s12265_s12 + $0x64] sm:$0xf]  ;;  %10927 = vmatmul.msk.bf16.gmra.mxu1 %vm865_vm7, %v2996_v22  ;;  %v3728_v62 = vrot.slane %v3727_v54, 4  ;;  %v2212_v42 = vor.u32 %v2211_v12, %v13142_v30  ;;  %v2203_v12 = vrot.slane %v2202_v38, 4  ;;  %v2229_v38 = vshll.u32 %v10831_v23, 16 }
 0x201   : > { %v3730_v3 = vshll.u32 %v11086_v7, 16  ;;  %v3734_v14 = vshrl.u32 %v11086_v7, 16  ;;  %v2873_v7 = vrot.slane %v2871_v13, 4 }
 0x202   : > { %v2213_v60 = vrot.slane %v2212_v42, 4  ;;  %v2208_v42 = vsel %vm12287_vm6, %v2203_v12, %v13142_v30 }
 0x203   : > { %v3732_v63 = vrot.slane %v3730_v3, 5  ;;  %v3736_v51 = vrot.slane %v3734_v14, 4  ;;  %v11960_v3 = vld [vmem:[%s12265_s12 + $0x60] sm:$0xff]  ;;  %v13152_v14 = vld [vmem:[%s12265_s12 + $0x5c] sm:$0x1]  ;;  %v2519_v12 = vunpack.c.l.b16 %v2208_v42  ;;  %v13195_v42 = vpop.f32.mrf.mxu3 }
 0x204   : > { %v2874_v19 = vrot.slane %v13152_v14, 5  ;;  %15896 = vst [vmem:[#allocation48_spill] sm:$0xff] %v13195_v42 }
 0x205   : > { %v1581_v55 = vpop.f32.mrf.mxu0  ;;  %v3737_v22 = vor.u32 %v3736_v51, %v3732_v63  ;;  %11055 = vmatmul.msk.bf16.gmra.mxu2 %vm865_vm7, %v11960_v3  ;;  %v2220_v51 = vshrl.u32 %v10830_v47, 16 }
 0x206   : > { %v13139_v15 = vadd.f32 %v1581_v55, %v1187_v53  ;;  %v10891_v53 = vld [vmem:[%s12265_s12 + $0x54] sm:$0xe]  ;;  %v3733_v55 = vsel %vm12287_vm6, %v3728_v62, %v3732_v63  ;;  %v2217_v63 = vrot.slane %v2215_v33, 5  ;;  %v2875_v54 = vsel %vm12281_vm5, %v2873_v7, %v2874_v19  ;;  %v11089_v7 = vld [vmem:[%s12265_s12 + $0x70] sm:$0xf]  ;;  %v13184_v19 = vpop.f32.mrf.mxu1 }
 0x207   : > { %v10909_v6 = vrot.slane %v10891_v53, 9  ;;  %v3738_v27 = vrot.slane %v3737_v22, 4  ;;  %v4022_v8 = vunpack.c.l.b16 %v3733_v55  ;;  %v2968_v10 = vunpack.c.l.b16 %v2875_v54  ;;  %15894 = vst [vmem:[#allocation46_spill] sm:$0xff] %v13184_v19 }
 0x208   : > { %v2233_v62 = vshrl.u32 %v10831_v23, 16  ;;  %v2218_v33 = vsel %vm12287_vm6, %v2213_v60, %v2217_v63  ;;  %v3758_v3 = vshrl.u32 %v11089_v7, 16  ;;  %v13187_v60 = vld [vmem:[%s12265_s12 + $0x64] sm:$0xf] }
 0x209   : > { %v2872_v20 = vsel %vm12281_vm5, %v10909_v6, %v2871_v13  ;;  %v3743_v52 = vsel %vm12287_vm6, %v3738_v27, %v3742_v5  ;;  %v2223_v13 = vshll.u32 %v10830_v47, 16  ;;  %v11088_v6 = vld [vmem:[%s12265_s12 + $0x6c] sm:$0xf]  ;;  %v1192_v5 = vadd.f32 %v13071_v24, %v12593_v16  ;;  %v11090_v47 = vld [vmem:[%s12265_s12 + $0x74] sm:$0x1] }
 0x20a   : > { %v2967_v40 = vunpack.c.l.b16 %v2872_v20  ;;  %v4023_v2 = vunpack.c.l.b16 %v3743_v52  ;;  %v3745_v23 = vshrl.u32 %v11088_v6, 16  ;;  %v2222_v16 = vrot.slane %v2220_v51, 4  ;;  %v13189_v51 = vpop.f32.mrf.mxu2 }
 0x20b   : > { %v2225_v24 = vrot.slane %v2223_v13, 5  ;;  %v13179_v27 = vrot.slane %v2229_v38, 5  ;;  %v3764_v54 = vshll.u32 %v11090_v47, 16  ;;  %15895 = vst [vmem:[#allocation47_spill] sm:$0xff] %v13189_v51  ;;  %v2878_v38 = vrot.slane %v13187_v60, 5 }
 0x20c   : > { %v4052_v22 = vpack.c.b16 %v4023_v2, %v4022_v8  ;;  %v2997_v53 = vpack.c.b16 %v2968_v10, %v2967_v40  ;;  %v3747_v8 = vrot.slane %v3745_v23, 4  ;;  %v2520_v40 = vunpack.c.l.b16 %v2218_v33 }
 0x20d   : > { %v1584_v11 = vpop.f32.mrf.mxu0  ;;  %v3760_v2 = vrot.slane %v3758_v3, 4  ;;  %v2226_v10 = vor.u32 %v2225_v24, %v2222_v16 }
 0x20e   : > { %v13160_v56 = vadd.f32 %v1584_v11, %v1190_v25  ;;  %v3748_v25 = vshll.u32 %v11088_v6, 16  ;;  %v2235_v11 = vrot.slane %v2233_v62, 4  ;;  %v2239_v62 = vshll.u32 %v13152_v14, 16 }
 0x20f   : > { %11128 = vmatmul.msk.bf16.gmra.mxu3 %vm865_vm7, %v4052_v22  ;;  %v3766_v6 = vrot.slane %v3764_v54, 5  ;;  %v2550_v23 = vpack.c.b16 %v2520_v40, %v2519_v12  ;;  %v2227_v24 = vrot.slane %v2226_v10, 4  ;;  %v10833_v54 = vld [vmem:[%s12265_s12 + $0x60] sm:$0xf] }
 0x210   : > { %10871 = vmatmul.msk.bf16.gmra.mxu0 %vm865_vm7, %v2549_v46  ;;  %10928 = vmatmul.msk.bf16.gmra.mxu1 %vm865_vm7, %v2997_v53  ;;  %v3754_v46 = vshll.u32 %v11089_v7, 16  ;;  %v3750_v20 = vrot.slane %v3748_v25, 5  ;;  %v2236_v13 = vor.u32 %v2235_v11, %v13179_v27  ;;  %v2880_v7 = vrot.slane %v2878_v38, 4  ;;  %v11961_v25 = vld [vmem:[%s12265_s12 + $0x6c] sm:$0xff] }
 0x212   : > { %v3756_v52 = vrot.slane %v3754_v46, 5  ;;  %v3751_v63 = vor.u32 %v3750_v20, %v3747_v8  ;;  %v13199_v46 = vld [vmem:[%s12265_s12 + $0x68] sm:$0x1]  ;;  %v2237_v8 = vrot.slane %v2236_v13, 4  ;;  %v2241_v20 = vrot.slane %v2239_v62, 5 }
 0x213   : > { %v2881_v47 = vrot.slane %v13199_v46, 5  ;;  %v2232_v62 = vsel %vm12287_vm6, %v2227_v24, %v13179_v27 }
 0x214   : > { %v3752_v22 = vrot.slane %v3751_v63, 4  ;;  %v3761_v53 = vor.u32 %v3760_v2, %v3756_v52 }
 0x215   : > { %v1586_v55 = vpop.f32.mrf.mxu0  ;;  %11056 = vmatmul.msk.bf16.gmra.mxu2 %vm865_vm7, %v11961_v25  ;;  %v2882_v2 = vsel %vm12281_vm5, %v2880_v7, %v2881_v47  ;;  %v2253_v7 = vshll.u32 %v13187_v60, 16  ;;  %v1980_v25 = vpop.f32.mrf.mxu3 }
 0x216   : > { %v13181_v30 = vadd.f32 %v1586_v55, %v1192_v5  ;;  %v10892_v5 = vld [vmem:[%s12265_s12 + $0x60] sm:$0xe]  ;;  %v3757_v3 = vsel %vm12287_vm6, %v3752_v22, %v3756_v52  ;;  %v3762_v55 = vrot.slane %v3761_v53, 4  ;;  %v1264_v52 = vpop.f32.mrf.mxu1  ;;  %v2970_v10 = vunpack.c.l.b16 %v2882_v2 }
 0x217   : > { %v10910_v33 = vrot.slane %v10892_v5, 9  ;;  %v4024_v14 = vunpack.c.l.b16 %v3757_v3  ;;  %v2242_v22 = vsel %vm12287_vm6, %v2237_v8, %v2241_v20  ;;  %v2244_v5 = vshrl.u32 %v10833_v54, 16  ;;  %v11092_v3 = vld [vmem:[%s12265_s12 + $0x7c] sm:$0xf]  ;;  %v11093_v8 = vld [vmem:[%s12265_s12 + $0x80] sm:$0x1] }
 0x218   : > { %v3767_v12 = vsel %vm12287_vm6, %v3762_v55, %v3766_v6  ;;  %v1659_v13 = vpop.f32.mrf.mxu2  ;;  %v11091_v6 = vld [vmem:[%s12265_s12 + $0x78] sm:$0xf]  ;;  %v3782_v24 = vshrl.u32 %v11092_v3, 16  ;;  %v2522_v47 = vunpack.c.l.b16 %v2242_v22  ;;  %v13225_v52 = vrot.slane %v2253_v7, 5 }
 0x219   : > { %v2879_v11 = vsel %vm12281_vm5, %v10910_v33, %v2878_v38  ;;  %v4025_v63 = vunpack.c.l.b16 %v3767_v12  ;;  %v2247_v33 = vshll.u32 %v10833_v54, 16  ;;  %v3769_v55 = vshrl.u32 %v11091_v6, 16 }
 0x21a   : > { %v2969_v40 = vunpack.c.l.b16 %v2879_v11  ;;  %v3772_v27 = vshll.u32 %v11091_v6, 16  ;;  %v2521_v11 = vunpack.c.l.b16 %v2232_v62  ;;  %v3784_v13 = vrot.slane %v3782_v24, 4 }
 0x21b   : > { %v4053_v38 = vpack.c.b16 %v4025_v63, %v4024_v14  ;;  %v3771_v20 = vrot.slane %v3769_v55, 4 }
 0x21c   : > { %v2998_v53 = vpack.c.b16 %v2970_v10, %v2969_v40  ;;  %v3774_v12 = vrot.slane %v3772_v27, 5  ;;  %v2246_v40 = vrot.slane %v2244_v5, 4  ;;  %v13228_v10 = vld [vmem:[%s12265_s12 + $0x70] sm:$0xf]  ;;  %v10893_v5 = vld [vmem:[%s12265_s12 + $0x6c] sm:$0xe] }
 0x21d   : > { %v1895_v16 = vpop.f32.mrf.mxu0  ;;  %v2885_v22 = vrot.slane %v13228_v10, 5  ;;  %v1982_v7 = vpop.f32.mrf.mxu3  ;;  %v10911_v55 = vrot.slane %v10893_v5, 9 }
 0x21e   : > { %v3778_v16 = vshll.u32 %v11092_v3, 16  ;;  %v1266_v63 = vpop.f32.mrf.mxu1 }
 0x21f   : > { %11129 = vmatmul.msk.bf16.gmra.mxu3 %vm865_vm7, %v4053_v38  ;;  %v3775_v38 = vor.u32 %v3774_v12, %v3771_v20  ;;  %v2887_v27 = vrot.slane %v2885_v22, 4  ;;  %v13235_v20 = vld [vmem:[%s12265_s12 + $0x74] sm:$0x1]  ;;  %v2263_v63 = vshll.u32 %v13199_v46, 16 }
 0x220   : > { %10872 = vmatmul.msk.bf16.gmra.mxu0 %vm865_vm7, %v2550_v23  ;;  %v2257_v23 = vshrl.u32 %v13187_v60, 16  ;;  %10929 = vmatmul.msk.bf16.gmra.mxu1 %vm865_vm7, %v2998_v53  ;;  %v2249_v60 = vrot.slane %v2247_v33, 5  ;;  %v3780_v2 = vrot.slane %v3778_v16, 5  ;;  %v3788_v53 = vshll.u32 %v11093_v8, 16  ;;  %v1661_v62 = vpop.f32.mrf.mxu2 }
 0x221   : > { %v3776_v6 = vrot.slane %v3775_v38, 4 }
 0x222   : > { %v2259_v54 = vrot.slane %v2257_v23, 4  ;;  %v3785_v25 = vor.u32 %v3784_v13, %v3780_v2  ;;  %v3790_v3 = vrot.slane %v3788_v53, 5  ;;  %v2250_v33 = vor.u32 %v2249_v60, %v2246_v40 }
 0x223   : > { %v2551_v23 = vpack.c.b16 %v2522_v47, %v2521_v11  ;;  %v3781_v24 = vsel %vm12287_vm6, %v3776_v6, %v3780_v2  ;;  %v2886_v40 = vsel %vm12281_vm5, %v10911_v55, %v2885_v22  ;;  %v2888_v60 = vrot.slane %v13235_v20, 5  ;;  %v10836_v47 = vld [vmem:[%s12265_s12 + $0x6c] sm:$0xf] }
 0x224   : > { %v2260_v16 = vor.u32 %v2259_v54, %v13225_v52  ;;  %v3786_v8 = vrot.slane %v3785_v25, 4  ;;  %v4026_v38 = vunpack.c.l.b16 %v3781_v24  ;;  %v2971_v54 = vunpack.c.l.b16 %v2886_v40  ;;  %v11094_v24 = vld [vmem:[%s12265_s12 + $0x84] sm:$0xf] }
 0x225   : > { %v1897_v14 = vpop.f32.mrf.mxu0  ;;  %v2251_v13 = vrot.slane %v2250_v33, 4  ;;  %v2889_v46 = vsel %vm12281_vm5, %v2887_v27, %v2888_v60  ;;  %v2268_v25 = vshrl.u32 %v10836_v47, 16  ;;  %v2271_v55 = vshll.u32 %v10836_v47, 16 }
 0x226   : > { %v11962_v14 = vld [vmem:[%s12265_s12 + $0x78] sm:$0xff]  ;;  %v3791_v2 = vsel %vm12287_vm6, %v3786_v8, %v3790_v3  ;;  %v2972_v62 = vunpack.c.l.b16 %v2889_v46  ;;  %v2261_v22 = vrot.slane %v2260_v16, 4  ;;  %v2277_v33 = vshll.u32 %v13228_v10, 16 }
 0x227   : > { %11057 = vmatmul.msk.bf16.gmra.mxu2 %vm865_vm7, %v11962_v14  ;;  %v4027_v53 = vunpack.c.l.b16 %v3791_v2  ;;  %v2256_v3 = vsel %vm12287_vm6, %v2251_v13, %v13225_v52  ;;  %v2281_v27 = vshrl.u32 %v13228_v10, 16  ;;  %v3793_v16 = vshrl.u32 %v11094_v24, 16  ;;  %v11096_v2 = vld [vmem:[%s12265_s12 + $0x8c] sm:$0x1] }
 0x228   : > { %v3396_v7 = vpop.f32.mrf.mxu2  ;;  %v2999_v14 = vpack.c.b16 %v2972_v62, %v2971_v54  ;;  %v3796_v8 = vshll.u32 %v11094_v24, 16  ;;  %v2270_v52 = vrot.slane %v2268_v25, 4  ;;  %v2273_v47 = vrot.slane %v2271_v55, 5 }
 0x229   : > { %v4054_v5 = vpack.c.b16 %v4027_v53, %v4026_v38  ;;  %v3795_v54 = vrot.slane %v3793_v16, 4  ;;  %v2523_v53 = vunpack.c.l.b16 %v2256_v3  ;;  %v13268_v46 = vrot.slane %v2277_v33, 5  ;;  %v10840_v7 = vld [vmem:[%s12265_s12 + $0x7c] sm:$0xf] }
 0x22a   : > { %v3075_v6 = vpop.f32.mrf.mxu1  ;;  %v3798_v13 = vrot.slane %v3796_v8, 5  ;;  %v2283_v62 = vrot.slane %v2281_v27, 4  ;;  %v2892_v55 = vrot.slane %v10840_v7, 5  ;;  %v2274_v24 = vor.u32 %v2273_v47, %v2270_v52  ;;  %v10894_v8 = vld [vmem:[%s12265_s12 + $0x78] sm:$0xe] }
 0x22b   : > { %v2287_v27 = vshll.u32 %v13235_v20, 16  ;;  %v10839_v52 = vld [vmem:[%s12265_s12 + $0x78] sm:$0xf] }
 0x22c   : > { %v2284_v33 = vor.u32 %v2283_v62, %v13268_v46 }
 0x22d   : > { %v1900_v12 = vpop.f32.mrf.mxu0 }
 0x22e   : > { %v13244_v11 = vadd.f32 %v1900_v12, %v13119_v36  ;;  %v2265_v36 = vrot.slane %v2263_v63, 5 }
 0x22f   : > { %11130 = vmatmul.msk.bf16.gmra.mxu3 %vm865_vm7, %v4054_v5 }
 0x230   : > { %10873 = vmatmul.msk.bf16.gmra.mxu0 %vm865_vm7, %v2551_v23  ;;  %v11095_v23 = vld [vmem:[%s12265_s12 + $0x88] sm:$0xf]  ;;  %10930 = vmatmul.msk.bf16.gmra.mxu1 %vm865_vm7, %v2999_v14  ;;  %v2266_v40 = vsel %vm12287_vm6, %v2261_v22, %v2265_v36  ;;  %v4130_v10 = vpop.f32.mrf.mxu3  ;;  %v3799_v14 = vor.u32 %v3798_v13, %v3795_v54  ;;  %v3812_v36 = vshll.u32 %v11096_v2, 16  ;;  %v3398_v25 = vpop.f32.mrf.mxu2 }
 0x231   : > { %v3802_v12 = vshll.u32 %v11095_v23, 16  ;;  %v3806_v63 = vshrl.u32 %v11095_v23, 16  ;;  %v2524_v5 = vunpack.c.l.b16 %v2266_v40  ;;  %v11963_v10 = vld [vmem:[%s12265_s12 + $0x84] sm:$0xff] }
 0x232   : > { %v3800_v23 = vrot.slane %v3799_v14, 4  ;;  %v3814_v3 = vrot.slane %v3812_v36, 5  ;;  %v2285_v36 = vrot.slane %v2284_v33, 4  ;;  %v11097_v33 = vld [vmem:[%s12265_s12 + $0x90] sm:$0xf] }
 0x233   : > { %v3804_v6 = vrot.slane %v3802_v12, 5  ;;  %v3808_v22 = vrot.slane %v3806_v63, 4  ;;  %v10912_v12 = vrot.slane %v10894_v8, 9  ;;  %v2552_v40 = vpack.c.b16 %v2524_v5, %v2523_v53  ;;  %v13276_v63 = vld [vmem:[%s12265_s12 + $0x80] sm:$0x1] }
 0x234   : > { %v2895_v62 = vrot.slane %v13276_v63, 5  ;;  %v2301_v8 = vshll.u32 %v10840_v7, 16 }
 0x235   : > { %v1902_v38 = vpop.f32.mrf.mxu0  ;;  %v3809_v16 = vor.u32 %v3808_v22, %v3804_v6  ;;  %v3805_v2 = vsel %vm12287_vm6, %v3800_v23, %v3804_v6  ;;  %v2893_v14 = vsel %vm12281_vm5, %v10912_v12, %v2892_v55  ;;  %v2275_v22 = vrot.slane %v2274_v24, 4 }
 0x236   : > { %v13265_v60 = vadd.f32 %v1902_v38, %v13139_v15  ;;  %v3077_v15 = vpop.f32.mrf.mxu1  ;;  %v2894_v38 = vrot.slane %v2892_v55, 4  ;;  %v4028_v47 = vunpack.c.l.b16 %v3805_v2  ;;  %v2973_v6 = vunpack.c.l.b16 %v2893_v14 }
 0x237   : > { %v3810_v54 = vrot.slane %v3809_v16, 4  ;;  %11058 = vmatmul.msk.bf16.gmra.mxu2 %vm865_vm7, %v11963_v10  ;;  %v2289_v15 = vrot.slane %v2287_v27, 5  ;;  %v2295_v16 = vshll.u32 %v10839_v52, 16  ;;  %v2305_v12 = vshrl.u32 %v10840_v7, 16 }
 0x238   : > { %v4132_v53 = vpop.f32.mrf.mxu3  ;;  %v2896_v55 = vsel %vm12281_vm5, %v2894_v38, %v2895_v62  ;;  %v2280_v27 = vsel %vm12287_vm6, %v2275_v22, %v13268_v46  ;;  %v3820_v7 = vshll.u32 %v11097_v33, 16 }
 0x239   : > { %v3815_v5 = vsel %vm12287_vm6, %v3810_v54, %v3814_v3  ;;  %v2974_v23 = vunpack.c.l.b16 %v2896_v55  ;;  %v13295_v3 = vpop.f32.mrf.mxu2  ;;  %v2290_v38 = vsel %vm12287_vm6, %v2285_v36, %v2289_v15  ;;  %v3817_v54 = vshrl.u32 %v11097_v33, 16 }
 0x23a   : > { %v4029_v25 = vunpack.c.l.b16 %v3815_v5  ;;  %v2297_v62 = vrot.slane %v2295_v16, 5  ;;  %v13306_v53 = vrot.slane %v2301_v8, 5  ;;  %v2307_v46 = vrot.slane %v2305_v12, 4 }
 0x23b   : > { %v3000_v2 = vpack.c.b16 %v2974_v23, %v2973_v6  ;;  %v11099_v6 = vld [vmem:[%s12265_s12 + $0x98] sm:$0x1]  ;;  %v3819_v36 = vrot.slane %v3817_v54, 4  ;;  %v3822_v15 = vrot.slane %v3820_v7, 5  ;;  %v2526_v23 = vunpack.c.l.b16 %v2290_v38 }
 0x23c   : > { %v4055_v10 = vpack.c.b16 %v4029_v25, %v4028_v47  ;;  %v2525_v25 = vunpack.c.l.b16 %v2280_v27  ;;  %v3836_v16 = vshll.u32 %v11099_v6, 16  ;;  %v11964_v6 = vld [vmem:[%s12265_s12 + $0x90] sm:$0xff] }
 0x23d   : > { %v1905_v13 = vpop.f32.mrf.mxu0 }
 0x23e   : > { %v13285_v20 = vadd.f32 %v1905_v13, %v13160_v56  ;;  %v2292_v56 = vshrl.u32 %v10839_v52, 16  ;;  %v13293_v24 = vpop.f32.mrf.mxu1  ;;  %v3838_v7 = vrot.slane %v3836_v16, 5 }
 0x23f   : > { %11131 = vmatmul.msk.bf16.gmra.mxu3 %vm865_vm7, %v4055_v10  ;;  %v13315_v10 = vld [vmem:[%s12265_s12 + $0x88] sm:$0xf] }
 0x240   : > { %10874 = vmatmul.msk.bf16.gmra.mxu0 %vm865_vm7, %v2552_v40  ;;  %v11098_v40 = vld [vmem:[%s12265_s12 + $0x94] sm:$0xf]  ;;  %10931 = vmatmul.msk.bf16.gmra.mxu1 %vm865_vm7, %v3000_v2  ;;  %v2294_v14 = vrot.slane %v2292_v56, 4  ;;  %v13311_v5 = vpop.f32.mrf.mxu3  ;;  %v3823_v2 = vor.u32 %v3822_v15, %v3819_v36  ;;  %v2899_v27 = vrot.slane %v13315_v10, 5  ;;  %v2553_v36 = vpack.c.b16 %v2526_v23, %v2525_v25  ;;  %v10842_v15 = vld [vmem:[%s12265_s12 + $0x84] sm:$0xf] }
 0x241   : > { %v3826_v13 = vshll.u32 %v11098_v40, 16  ;;  %v3830_v52 = vshrl.u32 %v11098_v40, 16  ;;  %v13320_v33 = vpop.f32.mrf.mxu2  ;;  %v2311_v40 = vshll.u32 %v13276_v63, 16  ;;  %v2316_v23 = vshrl.u32 %v10842_v15, 16 }
 0x242   : > { %v2298_v8 = vor.u32 %v2297_v62, %v2294_v14  ;;  %v3824_v38 = vrot.slane %v3823_v2, 4  ;;  %v13328_v14 = vld [vmem:[%s12265_s12 + $0x8c] sm:$0x1] }
 0x243   : > { %v3828_v55 = vrot.slane %v3826_v13, 5  ;;  %v3832_v56 = vrot.slane %v3830_v52, 4  ;;  %v10895_v13 = vld [vmem:[%s12265_s12 + $0x84] sm:$0xe]  ;;  %v2901_v52 = vrot.slane %v2899_v27, 4  ;;  %v2902_v2 = vrot.slane %v13328_v14, 5 }
 0x244   : > { %v2299_v51 = vrot.slane %v2298_v8, 4  ;;  %v2313_v16 = vrot.slane %v2311_v40, 5 }
 0x245   : > { %v1907_v47 = vpop.f32.mrf.mxu0  ;;  %v3833_v54 = vor.u32 %v3832_v56, %v3828_v55  ;;  %v3829_v62 = vsel %vm12287_vm6, %v3824_v38, %v3828_v55 }
 0x246   : > { %v13309_v22 = vadd.f32 %v1907_v47, %v13181_v30  ;;  %v2308_v30 = vor.u32 %v2307_v46, %v13306_v53  ;;  %v13318_v12 = vpop.f32.mrf.mxu1  ;;  %v10913_v47 = vrot.slane %v10895_v13, 9  ;;  %v4030_v19 = vunpack.c.l.b16 %v3829_v62 }
 0x247   : > { %v3834_v46 = vrot.slane %v3833_v54, 4  ;;  %11059 = vmatmul.msk.bf16.gmra.mxu2 %vm865_vm7, %v11964_v6  ;;  %v2318_v62 = vrot.slane %v2316_v23, 4  ;;  %v11102_v23 = vld [vmem:[%s12265_s12 + $0xa4] sm:$0x1] }
 0x248   : > { %v2900_v63 = vsel %vm12281_vm5, %v10913_v47, %v2899_v27  ;;  %v2309_v56 = vrot.slane %v2308_v30, 4  ;;  %v13335_v13 = vpop.f32.mrf.mxu3  ;;  %v2903_v27 = vsel %vm12281_vm5, %v2901_v52, %v2902_v2 }
 0x249   : > { %v3839_v25 = vsel %vm12287_vm6, %v3834_v46, %v3838_v7  ;;  %v2975_v55 = vunpack.c.l.b16 %v2900_v63  ;;  %v2976_v30 = vunpack.c.l.b16 %v2903_v27  ;;  %v13345_v54 = vpop.f32.mrf.mxu2  ;;  %v2304_v7 = vsel %vm12287_vm6, %v2299_v51, %v13306_v53 }
 0x24a   : > { %v4031_v8 = vunpack.c.l.b16 %v3839_v25  ;;  %v2314_v47 = vsel %vm12287_vm6, %v2309_v56, %v2313_v16  ;;  %v2329_v46 = vshrl.u32 %v13315_v10, 16  ;;  %v2527_v56 = vunpack.c.l.b16 %v2304_v7  ;;  %v12011_v7 = vld [vmem:[%s15839_s3 + $0xb8] sm:$0xff] }
 0x24b   : > { %v3001_v6 = vpack.c.b16 %v2976_v30, %v2975_v55  ;;  %v2528_v16 = vunpack.c.l.b16 %v2314_v47  ;;  %6711 = vmatpush.bf16.msra.mxu3 %v12011_v7 }
 0x24c   : > { %v4056_v38 = vpack.c.b16 %v4031_v8, %v4030_v19  ;;  %v11101_v19 = vld [vmem:[%s12265_s12 + $0xa0] sm:$0xf] }
 0x24d   : > { %v2629_v42 = vpop.f32.mrf.mxu0  ;;  %v3850_v51 = vshll.u32 %v11101_v19, 16  ;;  %v3854_v53 = vshrl.u32 %v11101_v19, 16 }
 0x24e   : > { %v2319_v42 = vshll.u32 %v10842_v15, 16  ;;  %v13343_v40 = vpop.f32.mrf.mxu1  ;;  %v11100_v15 = vld [vmem:[%s12265_s12 + $0x9c] sm:$0xf] }
 0x24f   : > { %11132 = vmatmul.msk.bf16.gmra.mxu3 %vm865_vm7, %v4056_v38  ;;  %v3841_v63 = vshrl.u32 %v11100_v15, 16  ;;  %v3844_v2 = vshll.u32 %v11100_v15, 16  ;;  %v2331_v38 = vrot.slane %v2329_v46, 4  ;;  %v3852_v47 = vrot.slane %v3850_v51, 5  ;;  %v12003_v46 = vld [vmem:[%s15839_s3 + $0x78] sm:$0xff] }
 0x250   : > { %10875 = vmatmul.msk.bf16.gmra.mxu0 %vm865_vm7, %v2553_v36  ;;  %v2321_v52 = vrot.slane %v2319_v42, 5  ;;  %v2325_v36 = vshll.u32 %v13315_v10, 16  ;;  %10932 = vmatmul.msk.bf16.gmra.mxu1 %vm865_vm7, %v3001_v6  ;;  %v11995_v10 = vld [vmem:[%s15839_s3 + $0x38] sm:$0xff]  ;;  %v3856_v6 = vrot.slane %v3854_v53, 4  ;;  %v3860_v15 = vshll.u32 %v11102_v23, 16 }
 0x251   : > { %v3843_v42 = vrot.slane %v3841_v63, 4  ;;  %v3846_v30 = vrot.slane %v3844_v2, 5  ;;  %6333 = vmatpush.bf16.msra.mxu2 %v11995_v10  ;;  %v10896_v51 = vld [vmem:[%s12265_s12 + $0x90] sm:$0xe]  ;;  %v2335_v23 = vshll.u32 %v13328_v14, 16  ;;  %6100 = vmatpush.bf16.msra.mxu1 %v12003_v46 }
 0x252   : > { %v13358_v55 = vpop.f32.mrf.mxu3  ;;  %v2322_v8 = vor.u32 %v2321_v52, %v2318_v62  ;;  %v13364_v27 = vrot.slane %v2325_v36, 5  ;;  %v10846_v62 = vld [vmem:[%s12265_s12 + $0x94] sm:$0xf]  ;;  %v2554_v36 = vpack.c.b16 %v2528_v16, %v2527_v56  ;;  %v3857_v63 = vor.u32 %v3856_v6, %v3852_v47 }
 0x253   : > { %v3847_v52 = vor.u32 %v3846_v30, %v3843_v42  ;;  %v3862_v2 = vrot.slane %v3860_v15, 5  ;;  %v2906_v53 = vrot.slane %v10846_v62, 5  ;;  %v10914_v50 = vrot.slane %v10896_v51, 9  ;;  %v13383_v42 = vld [vmem:[%s12265_s12 + $0x98] sm:$0x1] }
 0x254   : > { %v2323_v10 = vrot.slane %v2322_v8, 4  ;;  %v2332_v0 = vor.u32 %v2331_v38, %v13364_v27  ;;  %v2340_v56 = vshrl.u32 %v10845_v37, 16  ;;  %v3858_v16 = vrot.slane %v3857_v63, 4 }
 0x255   : > { %v2631_v25 = vpop.f32.mrf.mxu0  ;;  %v3848_v45 = vrot.slane %v3847_v52, 4  ;;  %v2908_v30 = vrot.slane %v2906_v53, 4  ;;  %v2907_v8 = vsel %vm12281_vm5, %v10914_v50, %v2906_v53  ;;  %v2909_v14 = vrot.slane %v13383_v42, 5 }
 0x256   : > { %v13369_v19 = vpop.f32.mrf.mxu1  ;;  %v13371_v25 = vpop.f32.mrf.mxu2  ;;  %v2349_v52 = vshll.u32 %v10846_v62, 16  ;;  %v3863_v46 = vsel %vm12287_vm6, %v3858_v16, %v3862_v2  ;;  %v2353_v37 = vshrl.u32 %v10846_v62, 16  ;;  %v2977_v50 = vunpack.c.l.b16 %v2907_v8 }
 0x257   : > { %v3853_v6 = vsel %vm12287_vm6, %v3848_v45, %v3852_v47  ;;  %11060 = vmatmul.msk.bf16.gmra.mxu2 %vm865_vm7, %v11965_v31  ;;  %v4033_v51 = vunpack.c.l.b16 %v3863_v46  ;;  %v2910_v45 = vsel %vm12281_vm5, %v2908_v30, %v2909_v14  ;;  %v2337_v53 = vrot.slane %v2335_v23, 5  ;;  %v11104_v23 = vld [vmem:[%s12265_s12 + $0xac] sm:$0xf] }
 0x258   : > { %v4032_v63 = vunpack.c.l.b16 %v3853_v6  ;;  %v2978_v31 = vunpack.c.l.b16 %v2910_v45  ;;  %v2328_v16 = vsel %vm12287_vm6, %v2323_v10, %v13364_v27  ;;  %v11103_v6 = vld [vmem:[%s12265_s12 + $0xa8] sm:$0xf]  ;;  %v13409_v8 = vrot.slane %v2349_v52, 5 }
 0x259   : > { %v3865_v27 = vshrl.u32 %v11103_v6, 16  ;;  %v3868_v10 = vshll.u32 %v11103_v6, 16  ;;  %v2529_v52 = vunpack.c.l.b16 %v2328_v16 }
 0x25a   : > { %v13391_v38 = vpop.f32.mrf.mxu3  ;;  %v4057_v58 = vpack.c.b16 %v4033_v51, %v4032_v63  ;;  %v3002_v30 = vpack.c.b16 %v2978_v31, %v2977_v50  ;;  %v2359_v50 = vshll.u32 %v13383_v42, 16  ;;  %v3878_v31 = vshrl.u32 %v11104_v23, 16 }
 0x25b   : > { %v3867_v63 = vrot.slane %v3865_v27, 4 }
 0x25c   : > { %v3880_v42 = vrot.slane %v3878_v31, 4 }
 0x25d   : > { %v2634_v7 = vpop.f32.mrf.mxu0 }
 0x25e   : > { %v2721_v15 = vadd.f32 %v2634_v7, %v13244_v11  ;;  %v2333_v11 = vrot.slane %v2332_v0, 4  ;;  %v13400_v7 = vpop.f32.mrf.mxu1  ;;  %v13402_v2 = vpop.f32.mrf.mxu2  ;;  %v2355_v0 = vrot.slane %v2353_v37, 4  ;;  %v3870_v37 = vrot.slane %v3868_v10, 5 }
 0x25f   : > { %11133 = vmatmul.msk.bf16.gmra.mxu3 %vm865_vm7, %v4057_v58  ;;  %v11105_v58 = vld [vmem:[%s12265_s12 + $0xb0] sm:$0x1] }
 0x260   : > { %v3167_v47 = vadd.f32 %v13293_v24, %v2721_v15  ;;  %10876 = vmatmul.msk.bf16.gmra.mxu0 %vm865_vm7, %v2554_v36  ;;  %v2342_v24 = vrot.slane %v2340_v56, 4  ;;  %v2345_v36 = vrot.slane %v2343_v39, 5  ;;  %10933 = vmatmul.msk.bf16.gmra.mxu1 %vm865_vm7, %v3002_v30  ;;  %v3874_v15 = vshll.u32 %v11104_v23, 16 }
 0x261   : > { %v2356_v45 = vor.u32 %v2355_v0, %v13409_v8  ;;  %v10897_v0 = vld [vmem:[%s12265_s12 + $0x9c] sm:$0xe] }
 0x262   : > { %v3488_v62 = vadd.f32 %v13295_v3, %v3167_v47  ;;  %v2338_v3 = vsel %vm12287_vm6, %v2333_v11, %v2337_v53  ;;  %v13420_v46 = vpop.f32.mrf.mxu3  ;;  %v2346_v51 = vor.u32 %v2345_v36, %v2342_v24  ;;  %v13427_v11 = vld [vmem:[%s12265_s12 + $0xa0] sm:$0xf]  ;;  %v3871_v53 = vor.u32 %v3870_v37, %v3867_v63  ;;  %v13441_v63 = vld [vmem:[%s12265_s12 + $0xa4] sm:$0x1] }
 0x263   : > { %v3876_v30 = vrot.slane %v3874_v15, 5  ;;  %v2913_v6 = vrot.slane %v13427_v11, 5  ;;  %v10915_v27 = vrot.slane %v10897_v0, 9 }
 0x264   : > { %v13414_v14 = vadd.f32 %v13311_v5, %v3488_v62  ;;  %v2530_v5 = vunpack.c.l.b16 %v2338_v3  ;;  %v3872_v36 = vrot.slane %v3871_v53, 4  ;;  %v2347_v3 = vrot.slane %v2346_v51, 4 }
 0x265   : > { %v2636_v56 = vpop.f32.mrf.mxu0  ;;  %v2915_v10 = vrot.slane %v2913_v6, 4 }
 0x266   : > { %v2722_v39 = vadd.f32 %v2636_v56, %v13265_v60  ;;  %v3884_v60 = vshll.u32 %v11105_v58, 16  ;;  %v13429_v62 = vpop.f32.mrf.mxu1  ;;  %v13431_v16 = vpop.f32.mrf.mxu2  ;;  %v2357_v56 = vrot.slane %v2356_v45, 4  ;;  %v11966_v58 = vld [vmem:[%s12265_s12 + $0xa8] sm:$0xff] }
 0x267   : > { %11061 = vmatmul.msk.bf16.gmra.mxu2 %vm865_vm7, %v11966_v58  ;;  %v11106_v58 = vld [vmem:[%s12265_s12 + $0xb4] sm:$0xf] }
 0x268   : > { %v3168_v47 = vadd.f32 %v13318_v12, %v2722_v39  ;;  %v2555_v12 = vpack.c.b16 %v2530_v5, %v2529_v52  ;;  %v2361_v39 = vrot.slane %v2359_v50, 5  ;;  %v3886_v15 = vrot.slane %v3884_v60, 5  ;;  %v10848_v50 = vld [vmem:[%s12265_s12 + $0x9c] sm:$0xf] }
 0x269   : > { %v2914_v52 = vsel %vm12281_vm5, %v10915_v27, %v2913_v6  ;;  %v2916_v5 = vrot.slane %v13441_v63, 5 }
 0x26a   : > { %v3489_v24 = vadd.f32 %v13320_v33, %v3168_v47  ;;  %v3877_v33 = vsel %vm12287_vm6, %v3872_v36, %v3876_v30  ;;  %v3881_v47 = vor.u32 %v3880_v42, %v3876_v30  ;;  %v2979_v45 = vunpack.c.l.b16 %v2914_v52 }
 0x26b   : > { %v2917_v31 = vsel %vm12281_vm5, %v2915_v10, %v2916_v5  ;;  %v4034_v30 = vunpack.c.l.b16 %v3877_v33  ;;  %v3889_v33 = vshrl.u32 %v11106_v58, 16 }
 0x26c   : > { %v13437_v23 = vadd.f32 %v13335_v13, %v3489_v24  ;;  %v13449_v13 = vpop.f32.mrf.mxu3  ;;  %v3882_v53 = vrot.slane %v3881_v47, 4  ;;  %v2980_v6 = vunpack.c.l.b16 %v2917_v31  ;;  %v2362_v24 = vsel %vm12287_vm6, %v2357_v56, %v2361_v39 }
 0x26d   : > { %v2639_v37 = vpop.f32.mrf.mxu0  ;;  %v3892_v47 = vshll.u32 %v11106_v58, 16  ;;  %v2532_v5 = vunpack.c.l.b16 %v2362_v24 }
 0x26e   : > { %v2723_v51 = vadd.f32 %v2639_v37, %v13285_v20  ;;  %v2352_v20 = vsel %vm12287_vm6, %v2347_v3, %v13409_v8  ;;  %v13462_v36 = vpop.f32.mrf.mxu1  ;;  %v3887_v42 = vsel %vm12287_vm6, %v3882_v53, %v3886_v15  ;;  %v13466_v0 = vpop.f32.mrf.mxu2  ;;  %v3003_v10 = vpack.c.b16 %v2980_v6, %v2979_v45  ;;  %v11107_v15 = vld [vmem:[%s12265_s12 + $0xb8] sm:$0xf] }
 0x26f   : > { %v4035_v27 = vunpack.c.l.b16 %v3887_v42  ;;  %v2367_v37 = vshll.u32 %v10848_v50, 16  ;;  %v2373_v8 = vshll.u32 %v13427_v11, 16  ;;  %v2377_v3 = vshrl.u32 %v13427_v11, 16  ;;  %v11108_v11 = vld [vmem:[%s12265_s12 + $0xbc] sm:$0x1] }
 0x270   : > { %v3169_v60 = vadd.f32 %v13343_v40, %v2723_v51  ;;  %10877 = vmatmul.msk.bf16.gmra.mxu0 %vm865_vm7, %v2555_v12  ;;  %v2364_v12 = vshrl.u32 %v10848_v50, 16  ;;  %10934 = vmatmul.msk.bf16.gmra.mxu1 %vm865_vm7, %v3003_v10  ;;  %v2531_v52 = vunpack.c.l.b16 %v2352_v20  ;;  %v3894_v53 = vrot.slane %v3892_v47, 5 }
 0x271   : > { %v4058_v39 = vpack.c.b16 %v4035_v27, %v4034_v30  ;;  %v2369_v31 = vrot.slane %v2367_v37, 5  ;;  %v2379_v30 = vrot.slane %v2377_v3, 4  ;;  %v3898_v6 = vshll.u32 %v11107_v15, 16  ;;  %v13490_v27 = vld [vmem:[%s12265_s12 + $0xac] sm:$0xf]  ;;  %v11994_v37 = vld [vmem:[%s15839_s3 + $0x30] sm:$0xff] }
 0x272   : > { %v3490_v40 = vadd.f32 %v13345_v54, %v3169_v60  ;;  %v2366_v45 = vrot.slane %v2364_v12, 4  ;;  %v13482_v60 = vrot.slane %v2373_v8, 5  ;;  %v3902_v42 = vshrl.u32 %v11107_v15, 16  ;;  %v10898_v3 = vld [vmem:[%s12265_s12 + $0xa8] sm:$0xe]  ;;  %6334 = vmatpush.bf16.msra.mxu2 %v11994_v37 }
 0x273   : > { %11134 = vmatmul.msk.bf16.gmra.mxu3 %vm865_vm7, %v4058_v39  ;;  %v3900_v10 = vrot.slane %v3898_v6, 5  ;;  %v2920_v47 = vrot.slane %v13490_v27, 5 }
 0x274   : > { %v13473_v56 = vadd.f32 %v13358_v55, %v3490_v40  ;;  %v13479_v50 = vpop.f32.mrf.mxu3  ;;  %v3891_v55 = vrot.slane %v3889_v33, 4  ;;  %v2370_v39 = vor.u32 %v2369_v31, %v2366_v45  ;;  %v2380_v15 = vor.u32 %v2379_v30, %v13482_v60  ;;  %v13508_v31 = vld [vmem:[%s12265_s12 + $0xb0] sm:$0x1] }
 0x275   : > { %v2641_v54 = vpop.f32.mrf.mxu0  ;;  %v10916_v33 = vrot.slane %v10898_v3, 9 }
 0x276   : > { %v2724_v51 = vadd.f32 %v2641_v54, %v13309_v22  ;;  %v3895_v24 = vor.u32 %v3894_v53, %v3891_v55  ;;  %v3908_v22 = vshll.u32 %v11108_v11, 16  ;;  %v13485_v40 = vpop.f32.mrf.mxu1  ;;  %v13487_v12 = vpop.f32.mrf.mxu2  ;;  %v12010_v11 = vld [vmem:[%s15839_s3 + $0xb0] sm:$0xff] }
 0x277   : > { %v11967_v55 = vld [vmem:[%s12265_s12 + $0xb4] sm:$0xff]  ;;  %6712 = vmatpush.bf16.msra.mxu3 %v12010_v11 }
 0x278   : > { %v3170_v20 = vadd.f32 %v13369_v19, %v2724_v51  ;;  %v3896_v8 = vrot.slane %v3895_v24, 4  ;;  %v3904_v19 = vrot.slane %v3902_v42, 4  ;;  %v2556_v51 = vpack.c.b16 %v2532_v5, %v2531_v52  ;;  %11062 = vmatmul.msk.bf16.gmra.mxu2 %vm865_vm7, %v11967_v55  ;;  %v10851_v24 = vld [vmem:[%s12265_s12 + $0xa8] sm:$0xf] }
 0x279   : > { %v3910_v53 = vrot.slane %v3908_v22, 5  ;;  %v2922_v52 = vrot.slane %v2920_v47, 4  ;;  %v2923_v42 = vrot.slane %v13508_v31, 5  ;;  %v2371_v22 = vrot.slane %v2370_v39, 4 }
 0x27a   : > { %v3491_v58 = vadd.f32 %v13371_v25, %v3170_v20  ;;  %v2383_v25 = vshll.u32 %v13441_v63, 16  ;;  %v3901_v30 = vsel %vm12287_vm6, %v3896_v8, %v3900_v10  ;;  %v3905_v6 = vor.u32 %v3904_v19, %v3900_v10  ;;  %v12002_v20 = vld [vmem:[%s15839_s3 + $0x70] sm:$0xff] }
 0x27b   : > { %v2381_v10 = vrot.slane %v2380_v15, 4  ;;  %6101 = vmatpush.bf16.msra.mxu1 %v12002_v20  ;;  %v4036_v19 = vunpack.c.l.b16 %v3901_v30  ;;  %v2924_v3 = vsel %vm12281_vm5, %v2922_v52, %v2923_v42  ;;  %v2391_v11 = vshll.u32 %v10851_v24, 16  ;;  %v11109_v30 = vld [vmem:[%s12265_s12 + $0xc0] sm:$0xf] }
 0x27c   : > { %v13500_v54 = vadd.f32 %v13391_v38, %v3491_v58  ;;  %v2921_v38 = vsel %vm12281_vm5, %v10916_v33, %v2920_v47  ;;  %v13515_v5 = vpop.f32.mrf.mxu3  ;;  %v3906_v58 = vrot.slane %v3905_v6, 4  ;;  %v2388_v47 = vshrl.u32 %v10851_v24, 16 }
 0x27d   : > { %v2644_v45 = vpop.f32.mrf.mxu0  ;;  %v2981_v37 = vunpack.c.l.b16 %v2921_v38  ;;  %v3913_v20 = vshrl.u32 %v11109_v30, 16 }
 0x27e   : > { %v2725_v63 = vadd.f32 %v2644_v45, %v12625_v9  ;;  %v2385_v9 = vrot.slane %v2383_v25, 5  ;;  %v13527_v33 = vpop.f32.mrf.mxu1  ;;  %v3911_v39 = vsel %vm12287_vm6, %v3906_v58, %v3910_v53  ;;  %v13531_v15 = vpop.f32.mrf.mxu2  ;;  %v2401_v25 = vshrl.u32 %v13490_v27, 16 }
 0x27f   : > { %v4037_v45 = vunpack.c.l.b16 %v3911_v39  ;;  %v2376_v53 = vsel %vm12287_vm6, %v2371_v22, %v13482_v60  ;;  %v2390_v42 = vrot.slane %v2388_v47, 4  ;;  %v3916_v58 = vshll.u32 %v11109_v30, 16  ;;  %v11111_v22 = vld [vmem:[%s12265_s12 + $0xc8] sm:$0x1] }
 0x280   : > { %v3171_v8 = vadd.f32 %v13400_v7, %v2725_v63  ;;  %10878 = vmatmul.msk.bf16.gmra.mxu0 %vm865_vm7, %v2556_v51  ;;  %v2982_v7 = vunpack.c.l.b16 %v2924_v3  ;;  %v2397_v51 = vshll.u32 %v13490_v27, 16  ;;  %v11110_v63 = vld [vmem:[%s12265_s12 + $0xc4] sm:$0xf]  ;;  %v2393_v27 = vrot.slane %v2391_v11, 5 }
 0x281   : > { %v4059_v52 = vpack.c.b16 %v4037_v45, %v4036_v19  ;;  %v3915_v19 = vrot.slane %v3913_v20, 4  ;;  %v2533_v3 = vunpack.c.l.b16 %v2376_v53  ;;  %v3926_v39 = vshrl.u32 %v11110_v63, 16  ;;  %v10855_v53 = vld [vmem:[%s12265_s12 + $0xb8] sm:$0xf] }
 0x282   : > { %v3492_v55 = vadd.f32 %v13402_v2, %v3171_v8  ;;  %v3004_v6 = vpack.c.b16 %v2982_v7, %v2981_v37  ;;  %v2386_v2 = vsel %vm12287_vm6, %v2381_v10, %v2385_v9  ;;  %v13548_v37 = vrot.slane %v2397_v51, 5 }
 0x283   : > { %v2403_v8 = vrot.slane %v2401_v25, 4  ;;  %11135 = vmatmul.msk.bf16.gmra.mxu3 %vm865_vm7, %v4059_v52  ;;  %v3918_v10 = vrot.slane %v3916_v58, 5  ;;  %v3922_v9 = vshll.u32 %v11110_v63, 16  ;;  %v2534_v11 = vunpack.c.l.b16 %v2386_v2  ;;  %v11968_v58 = vld [vmem:[%s12265_s12 + $0xc0] sm:$0xff] }
 0x284   : > { %v13538_v38 = vadd.f32 %v13420_v46, %v3492_v55  ;;  %10935 = vmatmul.msk.bf16.gmra.mxu1 %vm865_vm7, %v3004_v6  ;;  %v13551_v60 = vpop.f32.mrf.mxu3  ;;  %v3932_v7 = vshll.u32 %v11111_v22, 16  ;;  %v3928_v52 = vrot.slane %v3926_v39, 4  ;;  %v2407_v63 = vshll.u32 %v13508_v31, 16 }
 0x285   : > { %v2646_v24 = vpop.f32.mrf.mxu0  ;;  %v3919_v25 = vor.u32 %v3918_v10, %v3915_v19  ;;  %v3924_v45 = vrot.slane %v3922_v9, 5  ;;  %v2404_v6 = vor.u32 %v2403_v8, %v13548_v37  ;;  %v2927_v2 = vrot.slane %v10855_v53, 5  ;;  %v13570_v8 = vld [vmem:[%s12265_s12 + $0xbc] sm:$0x1] }
 0x286   : > { %v2726_v46 = vadd.f32 %v2646_v24, %v12655_v43  ;;  %v2394_v43 = vor.u32 %v2393_v27, %v2390_v42  ;;  %v13555_v55 = vpop.f32.mrf.mxu1  ;;  %v13557_v51 = vpop.f32.mrf.mxu2  ;;  %v2557_v27 = vpack.c.b16 %v2534_v11, %v2533_v3  ;;  %v3934_v19 = vrot.slane %v3932_v7, 5 }
 0x287   : > { %v3920_v20 = vrot.slane %v3919_v25, 4  ;;  %v3929_v22 = vor.u32 %v3928_v52, %v3924_v45  ;;  %v2930_v11 = vrot.slane %v13570_v8, 5  ;;  %v2409_v7 = vrot.slane %v2407_v63, 5 }
 0x288   : > { %v3172_v47 = vadd.f32 %v13429_v62, %v2726_v46  ;;  %v10899_v62 = vld [vmem:[%s12265_s12 + $0xb4] sm:$0xe]  ;;  %v2395_v10 = vrot.slane %v2394_v43, 4  ;;  %11063 = vmatmul.msk.bf16.gmra.mxu2 %vm865_vm7, %v11968_v58 }
 0x289   : > { %v10917_v24 = vrot.slane %v10899_v62, 9  ;;  %v10854_v46 = vld [vmem:[%s12265_s12 + $0xb4] sm:$0xf]  ;;  %v3925_v9 = vsel %vm12287_vm6, %v3920_v20, %v3924_v45  ;;  %v3930_v3 = vrot.slane %v3929_v22, 4  ;;  %v2421_v22 = vshll.u32 %v10855_v53, 16 }
 0x28a   : > { %v3493_v30 = vadd.f32 %v13431_v16, %v3172_v47  ;;  %v2929_v47 = vrot.slane %v2927_v2, 4  ;;  %v2412_v43 = vshrl.u32 %v10854_v46, 16  ;;  %v2415_v62 = vshll.u32 %v10854_v46, 16 }
 0x28b   : > { %v2928_v31 = vsel %vm12281_vm5, %v10917_v24, %v2927_v2 }
 0x28c   : > { %v13565_v42 = vadd.f32 %v13449_v13, %v3493_v30  ;;  %v2405_v13 = vrot.slane %v2404_v6, 4  ;;  %v13577_v25 = vpop.f32.mrf.mxu3  ;;  %v4038_v30 = vunpack.c.l.b16 %v3925_v9  ;;  %v2983_v52 = vunpack.c.l.b16 %v2928_v31  ;;  %v11113_v31 = vld [vmem:[%s12265_s12 + $0xd0] sm:$0xf] }
 0x28d   : > { %v2649_v16 = vpop.f32.mrf.mxu0  ;;  %v2931_v6 = vsel %vm12281_vm5, %v2929_v47, %v2930_v11 }
 0x28e   : > { %v2727_v39 = vadd.f32 %v2649_v16, %v12674_v59  ;;  %v3935_v59 = vsel %vm12287_vm6, %v3930_v3, %v3934_v19  ;;  %v13587_v20 = vpop.f32.mrf.mxu1  ;;  %v13589_v63 = vpop.f32.mrf.mxu2  ;;  %v2984_v2 = vunpack.c.l.b16 %v2931_v6  ;;  %v11112_v16 = vld [vmem:[%s12265_s12 + $0xcc] sm:$0xf]  ;;  %v2410_v46 = vsel %vm12287_vm6, %v2405_v13, %v2409_v7 }
 0x28f   : > { %v4039_v24 = vunpack.c.l.b16 %v3935_v59  ;;  %v2417_v3 = vrot.slane %v2415_v62, 5  ;;  %v13606_v13 = vrot.slane %v2421_v22, 5  ;;  %v13619_v22 = vld [vmem:[%s12265_s12 + $0xc4] sm:$0xf] }
 0x290   : > { %v3173_v45 = vadd.f32 %v13462_v36, %v2727_v39  ;;  %10879 = vmatmul.msk.bf16.gmra.mxu0 %vm865_vm7, %v2557_v27  ;;  %v2425_v36 = vshrl.u32 %v10855_v53, 16  ;;  %v2400_v27 = vsel %vm12287_vm6, %v2395_v10, %v13548_v37  ;;  %v3005_v9 = vpack.c.b16 %v2984_v2, %v2983_v52 }
 0x291   : > { %v4060_v19 = vpack.c.b16 %v4039_v24, %v4038_v30  ;;  %v2414_v39 = vrot.slane %v2412_v43, 4  ;;  %v3940_v53 = vshll.u32 %v11112_v16, 16  ;;  %v1207_v37 = vadd.f32 %v12641_v17, %v12734_v4  ;;  %v11114_v43 = vld [vmem:[%s12265_s12 + $0xd4] sm:$0x1] }
 0x292   : > { %v3494_v58 = vadd.f32 %v13466_v0, %v3173_v45  ;;  %v3937_v0 = vshrl.u32 %v11112_v16, 16  ;;  %v3946_v45 = vshll.u32 %v11113_v31, 16  ;;  %v2427_v7 = vrot.slane %v2425_v36, 4 }
 0x293   : > { %11136 = vmatmul.msk.bf16.gmra.mxu3 %vm865_vm7, %v4060_v19  ;;  %v2535_v30 = vunpack.c.l.b16 %v2400_v27  ;;  %v2536_v52 = vunpack.c.l.b16 %v2410_v46  ;;  %v3942_v59 = vrot.slane %v3940_v53, 5  ;;  %v2418_v24 = vor.u32 %v2417_v3, %v2414_v39  ;;  %v10900_v19 = vld [vmem:[%s12265_s12 + $0xc0] sm:$0xe]  ;;  %v11969_v53 = vld [vmem:[%s12265_s12 + $0xcc] sm:$0xff] }
 0x294   : > { %v13600_v47 = vadd.f32 %v13479_v50, %v3494_v58  ;;  %10936 = vmatmul.msk.bf16.gmra.mxu1 %vm865_vm7, %v3005_v9  ;;  %v13609_v50 = vpop.f32.mrf.mxu3  ;;  %v3939_v62 = vrot.slane %v3937_v0, 4  ;;  %v3948_v17 = vrot.slane %v3946_v45, 5  ;;  %v3950_v4 = vshrl.u32 %v11113_v31, 16 }
 0x295   : > { %v2651_v11 = vpop.f32.mrf.mxu0  ;;  %v3956_v16 = vshll.u32 %v11114_v43, 16  ;;  %v2428_v46 = vor.u32 %v2427_v7, %v13606_v13  ;;  %v2934_v9 = vrot.slane %v13619_v22, 5  ;;  %v2558_v31 = vpack.c.b16 %v2536_v52, %v2535_v30 }
 0x296   : > { %v2728_v10 = vadd.f32 %v2651_v11, %v12704_v49  ;;  %v2431_v49 = vshll.u32 %v13570_v8, 16  ;;  %v13614_v2 = vpop.f32.mrf.mxu1  ;;  %v13616_v58 = vpop.f32.mrf.mxu2  ;;  %v3943_v36 = vor.u32 %v3942_v59, %v3939_v62  ;;  %v1675_v8 = vadd.f32 %v12645_v32, %v1207_v37  ;;  %v13631_v62 = vld [vmem:[%s12265_s12 + $0xc8] sm:$0x1] }
 0x297   : > { %v10918_v3 = vrot.slane %v10900_v19, 9  ;;  %v2419_v11 = vrot.slane %v2418_v24, 4  ;;  %v2936_v37 = vrot.slane %v2934_v9, 4  ;;  %v11993_v59 = vld [vmem:[%s15839_s3 + $0x28] sm:$0xff]  ;;  %v2937_v24 = vrot.slane %v13631_v62, 5 }
 0x298   : > { %v3174_v6 = vadd.f32 %v13485_v40, %v2728_v10  ;;  %v3952_v40 = vrot.slane %v3950_v4, 4  ;;  %v3944_v39 = vrot.slane %v3943_v36, 4  ;;  %v3958_v10 = vrot.slane %v3956_v16, 5  ;;  %11064 = vmatmul.msk.bf16.gmra.mxu2 %vm865_vm7, %v11969_v53  ;;  %v12009_v16 = vld [vmem:[%s15839_s3 + $0xa8] sm:$0xff] }
 0x299   : > { %v2433_v43 = vrot.slane %v2431_v49, 5  ;;  %v2935_v32 = vsel %vm12281_vm5, %v10918_v3, %v2934_v9  ;;  %6335 = vmatpush.bf16.msra.mxu2 %v11993_v59  ;;  %v1996_v9 = vadd.f32 %v12652_v35, %v1675_v8  ;;  %6713 = vmatpush.bf16.msra.mxu3 %v12009_v16  ;;  %v12001_v53 = vld [vmem:[%s15839_s3 + $0x68] sm:$0xff]  ;;  %v11116_v35 = vld [vmem:[%s12265_s12 + $0xdc] sm:$0xf]  ;;  %v2449_v8 = vshrl.u32 %v13619_v22, 16 }
 0x29a   : > { %v3495_v27 = vadd.f32 %v13487_v12, %v3174_v6  ;;  %v3953_v45 = vor.u32 %v3952_v40, %v3948_v17  ;;  %v3949_v7 = vsel %vm12287_vm6, %v3944_v39, %v3948_v17  ;;  %v2985_v17 = vunpack.c.l.b16 %v2935_v32  ;;  %v11115_v32 = vld [vmem:[%s12265_s12 + $0xd8] sm:$0xf]  ;;  %6102 = vmatpush.bf16.msra.mxu1 %v12001_v53 }
 0x29b   : > { %v4040_v4 = vunpack.c.l.b16 %v3949_v7  ;;  %v2424_v39 = vsel %vm12287_vm6, %v2419_v11, %v13606_v13  ;;  %v2445_v13 = vshll.u32 %v13619_v22, 16  ;;  %v3961_v11 = vshrl.u32 %v11115_v32, 16 }
 0x29c   : > { %v13627_v0 = vadd.f32 %v13515_v5, %v3495_v27  ;;  %v2429_v5 = vrot.slane %v2428_v46, 4  ;;  %v13638_v52 = vpop.f32.mrf.mxu3  ;;  %v3954_v6 = vrot.slane %v3953_v45, 4  ;;  %v2938_v27 = vsel %vm12281_vm5, %v2936_v37, %v2937_v24  ;;  %v11117_v24 = vld [vmem:[%s12265_s12 + $0xe0] sm:$0x1] }
 0x29d   : > { %v2654_v12 = vpop.f32.mrf.mxu0  ;;  %v2986_v19 = vunpack.c.l.b16 %v2938_v27  ;;  %v3964_v37 = vshll.u32 %v11115_v32, 16  ;;  %v2537_v59 = vunpack.c.l.b16 %v2424_v39  ;;  %v3974_v27 = vshrl.u32 %v11116_v35, 16 }
 0x29e   : > { %v2729_v30 = vadd.f32 %v2654_v12, %v12723_v48  ;;  %v10857_v48 = vld [vmem:[%s12265_s12 + $0xc0] sm:$0xf]  ;;  %v3959_v36 = vsel %vm12287_vm6, %v3954_v6, %v3958_v10  ;;  %v13655_v46 = vpop.f32.mrf.mxu1  ;;  %v2434_v3 = vsel %vm12287_vm6, %v2429_v5, %v2433_v43  ;;  %v3980_v39 = vshll.u32 %v11117_v24, 16 }
 0x29f   : > { %v4041_v40 = vunpack.c.l.b16 %v3959_v36  ;;  %v2436_v45 = vshrl.u32 %v10857_v48, 16  ;;  %v2439_v10 = vshll.u32 %v10857_v48, 16  ;;  %v3006_v7 = vpack.c.b16 %v2986_v19, %v2985_v17 }
 0x2a0   : > { %v3175_v49 = vadd.f32 %v13527_v33, %v2729_v30  ;;  %10880 = vmatmul.msk.bf16.gmra.mxu0 %vm865_vm7, %v2558_v31  ;;  %v13657_v33 = vpop.f32.mrf.mxu2  ;;  %v3970_v30 = vshll.u32 %v11116_v35, 16  ;;  %v2538_v6 = vunpack.c.l.b16 %v2434_v3  ;;  %v3963_v17 = vrot.slane %v3961_v11, 4  ;;  %v11970_v11 = vld [vmem:[%s12265_s12 + $0xd8] sm:$0xff] }
 0x2a1   : > { %v4061_v12 = vpack.c.b16 %v4041_v40, %v4040_v4  ;;  %v2438_v4 = vrot.slane %v2436_v45, 4  ;;  %v2441_v22 = vrot.slane %v2439_v10, 5  ;;  %v13683_v48 = vrot.slane %v2445_v13, 5  ;;  %v10901_v45 = vld [vmem:[%s12265_s12 + $0xcc] sm:$0xe] }
 0x2a2   : > { %v3496_v31 = vadd.f32 %v13531_v15, %v3175_v49  ;;  %v3966_v49 = vrot.slane %v3964_v37, 5  ;;  %v2451_v36 = vrot.slane %v2449_v8, 4  ;;  %v3972_v16 = vrot.slane %v3970_v30, 5 }
 0x2a3   : > { %11137 = vmatmul.msk.bf16.gmra.mxu3 %vm865_vm7, %v4061_v12  ;;  %v1212_v3 = vadd.f32 %v12690_v18, %v12772_v1  ;;  %v3976_v53 = vrot.slane %v3974_v27, 4  ;;  %v2442_v12 = vor.u32 %v2441_v22, %v2438_v4  ;;  %v10919_v35 = vrot.slane %v10901_v45, 9 }
 0x2a4   : > { %v13672_v15 = vadd.f32 %v13551_v60, %v3496_v31  ;;  %10937 = vmatmul.msk.bf16.gmra.mxu1 %vm865_vm7, %v3006_v7  ;;  %v13680_v60 = vpop.f32.mrf.mxu3  ;;  %v3967_v31 = vor.u32 %v3966_v49, %v3963_v17  ;;  %v2455_v7 = vshll.u32 %v13631_v62, 16  ;;  %v2559_v13 = vpack.c.b16 %v2538_v6, %v2537_v59  ;;  %v10862_v17 = vld [vmem:[%s12265_s12 + $0xd4] sm:$0x1] }
 0x2a5   : > { %v2656_v43 = vpop.f32.mrf.mxu0  ;;  %v2452_v8 = vor.u32 %v2451_v36, %v13683_v48  ;;  %v3982_v37 = vrot.slane %v3980_v39, 5  ;;  %v1677_v4 = vadd.f32 %v12694_v34, %v1212_v3  ;;  %v2944_v6 = vrot.slane %v10862_v17, 5 }
 0x2a6   : > { %v13677_v5 = vadd.f32 %v2656_v43, %v1996_v9  ;;  %v13685_v40 = vpop.f32.mrf.mxu1  ;;  %v10861_v9 = vld [vmem:[%s12265_s12 + $0xd0] sm:$0xf]  ;;  %v3968_v32 = vrot.slane %v3967_v31, 4  ;;  %v3977_v43 = vor.u32 %v3976_v53, %v3972_v16  ;;  %v2443_v49 = vrot.slane %v2442_v12, 4 }
 0x2a7   : > { %v2941_v10 = vrot.slane %v10861_v9, 5  ;;  %v2457_v36 = vrot.slane %v2455_v7, 5  ;;  %v2453_v39 = vrot.slane %v2452_v8, 4  ;;  %v10860_v7 = vld [vmem:[%s12265_s12 + $0xcc] sm:$0xf] }
 0x2a8   : > { %v13687_v19 = vpop.f32.mrf.mxu2  ;;  %v3973_v24 = vsel %vm12287_vm6, %v3968_v32, %v3972_v16  ;;  %11065 = vmatmul.msk.bf16.gmra.mxu2 %vm865_vm7, %v11970_v11  ;;  %v3978_v59 = vrot.slane %v3977_v43, 4  ;;  %v2448_v8 = vsel %vm12287_vm6, %v2443_v49, %v13683_v48 }
 0x2a9   : > { %v2942_v18 = vsel %vm12281_vm5, %v10919_v35, %v2941_v10  ;;  %v2943_v1 = vrot.slane %v2941_v10, 4  ;;  %v4042_v27 = vunpack.c.l.b16 %v3973_v24  ;;  %v1998_v35 = vadd.f32 %v12701_v44, %v1677_v4 }
 0x2aa   : > { %v2987_v31 = vunpack.c.l.b16 %v2942_v18  ;;  %v3983_v34 = vsel %vm12287_vm6, %v3978_v59, %v3982_v37  ;;  %v2458_v11 = vsel %vm12287_vm6, %v2453_v39, %v2457_v36  ;;  %v2460_v37 = vshrl.u32 %v10860_v7, 16 }
 0x2ab   : > { %v4043_v53 = vunpack.c.l.b16 %v3983_v34  ;;  %v2469_v24 = vshll.u32 %v10861_v9, 16  ;;  %v2479_v39 = vshll.u32 %v10862_v17, 16  ;;  %v13750_v17 = vld [vmem:[%s12265_s12 + $0xdc] sm:$0xf] }
 0x2ac   : > { %v13703_v22 = vpop.f32.mrf.mxu3  ;;  %v2462_v4 = vrot.slane %v2460_v37, 4 }
 0x2ad   : > { %v2659_v30 = vpop.f32.mrf.mxu0  ;;  %v4062_v32 = vpack.c.b16 %v4043_v53, %v4042_v27 }
 0x2ae   : > { %v2731_v62 = vadd.f32 %v2659_v30, %v12766_v61  ;;  %v2945_v61 = vsel %vm12281_vm5, %v2943_v1, %v2944_v6  ;;  %v13712_v3 = vpop.f32.mrf.mxu1  ;;  %v2463_v30 = vshll.u32 %v10860_v7, 16  ;;  %v2540_v1 = vunpack.c.l.b16 %v2458_v11 }
 0x2af   : > { %v2988_v10 = vunpack.c.l.b16 %v2945_v61 }
 0x2b0   : > { %v3177_v16 = vadd.f32 %v13587_v20, %v2731_v62  ;;  %10881 = vmatmul.msk.bf16.gmra.mxu0 %vm865_vm7, %v2559_v13  ;;  %v13714_v45 = vpop.f32.mrf.mxu2  ;;  %v2465_v48 = vrot.slane %v2463_v30, 5  ;;  %v2471_v62 = vrot.slane %v2469_v24, 5 }
 0x2b1   : > { %v3007_v20 = vpack.c.b16 %v2988_v10, %v2987_v31 }
 0x2b2   : > { %v3498_v12 = vadd.f32 %v13589_v63, %v3177_v16  ;;  %v2473_v63 = vshrl.u32 %v10861_v9, 16  ;;  %v1217_v9 = vadd.f32 %v12738_v28, %v12795_v57  ;;  %v2466_v31 = vor.u32 %v2465_v48, %v2462_v4 }
 0x2b3   : > { %11138 = vmatmul.msk.bf16.gmra.mxu3 %vm865_vm7, %v4062_v32  ;;  %v2481_v28 = vrot.slane %v2479_v39, 5  ;;  %v10863_v32 = vld [vmem:[%s12265_s12 + $0xd8] sm:$0xf] }
 0x2b4   : > { %v13720_v13 = vadd.f32 %v13609_v50, %v3498_v12  ;;  %10938 = vmatmul.msk.bf16.gmra.mxu1 %vm865_vm7, %v3007_v20  ;;  %v13731_v44 = vpop.f32.mrf.mxu3  ;;  %v2539_v50 = vunpack.c.l.b16 %v2448_v8  ;;  %v2475_v59 = vrot.slane %v2473_v63, 4  ;;  %v1679_v53 = vadd.f32 %v12741_v41, %v1217_v9  ;;  %v12129_v9 = vld [vmem:[%s12265_s12 + $0x20] sm:$0x1]  ;;  %v11140_v39 = vld [vmem:[%s12265_s12 + $0x18] sm:$0xe] }
 0x2b5   : > { %v2661_v43 = vpop.f32.mrf.mxu0  ;;  %v2467_v12 = vrot.slane %v2466_v31, 4  ;;  %v2484_v37 = vshrl.u32 %v10863_v32, 16  ;;  %v2487_v30 = vshll.u32 %v10863_v32, 16 }
 0x2b6   : > { %v13728_v18 = vadd.f32 %v2661_v43, %v1998_v35  ;;  %v13733_v6 = vpop.f32.mrf.mxu1  ;;  %v2560_v36 = vpack.c.b16 %v2540_v1, %v2539_v50  ;;  %v2476_v16 = vor.u32 %v2475_v59, %v2471_v62  ;;  %v15897_v35 = vld [vmem:[#allocation3_spill] sm:$0xff]  ;;  %v2493_v1 = vshll.u32 %v13750_v17, 16  ;;  %v12000_v59 = vld [vmem:[%s15839_s3 + $0x60] sm:$0xff] }
 0x2b7   : > { %v2000_v41 = vadd.f32 %v15897_v35, %v1679_v53  ;;  %v2472_v63 = vsel %vm12287_vm6, %v2467_v12, %v2471_v62  ;;  %v2486_v31 = vrot.slane %v2484_v37, 4  ;;  %6103 = vmatpush.bf16.msra.mxu1 %v12000_v59  ;;  %v15899_v35 = vld [vmem:[#allocation4_spill] sm:$0xff] }
 0x2b8   : > { %v13735_v49 = vpop.f32.mrf.mxu2  ;;  %v2477_v7 = vrot.slane %v2476_v16, 4  ;;  %v2489_v16 = vrot.slane %v2487_v30, 5 }
 0x2ba   : > { %v2482_v50 = vsel %vm12287_vm6, %v2477_v7, %v2481_v28  ;;  %v13779_v7 = vld [vmem:[%s12265_s12 + $0xe0] sm:$0x1] }
 0x2bb   : > { %v2542_v62 = vunpack.c.l.b16 %v2482_v50  ;;  %v2503_v50 = vshll.u32 %v13779_v7, 16 }
 0x2bc   : > { %v13740_v61 = vpop.f32.mrf.mxu3 }
 0x2bd   : > { %v2664_v27 = vpop.f32.mrf.mxu0 }
 0x2be   : > { %v2733_v34 = vadd.f32 %v2664_v27, %v12785_v21  ;;  %v13745_v57 = vpop.f32.mrf.mxu1  ;;  %v11992_v21 = vld [vmem:[%s15839_s3 + $0x20] sm:$0xff]  ;;  %v2541_v27 = vunpack.c.l.b16 %v2472_v63 }
 0x2bf   : > { %6336 = vmatpush.bf16.msra.mxu2 %v11992_v21  ;;  %v15898_v21 = vld [vmem:[#allocation11_spill] sm:$0xff] }
 0x2c0   : > { %v3179_v10 = vadd.f32 %v13655_v46, %v2733_v34  ;;  %10882 = vmatmul.msk.bf16.gmra.mxu0 %vm865_vm7, %v2560_v36  ;;  %v13756_v8 = vpop.f32.mrf.mxu2  ;;  %v12128_v46 = vld [vmem:[%s12265_s12 + $0x1c] sm:$0xf]  ;;  %v4333_v36 = vrot.slane %v12129_v9, 5  ;;  %v2495_v34 = vrot.slane %v2493_v1, 5 }
 0x2c1   : > { %v4330_v11 = vrot.slane %v12128_v46, 5  ;;  %v2561_v46 = vpack.c.b16 %v2542_v62, %v2541_v27 }
 0x2c2   : > { %v3500_v20 = vadd.f32 %v13657_v33, %v3179_v10  ;;  %v12008_v33 = vld [vmem:[%s15839_s3 + $0xa0] sm:$0xff]  ;;  %v11158_v10 = vrot.slane %v11140_v39, 9  ;;  %v15902_v39 = vld [vmem:[#allocation5_spill] sm:$0xff] }
 0x2c3   : > { %6714 = vmatpush.bf16.msra.mxu3 %v12008_v33  ;;  %v4332_v12 = vrot.slane %v4330_v11, 4 }
 0x2c4   : > { %v13760_v43 = vadd.f32 %v13680_v60, %v3500_v20  ;;  %v2497_v60 = vshrl.u32 %v13750_v17, 16  ;;  %v4175_v48 = vpop.f32.mrf.mxu3  ;;  %v4331_v32 = vsel %vm12281_vm5, %v11158_v10, %v4330_v11 }
 0x2c5   : > { %v2666_v24 = vpop.f32.mrf.mxu0  ;;  %v4334_v20 = vsel %vm12281_vm5, %v4332_v12, %v4333_v36  ;;  %v4456_v37 = vunpack.c.l.b16 %v4331_v32  ;;  %v2505_v12 = vrot.slane %v2503_v50, 5 }
 0x2c6   : > { %v13771_v4 = vadd.f32 %v2666_v24, %v2000_v41  ;;  %v2499_v53 = vrot.slane %v2497_v60, 4  ;;  %v13781_v28 = vpop.f32.mrf.mxu1  ;;  %v1222_v41 = vadd.f32 %v15899_v35, %v15898_v21  ;;  %v4457_v30 = vunpack.c.l.b16 %v4334_v20  ;;  %v15900_v60 = vld [vmem:[#allocation10_spill] sm:$0xff] }
 0x2c7   : > { %v2490_v24 = vor.u32 %v2489_v16, %v2486_v31  ;;  %v15903_v16 = vld [vmem:[#allocation6_spill] sm:$0xff] }
 0x2c8   : > { %v2500_v63 = vor.u32 %v2499_v53, %v2495_v34  ;;  %v13790_v1 = vpop.f32.mrf.mxu2  ;;  %v4492_v9 = vpack.c.b16 %v4457_v30, %v4456_v37  ;;  %v1681_v36 = vadd.f32 %v15902_v39, %v1222_v41 }
 0x2c9   : > { %v2491_v27 = vrot.slane %v2490_v24, 4  ;;  %v15905_v24 = vld [vmem:[#allocation7_spill] sm:$0xff] }
 0x2ca   : > { %v2501_v62 = vrot.slane %v2500_v63, 4  ;;  %v2002_v53 = vadd.f32 %v15903_v16, %v1681_v36 }
 0x2cb   : > { %v2496_v21 = vsel %vm12287_vm6, %v2491_v27, %v2495_v34  ;;  %v15908_v34 = vld [vmem:[#allocation8_spill] sm:$0xff] }
 0x2cc   : > { %v13793_v11 = vpop.f32.mrf.mxu3  ;;  %v2506_v35 = vsel %vm12287_vm6, %v2501_v62, %v2505_v12  ;;  %v2543_v37 = vunpack.c.l.b16 %v2496_v21 }
 0x2cd   : > { %v2669_v33 = vpop.f32.mrf.mxu0  ;;  %15901 = vst [vmem:[#allocation3_spill] sm:$0xff] %v13793_v11  ;;  %v2544_v30 = vunpack.c.l.b16 %v2506_v35 }
 0x2ce   : > { %v2735_v59 = vadd.f32 %v2669_v33, %v15900_v60  ;;  %v15906_v60 = vld [vmem:[#allocation15_spill] sm:$0xff] }
 0x2cf   : > { %v2562_v50 = vpack.c.b16 %v2544_v30, %v2543_v37  ;;  %v15913_v30 = vld [vmem:[#allocation20_spill] sm:$0xff] }
 0x2d0   : > { %v3181_v10 = vadd.f32 %v13712_v3, %v2735_v59  ;;  %10883 = vmatmul.msk.bf16.gmra.mxu0 %vm865_vm7, %v2561_v46  ;;  %v3125_v3 = vpop.f32.mrf.mxu1  ;;  %v3446_v46 = vpop.f32.mrf.mxu2 }
 0x2d2   : > { %v3502_v31 = vadd.f32 %v13714_v45, %v3181_v10  ;;  %v15904_v45 = vld [vmem:[#allocation16_spill] sm:$0xff] }
 0x2d3   : > { %v1227_v63 = vadd.f32 %v15905_v24, %v15904_v45  ;;  %v15914_v45 = vld [vmem:[#allocation12_spill] sm:$0xff] }
 0x2d4   : > { %v13801_v32 = vadd.f32 %v13731_v44, %v3502_v31  ;;  %v4180_v33 = vpop.f32.mrf.mxu3  ;;  %v15911_v31 = vld [vmem:[#allocation9_spill] sm:$0xff]  ;;  %v1232_v24 = vadd.f32 %v15914_v45, %v15913_v30 }
 0x2d5   : > { %v2671_v20 = vpop.f32.mrf.mxu0  ;;  %v1683_v36 = vadd.f32 %v15908_v34, %v1227_v63 }
 0x2d6   : > { %v13807_v41 = vadd.f32 %v2671_v20, %v2002_v53 }
 0x2d7   : > { %v2004_v16 = vadd.f32 %v15911_v31, %v1683_v36  ;;  %v11141_v36 = vld [vmem:[%s12265_s12 + $0x24] sm:$0xe] }
 0x2d8   : > { %v13812_v39 = vpop.f32.mrf.mxu1  ;;  %v13817_v27 = vpop.f32.mrf.mxu2 }
 0x2d9   : > { %15907 = vst [vmem:[#allocation11_spill] sm:$0xff] %v13812_v39 }
 0x2da   : > { %15909 = vst [vmem:[#allocation4_spill] sm:$0xff] %v13817_v27 }
 0x2dc   : > { %v13820_v12 = vpop.f32.mrf.mxu3 }
 0x2dd   : > { %v2674_v44 = vpop.f32.mrf.mxu0  ;;  %15910 = vst [vmem:[#allocation10_spill] sm:$0xff] %v13820_v12 }
 0x2de   : > { %v2737_v59 = vadd.f32 %v2674_v44, %v15906_v60 }
 0x2e0   : > { %v3183_v10 = vadd.f32 %v13745_v57, %v2737_v59  ;;  %10884 = vmatmul.msk.bf16.gmra.mxu0 %vm865_vm7, %v2562_v50  ;;  %v11991_v57 = vld [vmem:[%s15839_s3 + $0x18] sm:$0xff]  ;;  %v3130_v35 = vpop.f32.mrf.mxu1  ;;  %v3451_v37 = vpop.f32.mrf.mxu2  ;;  %v12130_v50 = vld [vmem:[%s12265_s12 + $0x28] sm:$0xf]  ;;  %v15915_v59 = vld [vmem:[#allocation18_spill] sm:$0xff] }
 0x2e1   : > { %6337 = vmatpush.bf16.msra.mxu2 %v11991_v57  ;;  %v4337_v44 = vrot.slane %v12130_v50, 5  ;;  %v12131_v57 = vld [vmem:[%s12265_s12 + $0x2c] sm:$0x1] }
 0x2e2   : > { %v3504_v62 = vadd.f32 %v13756_v8, %v3183_v10  ;;  %v12007_v8 = vld [vmem:[%s15839_s3 + $0x98] sm:$0xff]  ;;  %v15916_v10 = vld [vmem:[#allocation13_spill] sm:$0xff] }
 0x2e3   : > { %6715 = vmatpush.bf16.msra.mxu3 %v12007_v8  ;;  %v4340_v8 = vrot.slane %v12131_v57, 5 }
 0x2e4   : > { %v13823_v53 = vadd.f32 %v4175_v48, %v3504_v62  ;;  %v11999_v48 = vld [vmem:[%s15839_s3 + $0x58] sm:$0xff]  ;;  %v4185_v60 = vpop.f32.mrf.mxu3  ;;  %v1685_v62 = vadd.f32 %v15916_v10, %v1232_v24 }
 0x2e5   : > { %v2676_v20 = vpop.f32.mrf.mxu0  ;;  %6104 = vmatpush.bf16.msra.mxu1 %v11999_v48  ;;  %v15918_v48 = vld [vmem:[#allocation14_spill] sm:$0xff]  ;;  %v15923_v10 = vld [vmem:[#allocation23_spill] sm:$0xff] }
 0x2e6   : > { %15912 = vst [vmem:[#allocation5_spill] sm:$0xff] %v13823_v53  ;;  %v13825_v21 = vadd.f32 %v2676_v20, %v2004_v16  ;;  %v11159_v16 = vrot.slane %v11141_v36, 9  ;;  %v4339_v20 = vrot.slane %v4337_v44, 4  ;;  %v2006_v45 = vadd.f32 %v15918_v48, %v1685_v62  ;;  %v12132_v48 = vld [vmem:[%s12265_s12 + $0x34] sm:$0xf] }
 0x2e8   : > { %v13844_v30 = vpop.f32.mrf.mxu1  ;;  %v4338_v24 = vsel %vm12281_vm5, %v11159_v16, %v4337_v44  ;;  %v4344_v44 = vrot.slane %v12132_v48, 5  ;;  %v15925_v16 = vld [vmem:[#allocation22_spill] sm:$0xff] }
 0x2e9   : > { %15917 = vst [vmem:[#allocation6_spill] sm:$0xff] %v13844_v30 }
 0x2ed   : > { %v2679_v63 = vpop.f32.mrf.mxu0 }
 0x2ee   : > { %v2739_v34 = vadd.f32 %v2679_v63, %v15915_v59 }
 0x2f0   : > { %v3185_v31 = vadd.f32 %v3125_v3, %v2739_v34  ;;  %11177 = vmatmul.msk.bf16.vlgmr.msrb.gmra.mxu0 %vm865_vm7, %v4492_v9  ;;  %v4341_v9 = vsel %vm12281_vm5, %v4339_v20, %v4340_v8  ;;  %v13853_v3 = vpop.f32.mrf.mxu2  ;;  %v4458_v34 = vunpack.c.l.b16 %v4338_v24  ;;  %v3135_v57 = vpop.f32.mrf.mxu1  ;;  %v11142_v20 = vld [vmem:[%s12265_s12 + $0x30] sm:$0xe] }
 0x2f1   : > { %15920 = vst [vmem:[#allocation7_spill] sm:$0xff] %v13853_v3  ;;  %v4459_v36 = vunpack.c.l.b16 %v4341_v9  ;;  %v15926_v3 = vld [vmem:[#allocation19_spill] sm:$0xff]  ;;  %v11160_v24 = vrot.slane %v11142_v20, 9  ;;  %v15933_v20 = vld [vmem:[#allocation28_spill] sm:$0xff] }
 0x2f2   : > { %v3506_v12 = vadd.f32 %v3446_v46, %v3185_v31  ;;  %v13857_v46 = vpop.f32.mrf.mxu3  ;;  %v12133_v9 = vld [vmem:[%s12265_s12 + $0x38] sm:$0x1] }
 0x2f3   : > { %15922 = vst [vmem:[#allocation8_spill] sm:$0xff] %v13857_v46  ;;  %v4493_v62 = vpack.c.b16 %v4459_v36, %v4458_v34  ;;  %v4346_v46 = vrot.slane %v4344_v44, 4  ;;  %v15927_v34 = vld [vmem:[#allocation21_spill] sm:$0xff] }
 0x2f4   : > { %v13847_v50 = vadd.f32 %v4180_v33, %v3506_v12  ;;  %v15924_v33 = vld [vmem:[#allocation17_spill] sm:$0xff] }
 0x2f5   : > { %v2681_v63 = vpop.f32.mrf.mxu0  ;;  %v1237_v12 = vadd.f32 %v15924_v33, %v15923_v10 }
 0x2f6   : > { %15919 = vst [vmem:[#allocation16_spill] sm:$0xff] %v13847_v50  ;;  %v13855_v59 = vadd.f32 %v2681_v63, %v2006_v45  ;;  %v4347_v50 = vrot.slane %v12133_v9, 5 }
 0x2f7   : > { %v1687_v45 = vadd.f32 %v15926_v3, %v1237_v12 }
 0x2f8   : > { %15921 = vst [vmem:[#allocation15_spill] sm:$0xff] %v13855_v59  ;;  %v3456_v8 = vpop.f32.mrf.mxu2  ;;  %v13876_v3 = vpop.f32.mrf.mxu1 }
 0x2f9   : > { %v2008_v36 = vadd.f32 %v15927_v34, %v1687_v45  ;;  %15930 = vst [vmem:[#allocation12_spill] sm:$0xff] %v13876_v3 }
 0x2fa   : > { %v4190_v27 = vpop.f32.mrf.mxu3 }
 0x2fd   : > { %v2684_v31 = vpop.f32.mrf.mxu0 }
 0x2fe   : > { %v2741_v30 = vadd.f32 %v2684_v31, %v15925_v16  ;;  %v4345_v31 = vsel %vm12281_vm5, %v11160_v24, %v4344_v44  ;;  %v15934_v44 = vld [vmem:[#allocation24_spill] sm:$0xff] }
 0x2ff   : > { %v4460_v12 = vunpack.c.l.b16 %v4345_v31  ;;  %v1242_v45 = vadd.f32 %v15934_v44, %v15933_v20  ;;  %v12134_v24 = vld [vmem:[%s12265_s12 + $0x40] sm:$0xf]  ;;  %v15936_v31 = vld [vmem:[#allocation25_spill] sm:$0xff]  ;;  %v12135_v44 = vld [vmem:[%s12265_s12 + $0x44] sm:$0x1] }
 0x300   : > { %v3187_v63 = vadd.f32 %v3130_v35, %v2741_v30  ;;  %11178 = vmatmul.msk.bf16.gmra.mxu0 %vm865_vm7, %v4493_v62  ;;  %v4348_v35 = vsel %vm12281_vm5, %v4346_v46, %v4347_v50  ;;  %v12006_v50 = vld [vmem:[%s15839_s3 + $0x90] sm:$0xff]  ;;  %v4351_v9 = vrot.slane %v12134_v24, 5 }
 0x301   : > { %v4461_v62 = vunpack.c.l.b16 %v4348_v35  ;;  %6716 = vmatpush.bf16.msra.mxu3 %v12006_v50  ;;  %v1689_v35 = vadd.f32 %v15936_v31, %v1242_v45  ;;  %v15941_v31 = vld [vmem:[#allocation33_spill] sm:$0xff] }
 0x302   : > { %v3508_v10 = vadd.f32 %v3451_v37, %v3187_v63  ;;  %v13878_v37 = vpop.f32.mrf.mxu2  ;;  %v13883_v16 = vpop.f32.mrf.mxu3  ;;  %v4353_v20 = vrot.slane %v4351_v9, 4 }
 0x303   : > { %15931 = vst [vmem:[#allocation18_spill] sm:$0xff] %v13878_v37  ;;  %v4494_v63 = vpack.c.b16 %v4461_v62, %v4460_v12  ;;  %v3140_v62 = vpop.f32.mrf.mxu1 }
 0x304   : > { %v13868_v33 = vadd.f32 %v4185_v60, %v3508_v10  ;;  %v11990_v60 = vld [vmem:[%s15839_s3 + $0x10] sm:$0xff]  ;;  %15932 = vst [vmem:[#allocation13_spill] sm:$0xff] %v13883_v16  ;;  %v15935_v10 = vld [vmem:[#allocation27_spill] sm:$0xff]  ;;  %v4354_v16 = vrot.slane %v12135_v44, 5 }
 0x305   : > { %v2686_v48 = vpop.f32.mrf.mxu0  ;;  %6338 = vmatpush.bf16.msra.mxu2 %v11990_v60 }
 0x306   : > { %15928 = vst [vmem:[#allocation9_spill] sm:$0xff] %v13868_v33  ;;  %v13874_v30 = vadd.f32 %v2686_v48, %v2008_v36  ;;  %v11143_v36 = vld [vmem:[%s12265_s12 + $0x3c] sm:$0xe]  ;;  %v11998_v48 = vld [vmem:[%s15839_s3 + $0x50] sm:$0xff]  ;;  %v4355_v45 = vsel %vm12281_vm5, %v4353_v20, %v4354_v16  ;;  %v11144_v16 = vld [vmem:[%s12265_s12 + $0x48] sm:$0xe] }
 0x307   : > { %6105 = vmatpush.bf16.msra.mxu1 %v11998_v48  ;;  %v11161_v60 = vrot.slane %v11143_v36, 9  ;;  %v4463_v48 = vunpack.c.l.b16 %v4355_v45  ;;  %v11162_v45 = vrot.slane %v11144_v16, 9  ;;  %v12192_v33 = vmov 0  }
 0x308   : > { %15929 = vst [vmem:[#allocation20_spill] sm:$0xff] %v13874_v30  ;;  %v11120_v30 = vld [vmem:[%s12265_s12 + $0xec] sm:$0x1] }
 0x309   : > { %4942 = vst [vmem:[#allocation2 + $0xc] sm:$0xf] %v12192_v33 }
 0x30a   : > { %4939 = vst [vmem:[#allocation2] sm:$0xf] %v12192_v33 }
 0x30b   : > { %4940 = vst [vmem:[#allocation2 + $0x4] sm:$0xf] %v12192_v33 }
 0x30c   : > { %4941 = vst [vmem:[#allocation2 + $0x8] sm:$0x1] %v12192_v33 }
 0x30d   : > { %v2689_v46 = vpop.f32.mrf.mxu0  ;;  %4943 = vst [vmem:[#allocation2 + $0x10] sm:$0xf] %v12192_v33 }
 0x30e   : > { %v2743_v34 = vadd.f32 %v2689_v46, %v15935_v10  ;;  %v3461_v46 = vpop.f32.mrf.mxu2  ;;  %v15937_v10 = vld [vmem:[#allocation26_spill] sm:$0xff]  ;;  %4944 = vst [vmem:[#allocation2 + $0x14] sm:$0x1] %v12192_v33 }
 0x30f   : > { %v2010_v50 = vadd.f32 %v15937_v10, %v1689_v35  ;;  %v15942_v35 = vld [vmem:[#allocation29_spill] sm:$0xff]  ;;  %4945 = vst [vmem:[#allocation2 + $0x18] sm:$0xf] %v12192_v33 }
 0x310   : > { %v3189_v12 = vadd.f32 %v3135_v57, %v2743_v34  ;;  %11179 = vmatmul.msk.bf16.gmra.mxu0 %vm865_vm7, %v4494_v63  ;;  %v4352_v57 = vsel %vm12281_vm5, %v11161_v60, %v4351_v9  ;;  %v4195_v63 = vpop.f32.mrf.mxu3  ;;  %v12136_v10 = vld [vmem:[%s12265_s12 + $0x4c] sm:$0xf]  ;;  %v15944_v60 = vld [vmem:[#allocation32_spill] sm:$0xff]  ;;  %4946 = vst [vmem:[#allocation2 + $0x1c] sm:$0xf] %v12192_v33 }
 0x311   : > { %v4462_v36 = vunpack.c.l.b16 %v4352_v57  ;;  %v4358_v9 = vrot.slane %v12136_v10, 5  ;;  %4947 = vst [vmem:[#allocation2 + $0x20] sm:$0x1] %v12192_v33 }
 0x312   : > { %v3510_v24 = vadd.f32 %v3456_v8, %v3189_v12  ;;  %v13908_v8 = vpop.f32.mrf.mxu1  ;;  %4948 = vst [vmem:[#allocation2 + $0x24] sm:$0xf] %v12192_v33 }
 0x313   : > { %15940 = vst [vmem:[#allocation17_spill] sm:$0xff] %v13908_v8  ;;  %v4495_v12 = vpack.c.b16 %v4463_v48, %v4462_v36  ;;  %v4360_v8 = vrot.slane %v4358_v9, 4  ;;  %v15947_v48 = vld [vmem:[#allocation31_spill] sm:$0xff] }
 0x314   : > { %v13900_v37 = vadd.f32 %v4190_v27, %v3510_v24  ;;  %v1247_v27 = vadd.f32 %v15942_v35, %v15941_v31  ;;  %4949 = vst [vmem:[#allocation2 + $0x28] sm:$0xf] %v12192_v33 }
 0x315   : > { %v2691_v3 = vpop.f32.mrf.mxu0  ;;  %4950 = vst [vmem:[#allocation2 + $0x2c] sm:$0x1] %v12192_v33 }
 0x316   : > { %15938 = vst [vmem:[#allocation14_spill] sm:$0xff] %v13900_v37  ;;  %v13906_v34 = vadd.f32 %v2691_v3, %v2010_v50  ;;  %v13912_v24 = vpop.f32.mrf.mxu2  ;;  %v15946_v3 = vld [vmem:[#allocation30_spill] sm:$0xff] }
 0x317   : > { %15943 = vst [vmem:[#allocation22_spill] sm:$0xff] %v13912_v24  ;;  %v1691_v50 = vadd.f32 %v15946_v3, %v1247_v27  ;;  %v15951_v3 = vld [vmem:[#allocation34_spill] sm:$0xff] }
 0x318   : > { %15939 = vst [vmem:[#allocation23_spill] sm:$0xff] %v13906_v34  ;;  %v13917_v20 = vpop.f32.mrf.mxu3  ;;  %v12137_v34 = vld [vmem:[%s12265_s12 + $0x50] sm:$0x1] }
 0x319   : > { %15945 = vst [vmem:[#allocation19_spill] sm:$0xff] %v13917_v20  ;;  %v4361_v31 = vrot.slane %v12137_v34, 5  ;;  %v2012_v35 = vadd.f32 %v15947_v48, %v1691_v50  ;;  %v15952_v20 = vld [vmem:[#allocation37_spill] sm:$0xff] }
 0x31a   : > { %v3145_v10 = vpop.f32.mrf.mxu1  ;;  %4951 = vst [vmem:[#allocation2 + $0x30] sm:$0xf] %v12192_v33 }
 0x31b   : > { %4952 = vst [vmem:[#allocation2 + $0x34] sm:$0xf] %v12192_v33 }
 0x31c   : > { %4953 = vst [vmem:[#allocation2 + $0x38] sm:$0x1] %v12192_v33 }
 0x31d   : > { %v2694_v44 = vpop.f32.mrf.mxu0  ;;  %4954 = vst [vmem:[#allocation2 + $0x3c] sm:$0xf] %v12192_v33 }
 0x31e   : > { %v2745_v37 = vadd.f32 %v2694_v44, %v15944_v60  ;;  %v4359_v60 = vsel %vm12281_vm5, %v11162_v45, %v4358_v9  ;;  %v3466_v27 = vpop.f32.mrf.mxu2  ;;  %v11145_v9 = vld [vmem:[%s12265_s12 + $0x54] sm:$0xe]  ;;  %4955 = vst [vmem:[#allocation2 + $0x40] sm:$0xf] %v12192_v33 }
 0x31f   : > { %4956 = vst [vmem:[#allocation2 + $0x44] sm:$0x1] %v12192_v33 }
 0x320   : > { %v3191_v57 = vadd.f32 %v3140_v62, %v2745_v37  ;;  %11180 = vmatmul.msk.bf16.gmra.mxu0 %vm865_vm7, %v4495_v12  ;;  %v4362_v37 = vsel %vm12281_vm5, %v4360_v8, %v4361_v31  ;;  %v4464_v12 = vunpack.c.l.b16 %v4359_v60  ;;  %v4200_v16 = vpop.f32.mrf.mxu3  ;;  %v11989_v8 = vld [vmem:[%s15839_s3 + $0x8] sm:$0xff]  ;;  %v15954_v31 = vld [vmem:[#allocation35_spill] sm:$0xff]  ;;  %4957 = vst [vmem:[#allocation2 + $0x48] sm:$0xf] %v12192_v33 }
 0x321   : > { %v4465_v34 = vunpack.c.l.b16 %v4362_v37  ;;  %6339 = vmatpush.bf16.msra.mxu2 %v11989_v8  ;;  %v12005_v60 = vld [vmem:[%s15839_s3 + $0x88] sm:$0xff]  ;;  %4958 = vst [vmem:[#allocation2 + $0x4c] sm:$0xf] %v12192_v33 }
 0x322   : > { %v3512_v36 = vadd.f32 %v3461_v46, %v3191_v57  ;;  %v15950_v46 = vld [vmem:[#allocation38_spill] sm:$0xff]  ;;  %v13939_v45 = vpop.f32.mrf.mxu1  ;;  %6717 = vmatpush.bf16.msra.mxu3 %v12005_v60  ;;  %4959 = vst [vmem:[#allocation2 + $0x50] sm:$0x1] %v12192_v33 }
 0x323   : > { %v1252_v50 = vadd.f32 %v15951_v3, %v15950_v46  ;;  %15953 = vst [vmem:[#allocation24_spill] sm:$0xff] %v13939_v45  ;;  %v15962_v45 = vld [vmem:[#allocation40_spill] sm:$0xff] }
 0x324   : > { %v13923_v24 = vadd.f32 %v4195_v63, %v3512_v36  ;;  %v4496_v63 = vpack.c.b16 %v4465_v34, %v4464_v12  ;;  %v12138_v36 = vld [vmem:[%s12265_s12 + $0x58] sm:$0xf]  ;;  %v12139_v34 = vld [vmem:[%s12265_s12 + $0x5c] sm:$0x1]  ;;  %4960 = vst [vmem:[#allocation2 + $0x54] sm:$0xf] %v12192_v33 }
 0x325   : > { %v2696_v44 = vpop.f32.mrf.mxu0  ;;  %v4365_v48 = vrot.slane %v12138_v36, 5  ;;  %v4368_v46 = vrot.slane %v12139_v34, 5  ;;  %4961 = vst [vmem:[#allocation2 + $0x58] sm:$0xf] %v12192_v33 }
 0x326   : > { %15948 = vst [vmem:[#allocation21_spill] sm:$0xff] %v13923_v24  ;;  %v13929_v62 = vadd.f32 %v2696_v44, %v2012_v35  ;;  %v1693_v35 = vadd.f32 %v15954_v31, %v1252_v50  ;;  %v13946_v37 = vpop.f32.mrf.mxu2  ;;  %v11997_v50 = vld [vmem:[%s15839_s3 + $0x48] sm:$0xff] }
 0x327   : > { %15955 = vst [vmem:[#allocation27_spill] sm:$0xff] %v13946_v37  ;;  %v4367_v12 = vrot.slane %v4365_v48, 4  ;;  %6106 = vmatpush.bf16.msra.mxu1 %v11997_v50 }
 0x328   : > { %15949 = vst [vmem:[#allocation28_spill] sm:$0xff] %v13929_v62  ;;  %v15963_v62 = vld [vmem:[#allocation41_spill] sm:$0xff] }
 0x329   : > { %4962 = vst [vmem:[#allocation2 + $0x5c] sm:$0x1] %v12192_v33 }
 0x32a   : > { %v3150_v60 = vpop.f32.mrf.mxu1  ;;  %4963 = vst [vmem:[#allocation2 + $0x60] sm:$0xf] %v12192_v33 }
 0x32b   : > { %4964 = vst [vmem:[#allocation2 + $0x64] sm:$0xf] %v12192_v33 }
 0x32c   : > { %4965 = vst [vmem:[#allocation2 + $0x68] sm:$0x1] %v12192_v33 }
 0x32d   : > { %v2699_v57 = vpop.f32.mrf.mxu0  ;;  %4966 = vst [vmem:[#allocation2 + $0x6c] sm:$0xf] %v12192_v33 }
 0x32e   : > { %v2747_v24 = vadd.f32 %v2699_v57, %v15952_v20  ;;  %v11163_v20 = vrot.slane %v11145_v9, 9  ;;  %v3471_v34 = vpop.f32.mrf.mxu2  ;;  %4967 = vst [vmem:[#allocation2 + $0x70] sm:$0xf] %v12192_v33 }
 0x32f   : > { %4968 = vst [vmem:[#allocation2 + $0x74] sm:$0x1] %v12192_v33 }
 0x330   : > { %v3193_v44 = vadd.f32 %v3145_v10, %v2747_v24  ;;  %11181 = vmatmul.msk.bf16.gmra.mxu0 %vm865_vm7, %v4496_v63  ;;  %v13952_v24 = vpop.f32.mrf.mxu3  ;;  %v15957_v10 = vld [vmem:[#allocation36_spill] sm:$0xff]  ;;  %v4366_v9 = vsel %vm12281_vm5, %v11163_v20, %v4365_v48  ;;  %4969 = vst [vmem:[#allocation2 + $0x78] sm:$0xf] %v12192_v33 }
 0x331   : > { %15956 = vst [vmem:[#allocation25_spill] sm:$0xff] %v13952_v24  ;;  %v2014_v63 = vadd.f32 %v15957_v10, %v1693_v35  ;;  %v4466_v31 = vunpack.c.l.b16 %v4366_v9  ;;  %v15960_v24 = vld [vmem:[#allocation42_spill] sm:$0xff]  ;;  %v15961_v35 = vld [vmem:[#allocation39_spill] sm:$0xff]  ;;  %v11146_v20 = vld [vmem:[%s12265_s12 + $0x60] sm:$0xe] }
 0x332   : > { %v3514_v3 = vadd.f32 %v3466_v27, %v3193_v44  ;;  %v4369_v27 = vsel %vm12281_vm5, %v4367_v12, %v4368_v46  ;;  %v12141_v9 = vld [vmem:[%s12265_s12 + $0x68] sm:$0x1]  ;;  %4970 = vst [vmem:[#allocation2 + $0x7c] sm:$0xf] %v12192_v33 }
 0x333   : > { %v4467_v44 = vunpack.c.l.b16 %v4369_v27  ;;  %v4375_v27 = vrot.slane %v12141_v9, 5  ;;  %v11147_v9 = vld [vmem:[%s12265_s12 + $0x6c] sm:$0xe]  ;;  %4971 = vst [vmem:[#allocation2 + $0x80] sm:$0x1] %v12192_v33 }
 0x334   : > { %v13955_v57 = vadd.f32 %v4200_v16, %v3514_v3  ;;  %v1257_v16 = vadd.f32 %v15961_v35, %v15960_v24  ;;  %v13971_v24 = vpop.f32.mrf.mxu1  ;;  %4972 = vst [vmem:[#allocation2 + $0x84] sm:$0xf] %v12192_v33 }
 0x335   : > { %v2701_v36 = vpop.f32.mrf.mxu0  ;;  %v4497_v3 = vpack.c.b16 %v4467_v44, %v4466_v31  ;;  %15964 = vst [vmem:[#allocation29_spill] sm:$0xff] %v13971_v24  ;;  %v15965_v31 = vld [vmem:[#allocation43_spill] sm:$0xff] }
 0x336   : > { %15958 = vst [vmem:[#allocation26_spill] sm:$0xff] %v13955_v57  ;;  %v13961_v8 = vadd.f32 %v2701_v36, %v2014_v63  ;;  %v12140_v57 = vld [vmem:[%s12265_s12 + $0x64] sm:$0xf]  ;;  %v1695_v12 = vadd.f32 %v15963_v62, %v1257_v16  ;;  %v11164_v63 = vrot.slane %v11146_v20, 9  ;;  %v13976_v35 = vpop.f32.mrf.mxu2  ;;  %v15971_v20 = vld [vmem:[#allocation46_spill] sm:$0xff] }
 0x337   : > { %v4372_v37 = vrot.slane %v12140_v57, 5  ;;  %15967 = vst [vmem:[#allocation30_spill] sm:$0xff] %v13976_v35  ;;  %v15974_v35 = vld [vmem:[#allocation48_spill] sm:$0xff] }
 0x338   : > { %15959 = vst [vmem:[#allocation33_spill] sm:$0xff] %v13961_v8  ;;  %v4205_v10 = vpop.f32.mrf.mxu3  ;;  %v2016_v44 = vadd.f32 %v15965_v31, %v1695_v12  ;;  %v15972_v31 = vld [vmem:[#allocation44_spill] sm:$0xff] }
 0x339   : > { %v4374_v36 = vrot.slane %v4372_v37, 4  ;;  %v4373_v62 = vsel %vm12281_vm5, %v11164_v63, %v4372_v37  ;;  %v12142_v37 = vld [vmem:[%s12265_s12 + $0x70] sm:$0xf]  ;;  %4973 = vst [vmem:[#allocation2 + $0x88] sm:$0xf] %v12192_v33 }
 0x33a   : > { %v4379_v63 = vrot.slane %v12142_v37, 5  ;;  %v12143_v37 = vld [vmem:[%s12265_s12 + $0x74] sm:$0x1]  ;;  %4974 = vst [vmem:[#allocation2 + $0x8c] sm:$0x1] %v12192_v33 }
 0x33b   : > { %4975 = vst [vmem:[#allocation2 + $0x90] sm:$0xf] %v12192_v33 }
 0x33c   : > { %4976 = vst [vmem:[#allocation2 + $0x94] sm:$0xf] %v12192_v33 }
 0x33d   : > { %v2704_v50 = vpop.f32.mrf.mxu0  ;;  %4977 = vst [vmem:[#allocation2 + $0x98] sm:$0x1] %v12192_v33 }
 0x33e   : > { %v2749_v48 = vadd.f32 %v2704_v50, %v15962_v45  ;;  %4978 = vst [vmem:[#allocation2 + $0x9c] sm:$0xf] %v12192_v33 }
 0x33f   : > { %4979 = vst [vmem:[#allocation2 + $0xa0] sm:$0xf] %v12192_v33 }
 0x340   : > { %v3195_v46 = vadd.f32 %v3150_v60, %v2749_v48  ;;  %11182 = vmatmul.msk.bf16.gmra.mxu0 %vm865_vm7, %v4497_v3  ;;  %v4376_v60 = vsel %vm12281_vm5, %v4374_v36, %v4375_v27  ;;  %v4468_v3 = vunpack.c.l.b16 %v4373_v62  ;;  %v15970_v48 = vld [vmem:[#allocation45_spill] sm:$0xff]  ;;  %v3476_v27 = vpop.f32.mrf.mxu2  ;;  %v11165_v62 = vrot.slane %v11147_v9, 9  ;;  %4980 = vst [vmem:[#allocation2 + $0xa4] sm:$0x1] %v12192_v33 }
 0x341   : > { %v4469_v50 = vunpack.c.l.b16 %v4376_v60  ;;  %v11988_v60 = vld [vmem:[%s15839_s3] sm:$0xff]  ;;  %4981 = vst [vmem:[#allocation2 + $0xa8] sm:$0xf] %v12192_v33 }
 0x342   : > { %v3516_v8 = vadd.f32 %v3471_v34, %v3195_v46  ;;  %v13984_v34 = vpop.f32.mrf.mxu3  ;;  %v3155_v46 = vpop.f32.mrf.mxu1  ;;  %6340 = vmatpush.bf16.msra.mxu2 %v11988_v60  ;;  %v11996_v60 = vld [vmem:[%s15839_s3 + $0x40] sm:$0xff]  ;;  %4982 = vst [vmem:[#allocation2 + $0xac] sm:$0xf] %v12192_v33 }
 0x343   : > { %15969 = vst [vmem:[#allocation38_spill] sm:$0xff] %v13984_v34  ;;  %6107 = vmatpush.bf16.msra.mxu1 %v11996_v60 }
 0x344   : > { %v13974_v57 = vadd.f32 %v4205_v10, %v3516_v8  ;;  %v1262_v8 = vadd.f32 %v15971_v20, %v15970_v48  ;;  %v4498_v10 = vpack.c.b16 %v4469_v50, %v4468_v3  ;;  %v12004_v3 = vld [vmem:[%s15839_s3 + $0x80] sm:$0xff]  ;;  %v4381_v20 = vrot.slane %v4379_v63, 4  ;;  %4983 = vst [vmem:[#allocation2 + $0xb0] sm:$0x1] %v12192_v33 }
 0x345   : > { %v2706_v45 = vpop.f32.mrf.mxu0  ;;  %v11118_v50 = vld [vmem:[%s12265_s12 + $0xe4] sm:$0xf]  ;;  %6718 = vmatpush.bf16.msra.mxu3 %v12004_v3  ;;  %v4004_v3 = vshll.u32 %v11120_v30, 16  ;;  %4984 = vst [vmem:[#allocation2 + $0xb4] sm:$0xf] %v12192_v33 }
 0x346   : > { %15966 = vst [vmem:[#allocation32_spill] sm:$0xff] %v13974_v57  ;;  %v13982_v16 = vadd.f32 %v2706_v45, %v2016_v44  ;;  %v15973_v44 = vld [vmem:[#allocation47_spill] sm:$0xff] }
 0x347   : > { %v1697_v45 = vadd.f32 %v15973_v44, %v1262_v8  ;;  %v3985_v8 = vshrl.u32 %v11118_v50, 16  ;;  %4985 = vst [vmem:[#allocation2 + $0xb8] sm:$0xf] %v12192_v33 }
 0x348   : > { %15968 = vst [vmem:[#allocation31_spill] sm:$0xff] %v13982_v16 }
 0x349   : > { %v3987_v44 = vrot.slane %v3985_v8, 4  ;;  %v2018_v24 = vadd.f32 %v15974_v35, %v1697_v45  ;;  %v11971_v35 = vld [vmem:[%s12265_s12 + $0xe4] sm:$0xff]  ;;  %4986 = vst [vmem:[#allocation2 + $0xbc] sm:$0x1] %v12192_v33 }
 0x34a   : > { %v4210_v48 = vpop.f32.mrf.mxu3  ;;  %11066 = vmatmul.msk.bf16.gmra.mxu2 %vm865_vm7, %v11971_v35  ;;  %4987 = vst [vmem:[#allocation2 + $0xc0] sm:$0xf] %v12192_v33 }
 0x34b   : > { %4988 = vst [vmem:[#allocation2 + $0xc4] sm:$0xf] %v12192_v33 }
 0x34c   : > { %4989 = vst [vmem:[#allocation2 + $0xc8] sm:$0x1] %v12192_v33 }
 0x34d   : > { %v2709_v12 = vpop.f32.mrf.mxu0  ;;  %4990 = vst [vmem:[#allocation2 + $0xcc] sm:$0xf] %v12192_v33 }
 0x34e   : > { %v2751_v36 = vadd.f32 %v2709_v12, %v15972_v31  ;;  %v4382_v12 = vrot.slane %v12143_v37, 5  ;;  %v11119_v31 = vld [vmem:[%s12265_s12 + $0xe8] sm:$0xf]  ;;  %4991 = vst [vmem:[#allocation2 + $0xd0] sm:$0xf] %v12192_v33 }
 0x34f   : > { %v3998_v9 = vshrl.u32 %v11119_v31, 16  ;;  %4992 = vst [vmem:[#allocation2 + $0xd4] sm:$0x1] %v12192_v33 }
 0x350   : > { %v3197_v34 = vadd.f32 %v3155_v46, %v2751_v36  ;;  %11183 = vmatmul.msk.bf16.gmra.mxu0 %vm865_vm7, %v4498_v10  ;;  %v3988_v46 = vshll.u32 %v11118_v50, 16  ;;  %v3994_v10 = vshll.u32 %v11119_v31, 16  ;;  %v10902_v31 = vld [vmem:[%s12265_s12 + $0xd8] sm:$0xe] }
 0x351   : > { %v4000_v39 = vrot.slane %v3998_v9, 4 }
 0x352   : > { %v3518_v36 = vadd.f32 %v3476_v27, %v3197_v34  ;;  %v3990_v57 = vrot.slane %v3988_v46, 5  ;;  %v3996_v37 = vrot.slane %v3994_v10, 5  ;;  %v4380_v34 = vsel %vm12281_vm5, %v11165_v62, %v4379_v63  ;;  %v12144_v10 = vld [vmem:[%s12265_s12 + $0x7c] sm:$0xf] }
 0x353   : > { %v4383_v27 = vsel %vm12281_vm5, %v4381_v20, %v4382_v12  ;;  %v4006_v62 = vrot.slane %v4004_v3, 5  ;;  %v4470_v20 = vunpack.c.l.b16 %v4380_v34  ;;  %v10920_v46 = vrot.slane %v10902_v31, 9 }
 0x354   : > { %v14003_v16 = vadd.f32 %v4210_v48, %v3518_v36  ;;  %v3991_v45 = vor.u32 %v3990_v57, %v3987_v44  ;;  %v4001_v48 = vor.u32 %v4000_v39, %v3996_v37  ;;  %v4471_v12 = vunpack.c.l.b16 %v4383_v27  ;;  %v11148_v27 = vld [vmem:[%s12265_s12 + $0x78] sm:$0xe] }
 0x355   : > { %v2711_v59 = vpop.f32.mrf.mxu0  ;;  %v4386_v9 = vrot.slane %v12144_v10, 5  ;;  %v2951_v34 = vrot.slane %v13779_v7, 5  ;;  %v11166_v3 = vrot.slane %v11148_v27, 9 }
 0x356   : > { %15975 = vst [vmem:[#allocation34_spill] sm:$0xff] %v14003_v16  ;;  %v14016_v50 = vadd.f32 %v2711_v59, %v2018_v24  ;;  %v3992_v63 = vrot.slane %v3991_v45, 4  ;;  %v4002_v57 = vrot.slane %v4001_v48, 4  ;;  %v4499_v8 = vpack.c.b16 %v4471_v12, %v4470_v20  ;;  %v12145_v48 = vld [vmem:[%s12265_s12 + $0x80] sm:$0x1] }
 0x357   : > { %v4389_v7 = vrot.slane %v12145_v48, 5 }
 0x358   : > { %15976 = vst [vmem:[#allocation37_spill] sm:$0xff] %v14016_v50  ;;  %v3997_v59 = vsel %vm12287_vm6, %v3992_v63, %v3996_v37  ;;  %v4007_v39 = vsel %vm12287_vm6, %v4002_v57, %v4006_v62  ;;  %v2948_v37 = vrot.slane %v13750_v17, 5  ;;  %v4388_v17 = vrot.slane %v4386_v9, 4 }
 0x359   : > { %v4044_v30 = vunpack.c.l.b16 %v3997_v59  ;;  %v4045_v24 = vunpack.c.l.b16 %v4007_v39  ;;  %v4387_v57 = vsel %vm12281_vm5, %v11166_v3, %v4386_v9  ;;  %v14089_v3 = vld [vmem:[%s15838_s2] ss:$0 sm:$0xff] }
 0x35a   : > { %v2949_v60 = vsel %vm12281_vm5, %v10920_v46, %v2948_v37  ;;  %v2950_v35 = vrot.slane %v2948_v37, 4  ;;  %v4390_v59 = vsel %vm12281_vm5, %v4388_v17, %v4389_v7  ;;  %v4472_v39 = vunpack.c.l.b16 %v4387_v57  ;;  %v12148_v7 = vld [vmem:[%s12265_s12 + $0x94] sm:$0xf] }
 0x35b   : > { %v4063_v44 = vpack.c.b16 %v4045_v24, %v4044_v30  ;;  %v2989_v45 = vunpack.c.l.b16 %v2949_v60  ;;  %v4473_v30 = vunpack.c.l.b16 %v4390_v59 }
 0x35c   : > { %v2952_v63 = vsel %vm12281_vm5, %v2950_v35, %v2951_v34 }
 0x35d   : > { %v2714_v36 = vpop.f32.mrf.mxu0  ;;  %11139 = vmatmul.msk.bf16.gmra.mxu3 %vm865_vm7, %v4063_v44  ;;  %v2990_v62 = vunpack.c.l.b16 %v2952_v63  ;;  %v4500_v24 = vpack.c.b16 %v4473_v30, %v4472_v39  ;;  %v12147_v44 = vld [vmem:[%s12265_s12 + $0x8c] sm:$0x1]  ;;  %v4400_v63 = vrot.slane %v12148_v7, 5  ;;  %v12149_v39 = vld [vmem:[%s12265_s12 + $0x98] sm:$0x1] }
 0x35e   : > { %v11149_v36 = vld [vmem:[%s12265_s12 + $0x84] sm:$0xe]  ;;  %v4396_v37 = vrot.slane %v12147_v44, 5  ;;  %v4403_v30 = vrot.slane %v12149_v39, 5  ;;  %v12150_v39 = vld [vmem:[%s12265_s12 + $0xa0] sm:$0xf] }
 0x35f   : > { %v3008_v20 = vpack.c.b16 %v2990_v62, %v2989_v45  ;;  %v11167_v10 = vrot.slane %v11149_v36, 9  ;;  %v4402_v59 = vrot.slane %v4400_v63, 4 }
 0x360   : > { %11184 = vmatmul.msk.bf16.gmra.mxu0 %vm865_vm7, %v4499_v8  ;;  %v12146_v8 = vld [vmem:[%s12265_s12 + $0x88] sm:$0xf] }
 0x361   : > { %10939 = vmatmul.msk.bf16.gmra.mxu1 %vm865_vm7, %v3008_v20  ;;  %v4393_v46 = vrot.slane %v12146_v8, 5  ;;  %v11150_v20 = vld [vmem:[%s12265_s12 + $0x90] sm:$0xe] }
 0x363   : > { %v4395_v9 = vrot.slane %v4393_v46, 4  ;;  %v4394_v27 = vsel %vm12281_vm5, %v11167_v10, %v4393_v46  ;;  %v5395_v10 = vld [vmem:[#allocation2] sm:$0xf] }
 0x364   : > { %v4474_v35 = vunpack.c.l.b16 %v4394_v27 }
 0x365   : > { %v2716_v12 = vpop.f32.mrf.mxu0  ;;  %v4397_v60 = vsel %vm12281_vm5, %v4395_v9, %v4396_v37  ;;  %v4404_v37 = vsel %vm12281_vm5, %v4402_v59, %v4403_v30  ;;  %v5404_v59 = vld [vmem:[#allocation2 + $0xc] sm:$0xf]  ;;  %v4407_v30 = vrot.slane %v12150_v39, 5 }
 0x366   : > { %v4475_v45 = vunpack.c.l.b16 %v4397_v60  ;;  %v14099_v12 = vrot.slane %v12192_v33, 7 }
 0x368   : > { %v4501_v17 = vpack.c.b16 %v4475_v45, %v4474_v35  ;;  %15977 = vst [vmem:[#allocation35_spill] sm:$0xff] %v14099_v12  ;;  %v14115_v8 = vrot.slane %v14099_v12, 4  ;;  %v15983_v35 = vmov 0 }
 0x369   : > { %v15984_v35 = vsel %vm14132_vm15, 4294967295, %v15983_v35 }
 0x36a   : > { %15980 = vst [vmem:[#allocation36_spill] sm:$0xff] %v14115_v8  ;;  %v5047_v45 = vsel %vm14119_vm13, %v14115_v8, %v14099_v12 }
 0x36b   : > { %15985 = vst [vmem:[#allocation42_spill] sm:$0xff] %v15984_v35 }
 0x36c   : > { %5398 = vst [vmem:[#allocation2 + $0x4] sm:$0xf] %v5047_v45 }
 0x36d   : > { %v4576_v31 = vpop.f32.mrf.mxu0  ;;  %5519 = vst [vmem:[#allocation2 + $0xd0] sm:$0xf] %v5047_v45 }
 0x36e   : > { %v11851_v31 = vld [vmem:[%s12265_s12 + $0x18] sm:$0xf] }
 0x370   : > { %11185 = vmatmul.msk.bf16.gmra.mxu0 %vm865_vm7, %v4500_v24 }
 0x375   : > { %v4578_v34 = vpop.f32.mrf.mxu0 }
 0x37d   : > { %v4581_v48 = vpop.f32.mrf.mxu0 }
 0x37e   : > { %v4668_v62 = vadd.f32 %v4581_v48, %v13414_v14  ;;  %v11168_v14 = vrot.slane %v11150_v20, 9  ;;  %v5401_v48 = vld [vmem:[#allocation2 + $0x8] sm:$0x1]  ;;  %v12043_v20 = vld [vmem:[%s15839_s3 + $0x138] sm:$0xff] }
 0x37f   : > { %7708 = vmatpush.bf16.msrb.mxu2 %v12043_v20 }
 0x380   : > { %v4708_v57 = vadd.f32 %v14089_v3, %v4668_v62  ;;  %11186 = vmatmul.msk.bf16.gmra.mxu0 %vm865_vm7, %v4501_v17  ;;  %v4401_v44 = vsel %vm12281_vm5, %v11168_v14, %v4400_v63  ;;  %v5396_v17 = vsel %vm14109_vm12, %v14099_v12, %v5395_v10  ;;  %v4477_v62 = vunpack.c.l.b16 %v4404_v37  ;;  %v12035_v14 = vld [vmem:[%s15839_s3 + $0xf8] sm:$0xff] }
 0x381   : > { %v4476_v63 = vunpack.c.l.b16 %v4401_v44  ;;  %5397 = vst [vmem:[#allocation2] sm:$0xf] %v5396_v17  ;;  %v11151_v10 = vld [vmem:[%s12265_s12 + $0x9c] sm:$0xe]  ;;  %7026 = vmatpush.bf16.msrb.mxu1 %v12035_v14  ;;  %v12151_v17 = vld [vmem:[%s12265_s12 + $0xa4] sm:$0x1] }
 0x382   : > { %v4744_v24 = vmax.f32 %v4708_v57, 0.0  ;;  %v12051_v57 = vld [vmem:[%s15839_s3 + $0x178] sm:$0xff] }
 0x383   : > { %8134 = vmatpush.bf16.msrb.mxu3 %v12051_v57  ;;  %v4502_v33 = vpack.c.b16 %v4477_v62, %v4476_v63 }
 0x384   : > { %v4995_v46 = vpack.c.bf16 %v4744_v24, %v4744_v24 }
 0x385   : > { %v4583_v9 = vpop.f32.mrf.mxu0 }
 0x386   : > { %v5050_v34 = vshrl.u32 %v4995_v46, 16  ;;  %v4669_v27 = vadd.f32 %v4583_v9, %v13437_v23  ;;  %v5053_v60 = vshll.u32 %v4995_v46, 16  ;;  %v5402_v9 = vsel %vm14132_vm15, %v14115_v8, %v5401_v48  ;;  %v5408_v48 = vld [vmem:[#allocation2 + $0x14] sm:$0x1] }
 0x387   : > { %5403 = vst [vmem:[#allocation2 + $0x8] sm:$0x1] %v5402_v9 }
 0x388   : > { %v5052_v23 = vrot.slane %v5050_v34, 7  ;;  %v4709_v7 = vadd.f32 %v14089_v3, %v4669_v27  ;;  %v11169_v27 = vrot.slane %v11151_v10, 9  ;;  %v6422_v45 = vld [vmem:[#allocation2] sm:$0xe] }
 0x389   : > { %v5523_v63 = vld [vmem:[#allocation2] sm:$0xf] }
 0x38a   : > { %v5055_v24 = vor.u32 %v5053_v60, %v5052_v23  ;;  %v4745_v46 = vmax.f32 %v4709_v7, 0.0  ;;  %v4409_v60 = vrot.slane %v4407_v30, 4  ;;  %v4410_v7 = vrot.slane %v12151_v17, 5 }
 0x38b   : > { %v4408_v62 = vsel %vm12281_vm5, %v11169_v27, %v4407_v30  ;;  %v5588_v17 = vshrl.u32 %v5523_v63, 16 }
 0x38c   : > { %v5405_v44 = vsel %vm14109_vm12, %v5055_v24, %v5404_v59  ;;  %v4996_v37 = vpack.c.bf16 %v4745_v46, %v4745_v46  ;;  %v5056_v59 = vrot.slane %v5052_v23, 4  ;;  %v4411_v24 = vsel %vm12281_vm5, %v4409_v60, %v4410_v7 }
 0x38d   : > { %5406 = vst [vmem:[#allocation2 + $0xc] sm:$0xf] %v5405_v44  ;;  %v4586_v34 = vpop.f32.mrf.mxu0  ;;  %v5524_v44 = vld [vmem:[#allocation2 + $0x4] sm:$0xf] }
 0x38e   : > { %v5058_v20 = vshrl.u32 %v4996_v37, 16  ;;  %v4670_v57 = vadd.f32 %v4586_v34, %v13473_v56  ;;  %v5061_v12 = vshll.u32 %v4996_v37, 16  ;;  %v11972_v56 = vld [vmem:[#allocation2] sm:$0xff]  ;;  %v11339_v37 = vrot.slane %v6422_v45, 9 }
 0x38f   : > { %v6472_v34 = vrot.slane %v5524_v44, 5  ;;  %6341 = vmatmul.bf16.vlgmr.msra.gmra.mxu2 %v11972_v56  ;;  %v5601_v27 = vshrl.u32 %v5524_v44, 16  ;;  %v4479_v45 = vunpack.c.l.b16 %v4411_v24 }
 0x390   : > { %v5060_v39 = vrot.slane %v5058_v20, 7  ;;  %v4710_v14 = vadd.f32 %v14089_v3, %v4670_v57  ;;  %11187 = vmatmul.msk.bf16.gmra.mxu0 %vm865_vm7, %v4502_v33  ;;  %v5591_v20 = vshll.u32 %v5523_v63, 16  ;;  %v5597_v57 = vshll.u32 %v5524_v44, 16 }
 0x391   : > { %v6473_v60 = vsel %vm12281_vm5, %v11339_v37, %v6472_v34  ;;  %v6474_v7 = vrot.slane %v6472_v34, 4 }
 0x392   : > { %v5063_v46 = vor.u32 %v5061_v12, %v5060_v39  ;;  %v5065_v10 = vrot.slane %v5060_v39, 4  ;;  %v4746_v9 = vmax.f32 %v4710_v14, 0.0  ;;  %v5571_v12 = vld [vmem:[#allocation2 + $0x8] sm:$0x1]  ;;  %v5590_v39 = vrot.slane %v5588_v17, 4 }
 0x393   : > { %v6475_v8 = vrot.slane %v5571_v12, 5  ;;  %v6599_v16 = vunpack.c.l.b16 %v6473_v60  ;;  %v5599_v50 = vrot.slane %v5597_v57, 5  ;;  %v5411_v17 = vld [vmem:[#allocation2 + $0x18] sm:$0xf] }
 0x394   : > { %v5064_v23 = vsel %vm14119_vm13, %v5056_v59, %v5063_v46  ;;  %v5409_v33 = vsel %vm14132_vm15, %v5065_v10, %v5408_v48  ;;  %v4997_v30 = vpack.c.bf16 %v4746_v9, %v4746_v9  ;;  %v4478_v59 = vunpack.c.l.b16 %v4408_v62  ;;  %v5525_v56 = vld [vmem:[#allocation2 + $0xc] sm:$0xf] }
 0x395   : > { %5407 = vst [vmem:[#allocation2 + $0x10] sm:$0xf] %v5064_v23  ;;  %v4588_v14 = vpop.f32.mrf.mxu0  ;;  %v5593_v46 = vrot.slane %v5591_v20, 5  ;;  %v5603_v48 = vrot.slane %v5601_v27, 4  ;;  %v5607_v10 = vshll.u32 %v5571_v12, 16  ;;  %v6476_v37 = vsel %vm12281_vm5, %v6474_v7, %v6475_v8 }
 0x396   : > { %5410 = vst [vmem:[#allocation2 + $0x14] sm:$0x1] %v5409_v33  ;;  %v5067_v63 = vshrl.u32 %v4997_v30, 16  ;;  %v5070_v44 = vshll.u32 %v4997_v30, 16  ;;  %v4671_v34 = vadd.f32 %v4588_v14, %v13500_v54  ;;  %v6600_v24 = vunpack.c.l.b16 %v6476_v37  ;;  %v6423_v60 = vld [vmem:[#allocation2 + $0xc] sm:$0xe] }
 0x397   : > { %v5594_v23 = vor.u32 %v5593_v46, %v5590_v39  ;;  %v5604_v33 = vor.u32 %v5603_v48, %v5599_v50  ;;  %v5609_v11 = vrot.slane %v5607_v10, 5  ;;  %v4503_v57 = vpack.c.b16 %v4479_v45, %v4478_v59 }
 0x398   : > { %v14176_v9 = vrot.slane %v5067_v63, 7  ;;  %v4711_v20 = vadd.f32 %v14089_v3, %v4671_v34  ;;  %v5612_v27 = vshrl.u32 %v5525_v56, 16  ;;  %v6631_v12 = vpack.c.b16 %v6600_v24, %v6599_v16 }
 0x399   : > { %v5595_v63 = vrot.slane %v5594_v23, 4  ;;  %v5605_v30 = vrot.slane %v5604_v33, 4  ;;  %v5615_v53 = vshll.u32 %v5525_v56, 16  ;;  %v11340_v39 = vrot.slane %v6423_v60, 9 }
 0x39a   : > { %v5072_v62 = vor.u32 %v5070_v44, %v14176_v9  ;;  %v4747_v54 = vmax.f32 %v4711_v20, 0.0  ;;  %v5614_v14 = vrot.slane %v5612_v27, 4  ;;  %6719 = vmatmul.bf16.vlgmr.msra.gmra.mxu3 %v6631_v12  ;;  %v5073_v24 = vrot.slane %v14176_v9, 4 }
 0x39b   : > { %v5600_v46 = vsel %vm12287_vm6, %v5595_v63, %v5599_v50  ;;  %v5610_v45 = vsel %vm12287_vm6, %v5605_v30, %v5609_v11  ;;  %v5617_v10 = vrot.slane %v5615_v53, 5 }
 0x39c   : > { %v5412_v8 = vsel %vm14109_vm12, %v5072_v62, %v5411_v17  ;;  %v5526_v7 = vld [vmem:[#allocation2 + $0x10] sm:$0xf]  ;;  %v5988_v56 = vunpack.c.l.b16 %v5600_v46  ;;  %v5989_v44 = vunpack.c.l.b16 %v5610_v45  ;;  %v4998_v37 = vpack.c.bf16 %v4747_v54, %v4747_v54  ;;  %v11152_v17 = vld [vmem:[%s12265_s12 + $0xa8] sm:$0xe] }
 0x39d   : > { %5413 = vst [vmem:[#allocation2 + $0x18] sm:$0xf] %v5412_v8  ;;  %v4591_v16 = vpop.f32.mrf.mxu0  ;;  %v5572_v59 = vld [vmem:[#allocation2 + $0x14] sm:$0x1]  ;;  %v6479_v48 = vrot.slane %v5526_v7, 5  ;;  %v11973_v20 = vld [vmem:[#allocation2 + $0xc] sm:$0xff]  ;;  %v5618_v53 = vor.u32 %v5617_v10, %v5614_v14 }
 0x39e   : > { %v4672_v34 = vadd.f32 %v4591_v16, %v13538_v38  ;;  %v6482_v50 = vrot.slane %v5572_v59, 5  ;;  %v6020_v60 = vpack.c.b16 %v5989_v44, %v5988_v56  ;;  %v5075_v62 = vshrl.u32 %v4998_v37, 16 }
 0x39f   : > { %v6480_v23 = vsel %vm12281_vm5, %v11340_v39, %v6479_v48  ;;  %v6481_v33 = vrot.slane %v6479_v48, 4  ;;  %v5078_v27 = vshll.u32 %v4998_v37, 16  ;;  %v5621_v12 = vshll.u32 %v5526_v7, 16  ;;  %v5415_v39 = vld [vmem:[#allocation2 + $0x20] sm:$0x1]  ;;  %6346 = vmatmul.bf16.gmra.mxu2 %v11973_v20  ;;  %v12042_v20 = vld [vmem:[%s15839_s3 + $0x130] sm:$0xff] }
 0x3a0   : > { %v4712_v11 = vadd.f32 %v14089_v3, %v4672_v34  ;;  %11188 = vmatmul.msk.bf16.gmra.mxu0 %vm865_vm7, %v4503_v57  ;;  %v11170_v9 = vrot.slane %v11152_v17, 9  ;;  %6108 = vmatmul.bf16.vlgmr.msra.gmra.mxu1 %v6020_v60  ;;  %v5077_v63 = vrot.slane %v5075_v62, 7  ;;  %v5625_v54 = vshrl.u32 %v5526_v7, 16  ;;  %v12152_v48 = vld [vmem:[%s12265_s12 + $0xac] sm:$0xf] }
 0x3a1   : > { %v6483_v38 = vsel %vm12281_vm5, %v6481_v33, %v6482_v50  ;;  %v6601_v46 = vunpack.c.l.b16 %v6480_v23  ;;  %v5623_v45 = vrot.slane %v5621_v12, 5  ;;  %v5631_v16 = vshll.u32 %v5572_v59, 16  ;;  %v12153_v50 = vld [vmem:[%s12265_s12 + $0xb0] sm:$0x1]  ;;  %7709 = vmatpush.bf16.msrb.mxu2 %v12042_v20 }
 0x3a2   : > { %v4748_v30 = vmax.f32 %v4712_v11, 0.0  ;;  %v6602_v8 = vunpack.c.l.b16 %v6483_v38  ;;  %v4414_v56 = vrot.slane %v12152_v48, 5  ;;  %v5080_v57 = vor.u32 %v5078_v27, %v5077_v63  ;;  %v12034_v27 = vld [vmem:[%s15839_s3 + $0xf0] sm:$0xff] }
 0x3a3   : > { %v5082_v14 = vrot.slane %v5077_v63, 4  ;;  %v5619_v44 = vrot.slane %v5618_v53, 4  ;;  %v5627_v17 = vrot.slane %v5625_v54, 4  ;;  %v4417_v7 = vrot.slane %v12153_v50, 5  ;;  %v12050_v53 = vld [vmem:[%s15839_s3 + $0x170] sm:$0xff]  ;;  %7027 = vmatpush.bf16.msrb.mxu1 %v12034_v27 }
 0x3a4   : > { %v4999_v10 = vpack.c.bf16 %v4748_v30, %v4748_v30  ;;  %v6632_v34 = vpack.c.b16 %v6602_v8, %v6601_v46  ;;  %v4415_v33 = vsel %vm12281_vm5, %v11170_v9, %v4414_v56  ;;  %v5527_v60 = vld [vmem:[#allocation2 + $0x18] sm:$0xf]  ;;  %v5081_v23 = vsel %vm14119_vm13, %v5073_v24, %v5080_v57  ;;  %8135 = vmatpush.bf16.msrb.mxu3 %v12050_v53 }
 0x3a5   : > { %v4593_v37 = vpop.f32.mrf.mxu0  ;;  %v5416_v59 = vsel %vm14132_vm15, %v5082_v14, %v5415_v39  ;;  %v5624_v11 = vsel %vm12287_vm6, %v5619_v44, %v5623_v45  ;;  %5414 = vst [vmem:[#allocation2 + $0x1c] sm:$0xf] %v5081_v23  ;;  %v5628_v38 = vor.u32 %v5627_v17, %v5623_v45  ;;  %v5633_v12 = vrot.slane %v5631_v16, 5  ;;  %v5418_v39 = vld [vmem:[#allocation2 + $0x24] sm:$0xf] }
 0x3a6   : > { %v5084_v62 = vshrl.u32 %v4999_v10, 16  ;;  %v4673_v24 = vadd.f32 %v4593_v37, %v13565_v42  ;;  %v4416_v9 = vrot.slane %v4414_v56, 4  ;;  %5417 = vst [vmem:[#allocation2 + $0x20] sm:$0x1] %v5416_v59  ;;  %v5087_v30 = vshll.u32 %v4999_v10, 16 }
 0x3a7   : > { %v4480_v8 = vunpack.c.l.b16 %v4415_v33  ;;  %v5636_v54 = vshrl.u32 %v5527_v60, 16  ;;  %v5629_v48 = vrot.slane %v5628_v38, 4  ;;  %v5639_v45 = vshll.u32 %v5527_v60, 16  ;;  %v6424_v57 = vld [vmem:[#allocation2 + $0x18] sm:$0xe] }
 0x3a8   : > { %v14218_v63 = vrot.slane %v5084_v62, 7  ;;  %v4713_v46 = vadd.f32 %v14089_v3, %v4673_v24  ;;  %v4418_v42 = vsel %vm12281_vm5, %v4416_v9, %v4417_v7  ;;  %v5990_v37 = vunpack.c.l.b16 %v5624_v11  ;;  %v11153_v33 = vld [vmem:[%s12265_s12 + $0xb4] sm:$0xe]  ;;  %v12154_v7 = vld [vmem:[%s12265_s12 + $0xb8] sm:$0xf] }
 0x3a9   : > { %v4481_v56 = vunpack.c.l.b16 %v4418_v42  ;;  %v5638_v14 = vrot.slane %v5636_v54, 4  ;;  %v5634_v44 = vsel %vm12287_vm6, %v5629_v48, %v5633_v12  ;;  %v5641_v17 = vrot.slane %v5639_v45, 5 }
 0x3aa   : > { %v5089_v16 = vor.u32 %v5087_v30, %v14218_v63  ;;  %v4749_v10 = vmax.f32 %v4713_v46, 0.0  ;;  %v5991_v23 = vunpack.c.l.b16 %v5634_v44  ;;  %v4421_v60 = vrot.slane %v12154_v7, 5  ;;  %6724 = vmatmul.bf16.gmra.mxu3 %v6632_v34 }
 0x3ab   : > { %v4504_v59 = vpack.c.b16 %v4481_v56, %v4480_v8  ;;  %v14232_v62 = vadd.f32 %v13555_v55, %v13677_v5  ;;  %v5090_v20 = vrot.slane %v14218_v63, 4  ;;  %v11341_v27 = vrot.slane %v6424_v57, 9  ;;  %v12155_v55 = vld [vmem:[%s12265_s12 + $0xbc] sm:$0x1] }
 0x3ac   : > { %v5419_v50 = vsel %vm14109_vm12, %v5089_v16, %v5418_v39  ;;  %v5000_v53 = vpack.c.bf16 %v4749_v10, %v4749_v10  ;;  %v6021_v24 = vpack.c.b16 %v5991_v23, %v5990_v37  ;;  %v5528_v12 = vld [vmem:[#allocation2 + $0x1c] sm:$0xf]  ;;  %v5642_v9 = vor.u32 %v5641_v17, %v5638_v14  ;;  %v5422_v14 = vld [vmem:[#allocation2 + $0x2c] sm:$0x1] }
 0x3ad   : > { %5420 = vst [vmem:[#allocation2 + $0x24] sm:$0xf] %v5419_v50  ;;  %v4596_v11 = vpop.f32.mrf.mxu0  ;;  %v11171_v30 = vrot.slane %v11153_v33, 9  ;;  %v5573_v54 = vld [vmem:[#allocation2 + $0x20] sm:$0x1]  ;;  %v6486_v39 = vrot.slane %v5528_v12, 5 }
 0x3ae   : > { %v4674_v38 = vadd.f32 %v4596_v11, %v13600_v47  ;;  %v5092_v8 = vshrl.u32 %v5000_v53, 16  ;;  %v4423_v46 = vrot.slane %v4421_v60, 4  ;;  %v4424_v5 = vrot.slane %v12155_v55, 5  ;;  %v11974_v42 = vld [vmem:[#allocation2 + $0x18] sm:$0xff] }
 0x3af   : > { %v5095_v48 = vshll.u32 %v5000_v53, 16  ;;  %v5645_v34 = vshll.u32 %v5528_v12, 16  ;;  %v5649_v45 = vshrl.u32 %v5528_v12, 16  ;;  %v6487_v47 = vsel %vm12281_vm5, %v11341_v27, %v6486_v39  ;;  %6351 = vmatmul.bf16.gmra.mxu2 %v11974_v42 }
 0x3b0   : > { %v4714_v63 = vadd.f32 %v14089_v3, %v4674_v38  ;;  %11189 = vmatmul.msk.bf16.gmra.mxu0 %vm865_vm7, %v4504_v59  ;;  %v5094_v16 = vrot.slane %v5092_v8, 7  ;;  %v6488_v56 = vrot.slane %v6486_v39, 4  ;;  %v6489_v57 = vrot.slane %v5573_v54, 5  ;;  %6113 = vmatmul.bf16.gmra.mxu1 %v6021_v24 }
 0x3b1   : > { %v5647_v44 = vrot.slane %v5645_v34, 5  ;;  %v5651_v37 = vrot.slane %v5649_v45, 4  ;;  %v5655_v17 = vshll.u32 %v5573_v54, 16  ;;  %v4422_v59 = vsel %vm12281_vm5, %v11171_v30, %v4421_v60 }
 0x3b2   : > { %v4750_v10 = vmax.f32 %v4714_v63, 0.0  ;;  %v5097_v33 = vor.u32 %v5095_v48, %v5094_v16  ;;  %v5099_v50 = vrot.slane %v5094_v16, 4  ;;  %v6490_v23 = vsel %vm12281_vm5, %v6488_v56, %v6489_v57  ;;  %v11154_v16 = vld [vmem:[%s12265_s12 + $0xc0] sm:$0xe] }
 0x3b3   : > { %v6603_v53 = vunpack.c.l.b16 %v6487_v47  ;;  %v5643_v11 = vrot.slane %v5642_v9, 4  ;;  %v5652_v27 = vor.u32 %v5651_v37, %v5647_v44  ;;  %v6604_v8 = vunpack.c.l.b16 %v6490_v23  ;;  %v5425_v47 = vld [vmem:[#allocation2 + $0x30] sm:$0xf] }
 0x3b4   : > { %v5001_v7 = vpack.c.bf16 %v4750_v10, %v4750_v10  ;;  %v5098_v24 = vsel %vm14119_vm13, %v5090_v20, %v5097_v33  ;;  %v5423_v38 = vsel %vm14132_vm15, %v5099_v50, %v5422_v14  ;;  %v4425_v54 = vsel %vm12281_vm5, %v4423_v46, %v4424_v5  ;;  %v5529_v39 = vld [vmem:[#allocation2 + $0x24] sm:$0xf] }
 0x3b5   : > { %v4598_v12 = vpop.f32.mrf.mxu0  ;;  %5421 = vst [vmem:[#allocation2 + $0x28] sm:$0xf] %v5098_v24  ;;  %v5648_v9 = vsel %vm12287_vm6, %v5643_v11, %v5647_v44  ;;  %v5657_v55 = vrot.slane %v5655_v17, 5  ;;  %v5653_v48 = vrot.slane %v5652_v27, 4  ;;  %v4482_v63 = vunpack.c.l.b16 %v4422_v59  ;;  %v6425_v57 = vld [vmem:[#allocation2 + $0x24] sm:$0xe] }
 0x3b6   : > { %v5101_v60 = vshrl.u32 %v5001_v7, 16  ;;  %v4675_v30 = vadd.f32 %v4598_v12, %v13627_v0  ;;  %5424 = vst [vmem:[#allocation2 + $0x2c] sm:$0x1] %v5423_v38  ;;  %v5104_v20 = vshll.u32 %v5001_v7, 16  ;;  %v4483_v42 = vunpack.c.l.b16 %v4425_v54  ;;  %v12156_v10 = vld [vmem:[%s12265_s12 + $0xc4] sm:$0xf] }
 0x3b7   : > { %v5660_v46 = vshrl.u32 %v5529_v39, 16  ;;  %v5663_v5 = vshll.u32 %v5529_v39, 16  ;;  %v6633_v56 = vpack.c.b16 %v6604_v8, %v6603_v53  ;;  %v5658_v0 = vsel %vm12287_vm6, %v5653_v48, %v5657_v55 }
 0x3b8   : > { %v5103_v34 = vrot.slane %v5101_v60, 7  ;;  %v4715_v45 = vadd.f32 %v14089_v3, %v4675_v30  ;;  %v11172_v14 = vrot.slane %v11154_v16, 9  ;;  %v4428_v44 = vrot.slane %v12156_v10, 5  ;;  %v5429_v16 = vld [vmem:[#allocation2 + $0x38] sm:$0x1] }
 0x3b9   : > { %v5993_v33 = vunpack.c.l.b16 %v5658_v0  ;;  %v5992_v50 = vunpack.c.l.b16 %v5648_v9  ;;  %v5662_v23 = vrot.slane %v5660_v46, 4  ;;  %v5665_v59 = vrot.slane %v5663_v5, 5 }
 0x3ba   : > { %v5106_v37 = vor.u32 %v5104_v20, %v5103_v34  ;;  %v4751_v17 = vmax.f32 %v4715_v45, 0.0  ;;  %v4505_v27 = vpack.c.b16 %v4483_v42, %v4482_v63  ;;  %v11342_v24 = vrot.slane %v6425_v57, 9  ;;  %6729 = vmatmul.bf16.gmra.mxu3 %v6633_v56 }
 0x3bb   : > { %v3497_v53 = vadd.f32 %v13557_v51, %v14232_v62  ;;  %v5107_v38 = vrot.slane %v5103_v34, 4  ;;  %v14265_v54 = vsel %vm12281_vm5, %v11172_v14, %v4428_v44  ;;  %v4430_v39 = vrot.slane %v4428_v44, 4 }
 0x3bc   : > { %v5426_v7 = vsel %vm14109_vm12, %v5106_v37, %v5425_v47  ;;  %v5002_v11 = vpack.c.bf16 %v4751_v17, %v4751_v17  ;;  %v5530_v8 = vld [vmem:[#allocation2 + $0x28] sm:$0xf]  ;;  %v6022_v30 = vpack.c.b16 %v5993_v33, %v5992_v50  ;;  %v5666_v63 = vor.u32 %v5665_v59, %v5662_v23 }
 0x3bd   : > { %5427 = vst [vmem:[#allocation2 + $0x30] sm:$0xf] %v5426_v7  ;;  %v4601_v12 = vpop.f32.mrf.mxu0  ;;  %v5574_v55 = vld [vmem:[#allocation2 + $0x2c] sm:$0x1]  ;;  %v6493_v20 = vrot.slane %v5530_v8, 5  ;;  %v5669_v51 = vshll.u32 %v5530_v8, 16  ;;  %v4231_v17 = vadd.f32 %v13577_v25, %v3497_v53  ;;  %v4484_v23 = vunpack.c.l.b16 %v14265_v54 }
 0x3be   : > { %v5109_v60 = vshrl.u32 %v5002_v11, 16  ;;  %v4676_v9 = vadd.f32 %v4601_v12, %v13672_v15  ;;  %v5112_v48 = vshll.u32 %v5002_v11, 16  ;;  %v5673_v62 = vshrl.u32 %v5530_v8, 16  ;;  %v11975_v45 = vld [vmem:[#allocation2 + $0x24] sm:$0xff] }
 0x3bf   : > { %v6495_v46 = vrot.slane %v6493_v20, 4  ;;  %v6496_v5 = vrot.slane %v5574_v55, 5  ;;  %v5671_v47 = vrot.slane %v5669_v51, 5  ;;  %v5679_v0 = vshll.u32 %v5574_v55, 16  ;;  %v12157_v15 = vld [vmem:[%s12265_s12 + $0xc8] sm:$0x1]  ;;  %6356 = vmatmul.bf16.gmra.mxu2 %v11975_v45 }
 0x3c0   : > { %v5111_v42 = vrot.slane %v5109_v60, 7  ;;  %v4716_v34 = vadd.f32 %v14089_v3, %v4676_v9  ;;  %11190 = vmatmul.msk.bf16.gmra.mxu0 %vm865_vm7, %v4505_v27  ;;  %v5675_v56 = vrot.slane %v5673_v62, 4  ;;  %v4431_v57 = vrot.slane %v12157_v15, 5  ;;  %6118 = vmatmul.bf16.gmra.mxu1 %v6022_v30  ;;  %v12041_v55 = vld [vmem:[%s15839_s3 + $0x128] sm:$0xff] }
 0x3c1   : > { %v6497_v37 = vsel %vm12281_vm5, %v6495_v46, %v6496_v5  ;;  %v6494_v33 = vsel %vm12281_vm5, %v11342_v24, %v6493_v20  ;;  %v5667_v27 = vrot.slane %v5666_v63, 4  ;;  %v5681_v53 = vrot.slane %v5679_v0, 5  ;;  %v12049_v20 = vld [vmem:[%s15839_s3 + $0x168] sm:$0xff]  ;;  %7710 = vmatpush.bf16.msrb.mxu2 %v12041_v55  ;;  %v12158_v5 = vld [vmem:[%s12265_s12 + $0xd0] sm:$0xf] }
 0x3c2   : > { %v5114_v14 = vor.u32 %v5112_v48, %v5111_v42  ;;  %v5116_v10 = vrot.slane %v5111_v42, 4  ;;  %v4752_v44 = vmax.f32 %v4716_v34, 0.0  ;;  %v5676_v50 = vor.u32 %v5675_v56, %v5671_v47  ;;  %v12033_v62 = vld [vmem:[%s15839_s3 + $0xe8] sm:$0xff]  ;;  %8136 = vmatpush.bf16.msrb.mxu3 %v12049_v20  ;;  %v5432_v56 = vld [vmem:[#allocation2 + $0x3c] sm:$0xf] }
 0x3c3   : > { %v6606_v60 = vunpack.c.l.b16 %v6497_v37  ;;  %v4432_v24 = vsel %vm12281_vm5, %v4430_v39, %v4431_v57  ;;  %v5672_v9 = vsel %vm12287_vm6, %v5667_v27, %v5671_v47  ;;  %v3178_v47 = vadd.f32 %v13614_v2, %v13728_v18  ;;  %7028 = vmatpush.bf16.msrb.mxu1 %v12033_v62  ;;  %v11155_v57 = vld [vmem:[%s12265_s12 + $0xcc] sm:$0xe]  ;;  %v12159_v55 = vld [vmem:[%s12265_s12 + $0xd4] sm:$0x1]  ;;  %v5436_v62 = vld [vmem:[#allocation2 + $0x44] sm:$0x1] }
 0x3c4   : > { %v5115_v59 = vsel %vm14119_vm13, %v5107_v38, %v5114_v14  ;;  %v5430_v7 = vsel %vm14132_vm15, %v5116_v10, %v5429_v16  ;;  %v5003_v11 = vpack.c.bf16 %v4752_v44, %v4752_v44  ;;  %v5531_v12 = vld [vmem:[#allocation2 + $0x30] sm:$0xf]  ;;  %v5677_v25 = vrot.slane %v5676_v50, 4 }
 0x3c5   : > { %5428 = vst [vmem:[#allocation2 + $0x34] sm:$0xf] %v5115_v59  ;;  %v4603_v8 = vpop.f32.mrf.mxu0  ;;  %v6605_v38 = vunpack.c.l.b16 %v6494_v33  ;;  %v4485_v39 = vunpack.c.l.b16 %v4432_v24  ;;  %v5684_v63 = vshrl.u32 %v5531_v12, 16  ;;  %v5687_v51 = vshll.u32 %v5531_v12, 16  ;;  %v6426_v46 = vld [vmem:[#allocation2 + $0x30] sm:$0xe] }
 0x3c6   : > { %5431 = vst [vmem:[#allocation2 + $0x38] sm:$0x1] %v5430_v7  ;;  %v5118_v54 = vshrl.u32 %v5003_v11, 16  ;;  %v4677_v30 = vadd.f32 %v4603_v8, %v4231_v17  ;;  %v5682_v48 = vsel %vm12287_vm6, %v5677_v25, %v5681_v53  ;;  %v5121_v34 = vshll.u32 %v5003_v11, 16 }
 0x3c7   : > { %v4435_v16 = vrot.slane %v12158_v5, 5  ;;  %v6634_v0 = vpack.c.b16 %v6606_v60, %v6605_v38  ;;  %v5995_v15 = vunpack.c.l.b16 %v5682_v48  ;;  %v14304_v44 = vrot.slane %v5684_v63, 4 }
 0x3c8   : > { %v14296_v42 = vrot.slane %v5118_v54, 7  ;;  %v4717_v45 = vadd.f32 %v14089_v3, %v4677_v30  ;;  %v5689_v37 = vrot.slane %v5687_v51, 5  ;;  %v5994_v17 = vunpack.c.l.b16 %v5672_v9 }
 0x3c9   : > { %v4506_v33 = vpack.c.b16 %v4485_v39, %v4484_v23  ;;  %v11343_v50 = vrot.slane %v6426_v46, 9  ;;  %v11173_v2 = vrot.slane %v11155_v57, 9  ;;  %v4437_v18 = vrot.slane %v4435_v16, 4  ;;  %v14317_v46 = vpop.f32.mrf.mxu2 }
 0x3ca   : > { %v5123_v14 = vor.u32 %v5121_v34, %v14296_v42  ;;  %v4753_v10 = vmax.f32 %v4717_v45, 0.0  ;;  %v3499_v27 = vadd.f32 %v13616_v58, %v3178_v47  ;;  %v5124_v12 = vrot.slane %v14296_v42, 4  ;;  %6734 = vmatmul.bf16.gmra.mxu3 %v6634_v0 }
 0x3cb   : > { %v6023_v23 = vpack.c.b16 %v5995_v15, %v5994_v17  ;;  %v5690_v54 = vor.u32 %v5689_v37, %v14304_v44  ;;  %v4438_v20 = vrot.slane %v12159_v55, 5  ;;  %v3180_v57 = vadd.f32 %v13685_v40, %v13771_v4 }
 0x3cc   : > { %v5433_v59 = vsel %vm14109_vm12, %v5123_v14, %v5432_v56  ;;  %v5004_v7 = vpack.c.bf16 %v4753_v10, %v4753_v10  ;;  %v5532_v11 = vld [vmem:[#allocation2 + $0x34] sm:$0xf]  ;;  %v4233_v15 = vadd.f32 %v13638_v52, %v3499_v27 }
 0x3cd   : > { %5434 = vst [vmem:[#allocation2 + $0x3c] sm:$0xf] %v5433_v59  ;;  %v4606_v8 = vpop.f32.mrf.mxu0  ;;  %v5575_v60 = vld [vmem:[#allocation2 + $0x38] sm:$0x1]  ;;  %v6500_v25 = vrot.slane %v5532_v11, 5  ;;  %v5693_v38 = vshll.u32 %v5532_v11, 16  ;;  %v4439_v17 = vsel %vm12281_vm5, %v4437_v18, %v4438_v20 }
 0x3ce   : > { %v5126_v53 = vshrl.u32 %v5004_v7, 16  ;;  %v4678_v24 = vadd.f32 %v4606_v8, %v13720_v13  ;;  %v5697_v9 = vshrl.u32 %v5532_v11, 16  ;;  %v5129_v58 = vshll.u32 %v5004_v7, 16  ;;  %v11976_v63 = vld [vmem:[#allocation2 + $0x30] sm:$0xff]  ;;  %v12160_v20 = vld [vmem:[%s12265_s12 + $0xdc] sm:$0xf] }
 0x3cf   : > { %v6502_v30 = vrot.slane %v6500_v25, 4  ;;  %v6503_v51 = vrot.slane %v5575_v60, 5  ;;  %v5695_v42 = vrot.slane %v5693_v38, 5  ;;  %v5703_v45 = vshll.u32 %v5575_v60, 16  ;;  %6361 = vmatmul.bf16.gmra.mxu2 %v11976_v63 }
 0x3d0   : > { %v5128_v48 = vrot.slane %v5126_v53, 7  ;;  %v4718_v39 = vadd.f32 %v14089_v3, %v4678_v24  ;;  %11191 = vmatmul.msk.bf16.gmra.mxu0 %vm865_vm7, %v4506_v33  ;;  %v5699_v34 = vrot.slane %v5697_v9, 4  ;;  %v4436_v13 = vsel %vm12281_vm5, %v11173_v2, %v4435_v16  ;;  %6123 = vmatmul.bf16.gmra.mxu1 %v6023_v23  ;;  %v5439_v23 = vld [vmem:[#allocation2 + $0x48] sm:$0xf] }
 0x3d1   : > { %v6504_v0 = vsel %vm12281_vm5, %v6502_v30, %v6503_v51  ;;  %v6501_v14 = vsel %vm12281_vm5, %v11343_v50, %v6500_v25  ;;  %v5705_v4 = vrot.slane %v5703_v45, 5  ;;  %v4486_v7 = vunpack.c.l.b16 %v4436_v13 }
 0x3d2   : > { %v5131_v5 = vor.u32 %v5129_v58, %v5128_v48  ;;  %v5133_v47 = vrot.slane %v5128_v48, 4  ;;  %v4754_v56 = vmax.f32 %v4718_v39, 0.0  ;;  %v5700_v10 = vor.u32 %v5699_v34, %v5695_v42  ;;  %v14344_v58 = vpop.f32.mrf.mxu3  ;;  %v14347_v34 = vpop.f32.mrf.mxu1 }
 0x3d3   : > { %v6608_v59 = vunpack.c.l.b16 %v6504_v0  ;;  %v6607_v2 = vunpack.c.l.b16 %v6501_v14  ;;  %v5691_v27 = vrot.slane %v5690_v54, 4  ;;  %v4487_v8 = vunpack.c.l.b16 %v4439_v17  ;;  %v11156_v54 = vld [vmem:[%s12265_s12 + $0xd8] sm:$0xe] }
 0x3d4   : > { %v5132_v16 = vsel %vm14119_vm13, %v5124_v12, %v5131_v5  ;;  %v5437_v44 = vsel %vm14132_vm15, %v5133_v47, %v5436_v62  ;;  %v5005_v37 = vpack.c.bf16 %v4754_v56, %v4754_v56  ;;  %v5533_v33 = vld [vmem:[#allocation2 + $0x3c] sm:$0xf]  ;;  %v5701_v40 = vrot.slane %v5700_v10, 4  ;;  %v3481_v62 = vpop.f32.mrf.mxu2 }
 0x3d5   : > { %5435 = vst [vmem:[#allocation2 + $0x40] sm:$0xf] %v5132_v16  ;;  %v4608_v52 = vpop.f32.mrf.mxu0  ;;  %v5708_v60 = vshrl.u32 %v5533_v33, 16  ;;  %v5711_v18 = vshll.u32 %v5533_v33, 16  ;;  %v5696_v30 = vsel %vm12287_vm6, %v5691_v27, %v5695_v42  ;;  %v3501_v38 = vadd.f32 %v13687_v19, %v3180_v57  ;;  %v14340_v55 = vld [vmem:[#allocation2 + $0x3c] sm:$0xe] }
 0x3d6   : > { %5438 = vst [vmem:[#allocation2 + $0x44] sm:$0x1] %v5437_v44  ;;  %v5135_v50 = vshrl.u32 %v5005_v37, 16  ;;  %v4679_v11 = vadd.f32 %v4608_v52, %v4233_v15  ;;  %v5706_v12 = vsel %vm12287_vm6, %v5701_v40, %v5705_v4  ;;  %v5138_v53 = vshll.u32 %v5005_v37, 16  ;;  %v12161_v52 = vld [vmem:[%s12265_s12 + $0xe0] sm:$0x1] }
 0x3d7   : > { %v6635_v9 = vpack.c.b16 %v6608_v59, %v6607_v2  ;;  %v4442_v48 = vrot.slane %v12160_v20, 5  ;;  %v5997_v51 = vunpack.c.l.b16 %v5706_v12  ;;  %v5996_v45 = vunpack.c.l.b16 %v5696_v30  ;;  %v12075_v40 = vld [vmem:[%s15839_s3 + $0x1b8] sm:$0xff] }
 0x3d8   : > { %v14334_v25 = vrot.slane %v5135_v50, 7  ;;  %v4719_v24 = vadd.f32 %v14089_v3, %v4679_v11  ;;  %v4507_v13 = vpack.c.b16 %v4487_v8, %v4486_v7  ;;  %v5710_v42 = vrot.slane %v5708_v60, 4  ;;  %v5443_v60 = vld [vmem:[#allocation2 + $0x50] sm:$0x1]  ;;  %8449 = vmatpush.bf16.msra.mxu0 %v12075_v40 }
 0x3d9   : > { %v5713_v5 = vrot.slane %v5711_v18, 5  ;;  %v11344_v0 = vrot.slane %v14340_v55, 9  ;;  %v11174_v15 = vrot.slane %v11156_v54, 9  ;;  %v4235_v57 = vadd.f32 %v13703_v22, %v3501_v38 }
 0x3da   : > { %v5140_v39 = vor.u32 %v5138_v53, %v14334_v25  ;;  %v4755_v63 = vmax.f32 %v4719_v24, 0.0  ;;  %6739 = vmatmul.bf16.gmra.mxu3 %v6635_v9  ;;  %v4444_v44 = vrot.slane %v4442_v48, 4  ;;  %v6024_v17 = vpack.c.b16 %v5997_v51, %v5996_v45 }
 0x3db   : > { %v4445_v59 = vrot.slane %v12161_v52, 5  ;;  %v5714_v7 = vor.u32 %v5713_v5, %v5710_v42 }
 0x3dc   : > { %v5440_v19 = vsel %vm14109_vm12, %v5140_v39, %v5439_v23  ;;  %v5006_v47 = vpack.c.bf16 %v4755_v63, %v4755_v63  ;;  %v5534_v56 = vld [vmem:[#allocation2 + $0x40] sm:$0xf]  ;;  %v4443_v39 = vsel %vm12281_vm5, %v11174_v15, %v4442_v48  ;;  %v12074_v63 = vld [vmem:[%s15839_s3 + $0x1b0] sm:$0xff] }
 0x3dd   : > { %5441 = vst [vmem:[#allocation2 + $0x48] sm:$0xf] %v5440_v19  ;;  %v4611_v14 = vpop.f32.mrf.mxu0  ;;  %v5576_v10 = vld [vmem:[#allocation2 + $0x44] sm:$0x1]  ;;  %v6507_v16 = vrot.slane %v5534_v56, 5  ;;  %v5717_v50 = vshll.u32 %v5534_v56, 16  ;;  %8450 = vmatpush.bf16.msra.mxu0 %v12074_v63 }
 0x3de   : > { %v5143_v37 = vshrl.u32 %v5006_v47, 16  ;;  %v4680_v33 = vadd.f32 %v4611_v14, %v13760_v43  ;;  %v5721_v22 = vshrl.u32 %v5534_v56, 16  ;;  %v5146_v2 = vshll.u32 %v5006_v47, 16  ;;  %v11977_v12 = vld [vmem:[#allocation2 + $0x3c] sm:$0xff]  ;;  %v3160_v51 = vpop.f32.mrf.mxu1 }
 0x3df   : > { %v6509_v4 = vrot.slane %v6507_v16, 4  ;;  %v6510_v8 = vrot.slane %v5576_v10, 5  ;;  %v5141_v43 = vrot.slane %v14334_v25, 4  ;;  %v5719_v18 = vrot.slane %v5717_v50, 5  ;;  %6366 = vmatmul.bf16.gmra.mxu2 %v11977_v12 }
 0x3e0   : > { %v5145_v11 = vrot.slane %v5143_v37, 7  ;;  %v4720_v27 = vadd.f32 %v14089_v3, %v4680_v33  ;;  %11192 = vmatmul.msk.bf16.gmra.mxu0 %vm865_vm7, %v4507_v13  ;;  %v5723_v53 = vrot.slane %v5721_v22, 4  ;;  %v5727_v23 = vshll.u32 %v5576_v10, 16  ;;  %6128 = vmatmul.bf16.gmra.mxu1 %v6024_v17  ;;  %v4215_v55 = vpop.f32.mrf.mxu3  ;;  %v3483_v3 = vpop.f32.mrf.mxu2  ;;  %v12040_v37 = vld [vmem:[%s15839_s3 + $0x120] sm:$0xff] }
 0x3e1   : > { %v6511_v9 = vsel %vm12281_vm5, %v6509_v4, %v6510_v8  ;;  %v5715_v54 = vrot.slane %v5714_v7, 4  ;;  %v4446_v25 = vsel %vm12281_vm5, %v4444_v44, %v4445_v59  ;;  %v6508_v42 = vsel %vm12281_vm5, %v11344_v0, %v6507_v16  ;;  %v12048_v0 = vld [vmem:[%s15839_s3 + $0x160] sm:$0xff]  ;;  %7711 = vmatpush.bf16.msrb.mxu2 %v12040_v37 }
 0x3e2   : > { %v5148_v24 = vor.u32 %v5146_v2, %v5145_v11  ;;  %v5150_v30 = vrot.slane %v5145_v11, 4  ;;  %v4756_v38 = vmax.f32 %v4720_v27, 0.0  ;;  %v5724_v20 = vor.u32 %v5723_v53, %v5719_v18  ;;  %v12032_v59 = vld [vmem:[%s15839_s3 + $0xe0] sm:$0xff]  ;;  %8137 = vmatpush.bf16.msrb.mxu3 %v12048_v0  ;;  %v5446_v27 = vld [vmem:[#allocation2 + $0x54] sm:$0xf] }
 0x3e3   : > { %v6610_v5 = vunpack.c.l.b16 %v6511_v9  ;;  %v5729_v47 = vrot.slane %v5727_v23, 5  ;;  %v4488_v10 = vunpack.c.l.b16 %v4443_v39  ;;  %v4489_v44 = vunpack.c.l.b16 %v4446_v25  ;;  %v14397_v4 = vld [vmem:[%s15838_s2] ss:$0 sm:$0xff]  ;;  %7029 = vmatpush.bf16.msrb.mxu1 %v12032_v59  ;;  %v12163_v53 = vld [vmem:[%s12265_s12 + $0xe8] sm:$0xf] }
 0x3e4   : > { %v5149_v62 = vsel %vm14119_vm13, %v5141_v43, %v5148_v24  ;;  %v5444_v45 = vsel %vm14132_vm15, %v5150_v30, %v5443_v60  ;;  %v5007_v13 = vpack.c.bf16 %v4756_v38, %v4756_v38  ;;  %v5725_v19 = vrot.slane %v5724_v20, 4  ;;  %v5535_v56 = vld [vmem:[#allocation2 + $0x48] sm:$0xf] }
 0x3e5   : > { %5442 = vst [vmem:[#allocation2 + $0x4c] sm:$0xf] %v5149_v62  ;;  %v4613_v48 = vpop.f32.mrf.mxu0  ;;  %v6609_v17 = vunpack.c.l.b16 %v6508_v42  ;;  %v5720_v33 = vsel %vm12287_vm6, %v5715_v54, %v5719_v18  ;;  %v14400_v50 = vld [vmem:[#allocation2 + $0x48] sm:$0xe]  ;;  %v5732_v22 = vshrl.u32 %v5535_v56, 16  ;;  %v5735_v11 = vshll.u32 %v5535_v56, 16 }
 0x3e6   : > { %5445 = vst [vmem:[#allocation2 + $0x50] sm:$0x1] %v5444_v45  ;;  %v5152_v15 = vshrl.u32 %v5007_v13, 16  ;;  %v4681_v14 = vadd.f32 %v4613_v48, %v4235_v57  ;;  %v5155_v16 = vshll.u32 %v5007_v13, 16  ;;  %v5730_v52 = vsel %vm12287_vm6, %v5725_v19, %v5729_v47  ;;  %v12073_v57 = vld [vmem:[%s15839_s3 + $0x1a8] sm:$0xff]  ;;  %v12071_v19 = vld [vmem:[%s15839_s3 + $0x198] sm:$0xff] }
 0x3e7   : > { %v3182_v2 = vadd.f32 %v13733_v6, %v13807_v41  ;;  %v6636_v12 = vpack.c.b16 %v6610_v5, %v6609_v17  ;;  %8451 = vmatpush.bf16.msra.mxu0 %v12073_v57  ;;  %v5999_v60 = vunpack.c.l.b16 %v5730_v52  ;;  %v11157_v18 = vld [vmem:[%s12265_s12 + $0xe4] sm:$0xe]  ;;  %v4449_v23 = vrot.slane %v12163_v53, 5  ;;  %v3162_v41 = vpop.f32.mrf.mxu1  ;;  %v12164_v52 = vld [vmem:[%s12265_s12 + $0xec] sm:$0x1] }
 0x3e8   : > { %v14392_v40 = vrot.slane %v5152_v15, 7  ;;  %v4721_v7 = vadd.f32 %v14397_v4, %v4681_v14  ;;  %v4217_v24 = vpop.f32.mrf.mxu3  ;;  %v5998_v30 = vunpack.c.l.b16 %v5720_v33  ;;  %v4508_v38 = vpack.c.b16 %v4489_v44, %v4488_v10  ;;  %v12072_v6 = vld [vmem:[%s15839_s3 + $0x1a0] sm:$0xff]  ;;  %v12069_v41 = vld [vmem:[%s15839_s3 + $0x188] sm:$0xff] }
 0x3e9   : > { %v11345_v9 = vrot.slane %v14400_v50, 9  ;;  %v5734_v20 = vrot.slane %v5732_v22, 4  ;;  %v5737_v39 = vrot.slane %v5735_v11, 5  ;;  %v3503_v25 = vadd.f32 %v13735_v49, %v3182_v2 }
 0x3ea   : > { %v5157_v8 = vor.u32 %v5155_v16, %v14392_v40  ;;  %v4757_v43 = vmax.f32 %v4721_v7, 0.0  ;;  %6744 = vmatmul.bf16.gmra.mxu3 %v6636_v12  ;;  %v11175_v45 = vrot.slane %v11157_v18, 9  ;;  %v6025_v42 = vpack.c.b16 %v5999_v60, %v5998_v30  ;;  %v12070_v12 = vld [vmem:[%s15839_s3 + $0x190] sm:$0xff] }
 0x3eb   : > { %8452 = vmatpush.bf16.msra.mxu0 %v12072_v6  ;;  %v4451_v5 = vrot.slane %v4449_v23, 4  ;;  %v5158_v47 = vrot.slane %v14392_v40, 4  ;;  %v4452_v57 = vrot.slane %v12164_v52, 5  ;;  %v4237_v22 = vadd.f32 %v13740_v61, %v3503_v25 }
 0x3ec   : > { %v5447_v55 = vsel %vm14109_vm12, %v5157_v8, %v5446_v27  ;;  %v5008_v3 = vpack.c.bf16 %v4757_v43, %v4757_v43  ;;  %v5536_v54 = vld [vmem:[#allocation2 + $0x4c] sm:$0xf]  ;;  %v5738_v11 = vor.u32 %v5737_v39, %v5734_v20  ;;  %v4450_v27 = vsel %vm12281_vm5, %v11175_v45, %v4449_v23  ;;  %v5453_v45 = vld [vmem:[#allocation2 + $0x60] sm:$0xf] }
 0x3ed   : > { %5448 = vst [vmem:[#allocation2 + $0x54] sm:$0xf] %v5447_v55  ;;  %v4616_v63 = vpop.f32.mrf.mxu0  ;;  %v5577_v51 = vld [vmem:[#allocation2 + $0x50] sm:$0x1]  ;;  %v6514_v62 = vrot.slane %v5536_v54, 5  ;;  %v5741_v56 = vshll.u32 %v5536_v54, 16  ;;  %v4453_v30 = vsel %vm12281_vm5, %v4451_v5, %v4452_v57 }
 0x3ee   : > { %v5160_v13 = vshrl.u32 %v5008_v3, 16  ;;  %v4682_v48 = vadd.f32 %v4616_v63, %v13801_v32  ;;  %v5745_v15 = vshrl.u32 %v5536_v54, 16  ;;  %v5163_v10 = vshll.u32 %v5008_v3, 16  ;;  %v11978_v37 = vld [vmem:[#allocation2 + $0x48] sm:$0xff]  ;;  %v5450_v32 = vld [vmem:[#allocation2 + $0x5c] sm:$0x1] }
 0x3ef   : > { %v6516_v49 = vrot.slane %v6514_v62, 4  ;;  %v6517_v0 = vrot.slane %v5577_v51, 5  ;;  %v5743_v16 = vrot.slane %v5741_v56, 5  ;;  %v5751_v33 = vshll.u32 %v5577_v51, 16  ;;  %8453 = vmatpush.bf16.msra.mxu0 %v12071_v19  ;;  %6371 = vmatmul.bf16.gmra.mxu2 %v11978_v37  ;;  %v15986_v57 = vld [vmem:[#allocation5_spill] sm:$0xff] }
 0x3f0   : > { %v5162_v14 = vrot.slane %v5160_v13, 7  ;;  %v4722_v44 = vadd.f32 %v14397_v4, %v4682_v48  ;;  %11193 = vmatmul.msk.bf16.gmra.mxu0 %vm865_vm7, %v4508_v38  ;;  %v5747_v17 = vrot.slane %v5745_v15, 4  ;;  %6133 = vmatmul.bf16.gmra.mxu1 %v6025_v42  ;;  %v6515_v61 = vsel %vm12281_vm5, %v11345_v9, %v6514_v62  ;;  %v12068_v15 = vld [vmem:[%s15839_s3 + $0x180] sm:$0xff] }
 0x3f1   : > { %v6518_v50 = vsel %vm12281_vm5, %v6516_v49, %v6517_v0  ;;  %v5753_v23 = vrot.slane %v5751_v33, 5  ;;  %v6611_v55 = vunpack.c.l.b16 %v6515_v61  ;;  %v5739_v3 = vrot.slane %v5738_v11, 4 }
 0x3f2   : > { %v5165_v59 = vor.u32 %v5163_v10, %v5162_v14  ;;  %v5167_v40 = vrot.slane %v5162_v14, 4  ;;  %v4758_v7 = vmax.f32 %v4722_v44, 0.0  ;;  %v5748_v2 = vor.u32 %v5747_v17, %v5743_v16 }
 0x3f3   : > { %v6612_v53 = vunpack.c.l.b16 %v6518_v50  ;;  %8454 = vmatpush.bf16.msra.mxu0 %v12070_v12  ;;  %v4490_v54 = vunpack.c.l.b16 %v4450_v27  ;;  %v4491_v51 = vunpack.c.l.b16 %v4453_v30  ;;  %v3184_v62 = vadd.f32 %v13781_v28, %v13825_v21 }
 0x3f4   : > { %v5166_v8 = vsel %vm14119_vm13, %v5158_v47, %v5165_v59  ;;  %v5451_v43 = vsel %vm14132_vm15, %v5167_v40, %v5450_v32  ;;  %v5009_v60 = vpack.c.bf16 %v4758_v7, %v4758_v7  ;;  %v5749_v24 = vrot.slane %v5748_v2, 4  ;;  %v5537_v20 = vld [vmem:[#allocation2 + $0x54] sm:$0xf] }
 0x3f5   : > { %5449 = vst [vmem:[#allocation2 + $0x58] sm:$0xf] %v5166_v8  ;;  %v4618_v18 = vpop.f32.mrf.mxu0  ;;  %v6637_v13 = vpack.c.b16 %v6612_v53, %v6611_v55  ;;  %v5744_v42 = vsel %vm12287_vm6, %v5739_v3, %v5743_v16  ;;  %v6429_v47 = vld [vmem:[#allocation2 + $0x54] sm:$0xe]  ;;  %v5756_v49 = vshrl.u32 %v5537_v20, 16  ;;  %v5759_v56 = vshll.u32 %v5537_v20, 16 }
 0x3f6   : > { %5452 = vst [vmem:[#allocation2 + $0x5c] sm:$0x1] %v5451_v43  ;;  %v5169_v38 = vshrl.u32 %v5009_v60, 16  ;;  %v4683_v6 = vadd.f32 %v4618_v18, %v4237_v22  ;;  %v5754_v9 = vsel %vm12287_vm6, %v5749_v24, %v5753_v23  ;;  %v5172_v25 = vshll.u32 %v5009_v60, 16  ;;  %v5457_v60 = vld [vmem:[#allocation2 + $0x68] sm:$0x1] }
 0x3f7   : > { %8455 = vmatpush.bf16.msra.mxu0 %v12069_v41  ;;  %v6001_v19 = vunpack.c.l.b16 %v5754_v9  ;;  %v6000_v21 = vunpack.c.l.b16 %v5744_v42  ;;  %v4509_v10 = vpack.c.b16 %v4491_v51, %v4490_v54  ;;  %v3505_v37 = vadd.f32 %v13790_v1, %v3184_v62  ;;  %v12039_v42 = vld [vmem:[%s15839_s3 + $0x118] sm:$0xff] }
 0x3f8   : > { %v5171_v39 = vrot.slane %v5169_v38, 7  ;;  %v4723_v63 = vadd.f32 %v14397_v4, %v4683_v6  ;;  %v11346_v16 = vrot.slane %v6429_v47, 9  ;;  %v5758_v40 = vrot.slane %v5756_v49, 4  ;;  %v15987_v6 = vld [vmem:[#allocation3_spill] sm:$0xff]  ;;  %7712 = vmatpush.bf16.msrb.mxu2 %v12039_v42 }
 0x3f9   : > { %v6026_v52 = vpack.c.b16 %v6001_v19, %v6000_v21  ;;  %v5761_v50 = vrot.slane %v5759_v56, 5  ;;  %v4239_v41 = vadd.f32 %v15987_v6, %v3505_v37  ;;  %v15989_v21 = vld [vmem:[#allocation11_spill] sm:$0xff] }
 0x3fa   : > { %v5174_v48 = vor.u32 %v5172_v25, %v5171_v39  ;;  %v4759_v5 = vmax.f32 %v4723_v63, 0.0  ;;  %6749 = vmatmul.bf16.gmra.mxu3 %v6637_v13  ;;  %v5175_v43 = vrot.slane %v5171_v39, 4 }
 0x3fb   : > { %8456 = vmatpush.bf16.msra.mxu0 %v12068_v15  ;;  %v5762_v55 = vor.u32 %v5761_v50, %v5758_v40 }
 0x3fc   : > { %v5454_v14 = vsel %vm14109_vm12, %v5174_v48, %v5453_v45  ;;  %v5010_v28 = vpack.c.bf16 %v4759_v5, %v4759_v5  ;;  %v5538_v44 = vld [vmem:[#allocation2 + $0x58] sm:$0xf] }
 0x3fd   : > { %5455 = vst [vmem:[#allocation2 + $0x60] sm:$0xf] %v5454_v14  ;;  %v4621_v0 = vpop.f32.mrf.mxu0  ;;  %v5578_v32 = vld [vmem:[#allocation2 + $0x5c] sm:$0x1]  ;;  %v6521_v17 = vrot.slane %v5538_v44, 5  ;;  %v5765_v22 = vshll.u32 %v5538_v44, 16 }
 0x3fe   : > { %v5177_v33 = vshrl.u32 %v5010_v28, 16  ;;  %v4684_v59 = vadd.f32 %v4621_v0, %v15986_v57  ;;  %v5769_v11 = vshrl.u32 %v5538_v44, 16  ;;  %v5180_v27 = vshll.u32 %v5010_v28, 16  ;;  %v11979_v12 = vld [vmem:[#allocation2 + $0x54] sm:$0xff]  ;;  %v5460_v44 = vld [vmem:[#allocation2 + $0x6c] sm:$0xf] }
 0x3ff   : > { %v6523_v7 = vrot.slane %v6521_v17, 4  ;;  %v6524_v8 = vrot.slane %v5578_v32, 5  ;;  %v5767_v61 = vrot.slane %v5765_v22, 5  ;;  %v5775_v53 = vshll.u32 %v5578_v32, 16  ;;  %6376 = vmatmul.bf16.gmra.mxu2 %v11979_v12  ;;  %v12047_v14 = vld [vmem:[%s15839_s3 + $0x158] sm:$0xff] }
 0x400   : > { %v5179_v2 = vrot.slane %v5177_v33, 7  ;;  %v4724_v1 = vadd.f32 %v14397_v4, %v4684_v59  ;;  %11194 = vmatmul.msk.bf16.gmra.mxu0 %vm865_vm7, %v4509_v10  ;;  %v5771_v18 = vrot.slane %v5769_v11, 4  ;;  %6138 = vmatmul.bf16.gmra.mxu1 %v6026_v52  ;;  %v6522_v39 = vsel %vm12281_vm5, %v11346_v16, %v6521_v17  ;;  %v15988_v28 = vld [vmem:[#allocation15_spill] sm:$0xff]  ;;  %v15990_v11 = vld [vmem:[#allocation4_spill] sm:$0xff] }
 0x401   : > { %v6525_v38 = vsel %vm12281_vm5, %v6523_v7, %v6524_v8  ;;  %v5777_v62 = vrot.slane %v5775_v53, 5  ;;  %v6613_v48 = vunpack.c.l.b16 %v6522_v39  ;;  %v5763_v5 = vrot.slane %v5762_v55, 4  ;;  %8138 = vmatpush.bf16.msrb.mxu3 %v12047_v14  ;;  %v12031_v57 = vld [vmem:[%s15839_s3 + $0xd8] sm:$0xff]  ;;  %v5464_v39 = vld [vmem:[#allocation2 + $0x74] sm:$0x1] }
 0x402   : > { %v5182_v24 = vor.u32 %v5180_v27, %v5179_v2  ;;  %v5184_v23 = vrot.slane %v5179_v2, 4  ;;  %v4760_v30 = vmax.f32 %v4724_v1, 0.0  ;;  %v5772_v3 = vor.u32 %v5771_v18, %v5767_v61  ;;  %7030 = vmatpush.bf16.msrb.mxu1 %v12031_v57  ;;  %v12052_v53 = vld [vmem:[#allocation2 + $0x18] sm:$0xff] }
 0x403   : > { %v6614_v63 = vunpack.c.l.b16 %v6525_v38  ;;  %v3186_v10 = vadd.f32 %v15989_v21, %v15988_v28  ;;  %v5768_v0 = vsel %vm12287_vm6, %v5763_v5, %v5767_v61  ;;  %v15991_v61 = vld [vmem:[#allocation16_spill] sm:$0xff] }
 0x404   : > { %v5183_v9 = vsel %vm14119_vm13, %v5175_v43, %v5182_v24  ;;  %v5458_v54 = vsel %vm14132_vm15, %v5184_v23, %v5457_v60  ;;  %v5011_v20 = vpack.c.bf16 %v4760_v30, %v4760_v30  ;;  %v5773_v51 = vrot.slane %v5772_v3, 4  ;;  %v5539_v47 = vld [vmem:[#allocation2 + $0x60] sm:$0xf] }
 0x405   : > { %5456 = vst [vmem:[#allocation2 + $0x64] sm:$0xf] %v5183_v9  ;;  %v4623_v25 = vpop.f32.mrf.mxu0  ;;  %v6638_v37 = vpack.c.b16 %v6614_v63, %v6613_v48  ;;  %v6430_v33 = vld [vmem:[#allocation2 + $0x60] sm:$0xe]  ;;  %v5780_v52 = vshrl.u32 %v5539_v47, 16  ;;  %v5783_v59 = vshll.u32 %v5539_v47, 16  ;;  %v6002_v50 = vunpack.c.l.b16 %v5768_v0 }
 0x406   : > { %5459 = vst [vmem:[#allocation2 + $0x68] sm:$0x1] %v5458_v54  ;;  %v5186_v45 = vshrl.u32 %v5011_v20, 16  ;;  %v4685_v13 = vadd.f32 %v4623_v25, %v4239_v41  ;;  %v5778_v19 = vsel %vm12287_vm6, %v5773_v51, %v5777_v62  ;;  %v5189_v56 = vshll.u32 %v5011_v20, 16  ;;  %v15992_v48 = vld [vmem:[#allocation10_spill] sm:$0xff] }
 0x407   : > { %v6003_v17 = vunpack.c.l.b16 %v5778_v19  ;;  %v3507_v2 = vadd.f32 %v15990_v11, %v3186_v10  ;;  %v11347_v12 = vrot.slane %v6430_v33, 9  ;;  %v5782_v24 = vrot.slane %v5780_v52, 4  ;;  %v15994_v11 = vld [vmem:[#allocation6_spill] sm:$0xff] }
 0x408   : > { %v5188_v49 = vrot.slane %v5186_v45, 7  ;;  %v4725_v15 = vadd.f32 %v14397_v4, %v4685_v13  ;;  %v5785_v30 = vrot.slane %v5783_v59, 5 }
 0x409   : > { %v6027_v60 = vpack.c.b16 %v6003_v17, %v6002_v50  ;;  %v4241_v5 = vadd.f32 %v15992_v48, %v3507_v2 }
 0x40a   : > { %v5191_v32 = vor.u32 %v5189_v56, %v5188_v49  ;;  %v4761_v16 = vmax.f32 %v4725_v15, 0.0  ;;  %6754 = vmatmul.bf16.gmra.mxu3 %v6638_v37  ;;  %v5192_v20 = vrot.slane %v5188_v49, 4  ;;  %v5786_v19 = vor.u32 %v5785_v30, %v5782_v24 }
 0x40c   : > { %v5461_v40 = vsel %vm14109_vm12, %v5191_v32, %v5460_v44  ;;  %v5012_v7 = vpack.c.bf16 %v4761_v16, %v4761_v16  ;;  %v5540_v22 = vld [vmem:[#allocation2 + $0x64] sm:$0xf]  ;;  %v5787_v52 = vrot.slane %v5786_v19, 4 }
 0x40d   : > { %5462 = vst [vmem:[#allocation2 + $0x6c] sm:$0xf] %v5461_v40  ;;  %v4626_v27 = vpop.f32.mrf.mxu0  ;;  %v5579_v1 = vld [vmem:[#allocation2 + $0x68] sm:$0x1]  ;;  %v6528_v8 = vrot.slane %v5540_v22, 5  ;;  %v5789_v38 = vshll.u32 %v5540_v22, 16 }
 0x40e   : > { %v5194_v43 = vshrl.u32 %v5012_v7, 16  ;;  %v4686_v18 = vadd.f32 %v4626_v27, %v15991_v61  ;;  %v5793_v6 = vshrl.u32 %v5540_v22, 16  ;;  %v5197_v55 = vshll.u32 %v5012_v7, 16  ;;  %v11980_v9 = vld [vmem:[#allocation2 + $0x60] sm:$0xff]  ;;  %v5467_v27 = vld [vmem:[#allocation2 + $0x78] sm:$0xf] }
 0x40f   : > { %v6530_v23 = vrot.slane %v6528_v8, 4  ;;  %v6531_v54 = vrot.slane %v5579_v1, 5  ;;  %v5791_v25 = vrot.slane %v5789_v38, 5  ;;  %v5799_v51 = vshll.u32 %v5579_v1, 16  ;;  %6381 = vmatmul.bf16.gmra.mxu2 %v11980_v9  ;;  %v15993_v22 = vld [vmem:[#allocation20_spill] sm:$0xff] }
 0x410   : > { %v5196_v41 = vrot.slane %v5194_v43, 7  ;;  %v4726_v3 = vadd.f32 %v14397_v4, %v4686_v18  ;;  %8457 = vmatmul.bf16.vlgmr.msra.gmra.mxu0 %v12052_v53  ;;  %v5795_v63 = vrot.slane %v5793_v6, 4  ;;  %6143 = vmatmul.bf16.gmra.mxu1 %v6027_v60  ;;  %v6529_v14 = vsel %vm12281_vm5, %v11347_v12, %v6528_v8 }
 0x411   : > { %v6532_v42 = vsel %vm12281_vm5, %v6530_v23, %v6531_v54  ;;  %v5801_v37 = vrot.slane %v5799_v51, 5  ;;  %v6615_v33 = vunpack.c.l.b16 %v6529_v14  ;;  %v3188_v2 = vadd.f32 %v15994_v11, %v15993_v22 }
 0x412   : > { %v5199_v62 = vor.u32 %v5197_v55, %v5196_v41  ;;  %v5201_v45 = vrot.slane %v5196_v41, 4  ;;  %v4762_v13 = vmax.f32 %v4726_v3, 0.0  ;;  %v5796_v47 = vor.u32 %v5795_v63, %v5791_v25  ;;  %v6342_v17 = vpop.f32.mrf.mxu2  ;;  %v15995_v41 = vld [vmem:[#allocation7_spill] sm:$0xff]  ;;  %v15996_v63 = vld [vmem:[#allocation9_spill] sm:$0xff] }
 0x413   : > { %v6616_v10 = vunpack.c.l.b16 %v6532_v42  ;;  %v5792_v12 = vsel %vm12287_vm6, %v5787_v52, %v5791_v25  ;;  %v3509_v55 = vadd.f32 %v15995_v41, %v3188_v2 }
 0x414   : > { %v5200_v56 = vsel %vm14119_vm13, %v5192_v20, %v5199_v62  ;;  %v5465_v49 = vsel %vm14132_vm15, %v5201_v45, %v5464_v39  ;;  %v5013_v15 = vpack.c.bf16 %v4762_v13, %v4762_v13  ;;  %v5541_v28 = vld [vmem:[#allocation2 + $0x6c] sm:$0xf]  ;;  %v5797_v44 = vrot.slane %v5796_v47, 4  ;;  %v12053_v62 = vld [vmem:[#allocation2 + $0x24] sm:$0xff] }
 0x415   : > { %5463 = vst [vmem:[#allocation2 + $0x70] sm:$0xf] %v5200_v56  ;;  %v4628_v21 = vpop.f32.mrf.mxu0  ;;  %v5804_v16 = vshrl.u32 %v5541_v28, 16  ;;  %v5807_v59 = vshll.u32 %v5541_v28, 16  ;;  %v6639_v1 = vpack.c.b16 %v6616_v10, %v6615_v33  ;;  %v6431_v43 = vld [vmem:[#allocation2 + $0x6c] sm:$0xe]  ;;  %v6004_v30 = vunpack.c.l.b16 %v5792_v12 }
 0x416   : > { %5466 = vst [vmem:[#allocation2 + $0x74] sm:$0x1] %v5465_v49  ;;  %v5203_v0 = vshrl.u32 %v5013_v15, 16  ;;  %v4687_v32 = vadd.f32 %v4628_v21, %v4241_v5  ;;  %v5802_v57 = vsel %vm12287_vm6, %v5797_v44, %v5801_v37  ;;  %v5206_v7 = vshll.u32 %v5013_v15, 16  ;;  %v5471_v10 = vld [vmem:[#allocation2 + $0x80] sm:$0x1] }
 0x417   : > { %v6005_v8 = vunpack.c.l.b16 %v5802_v57  ;;  %v5806_v18 = vrot.slane %v5804_v16, 4  ;;  %v5809_v53 = vrot.slane %v5807_v59, 5  ;;  %v11348_v6 = vrot.slane %v6431_v43, 9  ;;  %v15997_v57 = vld [vmem:[#allocation8_spill] sm:$0xff] }
 0x418   : > { %v5205_v40 = vrot.slane %v5203_v0, 7  ;;  %v4727_v50 = vadd.f32 %v14397_v4, %v4687_v32  ;;  %v4243_v59 = vadd.f32 %v15997_v57, %v3509_v55  ;;  %v12030_v55 = vld [vmem:[%s15839_s3 + $0xd0] sm:$0xff] }
 0x419   : > { %v6028_v25 = vpack.c.b16 %v6005_v8, %v6004_v30  ;;  %v5810_v45 = vor.u32 %v5809_v53, %v5806_v18  ;;  %v12038_v18 = vld [vmem:[%s15839_s3 + $0x110] sm:$0xff]  ;;  %7031 = vmatpush.bf16.msrb.mxu1 %v12030_v55 }
 0x41a   : > { %v5208_v60 = vor.u32 %v5206_v7, %v5205_v40  ;;  %v4763_v61 = vmax.f32 %v4727_v50, 0.0  ;;  %v5209_v3 = vrot.slane %v5205_v40, 4  ;;  %6759 = vmatmul.bf16.gmra.mxu3 %v6639_v1  ;;  %v6344_v42 = vpop.f32.mrf.mxu2  ;;  %v12046_v53 = vld [vmem:[%s15839_s3 + $0x150] sm:$0xff]  ;;  %7713 = vmatpush.bf16.msrb.mxu2 %v12038_v18 }
 0x41b   : > { %v5811_v40 = vrot.slane %v5810_v45, 4  ;;  %8139 = vmatpush.bf16.msrb.mxu3 %v12046_v53  ;;  %v5478_v53 = vld [vmem:[#allocation2 + $0x8c] sm:$0x1] }
 0x41c   : > { %v5468_v24 = vsel %vm14109_vm12, %v5208_v60, %v5467_v27  ;;  %v5014_v23 = vpack.c.bf16 %v4763_v61, %v4763_v61  ;;  %v5542_v38 = vld [vmem:[#allocation2 + $0x70] sm:$0xf] }
 0x41d   : > { %5469 = vst [vmem:[#allocation2 + $0x78] sm:$0xf] %v5468_v24  ;;  %v4631_v9 = vpop.f32.mrf.mxu0  ;;  %v5580_v54 = vld [vmem:[#allocation2 + $0x74] sm:$0x1]  ;;  %v6535_v20 = vrot.slane %v5542_v38, 5  ;;  %v6109_v13 = vpop.f32.mrf.mxu1  ;;  %v5813_v19 = vshll.u32 %v5542_v38, 16 }
 0x41e   : > { %v5211_v39 = vshrl.u32 %v5014_v23, 16  ;;  %v4688_v51 = vadd.f32 %v4631_v9, %v15996_v63  ;;  %v6538_v5 = vrot.slane %v5580_v54, 5  ;;  %v5817_v47 = vshrl.u32 %v5542_v38, 16  ;;  %v6720_v49 = vpop.f32.mrf.mxu3  ;;  %v11981_v21 = vld [vmem:[#allocation2 + $0x6c] sm:$0xff]  ;;  %v15999_v63 = vld [vmem:[#allocation12_spill] sm:$0xff] }
 0x41f   : > { %v6537_v48 = vrot.slane %v6535_v20, 4  ;;  %v6343_v56 = vadd.f32 %v6342_v17, %v6109_v13  ;;  %v5214_v14 = vshll.u32 %v5014_v23, 16  ;;  %v5815_v37 = vrot.slane %v5813_v19, 5  ;;  %6386 = vmatmul.bf16.gmra.mxu2 %v11981_v21 }
 0x420   : > { %v5213_v15 = vrot.slane %v5211_v39, 7  ;;  %v4728_v28 = vadd.f32 %v14397_v4, %v4688_v51  ;;  %8462 = vmatmul.bf16.gmra.mxu0 %v12053_v62  ;;  %v5819_v0 = vrot.slane %v5817_v47, 4  ;;  %v5823_v32 = vshll.u32 %v5580_v54, 16  ;;  %6148 = vmatmul.bf16.gmra.mxu1 %v6028_v25  ;;  %v15998_v25 = vld [vmem:[#allocation23_spill] sm:$0xff]  ;;  %v5474_v62 = vld [vmem:[#allocation2 + $0x84] sm:$0xf] }
 0x421   : > { %v6539_v44 = vsel %vm12281_vm5, %v6537_v48, %v6538_v5  ;;  %v14510_v16 = vadd.f32 %v6720_v49, %v6343_v56  ;;  %v6536_v2 = vsel %vm12281_vm5, %v11348_v6, %v6535_v20  ;;  %v5816_v6 = vsel %vm12287_vm6, %v5811_v40, %v5815_v37 }
 0x422   : > { %v5216_v33 = vor.u32 %v5214_v14, %v5213_v15  ;;  %v5218_v52 = vrot.slane %v5213_v15, 4  ;;  %v4764_v17 = vmax.f32 %v4728_v28, 0.0  ;;  %v5820_v7 = vor.u32 %v5819_v0, %v5815_v37  ;;  %v6347_v30 = vpop.f32.mrf.mxu2 }
 0x423   : > { %v6618_v1 = vunpack.c.l.b16 %v6539_v44  ;;  %v5825_v8 = vrot.slane %v5823_v32, 5  ;;  %v6617_v38 = vunpack.c.l.b16 %v6536_v2  ;;  %v3190_v51 = vadd.f32 %v15999_v63, %v15998_v25 }
 0x424   : > { %v5217_v50 = vsel %vm14119_vm13, %v5209_v3, %v5216_v33  ;;  %v5472_v22 = vsel %vm14132_vm15, %v5218_v52, %v5471_v10  ;;  %v5015_v11 = vpack.c.bf16 %v4764_v17, %v4764_v17  ;;  %v5821_v12 = vrot.slane %v5820_v7, 4  ;;  %v5543_v43 = vld [vmem:[#allocation2 + $0x78] sm:$0xf]  ;;  %v16000_v10 = vld [vmem:[#allocation18_spill] sm:$0xff] }
 0x425   : > { %5470 = vst [vmem:[#allocation2 + $0x7c] sm:$0xf] %v5217_v50  ;;  %v4633_v27 = vpop.f32.mrf.mxu0  ;;  %v6111_v24 = vpop.f32.mrf.mxu1  ;;  %v5828_v39 = vshrl.u32 %v5543_v43, 16  ;;  %v6640_v45 = vpack.c.b16 %v6618_v1, %v6617_v38  ;;  %v6432_v13 = vld [vmem:[#allocation2 + $0x78] sm:$0xe]  ;;  %v5831_v48 = vshll.u32 %v5543_v43, 16  ;;  %v6006_v56 = vunpack.c.l.b16 %v5816_v6 }
 0x426   : > { %5473 = vst [vmem:[#allocation2 + $0x80] sm:$0x1] %v5472_v22  ;;  %v5220_v60 = vshrl.u32 %v5015_v11, 16  ;;  %v4689_v61 = vadd.f32 %v4633_v27, %v4243_v59  ;;  %v5223_v23 = vshll.u32 %v5015_v11, 16  ;;  %v5826_v41 = vsel %vm12287_vm6, %v5821_v12, %v5825_v8  ;;  %v6722_v9 = vpop.f32.mrf.mxu3  ;;  %v16001_v59 = vld [vmem:[#allocation14_spill] sm:$0xff] }
 0x427   : > { %v6345_v3 = vadd.f32 %v6344_v42, %v6111_v24  ;;  %v6007_v42 = vunpack.c.l.b16 %v5826_v41  ;;  %v11349_v28 = vrot.slane %v6432_v13, 9  ;;  %v5830_v21 = vrot.slane %v5828_v39, 4  ;;  %v12054_v7 = vld [vmem:[#allocation2 + $0x30] sm:$0xff] }
 0x428   : > { %v5222_v54 = vrot.slane %v5220_v60, 7  ;;  %v4729_v20 = vadd.f32 %v14397_v4, %v4689_v61  ;;  %v3511_v44 = vadd.f32 %v16000_v10, %v3190_v51  ;;  %v5833_v33 = vrot.slane %v5831_v48, 5 }
 0x429   : > { %v14535_v5 = vadd.f32 %v6722_v9, %v6345_v3  ;;  %v6029_v57 = vpack.c.b16 %v6007_v42, %v6006_v56  ;;  %v16003_v42 = vld [vmem:[#allocation28_spill] sm:$0xff]  ;;  %v16004_v56 = vld [vmem:[#allocation17_spill] sm:$0xff] }
 0x42a   : > { %v5225_v19 = vor.u32 %v5223_v23, %v5222_v54  ;;  %v4765_v47 = vmax.f32 %v4729_v20, 0.0  ;;  %6764 = vmatmul.bf16.gmra.mxu3 %v6640_v45  ;;  %v5226_v52 = vrot.slane %v5222_v54, 4  ;;  %v6349_v22 = vpop.f32.mrf.mxu2  ;;  %v16002_v54 = vld [vmem:[#allocation13_spill] sm:$0xff]  ;;  %v5834_v20 = vor.u32 %v5833_v33, %v5830_v21 }
 0x42c   : > { %v5475_v49 = vsel %vm14109_vm12, %v5225_v19, %v5474_v62  ;;  %v5016_v15 = vpack.c.bf16 %v4765_v47, %v4765_v47  ;;  %v5544_v14 = vld [vmem:[#allocation2 + $0x7c] sm:$0xf] }
 0x42d   : > { %5476 = vst [vmem:[#allocation2 + $0x84] sm:$0xf] %v5475_v49  ;;  %v4636_v37 = vpop.f32.mrf.mxu0  ;;  %v5581_v0 = vld [vmem:[#allocation2 + $0x80] sm:$0x1]  ;;  %v6542_v32 = vrot.slane %v5544_v14, 5  ;;  %v6114_v50 = vpop.f32.mrf.mxu1  ;;  %v5837_v27 = vshll.u32 %v5544_v14, 16  ;;  %v3192_v49 = vadd.f32 %v16004_v56, %v16003_v42 }
 0x42e   : > { %v5228_v17 = vshrl.u32 %v5016_v15, 16  ;;  %v4690_v40 = vadd.f32 %v4636_v37, %v16001_v59  ;;  %v6545_v2 = vrot.slane %v5581_v0, 5  ;;  %v5841_v1 = vshrl.u32 %v5544_v14, 16  ;;  %v6725_v60 = vpop.f32.mrf.mxu3  ;;  %v11982_v18 = vld [vmem:[#allocation2 + $0x78] sm:$0xff] }
 0x42f   : > { %v6544_v11 = vrot.slane %v6542_v32, 4  ;;  %v5231_v8 = vshll.u32 %v5016_v15, 16  ;;  %v6348_v43 = vadd.f32 %v6347_v30, %v6114_v50  ;;  %v5839_v23 = vrot.slane %v5837_v27, 5  ;;  %6391 = vmatmul.bf16.gmra.mxu2 %v11982_v18 }
 0x430   : > { %v5230_v12 = vrot.slane %v5228_v17, 7  ;;  %v4730_v61 = vadd.f32 %v14397_v4, %v4690_v40  ;;  %8467 = vmatmul.bf16.gmra.mxu0 %v12054_v7  ;;  %v5843_v38 = vrot.slane %v5841_v1, 4  ;;  %v5847_v6 = vshll.u32 %v5581_v0, 16  ;;  %6153 = vmatmul.bf16.gmra.mxu1 %v6029_v57  ;;  %v5481_v40 = vld [vmem:[#allocation2 + $0x90] sm:$0xf] }
 0x431   : > { %v6546_v24 = vsel %vm12281_vm5, %v6544_v11, %v6545_v2  ;;  %v14544_v3 = vadd.f32 %v6725_v60, %v6348_v43  ;;  %v4245_v30 = vadd.f32 %v16002_v54, %v3511_v44  ;;  %v6543_v62 = vsel %vm12281_vm5, %v11349_v28, %v6542_v32 }
 0x432   : > { %v5233_v41 = vor.u32 %v5231_v8, %v5230_v12  ;;  %v5235_v55 = vrot.slane %v5230_v12, 4  ;;  %v4766_v9 = vmax.f32 %v4730_v61, 0.0  ;;  %v5844_v39 = vor.u32 %v5843_v38, %v5839_v23  ;;  %v6352_v44 = vpop.f32.mrf.mxu2 }
 0x433   : > { %v6620_v48 = vunpack.c.l.b16 %v6546_v24  ;;  %v5849_v47 = vrot.slane %v5847_v6, 5  ;;  %v6619_v37 = vunpack.c.l.b16 %v6543_v62  ;;  %v5835_v0 = vrot.slane %v5834_v20, 4  ;;  %v16005_v24 = vld [vmem:[#allocation22_spill] sm:$0xff] }
 0x434   : > { %v5234_v25 = vsel %vm14119_vm13, %v5226_v52, %v5233_v41  ;;  %v5479_v63 = vsel %vm14132_vm15, %v5235_v55, %v5478_v53  ;;  %v5017_v51 = vpack.c.bf16 %v4766_v9, %v4766_v9  ;;  %v5545_v45 = vld [vmem:[#allocation2 + $0x84] sm:$0xf]  ;;  %v5845_v19 = vrot.slane %v5844_v39, 4  ;;  %v12055_v39 = vld [vmem:[#allocation2 + $0x3c] sm:$0xff] }
 0x435   : > { %5477 = vst [vmem:[#allocation2 + $0x88] sm:$0xf] %v5234_v25  ;;  %v4638_v13 = vpop.f32.mrf.mxu0  ;;  %v5852_v21 = vshrl.u32 %v5545_v45, 16  ;;  %v6116_v10 = vpop.f32.mrf.mxu1  ;;  %v5855_v32 = vshll.u32 %v5545_v45, 16  ;;  %v6641_v7 = vpack.c.b16 %v6620_v48, %v6619_v37  ;;  %v5840_v50 = vsel %vm12287_vm6, %v5835_v0, %v5839_v23  ;;  %v6433_v2 = vld [vmem:[#allocation2 + $0x84] sm:$0xe] }
 0x436   : > { %5480 = vst [vmem:[#allocation2 + $0x8c] sm:$0x1] %v5479_v63  ;;  %v5237_v15 = vshrl.u32 %v5017_v51, 16  ;;  %v4691_v14 = vadd.f32 %v4638_v13, %v4245_v30  ;;  %v5850_v28 = vsel %vm12287_vm6, %v5845_v19, %v5849_v47  ;;  %v5240_v52 = vshll.u32 %v5017_v51, 16  ;;  %v6727_v57 = vpop.f32.mrf.mxu3  ;;  %v16006_v30 = vld [vmem:[#allocation21_spill] sm:$0xff] }
 0x437   : > { %v6350_v17 = vadd.f32 %v6349_v22, %v6116_v10  ;;  %v6009_v11 = vunpack.c.l.b16 %v5850_v28  ;;  %v5854_v27 = vrot.slane %v5852_v21, 4  ;;  %v5857_v43 = vrot.slane %v5855_v32, 5 }
 0x438   : > { %v5239_v33 = vrot.slane %v5237_v15, 7  ;;  %v4731_v59 = vadd.f32 %v14397_v4, %v4691_v14  ;;  %v6008_v61 = vunpack.c.l.b16 %v5840_v50  ;;  %v11350_v53 = vrot.slane %v6433_v2, 9  ;;  %v5485_v14 = vld [vmem:[#allocation2 + $0x98] sm:$0x1] }
 0x439   : > { %v14560_v12 = vadd.f32 %v6727_v57, %v6350_v17  ;;  %v3513_v38 = vadd.f32 %v16005_v24, %v3192_v49  ;;  %v5858_v25 = vor.u32 %v5857_v43, %v5854_v27  ;;  %v16007_v17 = vld [vmem:[#allocation19_spill] sm:$0xff] }
 0x43a   : > { %v5242_v1 = vor.u32 %v5240_v52, %v5239_v33  ;;  %v4767_v8 = vmax.f32 %v4731_v59, 0.0  ;;  %v5243_v6 = vrot.slane %v5239_v33, 4  ;;  %6769 = vmatmul.bf16.gmra.mxu3 %v6641_v7  ;;  %v6030_v54 = vpack.c.b16 %v6009_v11, %v6008_v61  ;;  %v6354_v51 = vpop.f32.mrf.mxu2  ;;  %v12037_v61 = vld [vmem:[%s15839_s3 + $0x108] sm:$0xff] }
 0x43b   : > { %v5859_v57 = vrot.slane %v5858_v25, 4  ;;  %7714 = vmatpush.bf16.msrb.mxu2 %v12037_v61  ;;  %v16008_v25 = vld [vmem:[#allocation33_spill] sm:$0xff] }
 0x43c   : > { %v5482_v60 = vsel %vm14109_vm12, %v5242_v1, %v5481_v40  ;;  %v5018_v22 = vpack.c.bf16 %v4767_v8, %v4767_v8  ;;  %v5546_v18 = vld [vmem:[#allocation2 + $0x88] sm:$0xf] }
 0x43d   : > { %5483 = vst [vmem:[#allocation2 + $0x90] sm:$0xf] %v5482_v60  ;;  %v4641_v23 = vpop.f32.mrf.mxu0  ;;  %v5582_v41 = vld [vmem:[#allocation2 + $0x8c] sm:$0x1]  ;;  %v6549_v55 = vrot.slane %v5546_v18, 5  ;;  %v6119_v63 = vpop.f32.mrf.mxu1  ;;  %v5861_v13 = vshll.u32 %v5546_v18, 16 }
 0x43e   : > { %v5245_v9 = vshrl.u32 %v5018_v22, 16  ;;  %v4692_v20 = vadd.f32 %v4641_v23, %v16006_v30  ;;  %v6552_v45 = vrot.slane %v5582_v41, 5  ;;  %v5865_v48 = vshrl.u32 %v5546_v18, 16  ;;  %v6730_v56 = vpop.f32.mrf.mxu3  ;;  %v11983_v15 = vld [vmem:[#allocation2 + $0x84] sm:$0xff] }
 0x43f   : > { %v6551_v62 = vrot.slane %v6549_v55, 4  ;;  %v5248_v47 = vshll.u32 %v5018_v22, 16  ;;  %v6353_v42 = vadd.f32 %v6352_v44, %v6119_v63  ;;  %v5863_v10 = vrot.slane %v5861_v13, 5  ;;  %6396 = vmatmul.bf16.gmra.mxu2 %v11983_v15  ;;  %v12045_v18 = vld [vmem:[%s15839_s3 + $0x148] sm:$0xff]  ;;  %v16009_v63 = vld [vmem:[#allocation24_spill] sm:$0xff] }
 0x440   : > { %v5247_v19 = vrot.slane %v5245_v9, 7  ;;  %v4732_v49 = vadd.f32 %v14397_v4, %v4692_v20  ;;  %8472 = vmatmul.bf16.gmra.mxu0 %v12055_v39  ;;  %v5867_v37 = vrot.slane %v5865_v48, 4  ;;  %v5871_v0 = vshll.u32 %v5582_v41, 16  ;;  %6158 = vmatmul.bf16.gmra.mxu1 %v6030_v54 }
 0x441   : > { %v6553_v21 = vsel %vm12281_vm5, %v6551_v62, %v6552_v45  ;;  %v14569_v33 = vadd.f32 %v6730_v56, %v6353_v42  ;;  %v4247_v44 = vadd.f32 %v16007_v17, %v3513_v38  ;;  %v6550_v11 = vsel %vm12281_vm5, %v11350_v53, %v6549_v55  ;;  %v12029_v55 = vld [vmem:[%s15839_s3 + $0xc8] sm:$0xff]  ;;  %8140 = vmatpush.bf16.msrb.mxu3 %v12045_v18  ;;  %v5488_v45 = vld [vmem:[#allocation2 + $0x9c] sm:$0xf] }
 0x442   : > { %v5250_v28 = vor.u32 %v5248_v47, %v5247_v19  ;;  %v5252_v32 = vrot.slane %v5247_v19, 4  ;;  %v4768_v52 = vmax.f32 %v4732_v49, 0.0  ;;  %v5868_v59 = vor.u32 %v5867_v37, %v5863_v10  ;;  %v6357_v53 = vpop.f32.mrf.mxu2  ;;  %7032 = vmatpush.bf16.msrb.mxu1 %v12029_v55  ;;  %v16010_v37 = vld [vmem:[#allocation27_spill] sm:$0xff] }
 0x443   : > { %v6622_v27 = vunpack.c.l.b16 %v6553_v21  ;;  %v5873_v8 = vrot.slane %v5871_v0, 5  ;;  %v5864_v23 = vsel %vm12287_vm6, %v5859_v57, %v5863_v10  ;;  %v3194_v62 = vadd.f32 %v16009_v63, %v16008_v25  ;;  %v16012_v25 = vld [vmem:[#allocation25_spill] sm:$0xff] }
 0x444   : > { %v5251_v40 = vsel %vm14119_vm13, %v5243_v6, %v5250_v28  ;;  %v5486_v7 = vsel %vm14132_vm15, %v5252_v32, %v5485_v14  ;;  %v5019_v50 = vpack.c.bf16 %v4768_v52, %v4768_v52  ;;  %v5869_v1 = vrot.slane %v5868_v59, 4  ;;  %v5547_v43 = vld [vmem:[#allocation2 + $0x90] sm:$0xf] }
 0x445   : > { %5484 = vst [vmem:[#allocation2 + $0x94] sm:$0xf] %v5251_v40  ;;  %v4643_v2 = vpop.f32.mrf.mxu0  ;;  %v6121_v38 = vpop.f32.mrf.mxu1  ;;  %v6621_v6 = vunpack.c.l.b16 %v6550_v11  ;;  %v5876_v39 = vshrl.u32 %v5547_v43, 16  ;;  %v6434_v48 = vld [vmem:[#allocation2 + $0x90] sm:$0xe]  ;;  %v5879_v19 = vshll.u32 %v5547_v43, 16  ;;  %v6010_v49 = vunpack.c.l.b16 %v5864_v23 }
 0x446   : > { %5487 = vst [vmem:[#allocation2 + $0x98] sm:$0x1] %v5486_v7  ;;  %v5254_v60 = vshrl.u32 %v5019_v50, 16  ;;  %v4693_v22 = vadd.f32 %v4643_v2, %v4247_v44  ;;  %v5257_v24 = vshll.u32 %v5019_v50, 16  ;;  %v5874_v41 = vsel %vm12287_vm6, %v5869_v1, %v5873_v8  ;;  %v6732_v30 = vpop.f32.mrf.mxu3  ;;  %v16011_v40 = vld [vmem:[#allocation26_spill] sm:$0xff]  ;;  %v12056_v50 = vld [vmem:[#allocation2 + $0x48] sm:$0xff] }
 0x447   : > { %v6355_v54 = vadd.f32 %v6354_v51, %v6121_v38  ;;  %v6642_v13 = vpack.c.b16 %v6622_v27, %v6621_v6  ;;  %v6011_v51 = vunpack.c.l.b16 %v5874_v41  ;;  %v11351_v21 = vrot.slane %v6434_v48, 9  ;;  %v5492_v23 = vld [vmem:[#allocation2 + $0xa4] sm:$0x1] }
 0x448   : > { %v14591_v9 = vrot.slane %v5254_v60, 7  ;;  %v4733_v20 = vadd.f32 %v14397_v4, %v4693_v22  ;;  %v5878_v10 = vrot.slane %v5876_v39, 4  ;;  %v3515_v0 = vadd.f32 %v16010_v37, %v3194_v62 }
 0x449   : > { %v14597_v42 = vadd.f32 %v6732_v30, %v6355_v54  ;;  %v5881_v17 = vrot.slane %v5879_v19, 5  ;;  %v6031_v59 = vpack.c.b16 %v6011_v51, %v6010_v49 }
 0x44a   : > { %v5259_v47 = vor.u32 %v5257_v24, %v14591_v9  ;;  %v4769_v56 = vmax.f32 %v4733_v20, 0.0  ;;  %6774 = vmatmul.bf16.gmra.mxu3 %v6642_v13  ;;  %v5260_v44 = vrot.slane %v14591_v9, 4  ;;  %v6359_v2 = vpop.f32.mrf.mxu2  ;;  %v14607_v24 = vld [vmem:[%s15838_s2] ss:$0 sm:$0xff]  ;;  %v4249_v63 = vadd.f32 %v16012_v25, %v3515_v0 }
 0x44b   : > { %v5882_v62 = vor.u32 %v5881_v17, %v5878_v10  ;;  %v16014_v10 = vld [vmem:[#allocation29_spill] sm:$0xff] }
 0x44c   : > { %v5489_v4 = vsel %vm14109_vm12, %v5259_v47, %v5488_v45  ;;  %v5020_v15 = vpack.c.bf16 %v4769_v56, %v4769_v56  ;;  %v5548_v14 = vld [vmem:[#allocation2 + $0x94] sm:$0xf] }
 0x44d   : > { %5490 = vst [vmem:[#allocation2 + $0x9c] sm:$0xf] %v5489_v4  ;;  %v4646_v28 = vpop.f32.mrf.mxu0  ;;  %v5583_v32 = vld [vmem:[#allocation2 + $0x98] sm:$0x1]  ;;  %v6556_v52 = vrot.slane %v5548_v14, 5  ;;  %v6124_v11 = vpop.f32.mrf.mxu1  ;;  %v5885_v8 = vshll.u32 %v5548_v14, 16 }
 0x44e   : > { %v5262_v57 = vshrl.u32 %v5020_v15, 16  ;;  %v4694_v7 = vadd.f32 %v4646_v28, %v16011_v40  ;;  %v6559_v1 = vrot.slane %v5583_v32, 5  ;;  %v5889_v43 = vshrl.u32 %v5548_v14, 16  ;;  %v6735_v18 = vpop.f32.mrf.mxu3  ;;  %v11984_v6 = vld [vmem:[#allocation2 + $0x90] sm:$0xff]  ;;  %v16013_v14 = vld [vmem:[#allocation31_spill] sm:$0xff] }
 0x44f   : > { %v6558_v27 = vrot.slane %v6556_v52, 4  ;;  %v5265_v22 = vshll.u32 %v5020_v15, 16  ;;  %v6358_v61 = vadd.f32 %v6357_v53, %v6124_v11  ;;  %v5887_v55 = vrot.slane %v5885_v8, 5  ;;  %6401 = vmatmul.bf16.gmra.mxu2 %v11984_v6 }
 0x450   : > { %v5264_v60 = vrot.slane %v5262_v57, 7  ;;  %v4734_v38 = vadd.f32 %v14607_v24, %v4694_v7  ;;  %8477 = vmatmul.bf16.gmra.mxu0 %v12056_v50  ;;  %v5891_v9 = vrot.slane %v5889_v43, 4  ;;  %v5895_v54 = vshll.u32 %v5583_v32, 16  ;;  %6163 = vmatmul.bf16.gmra.mxu1 %v6031_v59 }
 0x451   : > { %v6560_v41 = vsel %vm12281_vm5, %v6558_v27, %v6559_v1  ;;  %v14612_v53 = vadd.f32 %v6735_v18, %v6358_v61  ;;  %v6557_v47 = vsel %vm12281_vm5, %v11351_v21, %v6556_v52  ;;  %v3196_v37 = vadd.f32 %v16014_v10, %v16013_v14  ;;  %v5495_v1 = vld [vmem:[#allocation2 + $0xa8] sm:$0xf] }
 0x452   : > { %v5267_v30 = vor.u32 %v5265_v22, %v5264_v60  ;;  %v5269_v20 = vrot.slane %v5264_v60, 4  ;;  %v4770_v39 = vmax.f32 %v4734_v38, 0.0  ;;  %v5892_v45 = vor.u32 %v5891_v9, %v5887_v55 }
 0x453   : > { %v6624_v49 = vunpack.c.l.b16 %v6560_v41  ;;  %v5897_v15 = vrot.slane %v5895_v54, 5  ;;  %v6623_v57 = vunpack.c.l.b16 %v6557_v47  ;;  %v5883_v59 = vrot.slane %v5882_v62, 4  ;;  %v12057_v47 = vld [vmem:[#allocation2 + $0x54] sm:$0xff] }
 0x454   : > { %v5268_v13 = vsel %vm14119_vm13, %v5260_v44, %v5267_v30  ;;  %v5493_v48 = vsel %vm14132_vm15, %v5269_v20, %v5492_v23  ;;  %v5021_v19 = vpack.c.bf16 %v4770_v39, %v4770_v39  ;;  %v5549_v56 = vld [vmem:[#allocation2 + $0x9c] sm:$0xf]  ;;  %v5893_v4 = vrot.slane %v5892_v45, 4  ;;  %v6362_v44 = vpop.f32.mrf.mxu2  ;;  %v16015_v20 = vld [vmem:[#allocation30_spill] sm:$0xff] }
 0x455   : > { %5491 = vst [vmem:[#allocation2 + $0xa0] sm:$0xf] %v5268_v13  ;;  %v4648_v51 = vpop.f32.mrf.mxu0  ;;  %v5900_v32 = vshrl.u32 %v5549_v56, 16  ;;  %v6126_v17 = vpop.f32.mrf.mxu1  ;;  %v5903_v52 = vshll.u32 %v5549_v56, 16  ;;  %v6643_v8 = vpack.c.b16 %v6624_v49, %v6623_v57  ;;  %v5888_v43 = vsel %vm12287_vm6, %v5883_v59, %v5887_v55  ;;  %v6435_v22 = vld [vmem:[#allocation2 + $0x9c] sm:$0xe] }
 0x456   : > { %5494 = vst [vmem:[#allocation2 + $0xa4] sm:$0x1] %v5493_v48  ;;  %v5271_v0 = vshrl.u32 %v5021_v19, 16  ;;  %v4695_v28 = vadd.f32 %v4648_v51, %v4249_v63  ;;  %v5898_v21 = vsel %vm12287_vm6, %v5893_v4, %v5897_v15  ;;  %v5274_v7 = vshll.u32 %v5021_v19, 16  ;;  %v6737_v11 = vpop.f32.mrf.mxu3  ;;  %v16016_v48 = vld [vmem:[#allocation32_spill] sm:$0xff] }
 0x457   : > { %v6360_v50 = vadd.f32 %v6359_v2, %v6126_v17  ;;  %v6013_v60 = vunpack.c.l.b16 %v5898_v21  ;;  %v5902_v61 = vrot.slane %v5900_v32, 4  ;;  %v5905_v23 = vrot.slane %v5903_v52, 5  ;;  %v5499_v59 = vld [vmem:[#allocation2 + $0xb0] sm:$0x1] }
 0x458   : > { %v5273_v40 = vrot.slane %v5271_v0, 7  ;;  %v4735_v27 = vadd.f32 %v14607_v24, %v4695_v28  ;;  %v6012_v9 = vunpack.c.l.b16 %v5888_v43  ;;  %v11352_v30 = vrot.slane %v6435_v22, 9 }
 0x459   : > { %v14628_v38 = vadd.f32 %v6737_v11, %v6360_v50  ;;  %v3517_v39 = vadd.f32 %v16015_v20, %v3196_v37  ;;  %v5906_v56 = vor.u32 %v5905_v23, %v5902_v61 }
 0x45a   : > { %v5276_v18 = vor.u32 %v5274_v7, %v5273_v40  ;;  %v4771_v6 = vmax.f32 %v4735_v27, 0.0  ;;  %v5277_v25 = vrot.slane %v5273_v40, 4  ;;  %6779 = vmatmul.bf16.gmra.mxu3 %v6643_v8  ;;  %v6032_v13 = vpack.c.b16 %v6013_v60, %v6012_v9  ;;  %v16017_v8 = vld [vmem:[#allocation38_spill] sm:$0xff] }
 0x45b   : > { %v5907_v43 = vrot.slane %v5906_v56, 4 }
 0x45c   : > { %v5496_v41 = vsel %vm14109_vm12, %v5276_v18, %v5495_v1  ;;  %v5022_v2 = vpack.c.bf16 %v4771_v6, %v4771_v6  ;;  %v5550_v54 = vld [vmem:[#allocation2 + $0xa0] sm:$0xf]  ;;  %v6364_v49 = vpop.f32.mrf.mxu2 }
 0x45d   : > { %5497 = vst [vmem:[#allocation2 + $0xa8] sm:$0xf] %v5496_v41  ;;  %v4651_v55 = vpop.f32.mrf.mxu0  ;;  %v5584_v63 = vld [vmem:[#allocation2 + $0xa4] sm:$0x1]  ;;  %v6563_v62 = vrot.slane %v5550_v54, 5  ;;  %v6129_v51 = vpop.f32.mrf.mxu1  ;;  %v5909_v14 = vshll.u32 %v5550_v54, 16 }
 0x45e   : > { %v5279_v45 = vshrl.u32 %v5022_v2, 16  ;;  %v4696_v19 = vadd.f32 %v4651_v55, %v16016_v48  ;;  %v6566_v15 = vrot.slane %v5584_v63, 5  ;;  %v5913_v10 = vshrl.u32 %v5550_v54, 16  ;;  %v6740_v32 = vpop.f32.mrf.mxu3  ;;  %v11985_v57 = vld [vmem:[#allocation2 + $0x9c] sm:$0xff] }
 0x45f   : > { %v6565_v4 = vrot.slane %v6563_v62, 4  ;;  %v5282_v37 = vshll.u32 %v5022_v2, 16  ;;  %v6363_v28 = vadd.f32 %v6362_v44, %v6129_v51  ;;  %v5911_v52 = vrot.slane %v5909_v14, 5  ;;  %6406 = vmatmul.bf16.gmra.mxu2 %v11985_v57  ;;  %v12044_v55 = vld [vmem:[%s15839_s3 + $0x140] sm:$0xff]  ;;  %v16018_v14 = vld [vmem:[#allocation37_spill] sm:$0xff] }
 0x460   : > { %v5281_v0 = vrot.slane %v5279_v45, 7  ;;  %v4736_v17 = vadd.f32 %v14607_v24, %v4696_v19  ;;  %8482 = vmatmul.bf16.gmra.mxu0 %v12057_v47  ;;  %v5915_v40 = vrot.slane %v5913_v10, 4  ;;  %v5919_v7 = vshll.u32 %v5584_v63, 16  ;;  %6168 = vmatmul.bf16.gmra.mxu1 %v6032_v13  ;;  %v12028_v19 = vld [vmem:[%s15839_s3 + $0xc0] sm:$0xff] }
 0x461   : > { %v6567_v21 = vsel %vm12281_vm5, %v6565_v4, %v6566_v15  ;;  %v14637_v27 = vadd.f32 %v6740_v32, %v6363_v28  ;;  %v4251_v44 = vadd.f32 %v16017_v8, %v3517_v39  ;;  %v6564_v6 = vsel %vm12281_vm5, %v11352_v30, %v6563_v62  ;;  %8141 = vmatpush.bf16.msrb.mxu3 %v12044_v55 }
 0x462   : > { %v5284_v50 = vor.u32 %v5282_v37, %v5281_v0  ;;  %v5286_v11 = vrot.slane %v5281_v0, 4  ;;  %v4772_v1 = vmax.f32 %v4736_v17, 0.0  ;;  %v5916_v60 = vor.u32 %v5915_v40, %v5911_v52  ;;  %v5502_v0 = vld [vmem:[#allocation2 + $0xb4] sm:$0xf]  ;;  %7033 = vmatpush.bf16.msrb.mxu1 %v12028_v19 }
 0x463   : > { %v6626_v41 = vunpack.c.l.b16 %v6567_v21  ;;  %v5921_v9 = vrot.slane %v5919_v7, 5  ;;  %v6625_v62 = vunpack.c.l.b16 %v6564_v6  ;;  %v5912_v13 = vsel %vm12287_vm6, %v5907_v43, %v5911_v52 }
 0x464   : > { %v5285_v22 = vsel %vm14119_vm13, %v5277_v25, %v5284_v50  ;;  %v5500_v61 = vsel %vm14132_vm15, %v5286_v11, %v5499_v59  ;;  %v5023_v18 = vpack.c.bf16 %v4772_v1, %v4772_v1  ;;  %v5917_v2 = vrot.slane %v5916_v60, 4  ;;  %v5551_v54 = vld [vmem:[#allocation2 + $0xa8] sm:$0xf]  ;;  %v12036_v25 = vld [vmem:[%s15839_s3 + $0x100] sm:$0xff]  ;;  %v6367_v30 = vpop.f32.mrf.mxu2 }
 0x465   : > { %5498 = vst [vmem:[#allocation2 + $0xac] sm:$0xf] %v5285_v22  ;;  %v4653_v23 = vpop.f32.mrf.mxu0  ;;  %v6131_v45 = vpop.f32.mrf.mxu1  ;;  %7715 = vmatpush.bf16.msrb.mxu2 %v12036_v25  ;;  %v5924_v15 = vshrl.u32 %v5551_v54, 16  ;;  %v3198_v10 = vadd.f32 %v14347_v34, %v16018_v14  ;;  %v6644_v37 = vpack.c.b16 %v6626_v41, %v6625_v62  ;;  %v6436_v28 = vld [vmem:[#allocation2 + $0xa8] sm:$0xe]  ;;  %v5927_v32 = vshll.u32 %v5551_v54, 16 }
 0x466   : > { %5501 = vst [vmem:[#allocation2 + $0xb0] sm:$0x1] %v5500_v61  ;;  %v5288_v20 = vshrl.u32 %v5023_v18, 16  ;;  %v4697_v39 = vadd.f32 %v4653_v23, %v4251_v44  ;;  %v5291_v63 = vshll.u32 %v5023_v18, 16  ;;  %v5922_v48 = vsel %vm12287_vm6, %v5917_v2, %v5921_v9  ;;  %v6742_v51 = vpop.f32.mrf.mxu3  ;;  %v16019_v18 = vld [vmem:[#allocation34_spill] sm:$0xff]  ;;  %v12058_v23 = vld [vmem:[#allocation2 + $0x60] sm:$0xff] }
 0x467   : > { %v6365_v56 = vadd.f32 %v6364_v49, %v6131_v45  ;;  %v6015_v49 = vunpack.c.l.b16 %v5922_v48  ;;  %v6014_v21 = vunpack.c.l.b16 %v5912_v13  ;;  %v11353_v50 = vrot.slane %v6436_v28, 9  ;;  %v7147_v13 = vld [vmem:[#allocation2 + $0xc] sm:$0xf]  ;;  %v5506_v48 = vld [vmem:[#allocation2 + $0xbc] sm:$0x1] }
 0x468   : > { %v14659_v47 = vrot.slane %v5288_v20, 7  ;;  %v4737_v4 = vadd.f32 %v14607_v24, %v4697_v39  ;;  %v5926_v11 = vrot.slane %v5924_v15, 4  ;;  %v3519_v34 = vadd.f32 %v14317_v46, %v3198_v10  ;;  %v14678_v28 = vld [vmem:[#allocation2 + $0x10] sm:$0xf] }
 0x469   : > { %v14665_v57 = vadd.f32 %v6742_v51, %v6365_v56  ;;  %v5929_v43 = vrot.slane %v5927_v32, 5  ;;  %v6033_v61 = vpack.c.b16 %v6015_v49, %v6014_v21  ;;  %v7196_v32 = vshrl.u32 %v7147_v13, 16 }
 0x46a   : > { %v5293_v17 = vor.u32 %v5291_v63, %v14659_v47  ;;  %v4773_v59 = vmax.f32 %v4737_v4, 0.0  ;;  %6784 = vmatmul.bf16.gmra.mxu3 %v6644_v37  ;;  %v5294_v60 = vrot.slane %v14659_v47, 4 }
 0x46c   : > { %v5503_v52 = vsel %vm14109_vm12, %v5293_v17, %v5502_v0  ;;  %v5024_v40 = vpack.c.bf16 %v4773_v59, %v4773_v59  ;;  %v5552_v7 = vld [vmem:[#allocation2 + $0xac] sm:$0xf]  ;;  %v6369_v2 = vpop.f32.mrf.mxu2  ;;  %v5930_v0 = vor.u32 %v5929_v43, %v5926_v11  ;;  %v7199_v11 = vshll.u32 %v7147_v13, 16 }
 0x46d   : > { %5504 = vst [vmem:[#allocation2 + $0xb4] sm:$0xf] %v5503_v52  ;;  %v4656_v1 = vpop.f32.mrf.mxu0  ;;  %v5585_v8 = vld [vmem:[#allocation2 + $0xb0] sm:$0x1]  ;;  %v6570_v44 = vrot.slane %v5552_v7, 5  ;;  %v6134_v41 = vpop.f32.mrf.mxu1  ;;  %v5933_v20 = vshll.u32 %v5552_v7, 16 }
 0x46e   : > { %v5296_v22 = vshrl.u32 %v5024_v40, 16  ;;  %v4698_v6 = vadd.f32 %v4656_v1, %v16019_v18  ;;  %v6573_v54 = vrot.slane %v5585_v8, 5  ;;  %v5937_v39 = vshrl.u32 %v5552_v7, 16  ;;  %v6745_v63 = vpop.f32.mrf.mxu3  ;;  %v11986_v62 = vld [vmem:[#allocation2 + $0xa8] sm:$0xff] }
 0x46f   : > { %v6572_v9 = vrot.slane %v6570_v44, 4  ;;  %v5299_v25 = vshll.u32 %v5024_v40, 16  ;;  %v6368_v55 = vadd.f32 %v6367_v30, %v6134_v41  ;;  %v5935_v47 = vrot.slane %v5933_v20, 5  ;;  %6411 = vmatmul.bf16.gmra.mxu2 %v11986_v62  ;;  %v5509_v20 = vld [vmem:[#allocation2 + $0xc0] sm:$0xf] }
 0x470   : > { %v5298_v46 = vrot.slane %v5296_v22, 7  ;;  %v4738_v45 = vadd.f32 %v14607_v24, %v4698_v6  ;;  %8487 = vmatmul.bf16.gmra.mxu0 %v12058_v23  ;;  %v5939_v56 = vrot.slane %v5937_v39, 4  ;;  %v5943_v51 = vshll.u32 %v5585_v8, 16  ;;  %6173 = vmatmul.bf16.gmra.mxu1 %v6033_v61 }
 0x471   : > { %v6574_v19 = vsel %vm12281_vm5, %v6572_v9, %v6573_v54  ;;  %v14675_v14 = vadd.f32 %v6745_v63, %v6368_v55  ;;  %v4253_v30 = vadd.f32 %v14344_v58, %v3519_v34  ;;  %v6571_v21 = vsel %vm12281_vm5, %v11353_v50, %v6570_v44 }
 0x472   : > { %v5301_v4 = vor.u32 %v5299_v25, %v5298_v46  ;;  %v5303_v15 = vrot.slane %v5298_v46, 4  ;;  %v4774_v10 = vmax.f32 %v4738_v45, 0.0  ;;  %v5940_v37 = vor.u32 %v5939_v56, %v5935_v47 }
 0x473   : > { %v6628_v40 = vunpack.c.l.b16 %v6574_v19  ;;  %v5945_v7 = vrot.slane %v5943_v51, 5  ;;  %v7205_v43 = vshll.u32 %v14678_v28, 16  ;;  %v6627_v61 = vunpack.c.l.b16 %v6571_v21 }
 0x474   : > { %v5302_v17 = vsel %vm14119_vm13, %v5294_v60, %v5301_v4  ;;  %v5507_v59 = vsel %vm14132_vm15, %v5303_v15, %v5506_v48  ;;  %v5025_v49 = vpack.c.bf16 %v4774_v10, %v4774_v10  ;;  %v5941_v58 = vrot.slane %v5940_v37, 4  ;;  %v5553_v8 = vld [vmem:[#allocation2 + $0xb4] sm:$0xf]  ;;  %v6372_v22 = vpop.f32.mrf.mxu2 }
 0x475   : > { %5505 = vst [vmem:[#allocation2 + $0xb8] sm:$0xf] %v5302_v17  ;;  %v4658_v52 = vpop.f32.mrf.mxu0  ;;  %v6136_v60 = vpop.f32.mrf.mxu1  ;;  %v5931_v18 = vrot.slane %v5930_v0, 4  ;;  %v7209_v50 = vshrl.u32 %v14678_v28, 16  ;;  %v6645_v39 = vpack.c.b16 %v6628_v40, %v6627_v61  ;;  %v5948_v25 = vshrl.u32 %v5553_v8, 16 }
 0x476   : > { %5508 = vst [vmem:[#allocation2 + $0xbc] sm:$0x1] %v5507_v59  ;;  %v5305_v34 = vshrl.u32 %v5025_v49, 16  ;;  %v4699_v1 = vadd.f32 %v4658_v52, %v4253_v30  ;;  %v5946_v6 = vsel %vm12287_vm6, %v5941_v58, %v5945_v7  ;;  %v5308_v23 = vshll.u32 %v5025_v49, 16  ;;  %v6747_v9 = vpop.f32.mrf.mxu3  ;;  %v6437_v13 = vld [vmem:[#allocation2 + $0xb4] sm:$0xe] }
 0x477   : > { %v6370_v41 = vadd.f32 %v6369_v2, %v6136_v60  ;;  %v5936_v46 = vsel %vm12287_vm6, %v5931_v18, %v5935_v47  ;;  %v6017_v62 = vunpack.c.l.b16 %v5946_v6  ;;  %v5951_v48 = vshll.u32 %v5553_v8, 16  ;;  %v12059_v59 = vld [vmem:[#allocation2 + $0x6c] sm:$0xff]  ;;  %v12091_v52 = vld [vmem:[%s15839_s3 + $0x238] sm:$0xff] }
 0x478   : > { %v14690_v44 = vrot.slane %v5305_v34, 7  ;;  %v4739_v54 = vadd.f32 %v14607_v24, %v4699_v1  ;;  %v14698_v19 = vrot.slane %v7196_v32, 4  ;;  %v14700_v2 = vrot.slane %v7199_v11, 5  ;;  %9557 = vmatpush.bf16.msra.mxu2 %v12091_v52 }
 0x479   : > { %v14696_v63 = vadd.f32 %v6747_v9, %v6370_v41  ;;  %v14702_v56 = vrot.slane %v7205_v43, 5  ;;  %v6016_v47 = vunpack.c.l.b16 %v5936_v46  ;;  %v14706_v15 = vrot.slane %v7209_v50, 4  ;;  %v10146_v50 = vld [vmem:[%s15841_s5] sm:$0x3]  ;;  %v5513_v41 = vld [vmem:[#allocation2 + $0xc8] sm:$0x1] }
 0x47a   : > { %v5310_v55 = vor.u32 %v5308_v23, %v14690_v44  ;;  %v4775_v45 = vmax.f32 %v4739_v54, 0.0  ;;  %6789 = vmatmul.bf16.gmra.mxu3 %v6645_v39  ;;  %v11354_v0 = vrot.slane %v6437_v13, 9  ;;  %v5950_v49 = vrot.slane %v5948_v25, 4 }
 0x47b   : > { %v6034_v17 = vpack.c.b16 %v6017_v62, %v6016_v47  ;;  %v5953_v34 = vrot.slane %v5951_v48, 5  ;;  %v5311_v23 = vrot.slane %v14690_v44, 4  ;;  %v12083_v44 = vld [vmem:[%s15839_s3 + $0x1f8] sm:$0xff]  ;;  %v7212_v13 = vor.u32 %v14706_v15, %v14702_v56 }
 0x47c   : > { %v5510_v24 = vsel %vm14109_vm12, %v5310_v55, %v5509_v20  ;;  %v5026_v51 = vpack.c.bf16 %v4775_v45, %v4775_v45  ;;  %v5554_v4 = vld [vmem:[#allocation2 + $0xb8] sm:$0xf]  ;;  %v6374_v7 = vpop.f32.mrf.mxu2  ;;  %v10248_v20 = vsel %vm920_vm0, %v10146_v50, 0  ;;  %v14720_v55 = vld [vmem:[#allocation2 + $0x14] sm:$0x1]  ;;  %9131 = vmatpush.bf16.msra.mxu1 %v12083_v44  ;;  %v7202_v36 = vor.u32 %v14700_v2, %v14698_v19 }
 0x47d   : > { %5511 = vst [vmem:[#allocation2 + $0xc0] sm:$0xf] %v5510_v24  ;;  %v4661_v10 = vpop.f32.mrf.mxu0  ;;  %v5586_v30 = vld [vmem:[#allocation2 + $0xbc] sm:$0x1]  ;;  %v6577_v37 = vrot.slane %v5554_v4, 5  ;;  %v5957_v21 = vshll.u32 %v5554_v4, 16  ;;  %v6139_v58 = vpop.f32.mrf.mxu1  ;;  %10257 = vmatpush.bf16.msra.mxu3 %v10248_v20  ;;  %v5954_v45 = vor.u32 %v5953_v34, %v5950_v49 }
 0x47e   : > { %v5313_v32 = vshrl.u32 %v5026_v51, 16  ;;  %v5316_v40 = vshll.u32 %v5026_v51, 16  ;;  %v5961_v1 = vshrl.u32 %v5554_v4, 16  ;;  %v6373_v43 = vadd.f32 %v6372_v22, %v6139_v58  ;;  %v6750_v60 = vpop.f32.mrf.mxu3  ;;  %v11987_v61 = vld [vmem:[#allocation2 + $0xb4] sm:$0xff] }
 0x47f   : > { %v6579_v11 = vrot.slane %v6577_v37, 4  ;;  %v6580_v18 = vrot.slane %v5586_v30, 5  ;;  %v5959_v6 = vrot.slane %v5957_v21, 5  ;;  %v5967_v54 = vshll.u32 %v5586_v30, 16  ;;  %6416 = vmatmul.bf16.gmra.mxu2 %v11987_v61 }
 0x480   : > { %v5315_v8 = vrot.slane %v5313_v32, 7  ;;  %8492 = vmatmul.bf16.gmra.mxu0 %v12059_v59  ;;  %v5963_v9 = vrot.slane %v5961_v1, 4  ;;  %v14716_v22 = vadd.f32 %v6750_v60, %v6373_v43  ;;  %6178 = vmatmul.bf16.gmra.mxu1 %v6034_v17  ;;  %v6578_v51 = vsel %vm12281_vm5, %v11354_v0, %v6577_v37  ;;  %v7150_v60 = vld [vmem:[#allocation2 + $0x18] sm:$0xf] }
 0x481   : > { %v6581_v25 = vsel %vm12281_vm5, %v6579_v11, %v6580_v18  ;;  %v5969_v30 = vrot.slane %v5967_v54, 5  ;;  %v7215_v32 = vshll.u32 %v14720_v55, 16  ;;  %v6629_v59 = vunpack.c.l.b16 %v6578_v51 }
 0x482   : > { %v5318_v39 = vor.u32 %v5316_v40, %v5315_v8  ;;  %v5320_v46 = vrot.slane %v5315_v8, 4  ;;  %v5964_v62 = vor.u32 %v5963_v9, %v5959_v6  ;;  %v6630_v4 = vunpack.c.l.b16 %v6581_v25  ;;  %v14738_v40 = vld [vmem:[#allocation2 + $0x1c] sm:$0xf] }
 0x483   : > { %v5955_v49 = vrot.slane %v5954_v45, 4  ;;  %v7213_v0 = vrot.slane %v7212_v13, 4  ;;  %v7217_v34 = vrot.slane %v7215_v32, 5  ;;  %v7203_v2 = vrot.slane %v7202_v36, 4 }
 0x484   : > { %v5319_v48 = vsel %vm14119_vm13, %v5311_v23, %v5318_v39  ;;  %v5514_v24 = vsel %vm14132_vm15, %v5320_v46, %v5513_v41  ;;  %v5965_v10 = vrot.slane %v5964_v62, 4  ;;  %v6377_v17 = vpop.f32.mrf.mxu2  ;;  %v6646_v58 = vpack.c.b16 %v6630_v4, %v6629_v59  ;;  %v12060_v41 = vld [vmem:[#allocation2 + $0x78] sm:$0xff]  ;;  %v7829_v39 = vld [vmem:[#allocation2 + $0xc] sm:$0xe] }
 0x485   : > { %5512 = vst [vmem:[#allocation2 + $0xc4] sm:$0xf] %v5319_v48  ;;  %v4663_v47 = vpop.f32.mrf.mxu0  ;;  %v6141_v15 = vpop.f32.mrf.mxu1  ;;  %v5960_v11 = vsel %vm12287_vm6, %v5955_v49, %v5959_v6  ;;  %v7218_v8 = vsel %vm12287_vm6, %v7213_v0, %v7217_v34  ;;  %v7895_v43 = vrot.slane %v14678_v28, 5  ;;  %v7233_v61 = vshrl.u32 %v14738_v40, 16 }
 0x486   : > { %5515 = vst [vmem:[#allocation2 + $0xc8] sm:$0x1] %v5514_v24  ;;  %v5970_v21 = vsel %vm12287_vm6, %v5965_v10, %v5969_v30  ;;  %v6375_v37 = vadd.f32 %v6374_v7, %v6141_v15  ;;  %v6752_v52 = vpop.f32.mrf.mxu3  ;;  %v7229_v7 = vshll.u32 %v14738_v40, 16  ;;  %v6018_v18 = vunpack.c.l.b16 %v5960_v11  ;;  %v7152_v47 = vld [vmem:[#allocation2 + $0x20] sm:$0x1] }
 0x487   : > { %v6019_v19 = vunpack.c.l.b16 %v5970_v21  ;;  %v7208_v6 = vsel %vm12287_vm6, %v7203_v2, %v14702_v56  ;;  %v7597_v23 = vunpack.c.l.b16 %v7218_v8  ;;  %v7220_v9 = vshrl.u32 %v7150_v60, 16 }
 0x488   : > { %v14742_v1 = vadd.f32 %v6752_v52, %v6375_v37  ;;  %v7897_v46 = vrot.slane %v7895_v43, 4  ;;  %v7223_v28 = vshll.u32 %v7150_v60, 16  ;;  %v7231_v25 = vrot.slane %v7229_v7, 5 }
 0x489   : > { %v6035_v50 = vpack.c.b16 %v6019_v19, %v6018_v18  ;;  %v7235_v44 = vrot.slane %v7233_v61, 4  ;;  %v7596_v13 = vunpack.c.l.b16 %v7208_v6  ;;  %v7898_v48 = vrot.slane %v14720_v55, 5  ;;  %v7153_v61 = vld [vmem:[#allocation2 + $0x24] sm:$0xf]  ;;  %v12090_v6 = vld [vmem:[%s15839_s3 + $0x230] sm:$0xff] }
 0x48a   : > { %6794 = vmatmul.bf16.gmra.mxu3 %v6646_v58  ;;  %v11563_v51 = vrot.slane %v7829_v39, 9  ;;  %v7222_v10 = vrot.slane %v7220_v9, 4  ;;  %v7225_v30 = vrot.slane %v7223_v28, 5  ;;  %v7239_v15 = vshll.u32 %v7152_v47, 16  ;;  %v14759_v58 = vld [vmem:[#allocation2 + $0x28] sm:$0xf]  ;;  %9558 = vmatpush.bf16.msra.mxu2 %v12090_v6 }
 0x48b   : > { %v7628_v56 = vpack.c.b16 %v7597_v23, %v7596_v13  ;;  %v7899_v4 = vsel %vm12281_vm5, %v7897_v46, %v7898_v48  ;;  %v7236_v32 = vor.u32 %v7235_v44, %v7231_v25  ;;  %v7902_v2 = vrot.slane %v14738_v40, 5  ;;  %v12061_v23 = vld [vmem:[#allocation2 + $0x84] sm:$0xff] }
 0x48c   : > { %v6379_v20 = vpop.f32.mrf.mxu2  ;;  %v7896_v36 = vsel %vm12281_vm5, %v11563_v51, %v7895_v43  ;;  %v7226_v49 = vor.u32 %v7225_v30, %v7222_v10  ;;  %v7241_v11 = vrot.slane %v7239_v15, 5  ;;  %v7253_v60 = vshll.u32 %v14759_v58, 16  ;;  %v12082_v10 = vld [vmem:[%s15839_s3 + $0x1f0] sm:$0xff] }
 0x48d   : > { %v6144_v54 = vpop.f32.mrf.mxu1  ;;  %v7237_v21 = vrot.slane %v7236_v32, 4  ;;  %v8022_v52 = vunpack.c.l.b16 %v7896_v36  ;;  %v7257_v7 = vshrl.u32 %v14759_v58, 16  ;;  %v7904_v40 = vrot.slane %v7902_v2, 4  ;;  %9132 = vmatpush.bf16.msra.mxu1 %v12082_v10 }
 0x48e   : > { %v6378_v45 = vadd.f32 %v6377_v17, %v6144_v54  ;;  %v6755_v62 = vpop.f32.mrf.mxu3  ;;  %v8023_v17 = vunpack.c.l.b16 %v7899_v4  ;;  %v7227_v8 = vrot.slane %v7226_v49, 4  ;;  %v7830_v54 = vld [vmem:[#allocation2 + $0x18] sm:$0xe]  ;;  %v7247_v39 = vshll.u32 %v7153_v61, 16  ;;  %v7155_v4 = vld [vmem:[#allocation2 + $0x2c] sm:$0x1] }
 0x48f   : > { %7716 = vmatmul.bf16.vlgmr.msrb.gmra.mxu2 %v7628_v56  ;;  %v7242_v43 = vsel %vm12287_vm6, %v7237_v21, %v7241_v11  ;;  %v7255_v46 = vrot.slane %v7253_v60, 5  ;;  %v7259_v28 = vrot.slane %v7257_v7, 4  ;;  %v11564_v51 = vrot.slane %v7830_v54, 9 }
 0x490   : > { %8497 = vmatmul.bf16.gmra.mxu0 %v12060_v41  ;;  %v14753_v24 = vadd.f32 %v6755_v62, %v6378_v45  ;;  %6183 = vmatmul.bf16.gmra.mxu1 %v6035_v50  ;;  %v8054_v19 = vpack.c.b16 %v8023_v17, %v8022_v52  ;;  %v7232_v18 = vsel %vm12287_vm6, %v7227_v8, %v7231_v25  ;;  %v7599_v50 = vunpack.c.l.b16 %v7242_v43  ;;  %v12012_v62 = vld [vmem:[#allocation2 + $0xc] sm:$0xff] }
 0x491   : > { %v7598_v13 = vunpack.c.l.b16 %v7232_v18  ;;  %v7905_v25 = vrot.slane %v7152_v47, 5  ;;  %v7249_v36 = vrot.slane %v7247_v39, 5  ;;  %v7260_v15 = vor.u32 %v7259_v28, %v7255_v46  ;;  %v7831_v39 = vld [vmem:[#allocation2 + $0x24] sm:$0xe] }
 0x492   : > { %v7903_v47 = vsel %vm12281_vm5, %v11564_v51, %v7902_v2  ;;  %v7263_v17 = vshll.u32 %v7155_v4, 16  ;;  %v7909_v7 = vrot.slane %v14759_v58, 5  ;;  %v7912_v51 = vrot.slane %v7155_v4, 5 }
 0x493   : > { %v7629_v56 = vpack.c.b16 %v7599_v50, %v7598_v13  ;;  %v7906_v30 = vsel %vm12281_vm5, %v7904_v40, %v7905_v25  ;;  %v8024_v11 = vunpack.c.l.b16 %v7903_v47  ;;  %v7156_v50 = vld [vmem:[#allocation2 + $0x30] sm:$0xf]  ;;  %v12013_v25 = vld [vmem:[#allocation2 + $0x18] sm:$0xff] }
 0x494   : > { %v6382_v55 = vpop.f32.mrf.mxu2  ;;  %v7265_v8 = vrot.slane %v7263_v17, 5  ;;  %v7268_v58 = vshrl.u32 %v7156_v50, 16  ;;  %v7271_v28 = vshll.u32 %v7156_v50, 16 }
 0x495   : > { %v6146_v59 = vpop.f32.mrf.mxu1 }
 0x496   : > { %v6380_v0 = vadd.f32 %v6379_v20, %v6146_v59  ;;  %v6757_v37 = vpop.f32.mrf.mxu3  ;;  %v7244_v20 = vshrl.u32 %v7153_v61, 16  ;;  %v8025_v59 = vunpack.c.l.b16 %v7906_v30  ;;  %v11565_v30 = vrot.slane %v7831_v39, 9  ;;  %v12063_v39 = vld [vmem:[#allocation2 + $0x9c] sm:$0xff] }
 0x497   : > { %v7273_v47 = vrot.slane %v7271_v28, 5 }
 0x498   : > { %v14761_v34 = vadd.f32 %v6757_v37, %v6380_v0  ;;  %v7246_v32 = vrot.slane %v7244_v20, 4  ;;  %v7261_v0 = vrot.slane %v7260_v15, 4  ;;  %v8055_v60 = vpack.c.b16 %v8025_v59, %v8024_v11 }
 0x499   : > { %v7270_v15 = vrot.slane %v7268_v58, 4  ;;  %v7910_v59 = vsel %vm12281_vm5, %v11565_v30, %v7909_v7 }
 0x49a   : > { %8142 = vmatmul.bf16.vlgmr.msrb.gmra.mxu3 %v8054_v19  ;;  %v7250_v21 = vor.u32 %v7249_v36, %v7246_v32  ;;  %v14782_v19 = vld [vmem:[#allocation2 + $0x34] sm:$0xf]  ;;  %v7266_v2 = vsel %vm12287_vm6, %v7261_v0, %v7265_v8  ;;  %v7158_v32 = vld [vmem:[#allocation2 + $0x38] sm:$0x1]  ;;  %v8026_v8 = vunpack.c.l.b16 %v7910_v59 }
 0x49b   : > { %v7277_v18 = vshll.u32 %v14782_v19, 16  ;;  %v7281_v6 = vshrl.u32 %v14782_v19, 16  ;;  %v7601_v40 = vunpack.c.l.b16 %v7266_v2  ;;  %v7274_v0 = vor.u32 %v7273_v47, %v7270_v15 }
 0x49c   : > { %v6384_v9 = vpop.f32.mrf.mxu2  ;;  %v7251_v61 = vrot.slane %v7250_v21, 4  ;;  %v7919_v15 = vrot.slane %v7158_v32, 5 }
 0x49d   : > { %v6149_v41 = vpop.f32.mrf.mxu1  ;;  %v7275_v50 = vrot.slane %v7274_v0, 4 }
 0x49e   : > { %v6383_v44 = vadd.f32 %v6382_v55, %v6149_v41  ;;  %v6760_v45 = vpop.f32.mrf.mxu3  ;;  %v12062_v41 = vld [vmem:[#allocation2 + $0x90] sm:$0xff] }
 0x49f   : > { %7721 = vmatmul.bf16.gmra.mxu2 %v7629_v56 }
 0x4a0   : > { %8502 = vmatmul.bf16.gmra.mxu0 %v12061_v23  ;;  %v14773_v48 = vadd.f32 %v6760_v45, %v6383_v44  ;;  %7034 = vmatmul.bf16.vlgmr.msrb.gmra.mxu1 %v12012_v62  ;;  %v7256_v23 = vsel %vm12287_vm6, %v7251_v61, %v7255_v46  ;;  %v7279_v44 = vrot.slane %v7277_v18, 5  ;;  %v7283_v45 = vrot.slane %v7281_v6, 4 }
 0x4a1   : > { %v7600_v56 = vunpack.c.l.b16 %v7256_v23  ;;  %v7916_v6 = vrot.slane %v14782_v19, 5 }
 0x4a2   : > { %v7284_v17 = vor.u32 %v7283_v45, %v7279_v44 }
 0x4a3   : > { %v7630_v46 = vpack.c.b16 %v7601_v40, %v7600_v56  ;;  %v7918_v58 = vrot.slane %v7916_v6, 4 }
 0x4a4   : > { %v6387_v49 = vpop.f32.mrf.mxu2 }
 0x4a5   : > { %v6151_v55 = vpop.f32.mrf.mxu1 }
 0x4a6   : > { %v6385_v37 = vadd.f32 %v6384_v9, %v6151_v55  ;;  %v6762_v52 = vpop.f32.mrf.mxu3  ;;  %v7911_v9 = vrot.slane %v7909_v7, 4  ;;  %v7287_v55 = vshll.u32 %v7158_v32, 16 }
 0x4a8   : > { %v14784_v43 = vadd.f32 %v6762_v52, %v6385_v37  ;;  %v7913_v36 = vsel %vm12281_vm5, %v7911_v9, %v7912_v51  ;;  %v7285_v37 = vrot.slane %v7284_v17, 4  ;;  %v7289_v61 = vrot.slane %v7287_v55, 5  ;;  %v7161_v55 = vld [vmem:[#allocation2 + $0x44] sm:$0x1] }
 0x4a9   : > { %v7280_v9 = vsel %vm12287_vm6, %v7275_v50, %v7279_v44  ;;  %v12014_v44 = vld [vmem:[#allocation2 + $0x24] sm:$0xff] }
 0x4aa   : > { %8147 = vmatmul.bf16.gmra.mxu3 %v8055_v60  ;;  %v14799_v60 = vld [vmem:[#allocation2 + $0x40] sm:$0xf]  ;;  %v7290_v7 = vsel %vm12287_vm6, %v7285_v37, %v7289_v61 }
 0x4ab   : > { %v7301_v23 = vshll.u32 %v14799_v60, 16  ;;  %v7305_v40 = vshrl.u32 %v14799_v60, 16  ;;  %v7603_v19 = vunpack.c.l.b16 %v7290_v7 }
 0x4ac   : > { %v6389_v20 = vpop.f32.mrf.mxu2 }
 0x4ad   : > { %v6154_v54 = vpop.f32.mrf.mxu1  ;;  %v7303_v56 = vrot.slane %v7301_v23, 5  ;;  %v7307_v51 = vrot.slane %v7305_v40, 4 }
 0x4ae   : > { %v6388_v62 = vadd.f32 %v6387_v49, %v6154_v54  ;;  %v6765_v13 = vpop.f32.mrf.mxu3  ;;  %v8027_v49 = vunpack.c.l.b16 %v7913_v36  ;;  %v12089_v54 = vld [vmem:[%s15839_s3 + $0x228] sm:$0xff]  ;;  %v7602_v36 = vunpack.c.l.b16 %v7280_v9 }
 0x4af   : > { %7726 = vmatmul.bf16.gmra.mxu2 %v7630_v46  ;;  %v7308_v37 = vor.u32 %v7307_v51, %v7303_v56  ;;  %v14826_v9 = vld [vmem:[#allocation2 + $0x4c] sm:$0xf] }
 0x4b0   : > { %8507 = vmatmul.bf16.gmra.mxu0 %v12062_v41  ;;  %v14793_v10 = vadd.f32 %v6765_v13, %v6388_v62  ;;  %7039 = vmatmul.bf16.gmra.mxu1 %v12013_v25  ;;  %v8056_v18 = vpack.c.b16 %v8027_v49, %v8026_v8  ;;  %v7159_v41 = vld [vmem:[#allocation2 + $0x3c] sm:$0xf]  ;;  %v7832_v62 = vld [vmem:[#allocation2 + $0x30] sm:$0xe]  ;;  %v7631_v17 = vpack.c.b16 %v7603_v19, %v7602_v36  ;;  %v12081_v49 = vld [vmem:[%s15839_s3 + $0x1e8] sm:$0xff] }
 0x4b1   : > { %v7292_v13 = vshrl.u32 %v7159_v41, 16  ;;  %v7295_v25 = vshll.u32 %v7159_v41, 16  ;;  %9559 = vmatpush.bf16.msra.mxu2 %v12089_v54  ;;  %v11566_v59 = vrot.slane %v7832_v62, 9  ;;  %9133 = vmatpush.bf16.msra.mxu1 %v12081_v49  ;;  %v7309_v50 = vrot.slane %v7308_v37, 4 }
 0x4b2   : > { %v7325_v62 = vshll.u32 %v14826_v9, 16 }
 0x4b3   : > { %v7294_v0 = vrot.slane %v7292_v13, 4  ;;  %v7917_v32 = vsel %vm12281_vm5, %v11566_v59, %v7916_v6  ;;  %v7329_v13 = vshrl.u32 %v14826_v9, 16 }
 0x4b4   : > { %v6392_v4 = vpop.f32.mrf.mxu2  ;;  %v8028_v41 = vunpack.c.l.b16 %v7917_v32  ;;  %v7327_v59 = vrot.slane %v7325_v62, 5  ;;  %v7926_v32 = vrot.slane %v7161_v55, 5 }
 0x4b5   : > { %v6156_v21 = vpop.f32.mrf.mxu1  ;;  %v7331_v49 = vrot.slane %v7329_v13, 4 }
 0x4b6   : > { %v6390_v52 = vadd.f32 %v6389_v20, %v6156_v21  ;;  %v6767_v11 = vpop.f32.mrf.mxu3  ;;  %v14813_v20 = vpop.f32.mrf.mxu0  ;;  %v7920_v21 = vsel %vm12281_vm5, %v7918_v58, %v7919_v15  ;;  %v7923_v58 = vrot.slane %v14799_v60, 5  ;;  %v7833_v15 = vld [vmem:[#allocation2 + $0x3c] sm:$0xe] }
 0x4b7   : > { %16020 = vst [vmem:[#allocation39_spill] sm:$0xff] %v14813_v20 }
 0x4b8   : > { %v14801_v2 = vadd.f32 %v6767_v11, %v6390_v52  ;;  %v7311_v52 = vshll.u32 %v7161_v55, 16  ;;  %v8029_v11 = vunpack.c.l.b16 %v7920_v21 }
 0x4ba   : > { %8152 = vmatmul.bf16.gmra.mxu3 %v8056_v18  ;;  %v7313_v54 = vrot.slane %v7311_v52, 5 }
 0x4bc   : > { %v6394_v45 = vpop.f32.mrf.mxu2 }
 0x4bd   : > { %v6159_v28 = vpop.f32.mrf.mxu1 }
 0x4be   : > { %v6393_v46 = vadd.f32 %v6392_v4, %v6159_v28  ;;  %v6770_v30 = vpop.f32.mrf.mxu3  ;;  %v7297_v4 = vrot.slane %v7295_v25, 5  ;;  %v14824_v7 = vpop.f32.mrf.mxu0  ;;  %v7314_v28 = vsel %vm12287_vm6, %v7309_v50, %v7313_v54  ;;  %v7162_v25 = vld [vmem:[#allocation2 + $0x48] sm:$0xf] }
 0x4bf   : > { %7731 = vmatmul.bf16.gmra.mxu2 %v7631_v17  ;;  %16021 = vst [vmem:[#allocation40_spill] sm:$0xff] %v14824_v7  ;;  %v7605_v51 = vunpack.c.l.b16 %v7314_v28  ;;  %v7316_v60 = vshrl.u32 %v7162_v25, 16  ;;  %v7319_v17 = vshll.u32 %v7162_v25, 16 }
 0x4c0   : > { %8512 = vmatmul.bf16.gmra.mxu0 %v12063_v39  ;;  %v14815_v47 = vadd.f32 %v6770_v30, %v6393_v46  ;;  %7044 = vmatmul.bf16.gmra.mxu1 %v12014_v44  ;;  %v7298_v18 = vor.u32 %v7297_v4, %v7294_v0  ;;  %v8057_v39 = vpack.c.b16 %v8029_v11, %v8028_v41  ;;  %v12064_v46 = vld [vmem:[#allocation2 + $0xa8] sm:$0xff]  ;;  %v7925_v30 = vrot.slane %v7923_v58, 4  ;;  %v12015_v4 = vld [vmem:[#allocation2 + $0x30] sm:$0xff] }
 0x4c1   : > { %v7332_v41 = vor.u32 %v7331_v49, %v7327_v59 }
 0x4c2   : > { %v7299_v6 = vrot.slane %v7298_v18, 4  ;;  %v7164_v18 = vld [vmem:[#allocation2 + $0x50] sm:$0x1]  ;;  %v7927_v50 = vsel %vm12281_vm5, %v7925_v30, %v7926_v32 }
 0x4c3   : > { %v7335_v54 = vshll.u32 %v7164_v18, 16  ;;  %v8031_v55 = vunpack.c.l.b16 %v7927_v50  ;;  %v7333_v62 = vrot.slane %v7332_v41, 4  ;;  %v7834_v50 = vld [vmem:[#allocation2 + $0x48] sm:$0xe] }
 0x4c4   : > { %v6397_v61 = vpop.f32.mrf.mxu2 }
 0x4c5   : > { %v6161_v8 = vpop.f32.mrf.mxu1 }
 0x4c6   : > { %v6395_v23 = vadd.f32 %v6394_v45, %v6161_v8  ;;  %v6772_v40 = vpop.f32.mrf.mxu3  ;;  %v7304_v45 = vsel %vm12287_vm6, %v7299_v6, %v7303_v56  ;;  %v14837_v52 = vpop.f32.mrf.mxu0  ;;  %v11567_v8 = vrot.slane %v7833_v15, 9  ;;  %v7930_v15 = vrot.slane %v14826_v9, 5 }
 0x4c7   : > { %v7604_v37 = vunpack.c.l.b16 %v7304_v45  ;;  %16022 = vst [vmem:[#allocation41_spill] sm:$0xff] %v14837_v52 }
 0x4c8   : > { %v14828_v19 = vadd.f32 %v6772_v40, %v6395_v23  ;;  %v7318_v23 = vrot.slane %v7316_v60, 4  ;;  %v7321_v40 = vrot.slane %v7319_v17, 5  ;;  %v7932_v32 = vrot.slane %v7930_v15, 4 }
 0x4c9   : > { %v7632_v56 = vpack.c.b16 %v7605_v51, %v7604_v37  ;;  %v14845_v51 = vld [vmem:[#allocation2 + $0x58] sm:$0xf] }
 0x4ca   : > { %8157 = vmatmul.bf16.gmra.mxu3 %v8057_v39  ;;  %v7322_v28 = vor.u32 %v7321_v40, %v7318_v23  ;;  %v7349_v17 = vshll.u32 %v14845_v51, 16  ;;  %v7353_v49 = vshrl.u32 %v14845_v51, 16  ;;  %v12065_v37 = vld [vmem:[#allocation2 + $0xb4] sm:$0xff] }
 0x4cc   : > { %v6399_v36 = vpop.f32.mrf.mxu2  ;;  %v7323_v60 = vrot.slane %v7322_v28, 4  ;;  %v7351_v41 = vrot.slane %v7349_v17, 5 }
 0x4cd   : > { %v6164_v44 = vpop.f32.mrf.mxu1 }
 0x4ce   : > { %v6398_v21 = vadd.f32 %v6397_v61, %v6164_v44  ;;  %v6775_v0 = vpop.f32.mrf.mxu3  ;;  %v7924_v61 = vsel %vm12281_vm5, %v11567_v8, %v7923_v58 }
 0x4cf   : > { %7736 = vmatmul.bf16.gmra.mxu2 %v7632_v56  ;;  %v8030_v45 = vunpack.c.l.b16 %v7924_v61  ;;  %v7355_v61 = vrot.slane %v7353_v49, 4 }
 0x4d0   : > { %8517 = vmatmul.bf16.gmra.mxu0 %v12064_v46  ;;  %v14839_v11 = vadd.f32 %v6775_v0, %v6398_v21  ;;  %7049 = vmatmul.bf16.gmra.mxu1 %v12015_v4  ;;  %v7337_v46 = vrot.slane %v7335_v54, 5  ;;  %v14854_v21 = vpop.f32.mrf.mxu0  ;;  %v7328_v0 = vsel %vm12287_vm6, %v7323_v60, %v7327_v59  ;;  %v12088_v4 = vld [vmem:[%s15839_s3 + $0x220] sm:$0xff]  ;;  %v7933_v59 = vrot.slane %v7164_v18, 5 }
 0x4d1   : > { %v8058_v44 = vpack.c.b16 %v8031_v55, %v8030_v45  ;;  %16023 = vst [vmem:[#allocation43_spill] sm:$0xff] %v14854_v21  ;;  %9560 = vmatpush.bf16.msra.mxu2 %v12088_v4  ;;  %v7606_v28 = vunpack.c.l.b16 %v7328_v0  ;;  %v7167_v45 = vld [vmem:[#allocation2 + $0x5c] sm:$0x1] }
 0x4d2   : > { %v7338_v58 = vsel %vm12287_vm6, %v7333_v62, %v7337_v46  ;;  %v12080_v46 = vld [vmem:[%s15839_s3 + $0x1e0] sm:$0xff]  ;;  %v7359_v17 = vshll.u32 %v7167_v45, 16 }
 0x4d3   : > { %v7607_v9 = vunpack.c.l.b16 %v7338_v58  ;;  %v7356_v58 = vor.u32 %v7355_v61, %v7351_v41  ;;  %9134 = vmatpush.bf16.msra.mxu1 %v12080_v46  ;;  %v12066_v46 = vld [vmem:[#allocation2 + $0xc0] sm:$0xff] }
 0x4d4   : > { %v6402_v6 = vpop.f32.mrf.mxu2 }
 0x4d5   : > { %v6166_v39 = vpop.f32.mrf.mxu1 }
 0x4d6   : > { %v6400_v13 = vadd.f32 %v6399_v36, %v6166_v39  ;;  %v6777_v25 = vpop.f32.mrf.mxu3  ;;  %v7165_v36 = vld [vmem:[#allocation2 + $0x54] sm:$0xf]  ;;  %v12016_v39 = vld [vmem:[#allocation2 + $0x3c] sm:$0xff] }
 0x4d7   : > { %v7340_v23 = vshrl.u32 %v7165_v36, 16  ;;  %v7343_v40 = vshll.u32 %v7165_v36, 16 }
 0x4d8   : > { %v14847_v30 = vadd.f32 %v6777_v25, %v6400_v13  ;;  %v7633_v13 = vpack.c.b16 %v7607_v9, %v7606_v28  ;;  %v11568_v25 = vrot.slane %v7834_v50, 9  ;;  %v14870_v49 = vpop.f32.mrf.mxu0 }
 0x4d9   : > { %v7342_v60 = vrot.slane %v7340_v23, 4  ;;  %16024 = vst [vmem:[#allocation45_spill] sm:$0xff] %v14870_v49  ;;  %v7361_v23 = vrot.slane %v7359_v17, 5 }
 0x4da   : > { %8162 = vmatmul.bf16.gmra.mxu3 %v8058_v44  ;;  %v7934_v44 = vsel %vm12281_vm5, %v7932_v32, %v7933_v59  ;;  %v7931_v18 = vsel %vm12281_vm5, %v11568_v25, %v7930_v15  ;;  %v14872_v32 = vld [vmem:[#allocation2 + $0x64] sm:$0xf] }
 0x4db   : > { %v8033_v36 = vunpack.c.l.b16 %v7934_v44  ;;  %v7373_v28 = vshll.u32 %v14872_v32, 16  ;;  %v7377_v59 = vshrl.u32 %v14872_v32, 16 }
 0x4dc   : > { %v6404_v8 = vpop.f32.mrf.mxu2 }
 0x4dd   : > { %v6169_v56 = vpop.f32.mrf.mxu1  ;;  %v7375_v17 = vrot.slane %v7373_v28, 5 }
 0x4de   : > { %v6403_v54 = vadd.f32 %v6402_v6, %v6169_v56  ;;  %v6780_v55 = vpop.f32.mrf.mxu3  ;;  %v7345_v6 = vrot.slane %v7343_v40, 5 }
 0x4df   : > { %7741 = vmatmul.bf16.gmra.mxu2 %v7633_v13  ;;  %v7168_v13 = vld [vmem:[#allocation2 + $0x60] sm:$0xf] }
 0x4e0   : > { %8522 = vmatmul.bf16.gmra.mxu0 %v12065_v37  ;;  %v14861_v62 = vadd.f32 %v6780_v55, %v6403_v54  ;;  %7054 = vmatmul.bf16.gmra.mxu1 %v12016_v39  ;;  %v7346_v9 = vor.u32 %v7345_v6, %v7342_v60  ;;  %v7357_v37 = vrot.slane %v7356_v58, 4  ;;  %v8032_v54 = vunpack.c.l.b16 %v7931_v18  ;;  %v7835_v58 = vld [vmem:[#allocation2 + $0x54] sm:$0xe] }
 0x4e1   : > { %v7937_v55 = vrot.slane %v14845_v51, 5  ;;  %v7364_v51 = vshrl.u32 %v7168_v13, 16  ;;  %v7367_v18 = vshll.u32 %v7168_v13, 16 }
 0x4e2   : > { %v8059_v61 = vpack.c.b16 %v8033_v36, %v8032_v54  ;;  %v7347_v15 = vrot.slane %v7346_v9, 4  ;;  %v7362_v39 = vsel %vm12287_vm6, %v7357_v37, %v7361_v23  ;;  %v7379_v36 = vrot.slane %v7377_v59, 4 }
 0x4e3   : > { %v7609_v25 = vunpack.c.l.b16 %v7362_v39  ;;  %v7939_v44 = vrot.slane %v7937_v55, 4  ;;  %v7940_v54 = vrot.slane %v7167_v45, 5  ;;  %v7366_v13 = vrot.slane %v7364_v51, 4 }
 0x4e4   : > { %v6407_v4 = vpop.f32.mrf.mxu2  ;;  %v7369_v28 = vrot.slane %v7367_v18, 5  ;;  %v7380_v59 = vor.u32 %v7379_v36, %v7375_v17  ;;  %v7944_v18 = vrot.slane %v14872_v32, 5 }
 0x4e5   : > { %v6171_v0 = vpop.f32.mrf.mxu1  ;;  %v7941_v39 = vsel %vm12281_vm5, %v7939_v44, %v7940_v54 }
 0x4e6   : > { %v6405_v56 = vadd.f32 %v6404_v8, %v6171_v0  ;;  %v6782_v50 = vpop.f32.mrf.mxu3  ;;  %v7352_v8 = vsel %vm12287_vm6, %v7347_v15, %v7351_v41  ;;  %v14883_v0 = vpop.f32.mrf.mxu0  ;;  %v7170_v15 = vld [vmem:[#allocation2 + $0x68] sm:$0x1] }
 0x4e7   : > { %16025 = vst [vmem:[#allocation46_spill] sm:$0xff] %v14883_v0 }
 0x4e8   : > { %v14874_v40 = vadd.f32 %v6782_v50, %v6405_v56  ;;  %v12017_v56 = vld [vmem:[#allocation2 + $0x48] sm:$0xff]  ;;  %v7608_v50 = vunpack.c.l.b16 %v7352_v8  ;;  %v8035_v8 = vunpack.c.l.b16 %v7941_v39  ;;  %v12087_v39 = vld [vmem:[%s15839_s3 + $0x218] sm:$0xff] }
 0x4e9   : > { %9561 = vmatpush.bf16.msra.mxu2 %v12087_v39 }
 0x4ea   : > { %8167 = vmatmul.bf16.gmra.mxu3 %v8059_v61  ;;  %v7634_v41 = vpack.c.b16 %v7609_v25, %v7608_v50  ;;  %v11569_v61 = vrot.slane %v7835_v58, 9  ;;  %v14891_v50 = vld [vmem:[#allocation2 + $0x70] sm:$0xf] }
 0x4eb   : > { %v7397_v54 = vshll.u32 %v14891_v50, 16 }
 0x4ec   : > { %v6409_v6 = vpop.f32.mrf.mxu2 }
 0x4ed   : > { %v6174_v60 = vpop.f32.mrf.mxu1 }
 0x4ee   : > { %v6408_v9 = vadd.f32 %v6407_v4, %v6174_v60  ;;  %v6785_v37 = vpop.f32.mrf.mxu3  ;;  %v7938_v4 = vsel %vm12281_vm5, %v11569_v61, %v7937_v55  ;;  %v7383_v60 = vshll.u32 %v7170_v15, 16  ;;  %v7171_v61 = vld [vmem:[#allocation2 + $0x6c] sm:$0xf] }
 0x4ef   : > { %7746 = vmatmul.bf16.gmra.mxu2 %v7634_v41  ;;  %v8034_v58 = vunpack.c.l.b16 %v7938_v4  ;;  %v7401_v41 = vshrl.u32 %v14891_v50, 16  ;;  %v7836_v4 = vld [vmem:[#allocation2 + $0x60] sm:$0xe] }
 0x4f0   : > { %8527 = vmatmul.bf16.gmra.mxu0 %v12066_v46  ;;  %v14885_v23 = vadd.f32 %v6785_v37, %v6408_v9  ;;  %7059 = vmatmul.bf16.gmra.mxu1 %v12017_v56  ;;  %v7370_v9 = vor.u32 %v7369_v28, %v7366_v13  ;;  %v7381_v37 = vrot.slane %v7380_v59, 4  ;;  %v7385_v35 = vrot.slane %v7383_v60, 5 }
 0x4f1   : > { %v8060_v51 = vpack.c.b16 %v8035_v8, %v8034_v58  ;;  %v7946_v28 = vrot.slane %v7944_v18, 4  ;;  %v7388_v60 = vshrl.u32 %v7171_v61, 16  ;;  %v7399_v8 = vrot.slane %v7397_v54, 5 }
 0x4f2   : > { %v7371_v36 = vrot.slane %v7370_v9, 4  ;;  %v7386_v55 = vsel %vm12287_vm6, %v7381_v37, %v7385_v35  ;;  %v7391_v35 = vshll.u32 %v7171_v61, 16  ;;  %v7947_v58 = vrot.slane %v7170_v15, 5 }
 0x4f3   : > { %v7611_v13 = vunpack.c.l.b16 %v7386_v55  ;;  %v7173_v55 = vld [vmem:[#allocation2 + $0x74] sm:$0x1]  ;;  %v7390_v49 = vrot.slane %v7388_v60, 4 }
 0x4f4   : > { %v6412_v45 = vpop.f32.mrf.mxu2  ;;  %v7948_v0 = vsel %vm12281_vm5, %v7946_v28, %v7947_v58  ;;  %v7393_v21 = vrot.slane %v7391_v35, 5  ;;  %v7407_v54 = vshll.u32 %v7173_v55, 16  ;;  %v14914_v35 = vld [vmem:[#allocation2 + $0x7c] sm:$0xf] }
 0x4f5   : > { %v6176_v46 = vpop.f32.mrf.mxu1 }
 0x4f6   : > { %v6410_v56 = vadd.f32 %v6409_v6, %v6176_v46  ;;  %v6787_v25 = vpop.f32.mrf.mxu3  ;;  %v7376_v6 = vsel %vm12287_vm6, %v7371_v36, %v7375_v17  ;;  %v7403_v46 = vrot.slane %v7401_v41, 4  ;;  %v11570_v36 = vrot.slane %v7836_v4, 9 }
 0x4f7   : > { %v8037_v41 = vunpack.c.l.b16 %v7948_v0 }
 0x4f8   : > { %v14893_v44 = vadd.f32 %v6787_v25, %v6410_v56  ;;  %v12018_v56 = vld [vmem:[#allocation2 + $0x54] sm:$0xff]  ;;  %v7610_v25 = vunpack.c.l.b16 %v7376_v6  ;;  %v7404_v61 = vor.u32 %v7403_v46, %v7399_v8  ;;  %v7945_v15 = vsel %vm12281_vm5, %v11570_v36, %v7944_v18 }
 0x4f9   : > { %v8036_v60 = vunpack.c.l.b16 %v7945_v15  ;;  %v7409_v46 = vrot.slane %v7407_v54, 5  ;;  %v7421_v18 = vshll.u32 %v14914_v35, 16 }
 0x4fa   : > { %8172 = vmatmul.bf16.gmra.mxu3 %v8060_v51  ;;  %v7635_v51 = vpack.c.b16 %v7611_v13, %v7610_v25  ;;  %v7394_v13 = vor.u32 %v7393_v21, %v7390_v49  ;;  %v7425_v21 = vshrl.u32 %v14914_v35, 16  ;;  %v7174_v49 = vld [vmem:[#allocation2 + $0x78] sm:$0xf] }
 0x4fb   : > { %v7412_v15 = vshrl.u32 %v7174_v49, 16  ;;  %v7423_v54 = vrot.slane %v7421_v18, 5 }
 0x4fc   : > { %v6414_v59 = vpop.f32.mrf.mxu2  ;;  %v7395_v25 = vrot.slane %v7394_v13, 4 }
 0x4fd   : > { %v6179_v32 = vpop.f32.mrf.mxu1 }
 0x4fe   : > { %v6413_v9 = vadd.f32 %v6412_v45, %v6179_v32  ;;  %v6790_v37 = vpop.f32.mrf.mxu3  ;;  %v12079_v45 = vld [vmem:[%s15839_s3 + $0x1d8] sm:$0xff]  ;;  %v7405_v32 = vrot.slane %v7404_v61, 4 }
 0x4ff   : > { %7751 = vmatmul.bf16.gmra.mxu2 %v7635_v51  ;;  %9135 = vmatpush.bf16.msra.mxu1 %v12079_v45  ;;  %v7837_v45 = vld [vmem:[#allocation2 + $0x6c] sm:$0xe] }
 0x500   : > { %v14905_v17 = vadd.f32 %v6790_v37, %v6413_v9  ;;  %7064 = vmatmul.bf16.gmra.mxu1 %v12018_v56  ;;  %v8061_v37 = vpack.c.b16 %v8037_v41, %v8036_v60  ;;  %v7951_v56 = vrot.slane %v14891_v50, 5  ;;  %v7410_v0 = vsel %vm12287_vm6, %v7405_v32, %v7409_v46  ;;  %v12019_v32 = vld [vmem:[#allocation2 + $0x60] sm:$0xff] }
 0x501   : > { %v7613_v58 = vunpack.c.l.b16 %v7410_v0  ;;  %v7415_v50 = vshll.u32 %v7174_v49, 16  ;;  %v7427_v41 = vrot.slane %v7425_v21, 4  ;;  %v7414_v0 = vrot.slane %v7412_v15, 4 }
 0x502   : > { %v7953_v51 = vrot.slane %v7951_v56, 4 }
 0x503   : > { %v7417_v52 = vrot.slane %v7415_v50, 5  ;;  %v7428_v7 = vor.u32 %v7427_v41, %v7423_v54  ;;  %v7958_v50 = vrot.slane %v14914_v35, 5 }
 0x504   : > { %v6417_v39 = vpop.f32.mrf.mxu2 }
 0x505   : > { %v6181_v6 = vpop.f32.mrf.mxu1 }
 0x506   : > { %v6415_v4 = vadd.f32 %v6414_v59, %v6181_v6  ;;  %v6792_v28 = vpop.f32.mrf.mxu3  ;;  %v7400_v59 = vsel %vm12287_vm6, %v7395_v25, %v7399_v8  ;;  %v7176_v8 = vld [vmem:[#allocation2 + $0x80] sm:$0x1] }
 0x507   : > { %v7431_v18 = vshll.u32 %v7176_v8, 16 }
 0x508   : > { %v14916_v9 = vadd.f32 %v6792_v28, %v6415_v4  ;;  %v7612_v4 = vunpack.c.l.b16 %v7400_v59  ;;  %v7954_v28 = vrot.slane %v7173_v55, 5  ;;  %v7418_v59 = vor.u32 %v7417_v52, %v7414_v0  ;;  %v7838_v0 = vld [vmem:[#allocation2 + $0x78] sm:$0xe] }
 0x50a   : > { %8177 = vmatmul.bf16.gmra.mxu3 %v8061_v37  ;;  %v7636_v46 = vpack.c.b16 %v7613_v58, %v7612_v4  ;;  %v11571_v37 = vrot.slane %v7837_v45, 9  ;;  %v7955_v25 = vsel %vm12281_vm5, %v7953_v51, %v7954_v28  ;;  %v7419_v41 = vrot.slane %v7418_v59, 4  ;;  %v12086_v28 = vld [vmem:[%s15839_s3 + $0x210] sm:$0xff] }
 0x50b   : > { %v8039_v21 = vunpack.c.l.b16 %v7955_v25  ;;  %9562 = vmatpush.bf16.msra.mxu2 %v12086_v28 }
 0x50c   : > { %v6419_v61 = vpop.f32.mrf.mxu2 }
 0x50d   : > { %v6184_v36 = vpop.f32.mrf.mxu1 }
 0x50e   : > { %v6418_v6 = vadd.f32 %v6417_v39, %v6184_v36  ;;  %v6795_v13 = vpop.f32.mrf.mxu3  ;;  %v7952_v39 = vsel %vm12281_vm5, %v11571_v37, %v7951_v56  ;;  %v7429_v36 = vrot.slane %v7428_v7, 4  ;;  %v7177_v7 = vld [vmem:[#allocation2 + $0x84] sm:$0xf]  ;;  %v7960_v37 = vrot.slane %v7958_v50, 4 }
 0x50f   : > { %7756 = vmatmul.bf16.gmra.mxu2 %v7636_v46  ;;  %v8038_v45 = vunpack.c.l.b16 %v7952_v39  ;;  %v7436_v39 = vshrl.u32 %v7177_v7, 16 }
 0x510   : > { %v14925_v60 = vadd.f32 %v6795_v13, %v6418_v6  ;;  %7069 = vmatmul.bf16.gmra.mxu1 %v12019_v32  ;;  %v14931_v13 = vld [vmem:[#allocation2 + $0x88] sm:$0xf]  ;;  %v7433_v32 = vrot.slane %v7431_v18, 5  ;;  %v7439_v18 = vshll.u32 %v7177_v7, 16 }
 0x511   : > { %v8062_v15 = vpack.c.b16 %v8039_v21, %v8038_v45  ;;  %v7445_v4 = vshll.u32 %v14931_v13, 16  ;;  %v7449_v52 = vshrl.u32 %v14931_v13, 16  ;;  %v7438_v20 = vrot.slane %v7436_v39, 4 }
 0x512   : > { %v7434_v56 = vsel %vm12287_vm6, %v7429_v36, %v7433_v32 }
 0x513   : > { %v7615_v46 = vunpack.c.l.b16 %v7434_v56  ;;  %v7447_v21 = vrot.slane %v7445_v4, 5 }
 0x514   : > { %v7717_v55 = vpop.f32.mrf.mxu2 }
 0x515   : > { %v6186_v49 = vpop.f32.mrf.mxu1 }
 0x516   : > { %v6420_v6 = vadd.f32 %v6419_v61, %v6186_v49  ;;  %v6797_v58 = vpop.f32.mrf.mxu3  ;;  %v7424_v61 = vsel %vm12287_vm6, %v7419_v41, %v7423_v54  ;;  %v7451_v49 = vrot.slane %v7449_v52, 4  ;;  %v7961_v54 = vrot.slane %v7176_v8, 5  ;;  %v7179_v41 = vld [vmem:[#allocation2 + $0x8c] sm:$0x1] }
 0x518   : > { %v14933_v51 = vadd.f32 %v6797_v58, %v6420_v6  ;;  %v12020_v6 = vld [vmem:[#allocation2 + $0x6c] sm:$0xff]  ;;  %v7614_v58 = vunpack.c.l.b16 %v7424_v61  ;;  %v7962_v56 = vsel %vm12281_vm5, %v7960_v37, %v7961_v54  ;;  %v7452_v7 = vor.u32 %v7451_v49, %v7447_v21 }
 0x519   : > { %v8041_v52 = vunpack.c.l.b16 %v7962_v56 }
 0x51a   : > { %16026 = vst [vmem:[#allocation44_spill] sm:$0xff] %v14933_v51  ;;  %8182 = vmatmul.bf16.gmra.mxu3 %v8062_v15  ;;  %v7637_v32 = vpack.c.b16 %v7615_v46, %v7614_v58  ;;  %v11572_v15 = vrot.slane %v7838_v0, 9  ;;  %v7441_v51 = vrot.slane %v7439_v18, 5  ;;  %v7453_v37 = vrot.slane %v7452_v7, 4  ;;  %v14956_v18 = vld [vmem:[#allocation2 + $0x94] sm:$0xf] }
 0x51b   : > { %v7469_v54 = vshll.u32 %v14956_v18, 16 }
 0x51c   : > { %v7719_v25 = vpop.f32.mrf.mxu2  ;;  %v7959_v8 = vsel %vm12281_vm5, %v11572_v15, %v7958_v50  ;;  %v7442_v46 = vor.u32 %v7441_v51, %v7438_v20  ;;  %v7473_v20 = vshrl.u32 %v14956_v18, 16 }
 0x51d   : > { %v7035_v35 = vpop.f32.mrf.mxu1  ;;  %v8040_v39 = vunpack.c.l.b16 %v7959_v8  ;;  %v7471_v8 = vrot.slane %v7469_v54, 5 }
 0x51e   : > { %v7115_v59 = vadd.f32 %v7035_v35, %v14510_v16  ;;  %v8143_v36 = vpop.f32.mrf.mxu3  ;;  %v12078_v16 = vld [vmem:[%s15839_s3 + $0x1d0] sm:$0xff]  ;;  %v7443_v58 = vrot.slane %v7442_v46, 4  ;;  %v12021_v46 = vld [vmem:[#allocation2 + $0x78] sm:$0xff] }
 0x51f   : > { %7761 = vmatmul.bf16.gmra.mxu2 %v7637_v32  ;;  %9136 = vmatpush.bf16.msra.mxu1 %v12078_v16 }
 0x520   : > { %v7797_v45 = vadd.f32 %v7717_v55, %v7115_v59  ;;  %7074 = vmatmul.bf16.gmra.mxu1 %v12020_v6  ;;  %v7455_v55 = vshll.u32 %v7179_v41, 16  ;;  %v7965_v6 = vrot.slane %v14931_v13, 5  ;;  %v7839_v13 = vld [vmem:[#allocation2 + $0x84] sm:$0xe] }
 0x522   : > { %v14948_v4 = vadd.f32 %v8143_v36, %v7797_v45  ;;  %v7457_v49 = vrot.slane %v7455_v55, 5  ;;  %v8063_v36 = vpack.c.b16 %v8041_v52, %v8040_v39  ;;  %v7448_v45 = vsel %vm12287_vm6, %v7443_v58, %v7447_v21  ;;  %v7182_v21 = vld [vmem:[#allocation2 + $0x98] sm:$0x1] }
 0x523   : > { %v7475_v55 = vrot.slane %v7473_v20, 4  ;;  %v7479_v54 = vshll.u32 %v7182_v21, 16 }
 0x524   : > { %v7722_v28 = vpop.f32.mrf.mxu2  ;;  %v7458_v50 = vsel %vm12287_vm6, %v7453_v37, %v7457_v49  ;;  %v7616_v37 = vunpack.c.l.b16 %v7448_v45  ;;  %v11573_v49 = vrot.slane %v7839_v13, 9 }
 0x525   : > { %v7037_v61 = vpop.f32.mrf.mxu1  ;;  %v7617_v32 = vunpack.c.l.b16 %v7458_v50  ;;  %v7476_v50 = vor.u32 %v7475_v55, %v7471_v8 }
 0x526   : > { %v7116_v35 = vadd.f32 %v7037_v61, %v14535_v5  ;;  %v8145_v0 = vpop.f32.mrf.mxu3  ;;  %v7180_v5 = vld [vmem:[#allocation2 + $0x90] sm:$0xf] }
 0x527   : > { %v7460_v7 = vshrl.u32 %v7180_v5, 16  ;;  %v7463_v16 = vshll.u32 %v7180_v5, 16  ;;  %v7638_v39 = vpack.c.b16 %v7617_v32, %v7616_v37  ;;  %v7477_v32 = vrot.slane %v7476_v50, 4 }
 0x528   : > { %v7798_v59 = vadd.f32 %v7719_v25, %v7116_v35  ;;  %v7967_v25 = vrot.slane %v7965_v6, 4  ;;  %v7968_v35 = vrot.slane %v7179_v41, 5 }
 0x529   : > { %v7465_v58 = vrot.slane %v7463_v16, 5 }
 0x52a   : > { %v14963_v51 = vadd.f32 %v8145_v0, %v7798_v59  ;;  %8187 = vmatmul.bf16.gmra.mxu3 %v8063_v36  ;;  %v7969_v59 = vsel %vm12281_vm5, %v7967_v25, %v7968_v35  ;;  %v7462_v36 = vrot.slane %v7460_v7, 4  ;;  %v14975_v25 = vld [vmem:[#allocation2 + $0xa0] sm:$0xf]  ;;  %v7481_v7 = vrot.slane %v7479_v54, 5 }
 0x52b   : > { %v8043_v20 = vunpack.c.l.b16 %v7969_v59  ;;  %v7493_v37 = vshll.u32 %v14975_v25, 16  ;;  %v7497_v35 = vshrl.u32 %v14975_v25, 16 }
 0x52c   : > { %v7724_v56 = vpop.f32.mrf.mxu2  ;;  %v7466_v45 = vor.u32 %v7465_v58, %v7462_v36  ;;  %v7840_v58 = vld [vmem:[#allocation2 + $0x90] sm:$0xe] }
 0x52d   : > { %v7040_v15 = vpop.f32.mrf.mxu1  ;;  %v7495_v54 = vrot.slane %v7493_v37, 5 }
 0x52e   : > { %v7117_v52 = vadd.f32 %v7040_v15, %v14544_v3  ;;  %v8148_v61 = vpop.f32.mrf.mxu3  ;;  %v7966_v3 = vsel %vm12281_vm5, %v11573_v49, %v7965_v6  ;;  %v7482_v6 = vsel %vm12287_vm6, %v7477_v32, %v7481_v7  ;;  %v12022_v32 = vld [vmem:[#allocation2 + $0x84] sm:$0xff]  ;;  %v11574_v7 = vrot.slane %v7840_v58, 9 }
 0x52f   : > { %7766 = vmatmul.bf16.gmra.mxu2 %v7638_v39 }
 0x530   : > { %v7799_v0 = vadd.f32 %v7722_v28, %v7117_v52  ;;  %7079 = vmatmul.bf16.gmra.mxu1 %v12021_v46  ;;  %v8042_v52 = vunpack.c.l.b16 %v7966_v3  ;;  %v7467_v46 = vrot.slane %v7466_v45, 4 }
 0x532   : > { %v14970_v5 = vadd.f32 %v8148_v61, %v7799_v0  ;;  %v8064_v55 = vpack.c.b16 %v8043_v20, %v8042_v52  ;;  %v7972_v61 = vrot.slane %v14956_v18, 5  ;;  %v7472_v39 = vsel %vm12287_vm6, %v7467_v46, %v7471_v8 }
 0x533   : > { %v7619_v18 = vunpack.c.l.b16 %v7482_v6  ;;  %v7499_v20 = vrot.slane %v7497_v35, 4  ;;  %v7975_v8 = vrot.slane %v7182_v21, 5 }
 0x534   : > { %v7727_v28 = vpop.f32.mrf.mxu2  ;;  %v7974_v49 = vrot.slane %v7972_v61, 4  ;;  %v7973_v21 = vsel %vm12281_vm5, %v11574_v7, %v7972_v61 }
 0x535   : > { %v7042_v41 = vpop.f32.mrf.mxu1 }
 0x536   : > { %v7118_v15 = vadd.f32 %v7042_v41, %v14560_v12  ;;  %v8150_v13 = vpop.f32.mrf.mxu3  ;;  %v7183_v12 = vld [vmem:[#allocation2 + $0x9c] sm:$0xf] }
 0x537   : > { %v7484_v50 = vshrl.u32 %v7183_v12, 16  ;;  %v7487_v3 = vshll.u32 %v7183_v12, 16  ;;  %v7500_v12 = vor.u32 %v7499_v20, %v7495_v54 }
 0x538   : > { %v7800_v16 = vadd.f32 %v7724_v56, %v7118_v15  ;;  %v12085_v56 = vld [vmem:[%s15839_s3 + $0x208] sm:$0xff]  ;;  %v7618_v15 = vunpack.c.l.b16 %v7472_v39 }
 0x539   : > { %9563 = vmatpush.bf16.msra.mxu2 %v12085_v56  ;;  %v7486_v46 = vrot.slane %v7484_v50, 4  ;;  %v7489_v6 = vrot.slane %v7487_v3, 5  ;;  %v8044_v50 = vunpack.c.l.b16 %v7973_v21  ;;  %v15000_v3 = vld [vmem:[#allocation2 + $0xac] sm:$0xf] }
 0x53a   : > { %v14982_v0 = vadd.f32 %v8150_v13, %v7800_v16  ;;  %8192 = vmatmul.bf16.gmra.mxu3 %v8064_v55  ;;  %v7639_v52 = vpack.c.b16 %v7619_v18, %v7618_v15  ;;  %v7185_v16 = vld [vmem:[#allocation2 + $0xa4] sm:$0x1]  ;;  %v7976_v55 = vsel %vm12281_vm5, %v7974_v49, %v7975_v8  ;;  %v7501_v49 = vrot.slane %v7500_v12, 4 }
 0x53b   : > { %v8045_v35 = vunpack.c.l.b16 %v7976_v55  ;;  %v7490_v18 = vor.u32 %v7489_v6, %v7486_v46  ;;  %v7517_v8 = vshll.u32 %v15000_v3, 16 }
 0x53c   : > { %v7729_v36 = vpop.f32.mrf.mxu2 }
 0x53d   : > { %v7045_v59 = vpop.f32.mrf.mxu1  ;;  %v7491_v15 = vrot.slane %v7490_v18, 4  ;;  %v7519_v21 = vrot.slane %v7517_v8, 5  ;;  %v12023_v18 = vld [vmem:[#allocation2 + $0x90] sm:$0xff] }
 0x53e   : > { %v7119_v41 = vadd.f32 %v7045_v59, %v14569_v33  ;;  %v8153_v45 = vpop.f32.mrf.mxu3  ;;  %v12077_v33 = vld [vmem:[%s15839_s3 + $0x1c8] sm:$0xff] }
 0x53f   : > { %7771 = vmatmul.bf16.gmra.mxu2 %v7639_v52  ;;  %9137 = vmatpush.bf16.msra.mxu1 %v12077_v33  ;;  %v7496_v7 = vsel %vm12287_vm6, %v7491_v15, %v7495_v54  ;;  %v7188_v54 = vld [vmem:[#allocation2 + $0xb0] sm:$0x1] }
 0x540   : > { %v7801_v13 = vadd.f32 %v7727_v28, %v7119_v41  ;;  %7084 = vmatmul.bf16.gmra.mxu1 %v12022_v32  ;;  %v7503_v28 = vshll.u32 %v7185_v16, 16  ;;  %v7979_v32 = vrot.slane %v14975_v25, 5  ;;  %v7841_v25 = vld [vmem:[#allocation2 + $0x9c] sm:$0xe]  ;;  %v7527_v8 = vshll.u32 %v7188_v54, 16 }
 0x542   : > { %v14992_v37 = vadd.f32 %v8153_v45, %v7801_v13  ;;  %v7505_v20 = vrot.slane %v7503_v28, 5  ;;  %v8065_v45 = vpack.c.b16 %v8045_v35, %v8044_v50  ;;  %v7521_v13 = vshrl.u32 %v15000_v3, 16 }
 0x544   : > { %v7732_v56 = vpop.f32.mrf.mxu2  ;;  %v7506_v61 = vsel %vm12287_vm6, %v7501_v49, %v7505_v20  ;;  %v7523_v28 = vrot.slane %v7521_v13, 4  ;;  %v7620_v49 = vunpack.c.l.b16 %v7496_v7  ;;  %v11575_v20 = vrot.slane %v7841_v25, 9 }
 0x545   : > { %v7047_v39 = vpop.f32.mrf.mxu1  ;;  %v7621_v55 = vunpack.c.l.b16 %v7506_v61 }
 0x546   : > { %v7120_v59 = vadd.f32 %v7047_v39, %v14597_v42  ;;  %v8155_v58 = vpop.f32.mrf.mxu3  ;;  %v7186_v42 = vld [vmem:[#allocation2 + $0xa8] sm:$0xf]  ;;  %v7524_v61 = vor.u32 %v7523_v28, %v7519_v21 }
 0x547   : > { %v7508_v12 = vshrl.u32 %v7186_v42, 16  ;;  %v7511_v33 = vshll.u32 %v7186_v42, 16  ;;  %v7640_v50 = vpack.c.b16 %v7621_v55, %v7620_v49 }
 0x548   : > { %v7802_v41 = vadd.f32 %v7729_v36, %v7120_v59  ;;  %v7981_v36 = vrot.slane %v7979_v32, 4  ;;  %v7982_v59 = vrot.slane %v7185_v16, 5  ;;  %v7525_v55 = vrot.slane %v7524_v61, 4 }
 0x549   : > { %v7513_v15 = vrot.slane %v7511_v33, 5 }
 0x54a   : > { %v15007_v52 = vadd.f32 %v8155_v58, %v7802_v41  ;;  %8197 = vmatmul.bf16.gmra.mxu3 %v8065_v45  ;;  %v7983_v41 = vsel %vm12281_vm5, %v7981_v36, %v7982_v59  ;;  %v7510_v45 = vrot.slane %v7508_v12, 4  ;;  %v15019_v36 = vld [vmem:[#allocation2 + $0xb8] sm:$0xf]  ;;  %v7529_v12 = vrot.slane %v7527_v8, 5 }
 0x54b   : > { %v8047_v13 = vunpack.c.l.b16 %v7983_v41  ;;  %v7545_v49 = vshrl.u32 %v15019_v36, 16 }
 0x54c   : > { %v7734_v6 = vpop.f32.mrf.mxu2  ;;  %v7514_v7 = vor.u32 %v7513_v15, %v7510_v45 }
 0x54d   : > { %v7050_v46 = vpop.f32.mrf.mxu1  ;;  %v7547_v8 = vrot.slane %v7545_v49, 4  ;;  %v12076_v49 = vld [vmem:[%s15839_s3 + $0x1c0] sm:$0xff] }
 0x54e   : > { %v7121_v35 = vadd.f32 %v7050_v46, %v14612_v53  ;;  %v8158_v39 = vpop.f32.mrf.mxu3  ;;  %v7980_v53 = vsel %vm12281_vm5, %v11575_v20, %v7979_v32  ;;  %v7541_v32 = vshll.u32 %v15019_v36, 16  ;;  %9138 = vmatpush.bf16.msra.mxu1 %v12076_v49 }
 0x54f   : > { %7776 = vmatmul.bf16.gmra.mxu2 %v7640_v50 }
 0x550   : > { %v7803_v58 = vadd.f32 %v7732_v56, %v7121_v35  ;;  %7089 = vmatmul.bf16.gmra.mxu1 %v12023_v18  ;;  %v8046_v35 = vunpack.c.l.b16 %v7980_v53  ;;  %v7530_v18 = vsel %vm12287_vm6, %v7525_v55, %v7529_v12  ;;  %v7543_v53 = vrot.slane %v7541_v32, 5  ;;  %v7191_v12 = vld [vmem:[#allocation2 + $0xbc] sm:$0x1] }
 0x551   : > { %v7623_v20 = vunpack.c.l.b16 %v7530_v18 }
 0x552   : > { %v15014_v42 = vadd.f32 %v8158_v39, %v7803_v58  ;;  %v8066_v28 = vpack.c.b16 %v8047_v13, %v8046_v35  ;;  %v7515_v39 = vrot.slane %v7514_v7, 4  ;;  %v7986_v58 = vrot.slane %v15000_v3, 5 }
 0x553   : > { %v7989_v35 = vrot.slane %v7188_v54, 5 }
 0x554   : > { %v7737_v56 = vpop.f32.mrf.mxu2  ;;  %v7520_v50 = vsel %vm12287_vm6, %v7515_v39, %v7519_v21  ;;  %v7988_v55 = vrot.slane %v7986_v58, 4  ;;  %v7548_v39 = vor.u32 %v7547_v8, %v7543_v53 }
 0x555   : > { %v7052_v16 = vpop.f32.mrf.mxu1  ;;  %v7622_v7 = vunpack.c.l.b16 %v7520_v50 }
 0x556   : > { %v7122_v46 = vadd.f32 %v7052_v16, %v14628_v38  ;;  %v8160_v25 = vpop.f32.mrf.mxu3  ;;  %v7189_v38 = vld [vmem:[#allocation2 + $0xb4] sm:$0xf]  ;;  %v12024_v16 = vld [vmem:[#allocation2 + $0x9c] sm:$0xff] }
 0x557   : > { %v7532_v15 = vshrl.u32 %v7189_v38, 16  ;;  %v7535_v61 = vshll.u32 %v7189_v38, 16  ;;  %v7551_v38 = vshll.u32 %v7191_v12, 16 }
 0x558   : > { %v7804_v33 = vadd.f32 %v7734_v6, %v7122_v46  ;;  %v12084_v6 = vld [vmem:[%s15839_s3 + $0x200] sm:$0xff]  ;;  %v7842_v46 = vld [vmem:[#allocation2 + $0xa8] sm:$0xe] }
 0x559   : > { %9564 = vmatpush.bf16.msra.mxu2 %v12084_v6  ;;  %v11576_v32 = vrot.slane %v7842_v46, 9 }
 0x55a   : > { %v15025_v59 = vadd.f32 %v8160_v25, %v7804_v33  ;;  %8202 = vmatmul.bf16.gmra.mxu3 %v8066_v28  ;;  %v7641_v25 = vpack.c.b16 %v7623_v20, %v7622_v7  ;;  %v7534_v33 = vrot.slane %v7532_v15, 4  ;;  %v7537_v28 = vrot.slane %v7535_v61, 5  ;;  %v15043_v15 = vld [vmem:[#allocation2 + $0xc4] sm:$0xf]  ;;  %v7192_v7 = vld [vmem:[#allocation2 + $0xc0] sm:$0xf] }
 0x55b   : > { %v7569_v46 = vshrl.u32 %v15043_v15, 16 }
 0x55c   : > { %v7739_v45 = vpop.f32.mrf.mxu2  ;;  %v7538_v20 = vor.u32 %v7537_v28, %v7534_v33  ;;  %v7993_v33 = vrot.slane %v15019_v36, 5  ;;  %v7556_v28 = vshrl.u32 %v7192_v7, 16  ;;  %v15056_v36 = vld [vmem:[#allocation2 + $0xc8] sm:$0x1] }
 0x55d   : > { %v7055_v41 = vpop.f32.mrf.mxu1 }
 0x55e   : > { %v7123_v13 = vadd.f32 %v7055_v41, %v14637_v27  ;;  %v8163_v3 = vpop.f32.mrf.mxu3  ;;  %v7990_v27 = vsel %vm12281_vm5, %v7988_v55, %v7989_v35  ;;  %v7549_v41 = vrot.slane %v7548_v39, 4  ;;  %v7565_v55 = vshll.u32 %v15043_v15, 16 }
 0x55f   : > { %7781 = vmatmul.bf16.gmra.mxu2 %v7641_v25  ;;  %v8049_v6 = vunpack.c.l.b16 %v7990_v27  ;;  %v7559_v39 = vshll.u32 %v7192_v7, 16  ;;  %v7571_v27 = vrot.slane %v7569_v46, 4 }
 0x560   : > { %v7805_v21 = vadd.f32 %v7737_v56, %v7123_v13  ;;  %7094 = vmatmul.bf16.gmra.mxu1 %v12024_v16  ;;  %v7987_v56 = vsel %vm12281_vm5, %v11576_v32, %v7986_v58  ;;  %v7567_v32 = vrot.slane %v7565_v55, 5 }
 0x561   : > { %v8048_v13 = vunpack.c.l.b16 %v7987_v56 }
 0x562   : > { %v15034_v18 = vadd.f32 %v8163_v3, %v7805_v21  ;;  %v7553_v3 = vrot.slane %v7551_v38, 5  ;;  %v7539_v21 = vrot.slane %v7538_v20, 4  ;;  %v7572_v7 = vor.u32 %v7571_v27, %v7567_v32 }
 0x563   : > { %v8067_v58 = vpack.c.b16 %v8049_v6, %v8048_v13  ;;  %v12025_v6 = vld [vmem:[#allocation2 + $0xa8] sm:$0xff]  ;;  %v7558_v13 = vrot.slane %v7556_v28, 4 }
 0x564   : > { %v7742_v50 = vpop.f32.mrf.mxu2  ;;  %v7554_v25 = vsel %vm12287_vm6, %v7549_v41, %v7553_v3  ;;  %v7995_v41 = vrot.slane %v7993_v33, 4 }
 0x565   : > { %v7057_v54 = vpop.f32.mrf.mxu1 }
 0x566   : > { %v7124_v61 = vadd.f32 %v7057_v54, %v14665_v57  ;;  %v8165_v8 = vpop.f32.mrf.mxu3  ;;  %v7544_v57 = vsel %vm12287_vm6, %v7539_v21, %v7543_v53 }
 0x567   : > { %v7624_v20 = vunpack.c.l.b16 %v7544_v57 }
 0x568   : > { %v7806_v16 = vadd.f32 %v7739_v45, %v7124_v61  ;;  %v7625_v45 = vunpack.c.l.b16 %v7554_v25  ;;  %v7843_v61 = vld [vmem:[#allocation2 + $0xb4] sm:$0xe]  ;;  %v7573_v25 = vrot.slane %v7572_v7, 4 }
 0x569   : > { %v11577_v46 = vrot.slane %v7843_v61, 9 }
 0x56a   : > { %v15050_v35 = vadd.f32 %v8165_v8, %v7806_v16  ;;  %8207 = vmatmul.bf16.gmra.mxu3 %v8067_v58  ;;  %v7996_v8 = vrot.slane %v7191_v12, 5  ;;  %v7642_v53 = vpack.c.b16 %v7625_v45, %v7624_v20  ;;  %v7561_v16 = vrot.slane %v7559_v39, 5 }
 0x56b   : > { %v7575_v58 = vshll.u32 %v15056_v36, 16  ;;  %v7994_v12 = vsel %vm12281_vm5, %v11577_v46, %v7993_v33 }
 0x56c   : > { %v7744_v38 = vpop.f32.mrf.mxu2  ;;  %v7562_v21 = vor.u32 %v7561_v16, %v7558_v13  ;;  %v8571_v16 = vld [vmem:[#allocation2 + $0x1c] sm:$0xf] }
 0x56d   : > { %v7060_v49 = vpop.f32.mrf.mxu1  ;;  %v7577_v27 = vrot.slane %v7575_v58, 5 }
 0x56e   : > { %v7125_v56 = vadd.f32 %v7060_v49, %v14675_v14  ;;  %v8168_v54 = vpop.f32.mrf.mxu3  ;;  %v7997_v14 = vsel %vm12281_vm5, %v7995_v41, %v7996_v8  ;;  %v5516_v49 = vld [vmem:[#allocation2 + $0xcc] sm:$0xf]  ;;  %v7563_v41 = vrot.slane %v7562_v21, 4  ;;  %v12026_v21 = vld [vmem:[#allocation2 + $0xb4] sm:$0xff] }
 0x56f   : > { %7786 = vmatmul.bf16.gmra.mxu2 %v7642_v53  ;;  %v8051_v28 = vunpack.c.l.b16 %v7997_v14  ;;  %v7578_v61 = vsel %vm12287_vm6, %v7573_v25, %v7577_v27  ;;  %v11852_v14 = vld [vmem:[%s12265_s12 + $0x1c] sm:$0xf]  ;;  %v7844_v25 = vld [vmem:[#allocation2 + $0xc0] sm:$0xe] }
 0x570   : > { %v7807_v3 = vadd.f32 %v7742_v50, %v7125_v56  ;;  %7099 = vmatmul.bf16.gmra.mxu1 %v12025_v6  ;;  %v15066_v56 = vpop.f32.mrf.mxu0  ;;  %v16028_v6 = vld [vmem:[#allocation35_spill] sm:$0xff]  ;;  %v7568_v13 = vsel %vm12287_vm6, %v7563_v41, %v7567_v32  ;;  %v7627_v53 = vunpack.c.l.b16 %v7578_v61  ;;  %v9318_v32 = vrot.slane %v8571_v16, 5 }
 0x571   : > { %v5517_v20 = vsel %vm14109_vm12, %v16028_v6, %v5516_v49  ;;  %v9766_v49 = vshll.u32 %v11851_v31, 16  ;;  %v9776_v6 = vshrl.u32 %v11852_v14, 16  ;;  %v9252_v61 = vld [vmem:[#allocation2 + $0x18] sm:$0xe] }
 0x572   : > { %v15058_v55 = vadd.f32 %v8168_v54, %v7807_v3  ;;  %v8050_v54 = vunpack.c.l.b16 %v7994_v12  ;;  %5518 = vst [vmem:[#allocation2 + $0xcc] sm:$0xf] %v5517_v20  ;;  %v8000_v3 = vrot.slane %v15043_v15, 5  ;;  %v9763_v15 = vshrl.u32 %v11851_v31, 16 }
 0x574   : > { %16027 = vst [vmem:[#allocation47_spill] sm:$0xff] %v15058_v55  ;;  %v7747_v50 = vpop.f32.mrf.mxu2  ;;  %v8068_v8 = vpack.c.b16 %v8051_v28, %v8050_v54  ;;  %v9772_v54 = vshll.u32 %v11852_v14, 16 }
 0x575   : > { %v7062_v57 = vpop.f32.mrf.mxu1 }
 0x576   : > { %v7126_v45 = vadd.f32 %v7062_v57, %v14696_v63  ;;  %v8170_v39 = vpop.f32.mrf.mxu3  ;;  %v8002_v57 = vrot.slane %v8000_v3, 4  ;;  %v15092_v31 = vrot.slane %v9772_v54, 5 }
 0x578   : > { %v7808_v33 = vadd.f32 %v7744_v38, %v7126_v45  ;;  %v7626_v38 = vunpack.c.l.b16 %v7568_v13  ;;  %v8003_v45 = vrot.slane %v15056_v36, 5  ;;  %v15082_v20 = vpop.f32.mrf.mxu0  ;;  %v15088_v36 = vld [vmem:[#allocation2 + $0x20] sm:$0x1]  ;;  %v9765_v13 = vrot.slane %v9763_v15, 4 }
 0x57a   : > { %v15073_v63 = vadd.f32 %v8170_v39, %v7808_v33  ;;  %8212 = vmatmul.bf16.gmra.mxu3 %v8068_v8  ;;  %v7643_v28 = vpack.c.b16 %v7627_v53, %v7626_v38  ;;  %v12067_v39 = vld [vmem:[#allocation2 + $0xcc] sm:$0xff]  ;;  %v11578_v33 = vrot.slane %v7844_v25, 9  ;;  %v8004_v41 = vsel %vm12281_vm5, %v8002_v57, %v8003_v45  ;;  %v8570_v38 = vld [vmem:[#allocation2 + $0x18] sm:$0xf]  ;;  %v11853_v25 = vld [vmem:[%s12265_s12 + $0x20] sm:$0x1] }
 0x57b   : > { %8532 = vmatmul.bf16.gmra.mxu0 %v12067_v39  ;;  %v9320_v8 = vrot.slane %v9318_v32, 4  ;;  %v9768_v53 = vrot.slane %v9766_v49, 5  ;;  %v8628_v57 = vshll.u32 %v8571_v16, 16  ;;  %v11787_v39 = vrot.slane %v9252_v61, 9  ;;  %v11854_v61 = vld [vmem:[%s12265_s12 + $0x24] sm:$0xf] }
 0x57c   : > { %16029 = vst [vmem:[#allocation48_spill] sm:$0xff] %v15073_v63  ;;  %v7749_v46 = vpop.f32.mrf.mxu2  ;;  %v8619_v49 = vshrl.u32 %v8570_v38, 16  ;;  %v8622_v54 = vshll.u32 %v8570_v38, 16 }
 0x57d   : > { %v7065_v7 = vpop.f32.mrf.mxu1  ;;  %v15100_v55 = vrot.slane %v8628_v57, 5 }
 0x57e   : > { %v7127_v58 = vadd.f32 %v7065_v7, %v14716_v22  ;;  %v8173_v12 = vpop.f32.mrf.mxu3  ;;  %v9778_v7 = vrot.slane %v9776_v6, 4 }
 0x57f   : > { %7791 = vmatmul.bf16.gmra.mxu2 %v7643_v28  ;;  %v8632_v28 = vshrl.u32 %v8571_v16, 16 }
 0x580   : > { %v7809_v27 = vadd.f32 %v7747_v50, %v7127_v58  ;;  %7104 = vmatmul.bf16.gmra.mxu1 %v12026_v21  ;;  %v8001_v50 = vsel %vm12281_vm5, %v11578_v33, %v8000_v3  ;;  %v9321_v21 = vrot.slane %v15088_v36, 5  ;;  %v9769_v33 = vor.u32 %v9768_v53, %v9765_v13 }
 0x581   : > { %v8634_v16 = vrot.slane %v8632_v28, 4  ;;  %v8624_v53 = vrot.slane %v8622_v54, 5  ;;  %v9787_v28 = vshrl.u32 %v11854_v61, 16 }
 0x582   : > { %v15084_v22 = vadd.f32 %v8173_v12, %v7809_v27  ;;  %v8053_v12 = vunpack.c.l.b16 %v8004_v41  ;;  %v8052_v27 = vunpack.c.l.b16 %v8001_v50  ;;  %v9322_v15 = vsel %vm12281_vm5, %v9320_v8, %v9321_v21  ;;  %v11855_v21 = vld [vmem:[%s12265_s12 + $0x28] sm:$0xf] }
 0x583   : > { %v9779_v41 = vor.u32 %v9778_v7, %v15092_v31  ;;  %v9319_v50 = vsel %vm12281_vm5, %v11787_v39, %v9318_v32  ;;  %v9446_v8 = vunpack.c.l.b16 %v9322_v15  ;;  %v9770_v38 = vrot.slane %v9769_v33, 4  ;;  %v8574_v32 = vld [vmem:[#allocation2 + $0x28] sm:$0xf] }
 0x584   : > { %16030 = vst [vmem:[#allocation5_spill] sm:$0xff] %v15084_v22  ;;  %v7752_v58 = vpop.f32.mrf.mxu2  ;;  %v9782_v22 = vshll.u32 %v11853_v25, 16  ;;  %v8069_v63 = vpack.c.b16 %v8053_v12, %v8052_v27  ;;  %v9445_v12 = vunpack.c.l.b16 %v9319_v50  ;;  %v8635_v57 = vor.u32 %v8634_v16, %v15100_v55  ;;  %v12027_v27 = vld [vmem:[#allocation2 + $0xc0] sm:$0xff] }
 0x585   : > { %v7067_v14 = vpop.f32.mrf.mxu1  ;;  %v9790_v39 = vshll.u32 %v11854_v61, 16  ;;  %v9800_v15 = vshrl.u32 %v11855_v21, 16  ;;  %v9253_v16 = vld [vmem:[#allocation2 + $0x24] sm:$0xe]  ;;  %v9325_v50 = vrot.slane %v8574_v32, 5  ;;  %v9789_v61 = vrot.slane %v9787_v28, 4 }
 0x586   : > { %v7128_v45 = vadd.f32 %v7067_v14, %v14742_v1  ;;  %v8175_v3 = vpop.f32.mrf.mxu3  ;;  %v8621_v14 = vrot.slane %v8619_v49, 4  ;;  %v9784_v13 = vrot.slane %v9782_v22, 5  ;;  %v9477_v49 = vpack.c.b16 %v9446_v8, %v9445_v12  ;;  %v8573_v28 = vld [vmem:[#allocation2 + $0x24] sm:$0xf] }
 0x587   : > { %v9775_v22 = vsel %vm12287_vm6, %v9770_v38, %v15092_v31  ;;  %v9792_v8 = vrot.slane %v9790_v39, 5  ;;  %v15121_v38 = vld [vmem:[#allocation2 + $0x2c] sm:$0x1]  ;;  %v8656_v39 = vshrl.u32 %v8574_v32, 16 }
 0x588   : > { %v7810_v6 = vadd.f32 %v7749_v46, %v7128_v45  ;;  %v9780_v46 = vrot.slane %v9779_v41, 4  ;;  %v8636_v41 = vrot.slane %v8635_v57, 4  ;;  %v9327_v57 = vrot.slane %v9325_v50, 4 }
 0x58a   : > { %v15102_v1 = vadd.f32 %v8175_v3, %v7810_v6  ;;  %8217 = vmatmul.bf16.gmra.mxu3 %v8069_v63  ;;  %v9796_v63 = vshll.u32 %v11855_v21, 16  ;;  %v8638_v6 = vshll.u32 %v15088_v36, 16  ;;  %v9785_v54 = vsel %vm12287_vm6, %v9780_v46, %v9784_v13 }
 0x58b   : > { %v10151_v21 = vunpack.c.l.b16 %v9775_v22  ;;  %v10152_v12 = vunpack.c.l.b16 %v9785_v54  ;;  %v11788_v46 = vrot.slane %v9253_v16, 9 }
 0x58c   : > { %v7754_v25 = vpop.f32.mrf.mxu2  ;;  %v15118_v36 = vrot.slane %v9796_v63, 5 }
 0x58d   : > { %v7070_v7 = vpop.f32.mrf.mxu1  ;;  %v10183_v22 = vpack.c.b16 %v10152_v12, %v10151_v21 }
 0x58e   : > { %v7129_v45 = vadd.f32 %v7070_v7, %v14753_v24  ;;  %v8178_v3 = vpop.f32.mrf.mxu3  ;;  %v8625_v24 = vor.u32 %v8624_v53, %v8621_v14 }
 0x58f   : > { %9565 = vmatmul.bf16.vlgmr.msra.gmra.mxu2 %v9477_v49  ;;  %v9793_v49 = vor.u32 %v9792_v8, %v9789_v61 }
 0x590   : > { %v7811_v33 = vadd.f32 %v7752_v58, %v7129_v45  ;;  %7109 = vmatmul.bf16.gmra.mxu1 %v12027_v27  ;;  %v9802_v58 = vrot.slane %v9800_v15, 4  ;;  %v8640_v45 = vrot.slane %v8638_v6, 5  ;;  %v11856_v27 = vld [vmem:[%s12265_s12 + $0x2c] sm:$0x1]  ;;  %v8626_v31 = vrot.slane %v8625_v24, 4 }
 0x591   : > { %v9328_v24 = vrot.slane %v15121_v38, 5 }
 0x592   : > { %v15116_v7 = vadd.f32 %v8178_v3, %v7811_v33  ;;  %v8641_v53 = vsel %vm12287_vm6, %v8636_v41, %v8640_v45  ;;  %v8652_v3 = vshll.u32 %v8574_v32, 16  ;;  %v9803_v6 = vor.u32 %v9802_v58, %v15118_v36 }
 0x593   : > { %v9806_v33 = vshll.u32 %v11856_v27, 16  ;;  %v8631_v54 = vsel %vm12287_vm6, %v8626_v31, %v15100_v55  ;;  %v9326_v41 = vsel %vm12281_vm5, %v11788_v46, %v9325_v50  ;;  %v8643_v32 = vshrl.u32 %v8573_v28, 16  ;;  %v15140_v50 = vld [vmem:[#allocation2 + $0x34] sm:$0xf] }
 0x594   : > { %v7757_v13 = vpop.f32.mrf.mxu2  ;;  %v9020_v45 = vunpack.c.l.b16 %v8641_v53  ;;  %v9329_v61 = vsel %vm12281_vm5, %v9327_v57, %v9328_v24  ;;  %v15135_v8 = vrot.slane %v8652_v3, 5  ;;  %v8658_v58 = vrot.slane %v8656_v39, 4  ;;  %v11858_v53 = vld [vmem:[%s12265_s12 + $0x34] sm:$0xf] }
 0x595   : > { %v7072_v14 = vpop.f32.mrf.mxu1  ;;  %v9794_v55 = vrot.slane %v9793_v49, 4  ;;  %v9804_v12 = vrot.slane %v9803_v6, 4  ;;  %v9808_v27 = vrot.slane %v9806_v33, 5  ;;  %v9447_v31 = vunpack.c.l.b16 %v9326_v41 }
 0x596   : > { %v7130_v63 = vadd.f32 %v7072_v14, %v14761_v34  ;;  %v8180_v15 = vpop.f32.mrf.mxu3  ;;  %v8646_v34 = vshll.u32 %v8573_v28, 16  ;;  %v9448_v46 = vunpack.c.l.b16 %v9329_v61  ;;  %v11857_v14 = vld [vmem:[%s12265_s12 + $0x30] sm:$0xf]  ;;  %v8645_v3 = vrot.slane %v8643_v32, 4 }
 0x597   : > { %v8659_v39 = vor.u32 %v8658_v58, %v15135_v8  ;;  %v9799_v6 = vsel %vm12287_vm6, %v9794_v55, %v15118_v36  ;;  %v9809_v33 = vsel %vm12287_vm6, %v9804_v12, %v9808_v27  ;;  %v9820_v41 = vshll.u32 %v11858_v53, 16  ;;  %v9254_v27 = vld [vmem:[#allocation2 + $0x30] sm:$0xe] }
 0x598   : > { %v7812_v16 = vadd.f32 %v7754_v25, %v7130_v63  ;;  %v9019_v25 = vunpack.c.l.b16 %v8631_v54  ;;  %v8648_v24 = vrot.slane %v8646_v34, 5  ;;  %v9811_v54 = vshrl.u32 %v11857_v14, 16 }
 0x599   : > { %v9478_v34 = vpack.c.b16 %v9448_v46, %v9447_v31  ;;  %v8662_v61 = vshll.u32 %v15121_v38, 16  ;;  %v8660_v58 = vrot.slane %v8659_v39, 4  ;;  %v10153_v55 = vunpack.c.l.b16 %v9799_v6  ;;  %v11859_v46 = vld [vmem:[%s12265_s12 + $0x38] sm:$0x1] }
 0x59a   : > { %v15137_v21 = vadd.f32 %v8180_v15, %v7812_v16  ;;  %11899 = vmatmul.msk.bf16.vlgmr.msra.gmra.mxu3 %vm865_vm7, %v10183_v22  ;;  %v9051_v57 = vpack.c.b16 %v9020_v45, %v9019_v25  ;;  %v9332_v22 = vrot.slane %v15140_v50, 5  ;;  %v9814_v16 = vshll.u32 %v11857_v14, 16  ;;  %v15153_v25 = vld [vmem:[#allocation2 + $0x38] sm:$0x1] }
 0x59b   : > { %v9824_v45 = vshrl.u32 %v11858_v53, 16  ;;  %v10154_v12 = vunpack.c.l.b16 %v9809_v33  ;;  %v9813_v14 = vrot.slane %v9811_v54, 4  ;;  %v15157_v53 = vrot.slane %v9820_v41, 5 }
 0x59c   : > { %16031 = vst [vmem:[#allocation3_spill] sm:$0xff] %v15137_v21  ;;  %v7759_v63 = vpop.f32.mrf.mxu2  ;;  %v9816_v21 = vrot.slane %v9814_v16, 5  ;;  %v8664_v31 = vrot.slane %v8662_v61, 5  ;;  %v9335_v38 = vrot.slane %v15153_v25, 5  ;;  %v11789_v39 = vrot.slane %v9254_v27, 9 }
 0x59d   : > { %v7075_v28 = vpop.f32.mrf.mxu1  ;;  %v8576_v16 = vld [vmem:[#allocation2 + $0x30] sm:$0xf]  ;;  %v8680_v41 = vshrl.u32 %v15140_v50, 16  ;;  %v9830_v61 = vshll.u32 %v11859_v46, 16  ;;  %v15179_v46 = vld [vmem:[#allocation2 + $0x40] sm:$0xf] }
 0x59e   : > { %v7131_v15 = vadd.f32 %v7075_v28, %v14773_v48  ;;  %v8183_v49 = vpop.f32.mrf.mxu3  ;;  %v8649_v48 = vor.u32 %v8648_v24, %v8645_v3  ;;  %v9334_v28 = vrot.slane %v9332_v22, 4  ;;  %v8665_v33 = vsel %vm12287_vm6, %v8660_v58, %v8664_v31 }
 0x59f   : > { %9570 = vmatmul.bf16.gmra.mxu2 %v9478_v34  ;;  %v9022_v27 = vunpack.c.l.b16 %v8665_v33  ;;  %v9333_v58 = vsel %vm12281_vm5, %v11789_v39, %v9332_v22  ;;  %v8667_v31 = vshrl.u32 %v8576_v16, 16  ;;  %v11861_v33 = vld [vmem:[%s12265_s12 + $0x40] sm:$0xf] }
 0x5a0   : > { %v7813_v32 = vadd.f32 %v7757_v13, %v7131_v15  ;;  %9139 = vmatmul.bf16.vlgmr.msra.gmra.mxu1 %v9051_v57  ;;  %v9826_v13 = vrot.slane %v9824_v45, 4  ;;  %v8650_v24 = vrot.slane %v8649_v48, 4  ;;  %v8676_v15 = vshll.u32 %v15140_v50, 16 }
 0x5a1   : > { %v9336_v54 = vsel %vm12281_vm5, %v9334_v28, %v9335_v38  ;;  %v10184_v45 = vpack.c.b16 %v10154_v12, %v10153_v55  ;;  %v8670_v28 = vshll.u32 %v8576_v16, 16  ;;  %v8682_v55 = vrot.slane %v8680_v41, 4 }
 0x5a2   : > { %v15155_v36 = vadd.f32 %v8183_v49, %v7813_v32  ;;  %v9817_v32 = vor.u32 %v9816_v21, %v9813_v14  ;;  %v9827_v34 = vor.u32 %v9826_v13, %v15157_v53  ;;  %v9450_v50 = vunpack.c.l.b16 %v9336_v54 }
 0x5a3   : > { %v15176_v21 = vrot.slane %v8676_v15, 5  ;;  %v9449_v13 = vunpack.c.l.b16 %v9333_v58  ;;  %v9848_v58 = vshrl.u32 %v11861_v33, 16 }
 0x5a4   : > { %v7762_v3 = vpop.f32.mrf.mxu2  ;;  %v9818_v12 = vrot.slane %v9817_v32, 4  ;;  %v9828_v14 = vrot.slane %v9827_v34, 4 }
 0x5a5   : > { %v7077_v57 = vpop.f32.mrf.mxu1  ;;  %v9479_v16 = vpack.c.b16 %v9450_v50, %v9449_v13  ;;  %v8683_v41 = vor.u32 %v8682_v55, %v15176_v21  ;;  %v15194_v50 = vld [vmem:[#allocation2 + $0x44] sm:$0x1] }
 0x5a6   : > { %v7132_v49 = vadd.f32 %v7077_v57, %v14784_v43  ;;  %v8185_v6 = vpop.f32.mrf.mxu3  ;;  %v8655_v43 = vsel %vm12287_vm6, %v8650_v24, %v15135_v8  ;;  %v9832_v8 = vrot.slane %v9830_v61, 5  ;;  %v11860_v57 = vld [vmem:[%s12265_s12 + $0x3c] sm:$0xf]  ;;  %v9823_v32 = vsel %vm12287_vm6, %v9818_v12, %v15157_v53 }
 0x5a7   : > { %v9339_v61 = vrot.slane %v15179_v46, 5  ;;  %v10155_v53 = vunpack.c.l.b16 %v9823_v32  ;;  %v9255_v12 = vld [vmem:[#allocation2 + $0x3c] sm:$0xe] }
 0x5a8   : > { %v7814_v48 = vadd.f32 %v7759_v63, %v7132_v49  ;;  %v9021_v63 = vunpack.c.l.b16 %v8655_v43  ;;  %v8669_v49 = vrot.slane %v8667_v31, 4  ;;  %v9833_v34 = vsel %vm12287_vm6, %v9828_v14, %v9832_v8  ;;  %v8579_v8 = vld [vmem:[#allocation2 + $0x3c] sm:$0xf] }
 0x5a9   : > { %v10156_v55 = vunpack.c.l.b16 %v9833_v34  ;;  %v9341_v14 = vrot.slane %v9339_v61, 4  ;;  %v11790_v34 = vrot.slane %v9255_v12, 9 }
 0x5aa   : > { %v15174_v38 = vadd.f32 %v8185_v6, %v7814_v48  ;;  %11900 = vmatmul.msk.bf16.gmra.mxu3 %vm865_vm7, %v10184_v45  ;;  %v9052_v39 = vpack.c.b16 %v9022_v27, %v9021_v63  ;;  %v8672_v6 = vrot.slane %v8670_v28, 5  ;;  %v8686_v45 = vshll.u32 %v15153_v25, 16 }
 0x5ab   : > { %v9835_v48 = vshrl.u32 %v11860_v57, 16  ;;  %v9838_v27 = vshll.u32 %v11860_v57, 16  ;;  %v8684_v25 = vrot.slane %v8683_v41, 4  ;;  %v9850_v57 = vrot.slane %v9848_v58, 4 }
 0x5ac   : > { %v7764_v24 = vpop.f32.mrf.mxu2  ;;  %v8673_v31 = vor.u32 %v8672_v6, %v8669_v49  ;;  %v8688_v63 = vrot.slane %v8686_v45, 5  ;;  %v8694_v58 = vshll.u32 %v8579_v8, 16 }
 0x5ad   : > { %v7080_v22 = vpop.f32.mrf.mxu1  ;;  %v9837_v13 = vrot.slane %v9835_v48, 4  ;;  %v8691_v48 = vshrl.u32 %v8579_v8, 16 }
 0x5ae   : > { %v7133_v15 = vadd.f32 %v7080_v22, %v14793_v10  ;;  %v8188_v54 = vpop.f32.mrf.mxu3  ;;  %v9844_v10 = vshll.u32 %v11861_v33, 16  ;;  %v8674_v6 = vrot.slane %v8673_v31, 4  ;;  %v9342_v33 = vrot.slane %v15194_v50, 5 }
 0x5af   : > { %9575 = vmatmul.bf16.gmra.mxu2 %v9479_v16  ;;  %v8704_v16 = vshrl.u32 %v15179_v46, 16  ;;  %v8689_v32 = vsel %vm12287_vm6, %v8684_v25, %v8688_v63  ;;  %v8693_v8 = vrot.slane %v8691_v48, 4 }
 0x5b0   : > { %v7815_v43 = vadd.f32 %v7762_v3, %v7133_v15  ;;  %9144 = vmatmul.bf16.gmra.mxu1 %v9052_v39  ;;  %v9840_v3 = vrot.slane %v9838_v27, 5  ;;  %v15196_v22 = vrot.slane %v9844_v10, 5  ;;  %v11862_v15 = vld [vmem:[%s12265_s12 + $0x44] sm:$0x1]  ;;  %v8679_v27 = vsel %vm12287_vm6, %v8674_v6, %v15176_v21  ;;  %v11863_v21 = vld [vmem:[%s12265_s12 + $0x48] sm:$0xf] }
 0x5b1   : > { %v9343_v10 = vsel %vm12281_vm5, %v9341_v14, %v9342_v33  ;;  %v8706_v63 = vrot.slane %v8704_v16, 4  ;;  %v8696_v6 = vrot.slane %v8694_v58, 5 }
 0x5b2   : > { %v15192_v28 = vadd.f32 %v8188_v54, %v7815_v43  ;;  %v8700_v54 = vshll.u32 %v15179_v46, 16  ;;  %v10185_v43 = vpack.c.b16 %v10156_v55, %v10155_v53  ;;  %v9841_v31 = vor.u32 %v9840_v3, %v9837_v13 }
 0x5b3   : > { %v9340_v53 = vsel %vm12281_vm5, %v11790_v34, %v9339_v61  ;;  %v9023_v55 = vunpack.c.l.b16 %v8679_v27  ;;  %v9452_v14 = vunpack.c.l.b16 %v9343_v10  ;;  %v8583_v34 = vld [vmem:[#allocation2 + $0x4c] sm:$0xf] }
 0x5b4   : > { %16032 = vst [vmem:[#allocation15_spill] sm:$0xff] %v15192_v28  ;;  %v7767_v49 = vpop.f32.mrf.mxu2  ;;  %v9024_v28 = vunpack.c.l.b16 %v8689_v32  ;;  %v15211_v25 = vrot.slane %v8700_v54, 5  ;;  %v9842_v13 = vrot.slane %v9841_v31, 4  ;;  %v9451_v16 = vunpack.c.l.b16 %v9340_v53 }
 0x5b5   : > { %v7082_v39 = vpop.f32.mrf.mxu1 }
 0x5b6   : > { %v7134_v41 = vadd.f32 %v7082_v39, %v14801_v2  ;;  %v8190_v45 = vpop.f32.mrf.mxu3  ;;  %v9851_v2 = vor.u32 %v9850_v57, %v15196_v22  ;;  %v9854_v39 = vshll.u32 %v11862_v15, 16  ;;  %v9053_v54 = vpack.c.b16 %v9024_v28, %v9023_v55 }
 0x5b7   : > { %v9480_v48 = vpack.c.b16 %v9452_v14, %v9451_v16  ;;  %v9847_v28 = vsel %vm12287_vm6, %v9842_v13, %v15196_v22  ;;  %v15233_v13 = vld [vmem:[#allocation2 + $0x50] sm:$0x1] }
 0x5b8   : > { %v7816_v46 = vadd.f32 %v7764_v24, %v7134_v41  ;;  %v11864_v24 = vld [vmem:[%s12265_s12 + $0x4c] sm:$0xf]  ;;  %v9852_v3 = vrot.slane %v9851_v2, 4  ;;  %v9856_v57 = vrot.slane %v9854_v39, 5  ;;  %v8707_v41 = vor.u32 %v8706_v63, %v15211_v25  ;;  %v9256_v39 = vld [vmem:[#allocation2 + $0x48] sm:$0xe] }
 0x5b9   : > { %v9868_v27 = vshll.u32 %v11864_v24, 16  ;;  %v9872_v10 = vshrl.u32 %v11864_v24, 16  ;;  %v8697_v2 = vor.u32 %v8696_v6, %v8693_v8  ;;  %v9346_v63 = vrot.slane %v8583_v34, 5  ;;  %v8582_v8 = vld [vmem:[#allocation2 + $0x48] sm:$0xf] }
 0x5ba   : > { %v15213_v12 = vadd.f32 %v8190_v45, %v7816_v46  ;;  %11901 = vmatmul.msk.bf16.gmra.mxu3 %vm865_vm7, %v10185_v43  ;;  %v9859_v45 = vshrl.u32 %v11863_v21, 16  ;;  %v9862_v43 = vshll.u32 %v11863_v21, 16  ;;  %v8710_v46 = vshll.u32 %v15194_v50, 16 }
 0x5bb   : > { %v9857_v58 = vsel %vm12287_vm6, %v9852_v3, %v9856_v57  ;;  %v15230_v50 = vrot.slane %v9868_v27, 5  ;;  %v10157_v14 = vunpack.c.l.b16 %v9847_v28  ;;  %v8698_v22 = vrot.slane %v8697_v2, 4 }
 0x5bc   : > { %v7769_v15 = vpop.f32.mrf.mxu2  ;;  %v9861_v53 = vrot.slane %v9859_v45, 4  ;;  %v9864_v55 = vrot.slane %v9862_v43, 5  ;;  %v10158_v24 = vunpack.c.l.b16 %v9857_v58  ;;  %v11791_v3 = vrot.slane %v9256_v39, 9 }
 0x5bd   : > { %v7085_v33 = vpop.f32.mrf.mxu1  ;;  %v8724_v45 = vshll.u32 %v8583_v34, 16  ;;  %v8715_v28 = vshrl.u32 %v8582_v8, 16  ;;  %v8703_v2 = vsel %vm12287_vm6, %v8698_v22, %v15211_v25  ;;  %v11866_v22 = vld [vmem:[%s12265_s12 + $0x54] sm:$0xf] }
 0x5be   : > { %v7135_v61 = vadd.f32 %v7085_v33, %v14815_v47  ;;  %v8193_v32 = vpop.f32.mrf.mxu3  ;;  %v8708_v47 = vrot.slane %v8707_v41, 4  ;;  %v8712_v33 = vrot.slane %v8710_v46, 5  ;;  %v9348_v41 = vrot.slane %v9346_v63, 4 }
 0x5bf   : > { %9580 = vmatmul.bf16.gmra.mxu2 %v9480_v48  ;;  %v9865_v27 = vor.u32 %v9864_v55, %v9861_v53  ;;  %v10186_v46 = vpack.c.b16 %v10158_v24, %v10157_v14  ;;  %v15247_v53 = vrot.slane %v8724_v45, 5  ;;  %v9025_v25 = vunpack.c.l.b16 %v8703_v2 }
 0x5c0   : > { %v7817_v31 = vadd.f32 %v7767_v49, %v7135_v61  ;;  %9149 = vmatmul.bf16.gmra.mxu1 %v9053_v54  ;;  %v9874_v49 = vrot.slane %v9872_v10, 4  ;;  %v11865_v54 = vld [vmem:[%s12265_s12 + $0x50] sm:$0x1]  ;;  %v8713_v16 = vsel %vm12287_vm6, %v8708_v47, %v8712_v33  ;;  %v8728_v61 = vshrl.u32 %v8583_v34, 16  ;;  %v15252_v33 = vld [vmem:[#allocation2 + $0x58] sm:$0xf] }
 0x5c1   : > { %v9878_v48 = vshll.u32 %v11865_v54, 16  ;;  %v9347_v34 = vsel %vm12281_vm5, %v11791_v3, %v9346_v63  ;;  %v9026_v47 = vunpack.c.l.b16 %v8713_v16  ;;  %v11867_v3 = vld [vmem:[%s12265_s12 + $0x58] sm:$0xf] }
 0x5c2   : > { %v15228_v21 = vadd.f32 %v8193_v32, %v7817_v31  ;;  %v9875_v10 = vor.u32 %v9874_v49, %v15230_v50  ;;  %v9349_v31 = vrot.slane %v15233_v13, 5  ;;  %v8730_v55 = vrot.slane %v8728_v61, 4 }
 0x5c3   : > { %v9880_v24 = vrot.slane %v9878_v48, 5  ;;  %v9453_v63 = vunpack.c.l.b16 %v9347_v34  ;;  %v9054_v16 = vpack.c.b16 %v9026_v47, %v9025_v25  ;;  %v9353_v48 = vrot.slane %v15252_v33, 5 }
 0x5c4   : > { %v7772_v6 = vpop.f32.mrf.mxu2  ;;  %v9350_v39 = vsel %vm12281_vm5, %v9348_v41, %v9349_v31  ;;  %v9876_v14 = vrot.slane %v9875_v10, 4  ;;  %v8717_v41 = vrot.slane %v8715_v28, 4  ;;  %v8731_v61 = vor.u32 %v8730_v55, %v15247_v53 }
 0x5c5   : > { %v7087_v57 = vpop.f32.mrf.mxu1  ;;  %v9454_v54 = vunpack.c.l.b16 %v9350_v39  ;;  %v9886_v31 = vshll.u32 %v11866_v22, 16  ;;  %v9896_v2 = vshrl.u32 %v11867_v3, 16  ;;  %v15265_v39 = vld [vmem:[#allocation2 + $0x5c] sm:$0x1] }
 0x5c6   : > { %v7136_v32 = vadd.f32 %v7087_v57, %v14828_v19  ;;  %v8195_v43 = vpop.f32.mrf.mxu3  ;;  %v8718_v19 = vshll.u32 %v8582_v8, 16  ;;  %v9881_v10 = vsel %vm12287_vm6, %v9876_v14, %v9880_v24  ;;  %v8732_v47 = vrot.slane %v8731_v61, 4  ;;  %v9257_v14 = vld [vmem:[#allocation2 + $0x54] sm:$0xe] }
 0x5c7   : > { %v9481_v34 = vpack.c.b16 %v9454_v54, %v9453_v63  ;;  %v9355_v24 = vrot.slane %v9353_v48, 4  ;;  %v11868_v54 = vld [vmem:[%s12265_s12 + $0x5c] sm:$0x1]  ;;  %v8748_v61 = vshll.u32 %v15252_v33, 16 }
 0x5c8   : > { %v7818_v58 = vadd.f32 %v7769_v15, %v7136_v32  ;;  %v9866_v15 = vrot.slane %v9865_v27, 4  ;;  %v8720_v45 = vrot.slane %v8718_v19, 5  ;;  %v8734_v19 = vshll.u32 %v15233_v13, 16 }
 0x5c9   : > { %v9356_v13 = vrot.slane %v15265_v39, 5 }
 0x5ca   : > { %v15249_v49 = vadd.f32 %v8195_v43, %v7818_v58  ;;  %11902 = vmatmul.msk.bf16.gmra.mxu3 %vm865_vm7, %v10186_v46  ;;  %v9871_v27 = vsel %vm12287_vm6, %v9866_v15, %v15230_v50  ;;  %v9883_v46 = vshrl.u32 %v11866_v22, 16  ;;  %v9892_v58 = vshll.u32 %v11867_v3, 16 }
 0x5cb   : > { %v10159_v55 = vunpack.c.l.b16 %v9871_v27  ;;  %v10160_v15 = vunpack.c.l.b16 %v9881_v10  ;;  %v9888_v22 = vrot.slane %v9886_v31, 5  ;;  %v8736_v63 = vrot.slane %v8734_v19, 5 }
 0x5cc   : > { %v7774_v57 = vpop.f32.mrf.mxu2  ;;  %v9885_v25 = vrot.slane %v9883_v46, 4  ;;  %v15269_v3 = vrot.slane %v9892_v58, 5  ;;  %v9357_v10 = vsel %vm12281_vm5, %v9355_v24, %v9356_v13  ;;  %v8585_v46 = vld [vmem:[#allocation2 + $0x54] sm:$0xf]  ;;  %v8752_v31 = vshrl.u32 %v15252_v33, 16 }
 0x5cd   : > { %v7090_v8 = vpop.f32.mrf.mxu1  ;;  %v8737_v27 = vsel %vm12287_vm6, %v8732_v47, %v8736_v63  ;;  %v10187_v58 = vpack.c.b16 %v10160_v15, %v10159_v55  ;;  %v8742_v24 = vshll.u32 %v8585_v46, 16  ;;  %v9456_v33 = vunpack.c.l.b16 %v9357_v10  ;;  %v15291_v13 = vld [vmem:[#allocation2 + $0x64] sm:$0xf] }
 0x5ce   : > { %v7137_v32 = vadd.f32 %v7090_v8, %v14839_v11  ;;  %v8198_v43 = vpop.f32.mrf.mxu3  ;;  %v8721_v11 = vor.u32 %v8720_v45, %v8717_v41  ;;  %v11792_v45 = vrot.slane %v9257_v14, 9  ;;  %v8739_v14 = vshrl.u32 %v8585_v46, 16 }
 0x5cf   : > { %9585 = vmatmul.bf16.gmra.mxu2 %v9481_v34  ;;  %v9902_v34 = vshll.u32 %v11868_v54, 16  ;;  %v15288_v55 = vrot.slane %v8748_v61, 5  ;;  %v8754_v15 = vrot.slane %v8752_v31, 4  ;;  %v11869_v54 = vld [vmem:[%s12265_s12 + $0x60] sm:$0xf]  ;;  %v8758_v31 = vshll.u32 %v15265_v39, 16 }
 0x5d0   : > { %v7819_v28 = vadd.f32 %v7772_v6, %v7137_v32  ;;  %9154 = vmatmul.bf16.gmra.mxu1 %v9054_v16  ;;  %v9898_v6 = vrot.slane %v9896_v2, 4  ;;  %v8722_v41 = vrot.slane %v8721_v11, 4  ;;  %v9889_v2 = vor.u32 %v9888_v22, %v9885_v25 }
 0x5d1   : > { %v9028_v11 = vunpack.c.l.b16 %v8737_v27  ;;  %v9354_v47 = vsel %vm12281_vm5, %v11792_v45, %v9353_v48  ;;  %v8741_v45 = vrot.slane %v8739_v14, 4  ;;  %v8755_v46 = vor.u32 %v8754_v15, %v15288_v55 }
 0x5d2   : > { %v15267_v50 = vadd.f32 %v8198_v43, %v7819_v28  ;;  %v9899_v28 = vor.u32 %v9898_v6, %v15269_v3  ;;  %v9890_v25 = vrot.slane %v9889_v2, 4  ;;  %v9455_v6 = vunpack.c.l.b16 %v9354_v47 }
 0x5d3   : > { %v8756_v39 = vrot.slane %v8755_v46, 4  ;;  %v8760_v15 = vrot.slane %v8758_v31, 5 }
 0x5d4   : > { %v7777_v16 = vpop.f32.mrf.mxu2  ;;  %v9900_v22 = vrot.slane %v9899_v28, 4  ;;  %v9482_v10 = vpack.c.b16 %v9456_v33, %v9455_v6  ;;  %v9360_v28 = vrot.slane %v15291_v13, 5 }
 0x5d5   : > { %v7092_v8 = vpop.f32.mrf.mxu1  ;;  %v8761_v31 = vsel %vm12287_vm6, %v8756_v39, %v8760_v15 }
 0x5d6   : > { %v7138_v32 = vadd.f32 %v7092_v8, %v14847_v30  ;;  %v8200_v43 = vpop.f32.mrf.mxu3  ;;  %v8727_v30 = vsel %vm12287_vm6, %v8722_v41, %v15247_v53  ;;  %v9904_v53 = vrot.slane %v9902_v34, 5  ;;  %v9907_v34 = vshrl.u32 %v11869_v54, 16 }
 0x5d8   : > { %v7820_v19 = vadd.f32 %v7774_v57, %v7138_v32  ;;  %v9027_v57 = vunpack.c.l.b16 %v8727_v30  ;;  %v8744_v32 = vrot.slane %v8742_v24, 5  ;;  %v9905_v2 = vsel %vm12287_vm6, %v9900_v22, %v9904_v53  ;;  %v15306_v24 = vld [vmem:[#allocation2 + $0x68] sm:$0x1]  ;;  %v8588_v22 = vld [vmem:[#allocation2 + $0x60] sm:$0xf] }
 0x5d9   : > { %v9910_v30 = vshll.u32 %v11869_v54, 16  ;;  %v10162_v33 = vunpack.c.l.b16 %v9905_v2  ;;  %v9909_v53 = vrot.slane %v9907_v34, 4  ;;  %v8763_v2 = vshrl.u32 %v8588_v22, 16 }
 0x5da   : > { %v15286_v63 = vadd.f32 %v8200_v43, %v7820_v19  ;;  %11903 = vmatmul.msk.bf16.gmra.mxu3 %vm865_vm7, %v10187_v58  ;;  %v9055_v41 = vpack.c.b16 %v9028_v11, %v9027_v57  ;;  %v11870_v43 = vld [vmem:[%s12265_s12 + $0x64] sm:$0xf]  ;;  %v9895_v58 = vsel %vm12287_vm6, %v9890_v25, %v15269_v3  ;;  %v8745_v47 = vor.u32 %v8744_v32, %v8741_v45  ;;  %v9258_v57 = vld [vmem:[#allocation2 + $0x60] sm:$0xe] }
 0x5db   : > { %v9920_v11 = vshrl.u32 %v11870_v43, 16  ;;  %v10161_v3 = vunpack.c.l.b16 %v9895_v58  ;;  %v9362_v25 = vrot.slane %v9360_v28, 4  ;;  %v9363_v32 = vrot.slane %v15306_v24, 5 }
 0x5dc   : > { %v7779_v8 = vpop.f32.mrf.mxu2  ;;  %v8746_v45 = vrot.slane %v8745_v47, 4  ;;  %v11793_v58 = vrot.slane %v9258_v57, 9 }
 0x5dd   : > { %v7095_v48 = vpop.f32.mrf.mxu1  ;;  %v9922_v54 = vrot.slane %v9920_v11, 4  ;;  %v10188_v34 = vpack.c.b16 %v10162_v33, %v10161_v3 }
 0x5de   : > { %v7139_v61 = vadd.f32 %v7095_v48, %v14861_v62  ;;  %v8203_v27 = vpop.f32.mrf.mxu3  ;;  %v9916_v62 = vshll.u32 %v11870_v43, 16  ;;  %v11871_v43 = vld [vmem:[%s12265_s12 + $0x68] sm:$0x1]  ;;  %v9361_v3 = vsel %vm12281_vm5, %v11793_v58, %v9360_v28  ;;  %v8592_v58 = vld [vmem:[#allocation2 + $0x70] sm:$0xf] }
 0x5df   : > { %9590 = vmatmul.bf16.gmra.mxu2 %v9482_v10  ;;  %v9926_v47 = vshll.u32 %v11871_v43, 16 }
 0x5e0   : > { %v7821_v19 = vadd.f32 %v7777_v16, %v7139_v61  ;;  %9159 = vmatmul.bf16.gmra.mxu1 %v9055_v41  ;;  %v9912_v16 = vrot.slane %v9910_v30, 5  ;;  %v15308_v6 = vrot.slane %v9916_v62, 5  ;;  %v8772_v61 = vshll.u32 %v15291_v13, 16 }
 0x5e1   : > { %v9364_v30 = vsel %vm12281_vm5, %v9362_v25, %v9363_v32  ;;  %v8766_v62 = vshll.u32 %v8588_v22, 16  ;;  %v8765_v22 = vrot.slane %v8763_v2, 4 }
 0x5e2   : > { %v15304_v14 = vadd.f32 %v8203_v27, %v7821_v19  ;;  %v8776_v27 = vshrl.u32 %v15291_v13, 16  ;;  %v8751_v19 = vsel %vm12287_vm6, %v8746_v45, %v15288_v55  ;;  %v9913_v11 = vor.u32 %v9912_v16, %v9909_v53  ;;  %v11872_v55 = vld [vmem:[%s12265_s12 + $0x6c] sm:$0xf] }
 0x5e3   : > { %v15323_v39 = vrot.slane %v8772_v61, 5  ;;  %v9029_v33 = vunpack.c.l.b16 %v8751_v19  ;;  %v9458_v25 = vunpack.c.l.b16 %v9364_v30  ;;  %v8768_v45 = vrot.slane %v8766_v62, 5 }
 0x5e4   : > { %v7782_v41 = vpop.f32.mrf.mxu2  ;;  %v8778_v15 = vrot.slane %v8776_v27, 4  ;;  %v9914_v53 = vrot.slane %v9913_v11, 4  ;;  %v9457_v27 = vunpack.c.l.b16 %v9361_v3 }
 0x5e5   : > { %v7097_v48 = vpop.f32.mrf.mxu1 }
 0x5e6   : > { %v7140_v10 = vadd.f32 %v7097_v48, %v14874_v40  ;;  %v8205_v46 = vpop.f32.mrf.mxu3  ;;  %v9923_v40 = vor.u32 %v9922_v54, %v15308_v6  ;;  %v9030_v48 = vunpack.c.l.b16 %v8761_v31  ;;  %v9928_v54 = vrot.slane %v9926_v47, 5 }
 0x5e7   : > { %v9483_v2 = vpack.c.b16 %v9458_v25, %v9457_v27  ;;  %v9919_v62 = vsel %vm12287_vm6, %v9914_v53, %v15308_v6  ;;  %v8769_v47 = vor.u32 %v8768_v45, %v8765_v22  ;;  %v15345_v53 = vld [vmem:[#allocation2 + $0x74] sm:$0x1]  ;;  %v8591_v22 = vld [vmem:[#allocation2 + $0x6c] sm:$0xf] }
 0x5e8   : > { %v7822_v13 = vadd.f32 %v7779_v8, %v7140_v10  ;;  %v11873_v8 = vld [vmem:[%s12265_s12 + $0x70] sm:$0xf]  ;;  %v9924_v16 = vrot.slane %v9923_v40, 4  ;;  %v9056_v61 = vpack.c.b16 %v9030_v48, %v9029_v33  ;;  %v8779_v10 = vor.u32 %v8778_v15, %v15323_v39  ;;  %v9259_v48 = vld [vmem:[#allocation2 + $0x6c] sm:$0xe] }
 0x5e9   : > { %v9940_v19 = vshll.u32 %v11873_v8, 16  ;;  %v9944_v30 = vshrl.u32 %v11873_v8, 16  ;;  %v9367_v15 = vrot.slane %v8592_v58, 5  ;;  %v10163_v25 = vunpack.c.l.b16 %v9919_v62 }
 0x5ea   : > { %v15325_v57 = vadd.f32 %v8205_v46, %v7822_v13  ;;  %11904 = vmatmul.msk.bf16.gmra.mxu3 %vm865_vm7, %v10188_v34  ;;  %v9931_v46 = vshrl.u32 %v11872_v55, 16  ;;  %v9934_v34 = vshll.u32 %v11872_v55, 16  ;;  %v8782_v13 = vshll.u32 %v15306_v24, 16 }
 0x5eb   : > { %v9929_v40 = vsel %vm12287_vm6, %v9924_v16, %v9928_v54  ;;  %v15342_v24 = vrot.slane %v9940_v19, 5  ;;  %v8770_v6 = vrot.slane %v8769_v47, 4  ;;  %v11794_v16 = vrot.slane %v9259_v48, 9 }
 0x5ec   : > { %v7784_v43 = vpop.f32.mrf.mxu2  ;;  %v9933_v3 = vrot.slane %v9931_v46, 4  ;;  %v9936_v33 = vrot.slane %v9934_v34, 5  ;;  %v10164_v8 = vunpack.c.l.b16 %v9929_v40  ;;  %v8796_v46 = vshll.u32 %v8592_v58, 16 }
 0x5ed   : > { %v7100_v32 = vpop.f32.mrf.mxu1  ;;  %v8787_v62 = vshrl.u32 %v8591_v22, 16  ;;  %v8775_v47 = vsel %vm12287_vm6, %v8770_v6, %v15323_v39  ;;  %v11876_v6 = vld [vmem:[%s12265_s12 + $0x7c] sm:$0xf] }
 0x5ee   : > { %v7141_v28 = vadd.f32 %v7100_v32, %v14885_v23  ;;  %v8208_v31 = vpop.f32.mrf.mxu3  ;;  %v8780_v23 = vrot.slane %v8779_v10, 4  ;;  %v8784_v32 = vrot.slane %v8782_v13, 5  ;;  %v9369_v10 = vrot.slane %v9367_v15, 4 }
 0x5ef   : > { %9595 = vmatmul.bf16.gmra.mxu2 %v9483_v2  ;;  %v9937_v19 = vor.u32 %v9936_v33, %v9933_v3  ;;  %v10189_v13 = vpack.c.b16 %v10164_v8, %v10163_v25  ;;  %v15359_v3 = vrot.slane %v8796_v46, 5  ;;  %v8595_v46 = vld [vmem:[#allocation2 + $0x7c] sm:$0xf] }
 0x5f0   : > { %v7823_v11 = vadd.f32 %v7782_v41, %v7141_v28  ;;  %9164 = vmatmul.bf16.gmra.mxu1 %v9056_v61  ;;  %v9946_v41 = vrot.slane %v9944_v30, 4  ;;  %v11874_v61 = vld [vmem:[%s12265_s12 + $0x74] sm:$0x1]  ;;  %v8785_v27 = vsel %vm12287_vm6, %v8780_v23, %v8784_v32  ;;  %v8800_v28 = vshrl.u32 %v8592_v58, 16 }
 0x5f1   : > { %v9950_v2 = vshll.u32 %v11874_v61, 16  ;;  %v9368_v58 = vsel %vm12281_vm5, %v11794_v16, %v9367_v15  ;;  %v9032_v23 = vunpack.c.l.b16 %v8785_v27  ;;  %v9938_v25 = vrot.slane %v9937_v19, 4  ;;  %v11875_v61 = vld [vmem:[%s12265_s12 + $0x78] sm:$0xf] }
 0x5f2   : > { %v15340_v55 = vadd.f32 %v8208_v31, %v7823_v11  ;;  %v9947_v30 = vor.u32 %v9946_v41, %v15342_v24  ;;  %v9370_v11 = vrot.slane %v15345_v53, 5  ;;  %v8802_v33 = vrot.slane %v8800_v28, 4 }
 0x5f3   : > { %v9952_v8 = vrot.slane %v9950_v2, 5  ;;  %v9031_v32 = vunpack.c.l.b16 %v8775_v47  ;;  %v8789_v27 = vrot.slane %v8787_v62, 4  ;;  %v9955_v2 = vshrl.u32 %v11875_v61, 16 }
 0x5f4   : > { %v7787_v45 = vpop.f32.mrf.mxu2  ;;  %v9371_v48 = vsel %vm12281_vm5, %v9369_v10, %v9370_v11  ;;  %v9964_v11 = vshll.u32 %v11876_v6, 16 }
 0x5f5   : > { %v7102_v54 = vpop.f32.mrf.mxu1  ;;  %v9460_v39 = vunpack.c.l.b16 %v9371_v48 }
 0x5f6   : > { %v7142_v31 = vadd.f32 %v7102_v54, %v14893_v44  ;;  %v8210_v34 = vpop.f32.mrf.mxu3  ;;  %v8790_v44 = vshll.u32 %v8591_v22, 16  ;;  %v9057_v22 = vpack.c.b16 %v9032_v23, %v9031_v32  ;;  %v9459_v54 = vunpack.c.l.b16 %v9368_v58 }
 0x5f7   : > { %v8806_v58 = vshll.u32 %v15345_v53, 16  ;;  %v11877_v53 = vld [vmem:[%s12265_s12 + $0x80] sm:$0x1] }
 0x5f8   : > { %v7824_v40 = vadd.f32 %v7784_v43, %v7142_v31  ;;  %v9948_v43 = vrot.slane %v9947_v30, 4  ;;  %v8792_v10 = vrot.slane %v8790_v44, 5  ;;  %v8803_v30 = vor.u32 %v8802_v33, %v15359_v3  ;;  %v9260_v33 = vld [vmem:[#allocation2 + $0x78] sm:$0xe] }
 0x5f9   : > { %v9484_v62 = vpack.c.b16 %v9460_v39, %v9459_v54  ;;  %v8808_v39 = vrot.slane %v8806_v58, 5 }
 0x5fa   : > { %v15361_v41 = vadd.f32 %v8210_v34, %v7824_v40  ;;  %11905 = vmatmul.msk.bf16.gmra.mxu3 %vm865_vm7, %v10189_v13  ;;  %v9943_v34 = vsel %vm12287_vm6, %v9938_v25, %v15342_v24  ;;  %v9953_v19 = vsel %vm12287_vm6, %v9948_v43, %v9952_v8  ;;  %v9958_v13 = vshll.u32 %v11875_v61, 16  ;;  %v15376_v43 = vld [vmem:[#allocation2 + $0x80] sm:$0x1] }
 0x5fb   : > { %v9968_v40 = vshrl.u32 %v11876_v6, 16  ;;  %v8793_v44 = vor.u32 %v8792_v10, %v8789_v27  ;;  %v10165_v24 = vunpack.c.l.b16 %v9943_v34  ;;  %v10166_v48 = vunpack.c.l.b16 %v9953_v19 }
 0x5fc   : > { %v7789_v16 = vpop.f32.mrf.mxu2  ;;  %v8804_v25 = vrot.slane %v8803_v30, 4  ;;  %v9957_v8 = vrot.slane %v9955_v2, 4  ;;  %v9960_v32 = vrot.slane %v9958_v13, 5  ;;  %v15378_v61 = vrot.slane %v9964_v11, 5 }
 0x5fd   : > { %v7105_v15 = vpop.f32.mrf.mxu1  ;;  %v8794_v54 = vrot.slane %v8793_v44, 4  ;;  %v11795_v27 = vrot.slane %v9260_v33, 9  ;;  %v9377_v10 = vrot.slane %v15376_v43, 5  ;;  %v8820_v30 = vshll.u32 %v8595_v46, 16 }
 0x5fe   : > { %v7143_v28 = vadd.f32 %v7105_v15, %v14905_v17  ;;  %v8213_v31 = vpop.f32.mrf.mxu3  ;;  %v9374_v17 = vrot.slane %v8595_v46, 5  ;;  %v8809_v19 = vsel %vm12287_vm6, %v8804_v25, %v8808_v39  ;;  %v8824_v2 = vshrl.u32 %v8595_v46, 16  ;;  %v15393_v39 = vld [vmem:[#allocation2 + $0x88] sm:$0xf] }
 0x5ff   : > { %9600 = vmatmul.bf16.gmra.mxu2 %v9484_v62  ;;  %v10190_v13 = vpack.c.b16 %v10166_v48, %v10165_v24  ;;  %v9961_v11 = vor.u32 %v9960_v32, %v9957_v8  ;;  %v9034_v24 = vunpack.c.l.b16 %v8809_v19  ;;  %v15397_v48 = vrot.slane %v8820_v30, 5 }
 0x600   : > { %v7825_v47 = vadd.f32 %v7787_v45, %v7143_v28  ;;  %9169 = vmatmul.bf16.gmra.mxu1 %v9057_v22  ;;  %v9970_v45 = vrot.slane %v9968_v40, 4  ;;  %v9376_v6 = vrot.slane %v9374_v17, 4  ;;  %v8594_v28 = vld [vmem:[#allocation2 + $0x78] sm:$0xf]  ;;  %v9375_v25 = vsel %vm12281_vm5, %v11795_v27, %v9374_v17 }
 0x601   : > { %v8811_v44 = vshrl.u32 %v8594_v28, 16  ;;  %v8814_v33 = vshll.u32 %v8594_v28, 16  ;;  %v9962_v32 = vrot.slane %v9961_v11, 4  ;;  %v15401_v28 = vld [vmem:[#allocation2 + $0x8c] sm:$0x1] }
 0x602   : > { %v15374_v23 = vadd.f32 %v8213_v31, %v7825_v47  ;;  %v9971_v40 = vor.u32 %v9970_v45, %v15378_v61  ;;  %v9974_v47 = vshll.u32 %v11877_v53, 16  ;;  %v9378_v58 = vsel %vm12281_vm5, %v9376_v6, %v9377_v10 }
 0x603   : > { %v9462_v8 = vunpack.c.l.b16 %v9378_v58  ;;  %v9461_v10 = vunpack.c.l.b16 %v9375_v25 }
 0x604   : > { %16033 = vst [vmem:[#allocation11_spill] sm:$0xff] %v15374_v23  ;;  %v7792_v22 = vpop.f32.mrf.mxu2  ;;  %v9972_v45 = vrot.slane %v9971_v40, 4  ;;  %v9976_v6 = vrot.slane %v9974_v47, 5  ;;  %v8830_v40 = vshll.u32 %v15376_v43, 16 }
 0x605   : > { %v7107_v15 = vpop.f32.mrf.mxu1 }
 0x606   : > { %v7144_v31 = vadd.f32 %v7107_v15, %v14916_v9  ;;  %v8215_v34 = vpop.f32.mrf.mxu3  ;;  %v8799_v9 = vsel %vm12287_vm6, %v8794_v54, %v15359_v3  ;;  %v8813_v15 = vrot.slane %v8811_v44, 4  ;;  %v8816_v3 = vrot.slane %v8814_v33, 5  ;;  %v11878_v44 = vld [vmem:[%s12265_s12 + $0x84] sm:$0xf]  ;;  %v11879_v33 = vld [vmem:[%s12265_s12 + $0x88] sm:$0xf] }
 0x607   : > { %v9033_v53 = vunpack.c.l.b16 %v8799_v9  ;;  %v9381_v54 = vrot.slane %v15393_v39, 5  ;;  %v9977_v11 = vsel %vm12287_vm6, %v9972_v45, %v9976_v6  ;;  %v9261_v9 = vld [vmem:[#allocation2 + $0x84] sm:$0xe]  ;;  %v9979_v25 = vshrl.u32 %v11878_v44, 16 }
 0x608   : > { %v7826_v62 = vadd.f32 %v7789_v16, %v7144_v31  ;;  %v8826_v16 = vrot.slane %v8824_v2, 4  ;;  %v9485_v2 = vpack.c.b16 %v9462_v8, %v9461_v10  ;;  %v9992_v8 = vshrl.u32 %v11879_v33, 16 }
 0x609   : > { %v9058_v19 = vpack.c.b16 %v9034_v24, %v9033_v53  ;;  %v9383_v58 = vrot.slane %v9381_v54, 4  ;;  %v9982_v24 = vshll.u32 %v11878_v44, 16  ;;  %v10168_v45 = vunpack.c.l.b16 %v9977_v11 }
 0x60a   : > { %v15395_v46 = vadd.f32 %v8215_v34, %v7826_v62  ;;  %11906 = vmatmul.msk.bf16.gmra.mxu3 %vm865_vm7, %v10190_v13  ;;  %v8827_v30 = vor.u32 %v8826_v16, %v15397_v48  ;;  %v9967_v13 = vsel %vm12287_vm6, %v9962_v32, %v15378_v61  ;;  %v8817_v62 = vor.u32 %v8816_v3, %v8813_v15 }
 0x60b   : > { %v9988_v16 = vshll.u32 %v11879_v33, 16  ;;  %v10167_v32 = vunpack.c.l.b16 %v9967_v13  ;;  %v9981_v6 = vrot.slane %v9979_v25, 4  ;;  %v9984_v53 = vrot.slane %v9982_v24, 5  ;;  %v16036_v13 = vld [vmem:[#allocation44_spill] sm:$0xff] }
 0x60c   : > { %16034 = vst [vmem:[#allocation4_spill] sm:$0xff] %v15395_v46  ;;  %v7794_v27 = vpop.f32.mrf.mxu2  ;;  %v8828_v43 = vrot.slane %v8827_v30, 4  ;;  %v9994_v3 = vrot.slane %v9992_v8, 4  ;;  %v11796_v10 = vrot.slane %v9261_v9, 9  ;;  %v8818_v44 = vrot.slane %v8817_v62, 4 }
 0x60d   : > { %v7110_v17 = vpop.f32.mrf.mxu1  ;;  %v15416_v15 = vrot.slane %v9988_v16, 5  ;;  %v8844_v25 = vshll.u32 %v15393_v39, 16  ;;  %v10191_v9 = vpack.c.b16 %v10168_v45, %v10167_v32  ;;  %v9985_v24 = vor.u32 %v9984_v53, %v9981_v6 }
 0x60e   : > { %v7145_v31 = vadd.f32 %v7110_v17, %v14925_v60  ;;  %v8218_v34 = vpop.f32.mrf.mxu3  ;;  %v9384_v60 = vrot.slane %v15401_v28, 5  ;;  %v8832_v17 = vrot.slane %v8830_v40, 5  ;;  %v8848_v40 = vshrl.u32 %v15393_v39, 16 }
 0x60f   : > { %9605 = vmatmul.bf16.gmra.mxu2 %v9485_v2  ;;  %v9995_v16 = vor.u32 %v9994_v3, %v15416_v15  ;;  %v15436_v32 = vrot.slane %v8844_v25, 5 }
 0x610   : > { %v7827_v47 = vadd.f32 %v7792_v22, %v7145_v31  ;;  %9174 = vmatmul.bf16.gmra.mxu1 %v9058_v19  ;;  %v8597_v22 = vld [vmem:[#allocation2 + $0x84] sm:$0xf]  ;;  %v11880_v31 = vld [vmem:[%s12265_s12 + $0x8c] sm:$0x1]  ;;  %v8833_v33 = vsel %vm12287_vm6, %v8828_v43, %v8832_v17  ;;  %v15432_v43 = vld [vmem:[#allocation2 + $0x94] sm:$0xf] }
 0x611   : > { %v8838_v2 = vshll.u32 %v8597_v22, 16  ;;  %v9998_v62 = vshll.u32 %v11880_v31, 16  ;;  %v9036_v39 = vunpack.c.l.b16 %v8833_v33  ;;  %v8850_v45 = vrot.slane %v8848_v40, 4  ;;  %v16038_v31 = vld [vmem:[#allocation39_spill] sm:$0xff] }
 0x612   : > { %v15414_v61 = vadd.f32 %v8218_v34, %v7827_v47  ;;  %v9385_v34 = vsel %vm12281_vm5, %v9383_v58, %v9384_v60  ;;  %v8835_v47 = vshrl.u32 %v8597_v22, 16  ;;  %v8823_v58 = vsel %vm12287_vm6, %v8818_v44, %v15397_v48  ;;  %v9262_v48 = vld [vmem:[#allocation2 + $0x90] sm:$0xe]  ;;  %v15448_v33 = vld [vmem:[#allocation2 + $0x98] sm:$0x1] }
 0x613   : > { %v9382_v60 = vsel %vm12281_vm5, %v11796_v10, %v9381_v54  ;;  %v9464_v22 = vunpack.c.l.b16 %v9385_v34  ;;  %v9996_v6 = vrot.slane %v9995_v16, 4  ;;  %v10000_v53 = vrot.slane %v9998_v62, 5  ;;  %v15444_v10 = vld [vmem:[%s15842_s6] ss:$0 sm:$0xff] }
 0x614   : > { %16035 = vst [vmem:[#allocation16_spill] sm:$0xff] %v15414_v61  ;;  %v9566_v46 = vpop.f32.mrf.mxu2  ;;  %v8840_v3 = vrot.slane %v8838_v2, 5  ;;  %v8538_v54 = vadd.f32 %v16038_v31, %v14948_v4  ;;  %v9035_v44 = vunpack.c.l.b16 %v8823_v58  ;;  %v9388_v34 = vrot.slane %v15432_v43, 5  ;;  %v15453_v4 = vld [vmem:[%s15840_s4] ss:$0 sm:$0xff] }
 0x615   : > { %v7112_v19 = vpop.f32.mrf.mxu1  ;;  %v10001_v62 = vsel %vm12287_vm6, %v9996_v6, %v10000_v53  ;;  %v8600_v6 = vld [vmem:[#allocation2 + $0x90] sm:$0xf]  ;;  %v11883_v61 = vld [vmem:[%s12265_s12 + $0x98] sm:$0x1] }
 0x616   : > { %v7146_v11 = vadd.f32 %v7112_v19, %v16036_v13  ;;  %v8220_v30 = vpop.f32.mrf.mxu3  ;;  %v8837_v19 = vrot.slane %v8835_v47, 4  ;;  %v9059_v40 = vpack.c.b16 %v9036_v39, %v9035_v44  ;;  %v9390_v31 = vrot.slane %v9388_v34, 4 }
 0x617   : > { %v9391_v39 = vrot.slane %v15448_v33, 5 }
 0x618   : > { %v7828_v8 = vadd.f32 %v7794_v27, %v7146_v11  ;;  %v9986_v27 = vrot.slane %v9985_v24, 4  ;;  %v9463_v11 = vunpack.c.l.b16 %v9382_v60  ;;  %v11797_v24 = vrot.slane %v9262_v48, 9 }
 0x61a   : > { %v15434_v17 = vadd.f32 %v8220_v30, %v7828_v8  ;;  %11907 = vmatmul.msk.bf16.gmra.mxu3 %vm865_vm7, %v10191_v9  ;;  %v8854_v30 = vshll.u32 %v15401_v28, 16  ;;  %v8851_v9 = vor.u32 %v8850_v45, %v15436_v32  ;;  %v9486_v16 = vpack.c.b16 %v9464_v22, %v9463_v11  ;;  %v11882_v45 = vld [vmem:[%s12265_s12 + $0x94] sm:$0xf] }
 0x61b   : > { %v9991_v28 = vsel %vm12287_vm6, %v9986_v27, %v15416_v15  ;;  %v8841_v8 = vor.u32 %v8840_v3, %v8837_v19  ;;  %v10012_v22 = vshll.u32 %v11882_v45, 16  ;;  %v10170_v19 = vunpack.c.l.b16 %v10001_v62 }
 0x61c   : > { %16037 = vst [vmem:[#allocation10_spill] sm:$0xff] %v15434_v17  ;;  %v9568_v13 = vpop.f32.mrf.mxu2  ;;  %v10169_v27 = vunpack.c.l.b16 %v9991_v28  ;;  %v8856_v17 = vrot.slane %v8854_v30, 5  ;;  %v9392_v62 = vsel %vm12281_vm5, %v9390_v31, %v9391_v39  ;;  %v8862_v31 = vshll.u32 %v8600_v6, 16 }
 0x61d   : > { %v9140_v47 = vpop.f32.mrf.mxu1  ;;  %v15467_v11 = vrot.slane %v10012_v22, 5  ;;  %v8842_v28 = vrot.slane %v8841_v8, 4 }
 0x61e   : > { %v9220_v2 = vadd.f32 %v9140_v47, %v8538_v54  ;;  %v10259_v25 = vpop.f32.mrf.mxu3  ;;  %v11881_v54 = vld [vmem:[%s12265_s12 + $0x90] sm:$0xf]  ;;  %v10016_v47 = vshrl.u32 %v11882_v45, 16  ;;  %v9389_v45 = vsel %vm12281_vm5, %v11797_v24, %v9388_v34  ;;  %v8872_v24 = vshrl.u32 %v15432_v43, 16 }
 0x61f   : > { %v10260_v60 = vadd.f32 %v15444_v10, %v10259_v25  ;;  %v10003_v48 = vshrl.u32 %v11881_v54, 16  ;;  %v10006_v44 = vshll.u32 %v11881_v54, 16  ;;  %9610 = vmatmul.bf16.gmra.mxu2 %v9486_v16  ;;  %v8847_v39 = vsel %vm12287_vm6, %v8842_v28, %v15436_v32 }
 0x620   : > { %v9646_v58 = vadd.f32 %v9566_v46, %v9220_v2  ;;  %9179 = vmatmul.bf16.gmra.mxu1 %v9059_v40  ;;  %v8852_v46 = vrot.slane %v8851_v9, 4  ;;  %v10018_v2 = vrot.slane %v10016_v47, 4  ;;  %v16039_v40 = vld [vmem:[#allocation40_spill] sm:$0xff]  ;;  %v8864_v28 = vrot.slane %v8862_v31, 5 }
 0x621   : > { %v10005_v53 = vrot.slane %v10003_v48, 4  ;;  %v10008_v3 = vrot.slane %v10006_v44, 5  ;;  %v8539_v54 = vadd.f32 %v16039_v40, %v14963_v51  ;;  %v8868_v51 = vshll.u32 %v15432_v43, 16 }
 0x622   : > { %v9682_v15 = vadd.f32 %v15453_v4, %v9646_v58  ;;  %v8859_v58 = vshrl.u32 %v8600_v6, 16  ;;  %v8857_v34 = vsel %vm12287_vm6, %v8852_v46, %v8856_v17  ;;  %v10192_v44 = vpack.c.b16 %v10170_v19, %v10169_v27 }
 0x623   : > { %v10009_v22 = vor.u32 %v10008_v3, %v10005_v53  ;;  %v10019_v47 = vor.u32 %v10018_v2, %v15467_v11  ;;  %v9465_v40 = vunpack.c.l.b16 %v9389_v45  ;;  %v8878_v17 = vshll.u32 %v15448_v33, 16  ;;  %v15496_v2 = vpop.f32.mrf.mxu0  ;;  %v16040_v45 = vld [vmem:[#allocation41_spill] sm:$0xff] }
 0x624   : > { %v10339_v25 = vadd.f32 %v10260_v60, %v9682_v15  ;;  %v9571_v16 = vpop.f32.mrf.mxu2  ;;  %v10022_v15 = vshll.u32 %v11883_v61, 16  ;;  %v9038_v19 = vunpack.c.l.b16 %v8857_v34  ;;  %v8874_v46 = vrot.slane %v8872_v24, 4  ;;  %v8603_v61 = vld [vmem:[#allocation2 + $0x9c] sm:$0xf] }
 0x625   : > { %v9142_v9 = vpop.f32.mrf.mxu1  ;;  %v10020_v6 = vrot.slane %v10019_v47, 4  ;;  %v8861_v3 = vrot.slane %v8859_v58, 4  ;;  %v9037_v33 = vunpack.c.l.b16 %v8847_v39  ;;  %v8883_v34 = vshrl.u32 %v8603_v61, 16 }
 0x626   : > { %v10371_v30 = vmax.f32 %v10339_v25, 0.0  ;;  %v9221_v60 = vadd.f32 %v9142_v9, %v8539_v54  ;;  %v10261_v48 = vpop.f32.mrf.mxu3  ;;  %v9466_v25 = vunpack.c.l.b16 %v9392_v62  ;;  %v15490_v54 = vrot.slane %v8868_v51, 5  ;;  %v15500_v62 = vld [vmem:[#allocation2 + $0xa0] sm:$0xf] }
 0x627   : > { %v10262_v27 = vadd.f32 %v15444_v10, %v10261_v48  ;;  %v10024_v53 = vrot.slane %v10022_v15, 5  ;;  %v8540_v9 = vadd.f32 %v16040_v45, %v14970_v5  ;;  %v8880_v48 = vrot.slane %v8878_v17, 5 }
 0x628   : > { %10403 = vst [vmem:[%s15477_s23] sm:$0xff] %v10371_v30  ;;  %v9647_v8 = vadd.f32 %v9568_v13, %v9221_v60  ;;  %v10010_v13 = vrot.slane %v10009_v22, 4  ;;  %v9487_v60 = vpack.c.b16 %v9466_v25, %v9465_v40  ;;  %v8886_v24 = vshll.u32 %v8603_v61, 16 }
 0x629   : > { %v9060_v47 = vpack.c.b16 %v9038_v19, %v9037_v33  ;;  %v8875_v15 = vor.u32 %v8874_v46, %v15490_v54  ;;  %v9395_v40 = vrot.slane %v15500_v62, 5  ;;  %v8892_v31 = vshll.u32 %v15500_v62, 16 }
 0x62a   : > { %v9683_v43 = vadd.f32 %v15453_v4, %v9647_v8  ;;  %11908 = vmatmul.msk.bf16.gmra.mxu3 %vm865_vm7, %v10192_v44  ;;  %v10015_v5 = vsel %vm12287_vm6, %v10010_v13, %v15467_v11  ;;  %v10025_v8 = vsel %vm12287_vm6, %v10020_v6, %v10024_v53  ;;  %v8865_v17 = vor.u32 %v8864_v28, %v8861_v3 }
 0x62b   : > { %v8896_v19 = vshrl.u32 %v15500_v62, 16  ;;  %v10171_v53 = vunpack.c.l.b16 %v10015_v5  ;;  %v8876_v45 = vrot.slane %v8875_v15, 4  ;;  %v16041_v62 = vld [vmem:[#allocation43_spill] sm:$0xff]  ;;  %v15521_v15 = vrot.slane %v8892_v31, 5 }
 0x62c   : > { %v10340_v32 = vadd.f32 %v10262_v27, %v9683_v43  ;;  %v9573_v30 = vpop.f32.mrf.mxu2  ;;  %v11884_v43 = vld [vmem:[%s12265_s12 + $0x9c] sm:$0xf]  ;;  %v11885_v27 = vld [vmem:[%s12265_s12 + $0xa0] sm:$0xf] }
 0x62d   : > { %v9145_v51 = vpop.f32.mrf.mxu1  ;;  %v10027_v46 = vshrl.u32 %v11884_v43, 16  ;;  %v10030_v11 = vshll.u32 %v11884_v43, 16  ;;  %v10036_v61 = vshll.u32 %v11885_v27, 16  ;;  %v10040_v13 = vshrl.u32 %v11885_v27, 16  ;;  %v9263_v5 = vld [vmem:[#allocation2 + $0x9c] sm:$0xe] }
 0x62e   : > { %v10372_v58 = vmax.f32 %v10340_v32, 0.0  ;;  %v9222_v44 = vadd.f32 %v9145_v51, %v8540_v9  ;;  %v10264_v22 = vpop.f32.mrf.mxu3  ;;  %v10172_v32 = vunpack.c.l.b16 %v10025_v8  ;;  %v9397_v8 = vrot.slane %v9395_v40, 4 }
 0x62f   : > { %v10265_v25 = vadd.f32 %v15444_v10, %v10264_v22  ;;  %9615 = vmatmul.bf16.gmra.mxu2 %v9487_v60  ;;  %v10029_v9 = vrot.slane %v10027_v46, 4  ;;  %v10032_v33 = vrot.slane %v10030_v11, 5  ;;  %v15516_v51 = vrot.slane %v10036_v61, 5  ;;  %v15523_v46 = vpop.f32.mrf.mxu0 }
 0x630   : > { %10404 = vst [vmem:[%s15477_s23 + $0x8] sm:$0xff] %v10372_v58  ;;  %v9648_v39 = vadd.f32 %v9571_v16, %v9222_v44  ;;  %9184 = vmatmul.bf16.gmra.mxu1 %v9060_v47  ;;  %v8605_v16 = vld [vmem:[#allocation2 + $0xa4] sm:$0x1]  ;;  %v10042_v3 = vrot.slane %v10040_v13, 4  ;;  %v8541_v58 = vadd.f32 %v16041_v62, %v14982_v0  ;;  %v8885_v22 = vrot.slane %v8883_v34, 4 }
 0x631   : > { %v11886_v44 = vld [vmem:[%s12265_s12 + $0xa4] sm:$0x1]  ;;  %v8888_v47 = vrot.slane %v8886_v24, 5  ;;  %v8866_v60 = vrot.slane %v8865_v17, 4  ;;  %v8881_v0 = vsel %vm12287_vm6, %v8876_v45, %v8880_v48  ;;  %v9398_v13 = vrot.slane %v8605_v16, 5 }
 0x632   : > { %v9684_v6 = vadd.f32 %v15453_v4, %v9648_v39  ;;  %v8898_v39 = vrot.slane %v8896_v19, 4  ;;  %v10193_v34 = vpack.c.b16 %v10172_v32, %v10171_v53  ;;  %v10033_v24 = vor.u32 %v10032_v33, %v10029_v9 }
 0x633   : > { %v10046_v62 = vshll.u32 %v11886_v44, 16  ;;  %v8871_v31 = vsel %vm12287_vm6, %v8866_v60, %v15490_v54  ;;  %v11798_v19 = vrot.slane %v9263_v5, 9  ;;  %v8889_v23 = vor.u32 %v8888_v47, %v8885_v22  ;;  %v8606_v44 = vld [vmem:[#allocation2 + $0xa8] sm:$0xf]  ;;  %v15544_v5 = vld [vmem:[#allocation2 + $0xac] sm:$0xf] }
 0x634   : > { %v10341_v28 = vadd.f32 %v10265_v25, %v9684_v6  ;;  %v9576_v27 = vpop.f32.mrf.mxu2  ;;  %v10043_v6 = vor.u32 %v10042_v3, %v15516_v51  ;;  %v8899_v48 = vor.u32 %v8898_v39, %v15521_v15  ;;  %v8902_v45 = vshll.u32 %v8605_v16, 16  ;;  %v16042_v47 = vld [vmem:[#allocation45_spill] sm:$0xff] }
 0x635   : > { %v9147_v43 = vpop.f32.mrf.mxu1  ;;  %v9039_v9 = vunpack.c.l.b16 %v8871_v31  ;;  %v10034_v54 = vrot.slane %v10033_v24, 4  ;;  %v10048_v3 = vrot.slane %v10046_v62, 5  ;;  %v15542_v16 = vrot.slane %v8889_v23, 4 }
 0x636   : > { %v10373_v11 = vmax.f32 %v10341_v28, 0.0  ;;  %v9223_v61 = vadd.f32 %v9147_v43, %v8541_v58  ;;  %v10266_v25 = vpop.f32.mrf.mxu3  ;;  %v9040_v28 = vunpack.c.l.b16 %v8881_v0  ;;  %v9399_v58 = vsel %vm12281_vm5, %v9397_v8, %v9398_v13 }
 0x637   : > { %v10267_v32 = vadd.f32 %v15444_v10, %v10266_v25  ;;  %v10044_v33 = vrot.slane %v10043_v6, 4  ;;  %v8542_v43 = vadd.f32 %v16042_v47, %v14992_v37  ;;  %v9468_v60 = vunpack.c.l.b16 %v9399_v58  ;;  %v15553_v31 = vpop.f32.mrf.mxu0 }
 0x638   : > { %10405 = vst [vmem:[%s15477_s23 + $0x10] sm:$0xff] %v10373_v11  ;;  %v9649_v17 = vadd.f32 %v9573_v30, %v9223_v61  ;;  %v9396_v30 = vsel %vm12281_vm5, %v11798_v19, %v9395_v40  ;;  %v9061_v39 = vpack.c.b16 %v9040_v28, %v9039_v9  ;;  %v8900_v61 = vrot.slane %v8899_v48, 4  ;;  %v11887_v48 = vld [vmem:[%s12265_s12 + $0xa8] sm:$0xf] }
 0x639   : > { %v9467_v11 = vunpack.c.l.b16 %v9396_v30  ;;  %v8904_v25 = vrot.slane %v8902_v45, 5  ;;  %v8907_v24 = vshrl.u32 %v8606_v44, 16  ;;  %v8910_v6 = vshll.u32 %v8606_v44, 16  ;;  %v11888_v45 = vld [vmem:[%s12265_s12 + $0xac] sm:$0xf] }
 0x63a   : > { %v9685_v53 = vadd.f32 %v15453_v4, %v9649_v17  ;;  %11909 = vmatmul.msk.bf16.gmra.mxu3 %vm865_vm7, %v10193_v34  ;;  %v10039_v37 = vsel %vm12287_vm6, %v10034_v54, %v15516_v51  ;;  %v10049_v23 = vsel %vm12287_vm6, %v10044_v33, %v10048_v3  ;;  %v9402_v62 = vrot.slane %v15544_v5, 5  ;;  %v8608_v44 = vld [vmem:[#allocation2 + $0xb0] sm:$0x1] }
 0x63b   : > { %v8916_v17 = vshll.u32 %v15544_v5, 16  ;;  %v9488_v58 = vpack.c.b16 %v9468_v60, %v9467_v11  ;;  %v10051_v51 = vshrl.u32 %v11887_v48, 16  ;;  %v10060_v30 = vshll.u32 %v11888_v45, 16  ;;  %v11889_v11 = vld [vmem:[%s12265_s12 + $0xb0] sm:$0x1] }
 0x63c   : > { %v10342_v22 = vadd.f32 %v10267_v32, %v9685_v53  ;;  %v9578_v40 = vpop.f32.mrf.mxu2  ;;  %v8920_v53 = vshrl.u32 %v15544_v5, 16  ;;  %v10054_v32 = vshll.u32 %v11887_v48, 16  ;;  %v10064_v9 = vshrl.u32 %v11888_v45, 16 }
 0x63d   : > { %v9150_v8 = vpop.f32.mrf.mxu1  ;;  %v10173_v33 = vunpack.c.l.b16 %v10039_v37  ;;  %v10174_v3 = vunpack.c.l.b16 %v10049_v23  ;;  %v9404_v23 = vrot.slane %v9402_v62, 4 }
 0x63e   : > { %v10374_v0 = vmax.f32 %v10342_v22, 0.0  ;;  %v9224_v13 = vadd.f32 %v9150_v8, %v8542_v43  ;;  %v10269_v34 = vpop.f32.mrf.mxu3  ;;  %v10053_v22 = vrot.slane %v10051_v51, 4  ;;  %v10056_v47 = vrot.slane %v10054_v32, 5  ;;  %v16043_v8 = vld [vmem:[#allocation46_spill] sm:$0xff] }
 0x63f   : > { %v10270_v28 = vadd.f32 %v15444_v10, %v10269_v34  ;;  %9620 = vmatmul.bf16.gmra.mxu2 %v9488_v58  ;;  %v15563_v43 = vrot.slane %v10060_v30, 5  ;;  %v10066_v60 = vrot.slane %v10064_v9, 4  ;;  %v8922_v58 = vrot.slane %v8920_v53, 4 }
 0x640   : > { %10406 = vst [vmem:[%s15477_s23 + $0x18] sm:$0xff] %v10374_v0  ;;  %v9650_v19 = vadd.f32 %v9576_v27, %v9224_v13  ;;  %9189 = vmatmul.bf16.gmra.mxu1 %v9061_v39  ;;  %v8905_v27 = vsel %vm12287_vm6, %v8900_v61, %v8904_v25  ;;  %v8543_v39 = vadd.f32 %v16043_v8, %v15007_v52  ;;  %v8909_v0 = vrot.slane %v8907_v24, 4  ;;  %v9264_v25 = vld [vmem:[#allocation2 + $0xa8] sm:$0xe] }
 0x641   : > { %v8912_v13 = vrot.slane %v8910_v6, 5  ;;  %v8895_v61 = vsel %vm12287_vm6, %v15542_v16, %v15521_v15  ;;  %v9042_v52 = vunpack.c.l.b16 %v8905_v27  ;;  %v9405_v51 = vrot.slane %v8608_v44, 5 }
 0x642   : > { %v9686_v54 = vadd.f32 %v15453_v4, %v9650_v19  ;;  %v15572_v19 = vrot.slane %v8916_v17, 5  ;;  %v10194_v24 = vpack.c.b16 %v10174_v3, %v10173_v33  ;;  %v10057_v6 = vor.u32 %v10056_v47, %v10053_v22  ;;  %v8609_v22 = vld [vmem:[#allocation2 + $0xb4] sm:$0xf] }
 0x643   : > { %v10067_v32 = vor.u32 %v10066_v60, %v15563_v43  ;;  %v10070_v30 = vshll.u32 %v11889_v11, 16  ;;  %v8913_v8 = vor.u32 %v8912_v13, %v8909_v0  ;;  %v9041_v15 = vunpack.c.l.b16 %v8895_v61  ;;  %v15586_v11 = vld [vmem:[#allocation2 + $0xb8] sm:$0xf]  ;;  %v15592_v61 = vld [vmem:[#allocation2 + $0xbc] sm:$0x1] }
 0x644   : > { %v10343_v5 = vadd.f32 %v10270_v28, %v9686_v54  ;;  %v9581_v37 = vpop.f32.mrf.mxu2  ;;  %v11799_v54 = vrot.slane %v9264_v25, 9  ;;  %v9406_v16 = vsel %vm12281_vm5, %v9404_v23, %v9405_v51  ;;  %v8923_v17 = vor.u32 %v8922_v58, %v15572_v19 }
 0x645   : > { %v9152_v34 = vpop.f32.mrf.mxu1  ;;  %v8926_v53 = vshll.u32 %v8608_v44, 16  ;;  %v10058_v47 = vrot.slane %v10057_v6, 4  ;;  %v10068_v60 = vrot.slane %v10067_v32, 4  ;;  %v8544_v44 = vadd.f32 %v15066_v56, %v15014_v42 }
 0x646   : > { %v10375_v28 = vmax.f32 %v10343_v5, 0.0  ;;  %v9225_v48 = vadd.f32 %v9152_v34, %v8543_v39  ;;  %v10271_v45 = vpop.f32.mrf.mxu3  ;;  %v15579_v5 = vpop.f32.mrf.mxu0  ;;  %v9403_v3 = vsel %vm12281_vm5, %v11799_v54, %v9402_v62  ;;  %v10072_v39 = vrot.slane %v10070_v30, 5 }
 0x647   : > { %v10272_v33 = vadd.f32 %v15444_v10, %v10271_v45  ;;  %v9470_v13 = vunpack.c.l.b16 %v9406_v16  ;;  %v15590_v34 = vrot.slane %v8913_v8, 4  ;;  %v9469_v23 = vunpack.c.l.b16 %v9403_v3  ;;  %v11891_v16 = vld [vmem:[%s12265_s12 + $0xb8] sm:$0xf] }
 0x648   : > { %10407 = vst [vmem:[%s15477_s23 + $0x20] sm:$0xff] %v10375_v28  ;;  %v9651_v9 = vadd.f32 %v9578_v40, %v9225_v48  ;;  %v9062_v40 = vpack.c.b16 %v9042_v52, %v9041_v15  ;;  %v8924_v58 = vrot.slane %v8923_v17, 4  ;;  %v8928_v28 = vrot.slane %v8926_v53, 5  ;;  %v11890_v15 = vld [vmem:[%s12265_s12 + $0xb4] sm:$0xf] }
 0x649   : > { %v8931_v48 = vshrl.u32 %v8609_v22, 16  ;;  %v8934_v42 = vshll.u32 %v8609_v22, 16  ;;  %v10063_v56 = vsel %vm12287_vm6, %v10058_v47, %v15563_v43  ;;  %v10073_v6 = vsel %vm12287_vm6, %v10068_v60, %v10072_v39 }
 0x64a   : > { %v9687_v27 = vadd.f32 %v15453_v4, %v9651_v9  ;;  %11910 = vmatmul.msk.bf16.gmra.mxu3 %vm865_vm7, %v10194_v24  ;;  %v9409_v24 = vrot.slane %v15586_v11, 5  ;;  %v9412_v32 = vrot.slane %v15592_v61, 5  ;;  %v8940_v30 = vshll.u32 %v15586_v11, 16 }
 0x64b   : > { %v9489_v8 = vpack.c.b16 %v9470_v13, %v9469_v23  ;;  %v8944_v17 = vshrl.u32 %v15586_v11, 16  ;;  %v10075_v53 = vshrl.u32 %v11890_v15, 16  ;;  %v10078_v43 = vshll.u32 %v11890_v15, 16 }
 0x64c   : > { %v10344_v0 = vadd.f32 %v10272_v33, %v9687_v27  ;;  %v9583_v25 = vpop.f32.mrf.mxu2  ;;  %v10084_v27 = vshll.u32 %v11891_v16, 16  ;;  %v10088_v33 = vshrl.u32 %v11891_v16, 16  ;;  %v10175_v22 = vunpack.c.l.b16 %v10063_v56 }
 0x64d   : > { %v9155_v62 = vpop.f32.mrf.mxu1  ;;  %v10176_v47 = vunpack.c.l.b16 %v10073_v6  ;;  %v9411_v60 = vrot.slane %v9409_v24, 4  ;;  %v10080_v39 = vrot.slane %v10078_v43, 5  ;;  %v8545_v11 = vadd.f32 %v15082_v20, %v15025_v59  ;;  %v9265_v6 = vld [vmem:[#allocation2 + $0xb4] sm:$0xe] }
 0x64e   : > { %v10376_v45 = vmax.f32 %v10344_v0, 0.0  ;;  %v9226_v52 = vadd.f32 %v9155_v62, %v8544_v44  ;;  %v10274_v51 = vpop.f32.mrf.mxu3  ;;  %v15608_v0 = vrot.slane %v10084_v27, 5  ;;  %v15610_v44 = vpop.f32.mrf.mxu0  ;;  %v11892_v62 = vld [vmem:[%s12265_s12 + $0xbc] sm:$0x1]  ;;  %v15615_v23 = vrot.slane %v8940_v30, 5 }
 0x64f   : > { %v10275_v54 = vadd.f32 %v15444_v10, %v10274_v51  ;;  %9625 = vmatmul.bf16.gmra.mxu2 %v9489_v8  ;;  %v8919_v56 = vsel %vm12287_vm6, %v15590_v34, %v15572_v19  ;;  %v8936_v8 = vrot.slane %v8934_v42, 5  ;;  %v8929_v59 = vsel %vm12287_vm6, %v8924_v58, %v8928_v28 }
 0x650   : > { %10408 = vst [vmem:[%s15477_s23 + $0x28] sm:$0xff] %v10376_v45  ;;  %v9652_v9 = vadd.f32 %v9581_v37, %v9226_v52  ;;  %9194 = vmatmul.bf16.gmra.mxu1 %v9062_v40  ;;  %v10077_v37 = vrot.slane %v10075_v53, 4  ;;  %v10090_v40 = vrot.slane %v10088_v33, 4  ;;  %v8946_v45 = vrot.slane %v8944_v17, 4 }
 0x651   : > { %v9413_v20 = vsel %vm12281_vm5, %v9411_v60, %v9412_v32  ;;  %v10195_v30 = vpack.c.b16 %v10176_v47, %v10175_v22  ;;  %v10094_v43 = vshll.u32 %v11892_v62, 16  ;;  %v11800_v19 = vrot.slane %v9265_v6, 9 }
 0x652   : > { %v9688_v3 = vadd.f32 %v15453_v4, %v9652_v9  ;;  %v8933_v9 = vrot.slane %v8931_v48, 4  ;;  %v10081_v17 = vor.u32 %v10080_v39, %v10077_v37  ;;  %v10091_v53 = vor.u32 %v10090_v40, %v15608_v0  ;;  %v8612_v48 = vld [vmem:[#allocation2 + $0xc0] sm:$0xf] }
 0x653   : > { %v8947_v34 = vor.u32 %v8946_v45, %v15615_v23  ;;  %v9043_v42 = vunpack.c.l.b16 %v8919_v56  ;;  %v9044_v33 = vunpack.c.l.b16 %v8929_v59  ;;  %v9410_v32 = vsel %vm12281_vm5, %v11800_v19, %v9409_v24  ;;  %v8613_v24 = vld [vmem:[#allocation2 + $0xc4] sm:$0xf] }
 0x654   : > { %v10345_v13 = vadd.f32 %v10275_v54, %v9688_v3  ;;  %v9586_v51 = vpop.f32.mrf.mxu2  ;;  %v8937_v3 = vor.u32 %v8936_v8, %v8933_v9  ;;  %v9472_v22 = vunpack.c.l.b16 %v9413_v20  ;;  %v10092_v47 = vrot.slane %v10091_v53, 4  ;;  %v11894_v19 = vld [vmem:[%s12265_s12 + $0xc4] sm:$0xf] }
 0x655   : > { %v9157_v52 = vpop.f32.mrf.mxu1  ;;  %v10096_v60 = vrot.slane %v10094_v43, 5  ;;  %v8955_v37 = vshrl.u32 %v8612_v48, 16  ;;  %v8546_v40 = vadd.f32 %v15496_v2, %v15034_v18  ;;  %v9063_v62 = vpack.c.b16 %v9044_v33, %v9043_v42 }
 0x656   : > { %v10377_v15 = vmax.f32 %v10345_v13, 0.0  ;;  %v9227_v54 = vadd.f32 %v9157_v52, %v8545_v11  ;;  %v10276_v16 = vpop.f32.mrf.mxu3  ;;  %v8950_v13 = vshll.u32 %v15592_v61, 16  ;;  %v8948_v11 = vrot.slane %v8947_v34, 4  ;;  %v15638_v6 = vpop.f32.mrf.mxu0 }
 0x657   : > { %v10277_v28 = vadd.f32 %v15444_v10, %v10276_v16  ;;  %v9471_v52 = vunpack.c.l.b16 %v9410_v32  ;;  %v15636_v56 = vrot.slane %v8937_v3, 4  ;;  %v8958_v16 = vshll.u32 %v8612_v48, 16 }
 0x658   : > { %10409 = vst [vmem:[%s15477_s23 + $0x30] sm:$0xff] %v10377_v15  ;;  %v9653_v27 = vadd.f32 %v9583_v25, %v9227_v54  ;;  %v10082_v25 = vrot.slane %v10081_v17, 4  ;;  %v8952_v54 = vrot.slane %v8950_v13, 5  ;;  %v10097_v2 = vsel %vm12287_vm6, %v10092_v47, %v10096_v60 }
 0x659   : > { %v9490_v59 = vpack.c.b16 %v9472_v22, %v9471_v52  ;;  %v15645_v20 = vrot.slane %v8955_v37, 4  ;;  %v9416_v43 = vrot.slane %v8613_v24, 5  ;;  %v10112_v42 = vshrl.u32 %v11894_v19, 16  ;;  %v8614_v37 = vld [vmem:[#allocation2 + $0xc8] sm:$0x1] }
 0x65a   : > { %v9689_v58 = vadd.f32 %v15453_v4, %v9653_v27  ;;  %11911 = vmatmul.msk.bf16.gmra.mxu3 %vm865_vm7, %v10195_v30  ;;  %v10087_v18 = vsel %vm12287_vm6, %v10082_v25, %v15608_v0  ;;  %v8953_v53 = vsel %vm12287_vm6, %v8948_v11, %v8952_v54  ;;  %v11893_v27 = vld [vmem:[%s12265_s12 + $0xc0] sm:$0xf]  ;;  %v10108_v0 = vshll.u32 %v11894_v19, 16 }
 0x65b   : > { %v10099_v34 = vshrl.u32 %v11893_v27, 16  ;;  %v10102_v48 = vshll.u32 %v11893_v27, 16  ;;  %v10177_v3 = vunpack.c.l.b16 %v10087_v18  ;;  %v10178_v13 = vunpack.c.l.b16 %v10097_v2 }
 0x65c   : > { %v10346_v39 = vadd.f32 %v10277_v28, %v9689_v58  ;;  %v9588_v45 = vpop.f32.mrf.mxu2  ;;  %v11895_v58 = vld [vmem:[%s12265_s12 + $0xc8] sm:$0x1]  ;;  %v15655_v22 = vrot.slane %v10108_v0, 5  ;;  %v10114_v25 = vrot.slane %v10112_v42, 4  ;;  %v8547_v60 = vadd.f32 %v15523_v46, %v15050_v35 }
 0x65d   : > { %v9160_v61 = vpop.f32.mrf.mxu1  ;;  %v10101_v28 = vrot.slane %v10099_v34, 4  ;;  %v10104_v32 = vrot.slane %v10102_v48, 5  ;;  %v8968_v11 = vshrl.u32 %v8613_v24, 16  ;;  %v8943_v52 = vsel %vm12287_vm6, %v15636_v56, %v15615_v23  ;;  %v5520_v56 = vld [vmem:[#allocation2 + $0xd4] sm:$0x1] }
 0x65e   : > { %v10378_v9 = vmax.f32 %v10346_v39, 0.0  ;;  %v9228_v8 = vadd.f32 %v9160_v61, %v8546_v40  ;;  %v10279_v15 = vpop.f32.mrf.mxu3  ;;  %v9266_v39 = vld [vmem:[#allocation2 + $0xc0] sm:$0xe]  ;;  %v8964_v40 = vshll.u32 %v8613_v24, 16  ;;  %v10115_v35 = vor.u32 %v10114_v25, %v15655_v22 }
 0x65f   : > { %v10280_v17 = vadd.f32 %v15444_v10, %v10279_v15  ;;  %9630 = vmatmul.bf16.gmra.mxu2 %v9490_v59  ;;  %v10105_v59 = vor.u32 %v10104_v32, %v10101_v28  ;;  %v10196_v46 = vpack.c.b16 %v10178_v13, %v10177_v3  ;;  %v9046_v18 = vunpack.c.l.b16 %v8953_v53  ;;  %v16044_v53 = vld [vmem:[#allocation36_spill] sm:$0xff]  ;;  %v16046_v28 = vld [vmem:[#allocation47_spill] sm:$0xff] }
 0x660   : > { %10410 = vst [vmem:[%s15477_s23 + $0x38] sm:$0xff] %v10378_v9  ;;  %v9654_v30 = vadd.f32 %v9586_v51, %v9228_v8  ;;  %9199 = vmatmul.bf16.gmra.mxu1 %v9063_v62  ;;  %v8960_v51 = vrot.slane %v8958_v16, 5  ;;  %v9418_v9 = vrot.slane %v9416_v43, 4  ;;  %v10118_v8 = vshll.u32 %v11895_v58, 16 }
 0x661   : > { %v11801_v2 = vrot.slane %v9266_v39, 9  ;;  %v9419_v24 = vrot.slane %v8614_v37, 5  ;;  %v15668_v19 = vrot.slane %v8964_v40, 5  ;;  %v8970_v23 = vrot.slane %v8968_v11, 4 }
 0x662   : > { %v9690_v33 = vadd.f32 %v15453_v4, %v9654_v30  ;;  %v15664_v30 = vpop.f32.mrf.mxu0  ;;  %v8961_v27 = vor.u32 %v8960_v51, %v15645_v20  ;;  %v10120_v0 = vrot.slane %v10118_v8, 5  ;;  %v10106_v20 = vrot.slane %v10105_v59, 4  ;;  %v9267_v59 = vld [vmem:[#allocation2 + $0xcc] sm:$0xe] }
 0x663   : > { %v9417_v34 = vsel %vm12281_vm5, %v11801_v2, %v9416_v43  ;;  %v9420_v48 = vsel %vm12281_vm5, %v9418_v9, %v9419_v24  ;;  %v10116_v13 = vrot.slane %v10115_v35, 4  ;;  %v9045_v58 = vunpack.c.l.b16 %v8943_v52 }
 0x664   : > { %v10347_v47 = vadd.f32 %v10280_v17, %v9690_v33  ;;  %v9591_v62 = vpop.f32.mrf.mxu2  ;;  %v5521_v33 = vsel %vm14132_vm15, %v16044_v53, %v5520_v56  ;;  %v8974_v51 = vshll.u32 %v8614_v37, 16  ;;  %v8548_v32 = vadd.f32 %v15553_v31, %v16046_v28 }
 0x665   : > { %v9162_v61 = vpop.f32.mrf.mxu1  ;;  %5522 = vst [vmem:[#allocation2 + $0xd4] sm:$0x1] %v5521_v33  ;;  %v9474_v25 = vunpack.c.l.b16 %v9420_v48  ;;  %v9064_v40 = vpack.c.b16 %v9046_v18, %v9045_v58  ;;  %v8962_v9 = vrot.slane %v8961_v27, 4  ;;  %v10111_v31 = vsel %vm12287_vm6, %v10106_v20, %v15655_v22  ;;  %v11897_v22 = vld [vmem:[%s12265_s12 + $0xd0] sm:$0xf]  ;;  %v16047_v58 = vld [vmem:[#allocation48_spill] sm:$0xff] }
 0x666   : > { %v10379_v15 = vmax.f32 %v10347_v47, 0.0  ;;  %v9229_v54 = vadd.f32 %v9162_v61, %v8547_v60  ;;  %v10281_v16 = vpop.f32.mrf.mxu3  ;;  %v8971_v47 = vor.u32 %v8970_v23, %v15668_v19  ;;  %v15683_v60 = vld [vmem:[#allocation2 + $0xd0] sm:$0xf]  ;;  %v9473_v61 = vunpack.c.l.b16 %v9417_v34 }
 0x667   : > { %v9423_v35 = vrot.slane %v15683_v60, 5  ;;  %v10179_v27 = vunpack.c.l.b16 %v10111_v31  ;;  %v10132_v53 = vshll.u32 %v11897_v22, 16  ;;  %v10136_v42 = vshrl.u32 %v11897_v22, 16 }
 0x668   : > { %10411 = vst [vmem:[%s15477_s23 + $0x40] sm:$0xff] %v10379_v15  ;;  %v9655_v17 = vadd.f32 %v9588_v45, %v9229_v54  ;;  %v10282_v45 = vadd.f32 %v15444_v10, %v10281_v16  ;;  %v10121_v15 = vsel %vm12287_vm6, %v10116_v13, %v10120_v0  ;;  %v8967_v54 = vsel %vm12287_vm6, %v8962_v9, %v15668_v19 }
 0x669   : > { %v8976_v16 = vrot.slane %v8974_v51, 5  ;;  %v9491_v2 = vpack.c.b16 %v9474_v25, %v9473_v61  ;;  %v8972_v24 = vrot.slane %v8971_v47, 4  ;;  %v10180_v23 = vunpack.c.l.b16 %v10121_v15 }
 0x66a   : > { %v9691_v3 = vadd.f32 %v15453_v4, %v9655_v17  ;;  %11912 = vmatmul.msk.bf16.gmra.mxu3 %vm865_vm7, %v10196_v46  ;;  %v11896_v17 = vld [vmem:[%s12265_s12 + $0xcc] sm:$0xf]  ;;  %v15700_v48 = vpop.f32.mrf.mxu0  ;;  %v9425_v33 = vrot.slane %v9423_v35, 4  ;;  %v8549_v51 = vadd.f32 %v15579_v5, %v16047_v58  ;;  %v10134_v28 = vrot.slane %v10132_v53, 5 }
 0x66b   : > { %v10123_v34 = vshrl.u32 %v11896_v17, 16  ;;  %v10126_v19 = vshll.u32 %v11896_v17, 16  ;;  %v16048_v53 = vld [vmem:[#allocation5_spill] sm:$0xff] }
 0x66c   : > { %v10348_v43 = vadd.f32 %v10282_v45, %v9691_v3  ;;  %v9593_v11 = vpop.f32.mrf.mxu2  ;;  %v15698_v56 = vld [vmem:[#allocation2 + $0xd4] sm:$0x1] }
 0x66d   : > { %v9165_v39 = vpop.f32.mrf.mxu1  ;;  %v9426_v3 = vrot.slane %v15698_v56, 5  ;;  %v10125_v45 = vrot.slane %v10123_v34, 4  ;;  %v10128_v20 = vrot.slane %v10126_v19, 5 }
 0x66e   : > { %v10380_v8 = vmax.f32 %v10348_v43, 0.0  ;;  %v9230_v52 = vadd.f32 %v9165_v39, %v8548_v32  ;;  %v10284_v37 = vpop.f32.mrf.mxu3  ;;  %v11898_v43 = vld [vmem:[%s12265_s12 + $0xd4] sm:$0x1]  ;;  %v10138_v32 = vrot.slane %v10136_v42, 4  ;;  %v9047_v39 = vunpack.c.l.b16 %v8967_v54 }
 0x66f   : > { %v10285_v18 = vadd.f32 %v15444_v10, %v10284_v37  ;;  %9635 = vmatmul.bf16.gmra.mxu2 %v9491_v2  ;;  %v10197_v37 = vpack.c.b16 %v10180_v23, %v10179_v27  ;;  %v9427_v5 = vsel %vm12281_vm5, %v9425_v33, %v9426_v3  ;;  %v10129_v31 = vor.u32 %v10128_v20, %v10125_v45 }
 0x670   : > { %10412 = vst [vmem:[%s15477_s23 + $0x48] sm:$0xff] %v10380_v8  ;;  %v9656_v46 = vadd.f32 %v9591_v62, %v9230_v52  ;;  %9204 = vmatmul.bf16.gmra.mxu1 %v9064_v40  ;;  %v11802_v62 = vrot.slane %v9267_v59, 9  ;;  %v8977_v8 = vsel %vm12287_vm6, %v8972_v24, %v8976_v16  ;;  %v10142_v15 = vshll.u32 %v11898_v43, 16 }
 0x671   : > { %v8988_v54 = vshll.u32 %v15683_v60, 16  ;;  %v8992_v2 = vshrl.u32 %v15683_v60, 16  ;;  %v9048_v17 = vunpack.c.l.b16 %v8977_v8  ;;  %v9476_v26 = vunpack.c.l.b16 %v9427_v5 }
 0x672   : > { %v9692_v0 = vadd.f32 %v15453_v4, %v9656_v46  ;;  %v9424_v52 = vsel %vm12281_vm5, %v11802_v62, %v9423_v35  ;;  %v10139_v46 = vor.u32 %v10138_v32, %v10134_v28  ;;  %v10130_v34 = vrot.slane %v10129_v31, 4  ;;  %v15719_v62 = vpop.f32.mrf.mxu0 }
 0x673   : > { %v9475_v22 = vunpack.c.l.b16 %v9424_v52  ;;  %v8990_v23 = vrot.slane %v8988_v54, 5  ;;  %v8550_v42 = vadd.f32 %v15610_v44, %v16048_v53  ;;  %v10144_v3 = vrot.slane %v10142_v15, 5 }
 0x674   : > { %v10349_v13 = vadd.f32 %v10285_v18, %v9692_v0  ;;  %v9596_v47 = vpop.f32.mrf.mxu2  ;;  %v8615_v18 = vld [vmem:[#allocation2 + $0xcc] sm:$0xf]  ;;  %v8994_v0 = vrot.slane %v8992_v2, 4  ;;  %v10140_v33 = vrot.slane %v10139_v46, 4 }
 0x675   : > { %v9167_v25 = vpop.f32.mrf.mxu1  ;;  %v8979_v16 = vshrl.u32 %v8615_v18, 16  ;;  %v8982_v24 = vshll.u32 %v8615_v18, 16 }
 0x676   : > { %v10381_v40 = vmax.f32 %v10349_v13, 0.0  ;;  %v9231_v61 = vadd.f32 %v9167_v25, %v8549_v51  ;;  %v10286_v9 = vpop.f32.mrf.mxu3  ;;  %v8995_v58 = vor.u32 %v8994_v0, %v8990_v23  ;;  %v8998_v51 = vshll.u32 %v15698_v56, 16 }
 0x677   : > { %v10287_v27 = vadd.f32 %v15444_v10, %v10286_v9  ;;  %v8984_v19 = vrot.slane %v8982_v24, 5  ;;  %v10135_v9 = vsel %vm12287_vm6, %v10130_v34, %v10134_v28  ;;  %v10145_v52 = vsel %vm12287_vm6, %v10140_v33, %v10144_v3 }
 0x678   : > { %10413 = vst [vmem:[%s15477_s23 + $0x50] sm:$0xff] %v10381_v40  ;;  %v9657_v59 = vadd.f32 %v9593_v11, %v9231_v61  ;;  %v8981_v11 = vrot.slane %v8979_v16, 4  ;;  %v9065_v40 = vpack.c.b16 %v9048_v17, %v9047_v39  ;;  %v9492_v61 = vpack.c.b16 %v9476_v26, %v9475_v22 }
 0x679   : > { %v8996_v5 = vrot.slane %v8995_v58, 4  ;;  %v9000_v31 = vrot.slane %v8998_v51, 5  ;;  %v10181_v39 = vunpack.c.l.b16 %v10135_v9  ;;  %v10182_v15 = vunpack.c.l.b16 %v10145_v52 }
 0x67a   : > { %v9693_v35 = vadd.f32 %v15453_v4, %v9657_v59  ;;  %11913 = vmatmul.msk.bf16.gmra.mxu3 %vm865_vm7, %v10197_v37  ;;  %v8985_v13 = vor.u32 %v8984_v19, %v8981_v11  ;;  %v8551_v28 = vadd.f32 %v15638_v6, %v15102_v1  ;;  %v8500_v54 = vpop.f32.mrf.mxu0  ;;  %v15741_v1 = vld [vmem:[%s15840_s4] ss:$0 sm:$0xff] }
 0x67b   : > { %v9001_v18 = vsel %vm12287_vm6, %v8996_v5, %v9000_v31 }
 0x67c   : > { %v10350_v60 = vadd.f32 %v10287_v27, %v9693_v35  ;;  %v9598_v20 = vpop.f32.mrf.mxu2  ;;  %v8986_v37 = vrot.slane %v8985_v13, 4  ;;  %v9050_v35 = vunpack.c.l.b16 %v9001_v18  ;;  %v16049_v13 = vld [vmem:[#allocation3_spill] sm:$0xff] }
 0x67d   : > { %v9170_v45 = vpop.f32.mrf.mxu1  ;;  %v8553_v58 = vadd.f32 %v15700_v48, %v16049_v13 }
 0x67e   : > { %v10382_v43 = vmax.f32 %v10350_v60, 0.0  ;;  %v9232_v32 = vadd.f32 %v9170_v45, %v8550_v42  ;;  %v10289_v25 = vpop.f32.mrf.mxu3 }
 0x67f   : > { %v10290_v44 = vadd.f32 %v15444_v10, %v10289_v25  ;;  %9640 = vmatmul.bf16.gmra.mxu2 %v9492_v61  ;;  %v8991_v10 = vsel %vm12287_vm6, %v8986_v37, %v8990_v23  ;;  %v8552_v23 = vadd.f32 %v15664_v30, %v15116_v7 }
 0x680   : > { %10414 = vst [vmem:[%s15477_s23 + $0x58] sm:$0xff] %v10382_v43  ;;  %v9658_v8 = vadd.f32 %v9596_v47, %v9232_v32  ;;  %9209 = vmatmul.bf16.gmra.mxu1 %v9065_v40  ;;  %v9049_v24 = vunpack.c.l.b16 %v8991_v10 }
 0x682   : > { %v9694_v56 = vadd.f32 %v15453_v4, %v9658_v8  ;;  %v10198_v4 = vpack.c.b16 %v10182_v15, %v10181_v39  ;;  %v9066_v34 = vpack.c.b16 %v9050_v35, %v9049_v24  ;;  %v8503_v42 = vpop.f32.mrf.mxu0 }
 0x684   : > { %v10351_v59 = vadd.f32 %v10290_v44, %v9694_v56  ;;  %v9601_v46 = vpop.f32.mrf.mxu2  ;;  %v8554_v44 = vadd.f32 %v15719_v62, %v15155_v36 }
 0x685   : > { %v9172_v47 = vpop.f32.mrf.mxu1 }
 0x686   : > { %v10383_v2 = vmax.f32 %v10351_v59, 0.0  ;;  %v9233_v17 = vadd.f32 %v9172_v47, %v8551_v28  ;;  %v10291_v22 = vpop.f32.mrf.mxu3  ;;  %v8555_v47 = vadd.f32 %v8500_v54, %v15174_v38 }
 0x687   : > { %v10292_v27 = vadd.f32 %v15747_v29, %v10291_v22 }
 0x688   : > { %10415 = vst [vmem:[%s15477_s23 + $0x60] sm:$0xff] %v10383_v2  ;;  %v9659_v16 = vadd.f32 %v9598_v20, %v9233_v17 }
 0x68a   : > { %v9695_v6 = vadd.f32 %v15741_v1, %v9659_v16  ;;  %11914 = vmatmul.msk.bf16.gmra.mxu3 %vm865_vm7, %v10198_v4  ;;  %v8505_v40 = vpop.f32.mrf.mxu0  ;;  %v16050_v16 = vld [vmem:[#allocation15_spill] sm:$0xff] }
 0x68b   : > { %v8556_v24 = vadd.f32 %v8503_v42, %v16050_v16 }
 0x68c   : > { %v10352_v26 = vadd.f32 %v10292_v27, %v9695_v6  ;;  %v9603_v19 = vpop.f32.mrf.mxu2 }
 0x68d   : > { %v9175_v11 = vpop.f32.mrf.mxu1 }
 0x68e   : > { %v10384_v0 = vmax.f32 %v10352_v26, 0.0  ;;  %v9234_v60 = vadd.f32 %v9175_v11, %v8552_v23  ;;  %v10294_v53 = vpop.f32.mrf.mxu3 }
 0x68f   : > { %v10295_v3 = vadd.f32 %v15747_v29, %v10294_v53 }
 0x690   : > { %10416 = vst [vmem:[%s15477_s23 + $0x68] sm:$0xff] %v10384_v0  ;;  %v9660_v33 = vadd.f32 %v9601_v46, %v9234_v60  ;;  %9214 = vmatmul.bf16.gmra.mxu1 %v9066_v34  ;;  %v8557_v0 = vadd.f32 %v8505_v40, %v15213_v12 }
 0x692   : > { %v9696_v45 = vadd.f32 %v15741_v1, %v9660_v33  ;;  %v8508_v59 = vpop.f32.mrf.mxu0 }
 0x694   : > { %v10353_v20 = vadd.f32 %v10295_v3, %v9696_v45  ;;  %v9606_v30 = vpop.f32.mrf.mxu2 }
 0x695   : > { %v9177_v7 = vpop.f32.mrf.mxu1 }
 0x696   : > { %v10385_v51 = vmax.f32 %v10353_v20, 0.0  ;;  %v9235_v43 = vadd.f32 %v9177_v7, %v8553_v58  ;;  %v10296_v32 = vpop.f32.mrf.mxu3 }
 0x697   : > { %v10297_v9 = vadd.f32 %v15747_v29, %v10296_v32 }
 0x698   : > { %10417 = vst [vmem:[%s15477_s23 + $0x70] sm:$0xff] %v10385_v51  ;;  %v9661_v25 = vadd.f32 %v9603_v19, %v9235_v43 }
 0x69a   : > { %v9697_v61 = vadd.f32 %v15741_v1, %v9661_v25  ;;  %v8510_v27 = vpop.f32.mrf.mxu0 }
 0x69c   : > { %v10354_v8 = vadd.f32 %v10297_v9, %v9697_v61  ;;  %v9608_v37 = vpop.f32.mrf.mxu2 }
 0x69d   : > { %v9180_v52 = vpop.f32.mrf.mxu1 }
 0x69e   : > { %v10386_v48 = vmax.f32 %v10354_v8, 0.0  ;;  %v9236_v5 = vadd.f32 %v9180_v52, %v8554_v44  ;;  %v10299_v31 = vpop.f32.mrf.mxu3  ;;  %v8559_v52 = vadd.f32 %v8510_v27, %v15249_v49 }
 0x69f   : > { %v10300_v39 = vadd.f32 %v15747_v29, %v10299_v31 }
 0x6a0   : > { %10418 = vst [vmem:[%s15477_s23 + $0x78] sm:$0xff] %v10386_v48  ;;  %v9662_v56 = vadd.f32 %v9606_v30, %v9236_v5  ;;  %v8558_v30 = vadd.f32 %v8508_v59, %v15228_v21 }
 0x6a2   : > { %v9698_v15 = vadd.f32 %v15741_v1, %v9662_v56  ;;  %v8513_v45 = vpop.f32.mrf.mxu0 }
 0x6a4   : > { %v10355_v28 = vadd.f32 %v10300_v39, %v9698_v15  ;;  %v9611_v10 = vpop.f32.mrf.mxu2 }
 0x6a5   : > { %v9182_v46 = vpop.f32.mrf.mxu1 }
 0x6a6   : > { %v10387_v36 = vmax.f32 %v10355_v28, 0.0  ;;  %v9237_v62 = vadd.f32 %v9182_v46, %v8555_v47  ;;  %v10301_v18 = vpop.f32.mrf.mxu3  ;;  %v8560_v47 = vadd.f32 %v8513_v45, %v15267_v50 }
 0x6a7   : > { %v10302_v22 = vadd.f32 %v15747_v29, %v10301_v18 }
 0x6a8   : > { %10419 = vst [vmem:[%s15477_s23 + $0x80] sm:$0xff] %v10387_v36  ;;  %v9663_v2 = vadd.f32 %v9608_v37, %v9237_v62 }
 0x6aa   : > { %v9699_v17 = vadd.f32 %v15741_v1, %v9663_v2  ;;  %v8515_v9 = vpop.f32.mrf.mxu0 }
 0x6ac   : > { %v10356_v4 = vadd.f32 %v10302_v22, %v9699_v17  ;;  %v9613_v6 = vpop.f32.mrf.mxu2 }
 0x6ad   : > { %v9185_v35 = vpop.f32.mrf.mxu1 }
 0x6ae   : > { %v10388_v38 = vmax.f32 %v10356_v4, 0.0  ;;  %v9238_v54 = vadd.f32 %v9185_v35, %v8556_v24  ;;  %v10304_v26 = vpop.f32.mrf.mxu3  ;;  %v8561_v4 = vadd.f32 %v8515_v9, %v15286_v63 }
 0x6af   : > { %v10305_v34 = vadd.f32 %v15747_v29, %v10304_v26 }
 0x6b0   : > { %10420 = vst [vmem:[%s15477_s23 + $0x88] sm:$0xff] %v10388_v38  ;;  %v9664_v23 = vadd.f32 %v9611_v10, %v9238_v54 }
 0x6b2   : > { %v9700_v11 = vadd.f32 %v15741_v1, %v9664_v23  ;;  %v8518_v59 = vpop.f32.mrf.mxu0 }
 0x6b4   : > { %v10357_v19 = vadd.f32 %v10305_v34, %v9700_v11  ;;  %v9616_v53 = vpop.f32.mrf.mxu2  ;;  %v8562_v34 = vadd.f32 %v8518_v59, %v15304_v14 }
 0x6b5   : > { %v9187_v60 = vpop.f32.mrf.mxu1 }
 0x6b6   : > { %v10389_v42 = vmax.f32 %v10357_v19, 0.0  ;;  %v9239_v33 = vadd.f32 %v9187_v60, %v8557_v0  ;;  %v10306_v3 = vpop.f32.mrf.mxu3 }
 0x6b7   : > { %v10307_v58 = vadd.f32 %v15747_v29, %v10306_v3 }
 0x6b8   : > { %10421 = vst [vmem:[%s15477_s23 + $0x90] sm:$0xff] %v10389_v42  ;;  %v9665_v20 = vadd.f32 %v9613_v6, %v9239_v33 }
 0x6ba   : > { %v9701_v13 = vadd.f32 %v15741_v1, %v9665_v20  ;;  %v8520_v27 = vpop.f32.mrf.mxu0 }
 0x6bb   : > { %v8563_v20 = vadd.f32 %v8520_v27, %v15325_v57 }
 0x6bc   : > { %v10358_v7 = vadd.f32 %v10307_v58, %v9701_v13  ;;  %v9618_v43 = vpop.f32.mrf.mxu2 }
 0x6bd   : > { %v9190_v51 = vpop.f32.mrf.mxu1 }
 0x6be   : > { %v10390_v12 = vmax.f32 %v10358_v7, 0.0  ;;  %v9240_v32 = vadd.f32 %v9190_v51, %v8558_v30  ;;  %v10309_v25 = vpop.f32.mrf.mxu3 }
 0x6bf   : > { %v10310_v61 = vadd.f32 %v15747_v29, %v10309_v25 }
 0x6c0   : > { %10422 = vst [vmem:[%s15477_s23 + $0x98] sm:$0xff] %v10390_v12  ;;  %v9666_v40 = vadd.f32 %v9616_v53, %v9240_v32 }
 0x6c2   : > { %v9702_v8 = vadd.f32 %v15741_v1, %v9666_v40  ;;  %v8523_v33 = vpop.f32.mrf.mxu0 }
 0x6c3   : > { %v8564_v40 = vadd.f32 %v8523_v33, %v15340_v55 }
 0x6c4   : > { %v10359_v44 = vadd.f32 %v10310_v61, %v9702_v8  ;;  %v9621_v48 = vpop.f32.mrf.mxu2 }
 0x6c5   : > { %v9192_v37 = vpop.f32.mrf.mxu1 }
 0x6c6   : > { %v10391_v21 = vmax.f32 %v10359_v44, 0.0  ;;  %v9241_v5 = vadd.f32 %v9192_v37, %v8559_v52  ;;  %v10311_v31 = vpop.f32.mrf.mxu3 }
 0x6c7   : > { %v10312_v15 = vadd.f32 %v15747_v29, %v10311_v31 }
 0x6c8   : > { %10423 = vst [vmem:[%s15477_s23 + $0xa0] sm:$0xff] %v10391_v21  ;;  %v9667_v56 = vadd.f32 %v9618_v43, %v9241_v5 }
 0x6ca   : > { %v9703_v39 = vadd.f32 %v15741_v1, %v9667_v56  ;;  %v8525_v32 = vpop.f32.mrf.mxu0 }
 0x6cb   : > { %v8565_v5 = vadd.f32 %v8525_v32, %v15361_v41 }
 0x6cc   : > { %v10360_v28 = vadd.f32 %v10312_v15, %v9703_v39  ;;  %v9623_v10 = vpop.f32.mrf.mxu2 }
 0x6cd   : > { %v9195_v46 = vpop.f32.mrf.mxu1 }
 0x6ce   : > { %v10392_v49 = vmax.f32 %v10360_v28, 0.0  ;;  %v9242_v36 = vadd.f32 %v9195_v46, %v8560_v47  ;;  %v10314_v62 = vpop.f32.mrf.mxu3 }
 0x6cf   : > { %v10315_v2 = vadd.f32 %v15747_v29, %v10314_v62 }
 0x6d0   : > { %10424 = vst [vmem:[%s15477_s23 + $0xa8] sm:$0xff] %v10392_v49  ;;  %v9668_v18 = vadd.f32 %v9621_v48, %v9242_v36  ;;  %v16051_v49 = vld [vmem:[#allocation11_spill] sm:$0xff] }
 0x6d2   : > { %v9704_v17 = vadd.f32 %v15741_v1, %v9668_v18  ;;  %v8528_v31 = vpop.f32.mrf.mxu0 }
 0x6d3   : > { %v8566_v36 = vadd.f32 %v8528_v31, %v16051_v49 }
 0x6d4   : > { %v10361_v22 = vadd.f32 %v10315_v2, %v9704_v17  ;;  %v9626_v24 = vpop.f32.mrf.mxu2 }
 0x6d5   : > { %v9197_v16 = vpop.f32.mrf.mxu1 }
 0x6d6   : > { %v10393_v35 = vmax.f32 %v10361_v22, 0.0  ;;  %v9243_v50 = vadd.f32 %v9197_v16, %v8561_v4  ;;  %v10316_v6 = vpop.f32.mrf.mxu3 }
 0x6d7   : > { %v10317_v26 = vadd.f32 %v15747_v29, %v10316_v6 }
 0x6d8   : > { %10425 = vst [vmem:[%s15477_s23 + $0xb0] sm:$0xff] %v10393_v35  ;;  %v9669_v38 = vadd.f32 %v9623_v10, %v9243_v50  ;;  %v16052_v50 = vld [vmem:[#allocation4_spill] sm:$0xff] }
 0x6da   : > { %v9705_v54 = vadd.f32 %v15741_v1, %v9669_v38  ;;  %v8530_v17 = vpop.f32.mrf.mxu0 }
 0x6db   : > { %v8567_v6 = vadd.f32 %v8530_v17, %v16052_v50 }
 0x6dc   : > { %v10362_v23 = vadd.f32 %v10317_v26, %v9705_v54  ;;  %v9628_v19 = vpop.f32.mrf.mxu2 }
 0x6dd   : > { %v9200_v11 = vpop.f32.mrf.mxu1 }
 0x6de   : > { %v10394_v63 = vmax.f32 %v10362_v23, 0.0  ;;  %v9244_v0 = vadd.f32 %v9200_v11, %v8562_v34  ;;  %v10319_v60 = vpop.f32.mrf.mxu3 }
 0x6df   : > { %v10320_v42 = vadd.f32 %v15747_v29, %v10319_v60 }
 0x6e0   : > { %10426 = vst [vmem:[%s15477_s23 + $0xb8] sm:$0xff] %v10394_v63  ;;  %v9670_v53 = vadd.f32 %v9626_v24, %v9244_v0  ;;  %v16053_v63 = vld [vmem:[#allocation16_spill] sm:$0xff] }
 0x6e2   : > { %v9706_v3 = vadd.f32 %v15741_v1, %v9670_v53  ;;  %v8533_v23 = vpop.f32.mrf.mxu0 }
 0x6e3   : > { %v8568_v0 = vadd.f32 %v8533_v23, %v16053_v63 }
 0x6e4   : > { %v10363_v45 = vadd.f32 %v10320_v42, %v9706_v3  ;;  %v9631_v58 = vpop.f32.mrf.mxu2 }
 0x6e5   : > { %v9202_v13 = vpop.f32.mrf.mxu1 }
 0x6e6   : > { %v10395_v14 = vmax.f32 %v10363_v45, 0.0  ;;  %v9245_v7 = vadd.f32 %v9202_v13, %v8563_v20  ;;  %v10321_v30 = vpop.f32.mrf.mxu3 }
 0x6e7   : > { %v10322_v12 = vadd.f32 %v15747_v29, %v10321_v30 }
 0x6e8   : > { %10427 = vst [vmem:[%s15477_s23 + $0xc0] sm:$0xff] %v10395_v14  ;;  %v9671_v51 = vadd.f32 %v9628_v19, %v9245_v7  ;;  %v16054_v7 = vld [vmem:[#allocation10_spill] sm:$0xff] }
 0x6ea   : > { %v9707_v43 = vadd.f32 %v15741_v1, %v9671_v51 }
 0x6ec   : > { %v10364_v25 = vadd.f32 %v10322_v12, %v9707_v43  ;;  %v9633_v44 = vpop.f32.mrf.mxu2 }
 0x6ed   : > { %v9205_v61 = vpop.f32.mrf.mxu1 }
 0x6ee   : > { %v10396_v9 = vmax.f32 %v10364_v25, 0.0  ;;  %v9246_v57 = vadd.f32 %v9205_v61, %v8564_v40  ;;  %v10324_v8 = vpop.f32.mrf.mxu3 }
 0x6ef   : > { %v10325_v37 = vadd.f32 %v15747_v29, %v10324_v8 }
 0x6f0   : > { %10428 = vst [vmem:[%s15477_s23 + $0xc8] sm:$0xff] %v10396_v9  ;;  %v9672_v52 = vadd.f32 %v9631_v58, %v9246_v57  ;;  %v8535_v58 = vpop.f32.mrf.mxu0 }
 0x6f1   : > { %v8569_v30 = vadd.f32 %v8535_v58, %v16054_v7 }
 0x6f2   : > { %v9708_v48 = vadd.f32 %v15741_v1, %v9672_v52 }
 0x6f4   : > { %v10365_v21 = vadd.f32 %v10325_v37, %v9708_v48  ;;  %v9636_v28 = vpop.f32.mrf.mxu2 }
 0x6f5   : > { %v9207_v56 = vpop.f32.mrf.mxu1 }
 0x6f6   : > { %v10397_v39 = vmax.f32 %v10365_v21, 0.0  ;;  %v9247_v55 = vadd.f32 %v9207_v56, %v8565_v5  ;;  %v10326_v15 = vpop.f32.mrf.mxu3 }
 0x6f7   : > { %v10327_v46 = vadd.f32 %v15747_v29, %v10326_v15 }
 0x6f8   : > { %10429 = vst [vmem:[%s15477_s23 + $0xd0] sm:$0xff] %v10397_v39  ;;  %v9673_v59 = vadd.f32 %v9633_v44, %v9247_v55 }
 0x6fa   : > { %v9709_v47 = vadd.f32 %v15741_v1, %v9673_v59 }
 0x6fc   : > { %v10366_v10 = vadd.f32 %v10327_v46, %v9709_v47  ;;  %v9638_v24 = vpop.f32.mrf.mxu2 }
 0x6fd   : > { %v9210_v62 = vpop.f32.mrf.mxu1 }
 0x6fe   : > { %v10398_v18 = vmax.f32 %v10366_v10, 0.0  ;;  %v9248_v41 = vadd.f32 %v9210_v62, %v8566_v36  ;;  %v10329_v2 = vpop.f32.mrf.mxu3 }
 0x6ff   : > { %v10330_v4 = vadd.f32 %v15747_v29, %v10329_v2 }
 0x700   : > { %10430 = vst [vmem:[%s15477_s23 + $0xd8] sm:$0xff] %v10398_v18  ;;  %v9674_v22 = vadd.f32 %v9636_v28, %v9248_v41 }
 0x702   : > { %v9710_v16 = vadd.f32 %v15741_v1, %v9674_v22 }
 0x704   : > { %v10367_v35 = vadd.f32 %v10330_v4, %v9710_v16  ;;  %v9641_v53 = vpop.f32.mrf.mxu2 }
 0x705   : > { %v9212_v27 = vpop.f32.mrf.mxu1 }
 0x706   : > { %v10399_v38 = vmax.f32 %v10367_v35, 0.0  ;;  %v9249_v54 = vadd.f32 %v9212_v27, %v8567_v6  ;;  %v10331_v26 = vpop.f32.mrf.mxu3 }
 0x707   : > { %v10332_v19 = vadd.f32 %v15747_v29, %v10331_v26 }
 0x708   : > { %10431 = vst [vmem:[%s15477_s23 + $0xe0] sm:$0xff] %v10399_v38  ;;  %v9675_v34 = vadd.f32 %v9638_v24, %v9249_v54 }
 0x70a   : > { %v9711_v11 = vadd.f32 %v15741_v1, %v9675_v34 }
 0x70c   : > { %v10368_v60 = vadd.f32 %v10332_v19, %v9711_v11  ;;  %v9643_v25 = vpop.f32.mrf.mxu2 }
 0x70d   : > { %v9215_v42 = vpop.f32.mrf.mxu1 }
 0x70e   : > { %v10400_v33 = vmax.f32 %v10368_v60, 0.0  ;;  %v9250_v3 = vadd.f32 %v9215_v42, %v8568_v0  ;;  %v10334_v45 = vpop.f32.mrf.mxu3 }
 0x70f   : > { %v10335_v13 = vadd.f32 %v15747_v29, %v10334_v45 }
 0x710   : > { %10432 = vst [vmem:[%s15477_s23 + $0xe8] sm:$0xff] %v10400_v33  ;;  %v9676_v20 = vadd.f32 %v9641_v53, %v9250_v3 }
 0x712   : > { %v9712_v14 = vadd.f32 %v15741_v1, %v9676_v20 }
 0x714   : > { %v10369_v51 = vadd.f32 %v10335_v13, %v9712_v14 }
 0x715   : > { %v9217_v43 = vpop.f32.mrf.mxu1 }
 0x716   : > { %v10401_v12 = vmax.f32 %v10369_v51, 0.0  ;;  %v9251_v32 = vadd.f32 %v9217_v43, %v8569_v30  ;;  %v10336_v40 = vpop.f32.mrf.mxu3 }
 0x717   : > { %v10337_v57 = vadd.f32 %v15747_v29, %v10336_v40 }
 0x718   : > { %10433 = vst [vmem:[%s15477_s23 + $0xf0] sm:$0xff] %v10401_v12  ;;  %v9677_v61 = vadd.f32 %v9643_v25, %v9251_v32 }
 0x71a   : > { %v9713_v9 = vadd.f32 %v15741_v1, %v9677_v61 }
 0x71c   : > { %v10370_v8 = vadd.f32 %v10337_v57, %v9713_v9 }
 0x71e   : > { %v10402_v44 = vmax.f32 %v10370_v8, 0.0 }
 0x720   : > { %10434 = vst [vmem:[%s15477_s23 + $0xf8] sm:$0xff] %v10402_v44 }
 0x721 PF: > { %s17_s26 = sadd.s32 1, %s12190_s26   ;;  %s16055_s24 = smov %s12186_s25 }
 0x722   : > { %p14_p5 = scmp.ge.s32.totalorder %s17_s26, 4   ;;  %s16056_s25 = smov %s16058_s27 }
 0x724   :  { %16 = sbr.rel (!%p14_p5) target bundleno = 2 (0x2), region = 98 }

</bundles_post_ra>
